<compile_context>
chip_gen: v6e
topology: v6e:2x2x1
jax: 0.10.0
libtpu: 0.0.40
codegen_flags: <defaults>
</compile_context>

<pallas_src>
import numpy as np
import jax
import jax.numpy as jnp
from jax import lax
from jax.experimental import pallas as pl
from jax.experimental.pallas import tpu as pltpu

LANE = 128


def predict_kernel(adj_ref, x_ref, w_ref, lab_ref, wmask_ref, logits_ref, lossw_ref):
    N = adj_ref.shape[0]
    F = x_ref.shape[1]
    H = w_ref.shape[0]
    Bb = adj_ref.shape[2]
    f32 = jnp.float32

    # Hoist the per-row slabs once (bf16 adj cast to f32 a single time).
    a_rows = [adj_ref[i].astype(f32) for i in range(N)]   # a_rows[i][j, b] = sub_adj[i, j, b]
    x_rows = [x_ref[n] for n in range(N)]                 # x_rows[n][f, b] = sub_x[n, f, b]

    # rowsum[j, b] = sum_k (adj + I)[j, k, b] = sum_k adj[j, k, b] + 1   (A = adj + I never built)
    rowsum = jnp.concatenate(
        [jnp.sum(a_rows[j], axis=0, keepdims=True) for j in range(N)], axis=0) + 1.0   # (N, Bb)
    inv = pl.reciprocal(rowsum, approx=True)               # EUP vrcp (off the VALU path)
    inv = inv * (2.0 - rowsum * inv)                       # one Newton step -> ~exact (<< 1e-3)

    row_idx = lax.broadcasted_iota(jnp.int32, (N, Bb), 0)

    def propagate(rk):
        # rk: (N, Bb) = row of A_norm^{p-1};  returns row of A_norm^p.
        acc = rk                                           # r @ I (folded +I term)
        for i in range(N):                                 # r @ adj: unrolled MAC, batch in lanes
            acc = acc + rk[i:i + 1, :] * a_rows[i]
        return acc * inv                                   # fold column scaling 1/rowsum

    def project(rk):
        # s_k[f, b] = sum_n rk[n, b] * x[n, f, b]   -> (F, Bb)
        acc = rk[0:1, :] * x_rows[0]
        for n in range(1, N):
            acc = acc + rk[n:n + 1, :] * x_rows[n]
        return acc

    logits = jnp.zeros((1, Bb), f32)
    r = [None, None]
    s = [x_rows[0], x_rows[1]]                             # p = 0: identity rows -> x[{src, dst}]

    for p in range(H):                                     # n_heuristic is static -> unrolled
        if p == 1:
            for k in range(2):
                onehot = (row_idx == k).astype(f32)        # +I contribution of row k
                r[k] = (a_rows[k] + onehot) * inv          # row k of A_norm, no matmul
                s[k] = project(r[k])
        elif p >= 2:
            for k in range(2):
                r[k] = propagate(r[k])
                s[k] = project(r[k])
        wp = w_ref[p]                                      # (D, F) = W[p].T
        z = []
        for k in range(2):                                 # z_k[d, b] = sum_f s_k[f, b] * W[p][f, d]
            acc = s[k][0:1, :] * wp[:, 0:1]                # (1, Bb) * (D, 1) -> (D, Bb)
            for f in range(1, F):
                acc = acc + s[k][f:f + 1, :] * wp[:, f:f + 1]
            # ELU (alpha = 1), exp argument clamped
            z.append(jnp.where(acc > 0, acc, jnp.exp(jnp.minimum(acc, 0.0)) - 1.0))
        logits = logits + jnp.sum(z[0] * z[1], axis=0, keepdims=True)   # pooled.sum(-1) -> (1, Bb)

    labels = lab_ref[...]                                  # (1, Bb)
    wm = wmask_ref[...]                                    # 1/B for real pairs, 0 for padding
    # BCEWithLogitsLoss terms (masked mean finished by the wrapper sum), numerically stable
    per = (jnp.maximum(logits, 0.0) - logits * labels
           + jnp.log(1.0 + jnp.exp(-jnp.abs(logits))))
    logits_ref[...] = logits                               # lane-dense (1, blkB) store
    lossw_ref[...] = per * wm


# ----------------------------- host-side glue -------------------------------

# TODO(synk): `h_hop_subgraph` is not defined in the reference source; implemented here as a
# BFS h-hop extraction (from {src, dst}) padded back to N nodes with src->0, dst->1; padded
# nodes are isolated, which is exactly equivalent to running on the compact subgraph.
def h_hop_subgraph_padded(src, dst, h_hops, adj_np, x_np):
    N = adj_np.shape[0]
    und = (adj_np + adj_np.T) > 0
    frontier = {int(src), int(dst)}
    visited = set(frontier)
    for _ in range(h_hops):
        nxt = set()
        for u in frontier:
            nxt |= set(np.nonzero(und[u])[0].tolist())
        frontier = nxt - visited
        visited |= nxt
    rest = sorted(visited - {int(src), int(dst)})
    order = [int(src), int(dst)] + rest
    k = len(order)
    perm = np.array(order + [i for i in range(N) if i not in set(order)], np.int32)

    x_perm = np.asarray(x_np, np.float32)[perm].copy()
    x_perm[k:] = 0.0
    adj_sub = np.zeros((N, N), np.float32)
    adj_sub[:k, :k] = np.asarray(adj_np, np.float32)[np.ix_(perm[:k], perm[:k])]
    return adj_sub, x_perm


def predict_model_forward(src, dst, labels, adj_np, x_np, W, h_hops, blk_b=LANE):
    B = len(src)
    N = adj_np.shape[0]
    F = x_np.shape[1]
    H, _, D = W.shape

    Bp = ((B + blk_b - 1) // blk_b) * blk_b            # lane-dense batch padding
    n_blocks = Bp // blk_b

    # Batch packed on the LAST (lane) axis.
    adj_b = np.zeros((N, N, Bp), np.float32)
    x_b = np.zeros((N, F, Bp), np.float32)
    for i in range(B):
        a_i, x_i = h_hop_subgraph_padded(src[i], dst[i], h_hops, adj_np, x_np)
        adj_b[:, :, i] = a_i
        x_b[:, :, i] = x_i

    lab_p = np.zeros((1, Bp), np.float32)
    lab_p[0, :B] = np.asarray(labels, np.float32)
    wmask = np.zeros((1, Bp), np.float32)
    wmask[0, :B] = 1.0 / B                             # masked-mean weights for BCE

    W_t = np.ascontiguousarray(np.transpose(np.asarray(W, np.float32), (0, 2, 1)))  # (H, D, F)

    # TODO(synk): at production batch sizes raise blk_b per generation (keep
    # 2 inputs x 2 buffers x block bytes under the ~32 MiB scoped VMEM on v7x, ~2x larger on
    # v6e/v5e with vmem_limit_bytes raised) — demo working set is tiny so blk_b=128 suffices.
    logits2d, lossw = pl.pallas_call(
        predict_kernel,
        out_shape=(jax.ShapeDtypeStruct((1, Bp), jnp.float32),
                   jax.ShapeDtypeStruct((1, Bp), jnp.float32)),
        grid=(n_blocks,),
        in_specs=[
            pl.BlockSpec((N, N, blk_b), lambda i: (0, 0, i)),
            pl.BlockSpec((N, F, blk_b), lambda i: (0, 0, i)),
            pl.BlockSpec((H, D, F), lambda i: (0, 0, 0)),
            pl.BlockSpec((1, blk_b), lambda i: (0, i)),
            pl.BlockSpec((1, blk_b), lambda i: (0, i)),
        ],
        out_specs=(
            pl.BlockSpec((1, blk_b), lambda i: (0, i)),
            pl.BlockSpec((1, blk_b), lambda i: (0, i)),
        ),
        compiler_params=pltpu.CompilerParams(
            dimension_semantics=("parallel",)),
    )(
        jnp.asarray(adj_b, dtype=jnp.bfloat16),        # 0/1 exact in bf16: halves adj HBM traffic
        jnp.asarray(x_b),
        jnp.asarray(W_t),
        jnp.asarray(lab_p),
        jnp.asarray(wmask),
    )

    loss = jnp.sum(lossw)                              # masked mean (1/B weights baked into wmask)
    logits = logits2d[0, :B]
    predict = logits >= 0                              # trivial elementwise, kept in wrapper
    return loss, logits, predict, adj_b, x_b


# ------------------------------- numpy reference ----------------------------

def reference(adj_b, x_b, W, labels):
    N = adj_b.shape[0]
    H, F, D = W.shape
    B = len(labels)
    logits = []
    for b in range(B):
        A = adj_b[:, :, b] + np.eye(N, dtype=np.float32)
        A = A / A.sum(axis=1)                          # same broadcast as torch sum(dim=1)
        zs, Ap = [], np.eye(N, dtype=np.float32)
        for p in range(H):
            zs.append(Ap @ (x_b[:, :, b] @ W[p]))
            Ap = Ap @ A
        z = np.concatenate(zs, axis=1)
        z = np.where(z > 0, z, np.exp(np.minimum(z, 0.0)) - 1.0)
        logits.append((z[0] * z[1]).sum())
    logits = np.array(logits, np.float32)
    labels = np.asarray(labels, np.float32)
    per = np.maximum(logits, 0) - logits * labels + np.log1p(np.exp(-np.abs(logits)))
    return per.mean(), logits


if __name__ == "__main__":
    # PredictModel(in_feats=16, h_feats=32, h_hops=2, n_heuristic=3, dropout=0.5)
    N, F, D, H, h_hops, B = 16, 16, 32, 3, 2, 4

    key = jax.random.PRNGKey(0)
    k1, k2, k3 = jax.random.split(key, 3)

    # random symmetric 0/1 adjacency, zero diagonal
    up = (jax.random.uniform(k1, (N, N)) < 0.3).astype(jnp.float32)
    up = jnp.triu(up, 1)
    adj_np = np.asarray(up + up.T, np.float32)

    x_np = np.asarray(jax.random.normal(k2, (N, F), jnp.float32))

    # GCNLayer weights: xavier_uniform_(gain=1.414) on (F, D), one per heuristic
    bound = 1.414 * float(np.sqrt(6.0 / (F + D)))
    W = np.asarray(jax.random.uniform(k3, (H, F, D), jnp.float32, -bound, bound))
    # NOTE: out1 / out2 Linear layers and dropout of PredictModel are dead code
    # (everything after the first return statement).

    src = [0, 2, 5, 7]
    dst = [1, 3, 6, 9]
    labels = [1.0, 0.0, 1.0, 0.0]

    loss, logits, predict, adj_b, x_b = predict_model_forward(
        src, dst, labels, adj_np, x_np, W, h_hops)
    jax.block_until_ready((loss, logits, predict))

    ref_loss, ref_logits = reference(adj_b, x_b, W, labels)
    np.testing.assert_allclose(np.asarray(logits), ref_logits, rtol=1e-3, atol=1e-3)
    np.testing.assert_allclose(float(loss), float(ref_loss), rtol=1e-3, atol=1e-3)

    print("KERNEL_OK")
</pallas_src>

<mosaic_0001>
module attributes {stable_mosaic.version = 11 : i64} {
  func.func @predict_kernel(%arg0: i32, %arg1: memref<16x16x128xbf16, #tpu.memory_space<vmem>>, %arg2: memref<16x16x128xf32, #tpu.memory_space<vmem>>, %arg3: memref<3x32x16xf32, #tpu.memory_space<vmem>>, %arg4: memref<1x128xf32, #tpu.memory_space<vmem>>, %arg5: memref<1x128xf32, #tpu.memory_space<vmem>>, %arg6: memref<1x128xf32, #tpu.memory_space<vmem>>, %arg7: memref<1x128xf32, #tpu.memory_space<vmem>>) attributes {dimension_semantics = [#tpu.dimension_semantics<parallel>], iteration_bounds = array<i64: 1>, scalar_prefetch = 0 : i64, scratch_operands = 0 : i64, tpu.core_type = #tpu.core_type<tc>, window_params = [{transform_indices = @transform_0, window_bounds = array<i64: 16, 16, 128>}, {transform_indices = @transform_1, window_bounds = array<i64: 16, 16, 128>}, {pipeline_mode = #tpu.pipeline_mode<synchronous>, transform_indices = @transform_2, window_bounds = array<i64: 3, 32, 16>}, {transform_indices = @transform_3, window_bounds = array<i64: 1, 128>}, {transform_indices = @transform_4, window_bounds = array<i64: 1, 128>}, {transform_indices = @transform_5, window_bounds = array<i64: 1, 128>}, {transform_indices = @transform_6, window_bounds = array<i64: 1, 128>}]} {
    %c0 = arith.constant 0 : index
    %c0_0 = arith.constant 0 : index
    %c0_1 = arith.constant 0 : index
    %0 = vector.load %arg1[%c0, %c0_0, %c0_1] : memref<16x16x128xbf16, #tpu.memory_space<vmem>>, vector<1x16x128xbf16>
    %1 = vector.shape_cast %0 : vector<1x16x128xbf16> to vector<16x128xbf16>
    %2 = arith.extf %1 : vector<16x128xbf16> to vector<16x128xf32>
    %c1 = arith.constant 1 : index
    %c0_2 = arith.constant 0 : index
    %c0_3 = arith.constant 0 : index
    %3 = vector.load %arg1[%c1, %c0_2, %c0_3] : memref<16x16x128xbf16, #tpu.memory_space<vmem>>, vector<1x16x128xbf16>
    %4 = vector.shape_cast %3 : vector<1x16x128xbf16> to vector<16x128xbf16>
    %5 = arith.extf %4 : vector<16x128xbf16> to vector<16x128xf32>
    %c2 = arith.constant 2 : index
    %c0_4 = arith.constant 0 : index
    %c0_5 = arith.constant 0 : index
    %6 = vector.load %arg1[%c2, %c0_4, %c0_5] : memref<16x16x128xbf16, #tpu.memory_space<vmem>>, vector<1x16x128xbf16>
    %7 = vector.shape_cast %6 : vector<1x16x128xbf16> to vector<16x128xbf16>
    %8 = arith.extf %7 : vector<16x128xbf16> to vector<16x128xf32>
    %c3 = arith.constant 3 : index
    %c0_6 = arith.constant 0 : index
    %c0_7 = arith.constant 0 : index
    %9 = vector.load %arg1[%c3, %c0_6, %c0_7] : memref<16x16x128xbf16, #tpu.memory_space<vmem>>, vector<1x16x128xbf16>
    %10 = vector.shape_cast %9 : vector<1x16x128xbf16> to vector<16x128xbf16>
    %11 = arith.extf %10 : vector<16x128xbf16> to vector<16x128xf32>
    %c4 = arith.constant 4 : index
    %c0_8 = arith.constant 0 : index
    %c0_9 = arith.constant 0 : index
    %12 = vector.load %arg1[%c4, %c0_8, %c0_9] : memref<16x16x128xbf16, #tpu.memory_space<vmem>>, vector<1x16x128xbf16>
    %13 = vector.shape_cast %12 : vector<1x16x128xbf16> to vector<16x128xbf16>
    %14 = arith.extf %13 : vector<16x128xbf16> to vector<16x128xf32>
    %c5 = arith.constant 5 : index
    %c0_10 = arith.constant 0 : index
    %c0_11 = arith.constant 0 : index
    %15 = vector.load %arg1[%c5, %c0_10, %c0_11] : memref<16x16x128xbf16, #tpu.memory_space<vmem>>, vector<1x16x128xbf16>
    %16 = vector.shape_cast %15 : vector<1x16x128xbf16> to vector<16x128xbf16>
    %17 = arith.extf %16 : vector<16x128xbf16> to vector<16x128xf32>
    %c6 = arith.constant 6 : index
    %c0_12 = arith.constant 0 : index
    %c0_13 = arith.constant 0 : index
    %18 = vector.load %arg1[%c6, %c0_12, %c0_13] : memref<16x16x128xbf16, #tpu.memory_space<vmem>>, vector<1x16x128xbf16>
    %19 = vector.shape_cast %18 : vector<1x16x128xbf16> to vector<16x128xbf16>
    %20 = arith.extf %19 : vector<16x128xbf16> to vector<16x128xf32>
    %c7 = arith.constant 7 : index
    %c0_14 = arith.constant 0 : index
    %c0_15 = arith.constant 0 : index
    %21 = vector.load %arg1[%c7, %c0_14, %c0_15] : memref<16x16x128xbf16, #tpu.memory_space<vmem>>, vector<1x16x128xbf16>
    %22 = vector.shape_cast %21 : vector<1x16x128xbf16> to vector<16x128xbf16>
    %23 = arith.extf %22 : vector<16x128xbf16> to vector<16x128xf32>
    %c8 = arith.constant 8 : index
    %c0_16 = arith.constant 0 : index
    %c0_17 = arith.constant 0 : index
    %24 = vector.load %arg1[%c8, %c0_16, %c0_17] : memref<16x16x128xbf16, #tpu.memory_space<vmem>>, vector<1x16x128xbf16>
    %25 = vector.shape_cast %24 : vector<1x16x128xbf16> to vector<16x128xbf16>
    %26 = arith.extf %25 : vector<16x128xbf16> to vector<16x128xf32>
    %c9 = arith.constant 9 : index
    %c0_18 = arith.constant 0 : index
    %c0_19 = arith.constant 0 : index
    %27 = vector.load %arg1[%c9, %c0_18, %c0_19] : memref<16x16x128xbf16, #tpu.memory_space<vmem>>, vector<1x16x128xbf16>
    %28 = vector.shape_cast %27 : vector<1x16x128xbf16> to vector<16x128xbf16>
    %29 = arith.extf %28 : vector<16x128xbf16> to vector<16x128xf32>
    %c10 = arith.constant 10 : index
    %c0_20 = arith.constant 0 : index
    %c0_21 = arith.constant 0 : index
    %30 = vector.load %arg1[%c10, %c0_20, %c0_21] : memref<16x16x128xbf16, #tpu.memory_space<vmem>>, vector<1x16x128xbf16>
    %31 = vector.shape_cast %30 : vector<1x16x128xbf16> to vector<16x128xbf16>
    %32 = arith.extf %31 : vector<16x128xbf16> to vector<16x128xf32>
    %c11 = arith.constant 11 : index
    %c0_22 = arith.constant 0 : index
    %c0_23 = arith.constant 0 : index
    %33 = vector.load %arg1[%c11, %c0_22, %c0_23] : memref<16x16x128xbf16, #tpu.memory_space<vmem>>, vector<1x16x128xbf16>
    %34 = vector.shape_cast %33 : vector<1x16x128xbf16> to vector<16x128xbf16>
    %35 = arith.extf %34 : vector<16x128xbf16> to vector<16x128xf32>
    %c12 = arith.constant 12 : index
    %c0_24 = arith.constant 0 : index
    %c0_25 = arith.constant 0 : index
    %36 = vector.load %arg1[%c12, %c0_24, %c0_25] : memref<16x16x128xbf16, #tpu.memory_space<vmem>>, vector<1x16x128xbf16>
    %37 = vector.shape_cast %36 : vector<1x16x128xbf16> to vector<16x128xbf16>
    %38 = arith.extf %37 : vector<16x128xbf16> to vector<16x128xf32>
    %c13 = arith.constant 13 : index
    %c0_26 = arith.constant 0 : index
    %c0_27 = arith.constant 0 : index
    %39 = vector.load %arg1[%c13, %c0_26, %c0_27] : memref<16x16x128xbf16, #tpu.memory_space<vmem>>, vector<1x16x128xbf16>
    %40 = vector.shape_cast %39 : vector<1x16x128xbf16> to vector<16x128xbf16>
    %41 = arith.extf %40 : vector<16x128xbf16> to vector<16x128xf32>
    %c14 = arith.constant 14 : index
    %c0_28 = arith.constant 0 : index
    %c0_29 = arith.constant 0 : index
    %42 = vector.load %arg1[%c14, %c0_28, %c0_29] : memref<16x16x128xbf16, #tpu.memory_space<vmem>>, vector<1x16x128xbf16>
    %43 = vector.shape_cast %42 : vector<1x16x128xbf16> to vector<16x128xbf16>
    %44 = arith.extf %43 : vector<16x128xbf16> to vector<16x128xf32>
    %c15 = arith.constant 15 : index
    %c0_30 = arith.constant 0 : index
    %c0_31 = arith.constant 0 : index
    %45 = vector.load %arg1[%c15, %c0_30, %c0_31] : memref<16x16x128xbf16, #tpu.memory_space<vmem>>, vector<1x16x128xbf16>
    %46 = vector.shape_cast %45 : vector<1x16x128xbf16> to vector<16x128xbf16>
    %47 = arith.extf %46 : vector<16x128xbf16> to vector<16x128xf32>
    %c0_32 = arith.constant 0 : index
    %c0_33 = arith.constant 0 : index
    %c0_34 = arith.constant 0 : index
    %48 = vector.load %arg2[%c0_32, %c0_33, %c0_34] : memref<16x16x128xf32, #tpu.memory_space<vmem>>, vector<1x16x128xf32>
    %49 = vector.shape_cast %48 : vector<1x16x128xf32> to vector<16x128xf32>
    %c1_35 = arith.constant 1 : index
    %c0_36 = arith.constant 0 : index
    %c0_37 = arith.constant 0 : index
    %50 = vector.load %arg2[%c1_35, %c0_36, %c0_37] : memref<16x16x128xf32, #tpu.memory_space<vmem>>, vector<1x16x128xf32>
    %51 = vector.shape_cast %50 : vector<1x16x128xf32> to vector<16x128xf32>
    %c2_38 = arith.constant 2 : index
    %c0_39 = arith.constant 0 : index
    %c0_40 = arith.constant 0 : index
    %52 = vector.load %arg2[%c2_38, %c0_39, %c0_40] : memref<16x16x128xf32, #tpu.memory_space<vmem>>, vector<1x16x128xf32>
    %53 = vector.shape_cast %52 : vector<1x16x128xf32> to vector<16x128xf32>
    %c3_41 = arith.constant 3 : index
    %c0_42 = arith.constant 0 : index
    %c0_43 = arith.constant 0 : index
    %54 = vector.load %arg2[%c3_41, %c0_42, %c0_43] : memref<16x16x128xf32, #tpu.memory_space<vmem>>, vector<1x16x128xf32>
    %55 = vector.shape_cast %54 : vector<1x16x128xf32> to vector<16x128xf32>
    %c4_44 = arith.constant 4 : index
    %c0_45 = arith.constant 0 : index
    %c0_46 = arith.constant 0 : index
    %56 = vector.load %arg2[%c4_44, %c0_45, %c0_46] : memref<16x16x128xf32, #tpu.memory_space<vmem>>, vector<1x16x128xf32>
    %57 = vector.shape_cast %56 : vector<1x16x128xf32> to vector<16x128xf32>
    %c5_47 = arith.constant 5 : index
    %c0_48 = arith.constant 0 : index
    %c0_49 = arith.constant 0 : index
    %58 = vector.load %arg2[%c5_47, %c0_48, %c0_49] : memref<16x16x128xf32, #tpu.memory_space<vmem>>, vector<1x16x128xf32>
    %59 = vector.shape_cast %58 : vector<1x16x128xf32> to vector<16x128xf32>
    %c6_50 = arith.constant 6 : index
    %c0_51 = arith.constant 0 : index
    %c0_52 = arith.constant 0 : index
    %60 = vector.load %arg2[%c6_50, %c0_51, %c0_52] : memref<16x16x128xf32, #tpu.memory_space<vmem>>, vector<1x16x128xf32>
    %61 = vector.shape_cast %60 : vector<1x16x128xf32> to vector<16x128xf32>
    %c7_53 = arith.constant 7 : index
    %c0_54 = arith.constant 0 : index
    %c0_55 = arith.constant 0 : index
    %62 = vector.load %arg2[%c7_53, %c0_54, %c0_55] : memref<16x16x128xf32, #tpu.memory_space<vmem>>, vector<1x16x128xf32>
    %63 = vector.shape_cast %62 : vector<1x16x128xf32> to vector<16x128xf32>
    %c8_56 = arith.constant 8 : index
    %c0_57 = arith.constant 0 : index
    %c0_58 = arith.constant 0 : index
    %64 = vector.load %arg2[%c8_56, %c0_57, %c0_58] : memref<16x16x128xf32, #tpu.memory_space<vmem>>, vector<1x16x128xf32>
    %65 = vector.shape_cast %64 : vector<1x16x128xf32> to vector<16x128xf32>
    %c9_59 = arith.constant 9 : index
    %c0_60 = arith.constant 0 : index
    %c0_61 = arith.constant 0 : index
    %66 = vector.load %arg2[%c9_59, %c0_60, %c0_61] : memref<16x16x128xf32, #tpu.memory_space<vmem>>, vector<1x16x128xf32>
    %67 = vector.shape_cast %66 : vector<1x16x128xf32> to vector<16x128xf32>
    %c10_62 = arith.constant 10 : index
    %c0_63 = arith.constant 0 : index
    %c0_64 = arith.constant 0 : index
    %68 = vector.load %arg2[%c10_62, %c0_63, %c0_64] : memref<16x16x128xf32, #tpu.memory_space<vmem>>, vector<1x16x128xf32>
    %69 = vector.shape_cast %68 : vector<1x16x128xf32> to vector<16x128xf32>
    %c11_65 = arith.constant 11 : index
    %c0_66 = arith.constant 0 : index
    %c0_67 = arith.constant 0 : index
    %70 = vector.load %arg2[%c11_65, %c0_66, %c0_67] : memref<16x16x128xf32, #tpu.memory_space<vmem>>, vector<1x16x128xf32>
    %71 = vector.shape_cast %70 : vector<1x16x128xf32> to vector<16x128xf32>
    %c12_68 = arith.constant 12 : index
    %c0_69 = arith.constant 0 : index
    %c0_70 = arith.constant 0 : index
    %72 = vector.load %arg2[%c12_68, %c0_69, %c0_70] : memref<16x16x128xf32, #tpu.memory_space<vmem>>, vector<1x16x128xf32>
    %73 = vector.shape_cast %72 : vector<1x16x128xf32> to vector<16x128xf32>
    %c13_71 = arith.constant 13 : index
    %c0_72 = arith.constant 0 : index
    %c0_73 = arith.constant 0 : index
    %74 = vector.load %arg2[%c13_71, %c0_72, %c0_73] : memref<16x16x128xf32, #tpu.memory_space<vmem>>, vector<1x16x128xf32>
    %75 = vector.shape_cast %74 : vector<1x16x128xf32> to vector<16x128xf32>
    %c14_74 = arith.constant 14 : index
    %c0_75 = arith.constant 0 : index
    %c0_76 = arith.constant 0 : index
    %76 = vector.load %arg2[%c14_74, %c0_75, %c0_76] : memref<16x16x128xf32, #tpu.memory_space<vmem>>, vector<1x16x128xf32>
    %77 = vector.shape_cast %76 : vector<1x16x128xf32> to vector<16x128xf32>
    %c15_77 = arith.constant 15 : index
    %c0_78 = arith.constant 0 : index
    %c0_79 = arith.constant 0 : index
    %78 = vector.load %arg2[%c15_77, %c0_78, %c0_79] : memref<16x16x128xf32, #tpu.memory_space<vmem>>, vector<1x16x128xf32>
    %79 = vector.shape_cast %78 : vector<1x16x128xf32> to vector<16x128xf32>
    %cst = arith.constant dense<0.000000e+00> : vector<128xf32>
    %80 = vector.multi_reduction <add>, %2, %cst [0] : vector<16x128xf32> to vector<128xf32>
    %81 = vector.shape_cast %80 : vector<128xf32> to vector<1x128xf32>
    %cst_80 = arith.constant dense<0.000000e+00> : vector<128xf32>
    %82 = vector.multi_reduction <add>, %5, %cst_80 [0] : vector<16x128xf32> to vector<128xf32>
    %83 = vector.shape_cast %82 : vector<128xf32> to vector<1x128xf32>
    %cst_81 = arith.constant dense<0.000000e+00> : vector<128xf32>
    %84 = vector.multi_reduction <add>, %8, %cst_81 [0] : vector<16x128xf32> to vector<128xf32>
    %85 = vector.shape_cast %84 : vector<128xf32> to vector<1x128xf32>
    %cst_82 = arith.constant dense<0.000000e+00> : vector<128xf32>
    %86 = vector.multi_reduction <add>, %11, %cst_82 [0] : vector<16x128xf32> to vector<128xf32>
    %87 = vector.shape_cast %86 : vector<128xf32> to vector<1x128xf32>
    %cst_83 = arith.constant dense<0.000000e+00> : vector<128xf32>
    %88 = vector.multi_reduction <add>, %14, %cst_83 [0] : vector<16x128xf32> to vector<128xf32>
    %89 = vector.shape_cast %88 : vector<128xf32> to vector<1x128xf32>
    %cst_84 = arith.constant dense<0.000000e+00> : vector<128xf32>
    %90 = vector.multi_reduction <add>, %17, %cst_84 [0] : vector<16x128xf32> to vector<128xf32>
    %91 = vector.shape_cast %90 : vector<128xf32> to vector<1x128xf32>
    %cst_85 = arith.constant dense<0.000000e+00> : vector<128xf32>
    %92 = vector.multi_reduction <add>, %20, %cst_85 [0] : vector<16x128xf32> to vector<128xf32>
    %93 = vector.shape_cast %92 : vector<128xf32> to vector<1x128xf32>
    %cst_86 = arith.constant dense<0.000000e+00> : vector<128xf32>
    %94 = vector.multi_reduction <add>, %23, %cst_86 [0] : vector<16x128xf32> to vector<128xf32>
    %95 = vector.shape_cast %94 : vector<128xf32> to vector<1x128xf32>
    %cst_87 = arith.constant dense<0.000000e+00> : vector<128xf32>
    %96 = vector.multi_reduction <add>, %26, %cst_87 [0] : vector<16x128xf32> to vector<128xf32>
    %97 = vector.shape_cast %96 : vector<128xf32> to vector<1x128xf32>
    %cst_88 = arith.constant dense<0.000000e+00> : vector<128xf32>
    %98 = vector.multi_reduction <add>, %29, %cst_88 [0] : vector<16x128xf32> to vector<128xf32>
    %99 = vector.shape_cast %98 : vector<128xf32> to vector<1x128xf32>
    %cst_89 = arith.constant dense<0.000000e+00> : vector<128xf32>
    %100 = vector.multi_reduction <add>, %32, %cst_89 [0] : vector<16x128xf32> to vector<128xf32>
    %101 = vector.shape_cast %100 : vector<128xf32> to vector<1x128xf32>
    %cst_90 = arith.constant dense<0.000000e+00> : vector<128xf32>
    %102 = vector.multi_reduction <add>, %35, %cst_90 [0] : vector<16x128xf32> to vector<128xf32>
    %103 = vector.shape_cast %102 : vector<128xf32> to vector<1x128xf32>
    %cst_91 = arith.constant dense<0.000000e+00> : vector<128xf32>
    %104 = vector.multi_reduction <add>, %38, %cst_91 [0] : vector<16x128xf32> to vector<128xf32>
    %105 = vector.shape_cast %104 : vector<128xf32> to vector<1x128xf32>
    %cst_92 = arith.constant dense<0.000000e+00> : vector<128xf32>
    %106 = vector.multi_reduction <add>, %41, %cst_92 [0] : vector<16x128xf32> to vector<128xf32>
    %107 = vector.shape_cast %106 : vector<128xf32> to vector<1x128xf32>
    %cst_93 = arith.constant dense<0.000000e+00> : vector<128xf32>
    %108 = vector.multi_reduction <add>, %44, %cst_93 [0] : vector<16x128xf32> to vector<128xf32>
    %109 = vector.shape_cast %108 : vector<128xf32> to vector<1x128xf32>
    %cst_94 = arith.constant dense<0.000000e+00> : vector<128xf32>
    %110 = vector.multi_reduction <add>, %47, %cst_94 [0] : vector<16x128xf32> to vector<128xf32>
    %111 = vector.shape_cast %110 : vector<128xf32> to vector<1x128xf32>
    %112 = tpu.concatenate %81, %83, %85, %87, %89, %91, %93, %95, %97, %99, %101, %103, %105, %107, %109, %111 in 0 : vector<1x128xf32>, vector<1x128xf32>, vector<1x128xf32>, vector<1x128xf32>, vector<1x128xf32>, vector<1x128xf32>, vector<1x128xf32>, vector<1x128xf32>, vector<1x128xf32>, vector<1x128xf32>, vector<1x128xf32>, vector<1x128xf32>, vector<1x128xf32>, vector<1x128xf32>, vector<1x128xf32>, vector<1x128xf32> -> vector<16x128xf32>
    %cst_95 = arith.constant 1.000000e+00 : f32
    %113 = vector.broadcast %cst_95 : f32 to vector<16x128xf32>
    %114 = arith.addf %112, %113 : vector<16x128xf32>
    %115 = tpu.reciprocal %114 {approx = true} : vector<16x128xf32> -> vector<16x128xf32>
    %116 = arith.mulf %114, %115 : vector<16x128xf32>
    %cst_96 = arith.constant 2.000000e+00 : f32
    %117 = vector.broadcast %cst_96 : f32 to vector<16x128xf32>
    %118 = arith.subf %117, %116 : vector<16x128xf32>
    %119 = arith.mulf %115, %118 : vector<16x128xf32>
    %120 = tpu.iota {dimensions = array<i32: 0>} : vector<16x128xi32>
    %cst_97 = arith.constant 0.000000e+00 : f32
    %121 = vector.broadcast %cst_97 : f32 to vector<1x128xf32>
    %c0_98 = arith.constant 0 : index
    %c0_99 = arith.constant 0 : index
    %c0_100 = arith.constant 0 : index
    %122 = vector.load %arg3[%c0_98, %c0_99, %c0_100] : memref<3x32x16xf32, #tpu.memory_space<vmem>>, vector<1x32x16xf32>
    %123 = vector.shape_cast %122 : vector<1x32x16xf32> to vector<32x16xf32>
    %124 = vector.extract_strided_slice %49 {offsets = [0, 0], sizes = [1, 128], strides = [1, 1]} : vector<16x128xf32> to vector<1x128xf32>
    %125 = vector.extract_strided_slice %123 {offsets = [0, 0], sizes = [32, 1], strides = [1, 1]} : vector<32x16xf32> to vector<32x1xf32>
    %126 = vector.broadcast %124 : vector<1x128xf32> to vector<32x128xf32>
    %127 = vector.broadcast %125 : vector<32x1xf32> to vector<32x128xf32>
    %128 = arith.mulf %126, %127 : vector<32x128xf32>
    %129 = vector.extract_strided_slice %49 {offsets = [1, 0], sizes = [1, 128], strides = [1, 1]} : vector<16x128xf32> to vector<1x128xf32>
    %130 = vector.extract_strided_slice %123 {offsets = [0, 1], sizes = [32, 1], strides = [1, 1]} : vector<32x16xf32> to vector<32x1xf32>
    %131 = vector.broadcast %129 : vector<1x128xf32> to vector<32x128xf32>
    %132 = vector.broadcast %130 : vector<32x1xf32> to vector<32x128xf32>
    %133 = arith.mulf %131, %132 : vector<32x128xf32>
    %134 = arith.addf %128, %133 : vector<32x128xf32>
    %135 = vector.extract_strided_slice %49 {offsets = [2, 0], sizes = [1, 128], strides = [1, 1]} : vector<16x128xf32> to vector<1x128xf32>
    %136 = vector.extract_strided_slice %123 {offsets = [0, 2], sizes = [32, 1], strides = [1, 1]} : vector<32x16xf32> to vector<32x1xf32>
    %137 = vector.broadcast %135 : vector<1x128xf32> to vector<32x128xf32>
    %138 = vector.broadcast %136 : vector<32x1xf32> to vector<32x128xf32>
    %139 = arith.mulf %137, %138 : vector<32x128xf32>
    %140 = arith.addf %134, %139 : vector<32x128xf32>
    %141 = vector.extract_strided_slice %49 {offsets = [3, 0], sizes = [1, 128], strides = [1, 1]} : vector<16x128xf32> to vector<1x128xf32>
    %142 = vector.extract_strided_slice %123 {offsets = [0, 3], sizes = [32, 1], strides = [1, 1]} : vector<32x16xf32> to vector<32x1xf32>
    %143 = vector.broadcast %141 : vector<1x128xf32> to vector<32x128xf32>
    %144 = vector.broadcast %142 : vector<32x1xf32> to vector<32x128xf32>
    %145 = arith.mulf %143, %144 : vector<32x128xf32>
    %146 = arith.addf %140, %145 : vector<32x128xf32>
    %147 = vector.extract_strided_slice %49 {offsets = [4, 0], sizes = [1, 128], strides = [1, 1]} : vector<16x128xf32> to vector<1x128xf32>
    %148 = vector.extract_strided_slice %123 {offsets = [0, 4], sizes = [32, 1], strides = [1, 1]} : vector<32x16xf32> to vector<32x1xf32>
    %149 = vector.broadcast %147 : vector<1x128xf32> to vector<32x128xf32>
    %150 = vector.broadcast %148 : vector<32x1xf32> to vector<32x128xf32>
    %151 = arith.mulf %149, %150 : vector<32x128xf32>
    %152 = arith.addf %146, %151 : vector<32x128xf32>
    %153 = vector.extract_strided_slice %49 {offsets = [5, 0], sizes = [1, 128], strides = [1, 1]} : vector<16x128xf32> to vector<1x128xf32>
    %154 = vector.extract_strided_slice %123 {offsets = [0, 5], sizes = [32, 1], strides = [1, 1]} : vector<32x16xf32> to vector<32x1xf32>
    %155 = vector.broadcast %153 : vector<1x128xf32> to vector<32x128xf32>
    %156 = vector.broadcast %154 : vector<32x1xf32> to vector<32x128xf32>
    %157 = arith.mulf %155, %156 : vector<32x128xf32>
    %158 = arith.addf %152, %157 : vector<32x128xf32>
    %159 = vector.extract_strided_slice %49 {offsets = [6, 0], sizes = [1, 128], strides = [1, 1]} : vector<16x128xf32> to vector<1x128xf32>
    %160 = vector.extract_strided_slice %123 {offsets = [0, 6], sizes = [32, 1], strides = [1, 1]} : vector<32x16xf32> to vector<32x1xf32>
    %161 = vector.broadcast %159 : vector<1x128xf32> to vector<32x128xf32>
    %162 = vector.broadcast %160 : vector<32x1xf32> to vector<32x128xf32>
    %163 = arith.mulf %161, %162 : vector<32x128xf32>
    %164 = arith.addf %158, %163 : vector<32x128xf32>
    %165 = vector.extract_strided_slice %49 {offsets = [7, 0], sizes = [1, 128], strides = [1, 1]} : vector<16x128xf32> to vector<1x128xf32>
    %166 = vector.extract_strided_slice %123 {offsets = [0, 7], sizes = [32, 1], strides = [1, 1]} : vector<32x16xf32> to vector<32x1xf32>
    %167 = vector.broadcast %165 : vector<1x128xf32> to vector<32x128xf32>
    %168 = vector.broadcast %166 : vector<32x1xf32> to vector<32x128xf32>
    %169 = arith.mulf %167, %168 : vector<32x128xf32>
    %170 = arith.addf %164, %169 : vector<32x128xf32>
    %171 = vector.extract_strided_slice %49 {offsets = [8, 0], sizes = [1, 128], strides = [1, 1]} : vector<16x128xf32> to vector<1x128xf32>
    %172 = vector.extract_strided_slice %123 {offsets = [0, 8], sizes = [32, 1], strides = [1, 1]} : vector<32x16xf32> to vector<32x1xf32>
    %173 = vector.broadcast %171 : vector<1x128xf32> to vector<32x128xf32>
    %174 = vector.broadcast %172 : vector<32x1xf32> to vector<32x128xf32>
    %175 = arith.mulf %173, %174 : vector<32x128xf32>
    %176 = arith.addf %170, %175 : vector<32x128xf32>
    %177 = vector.extract_strided_slice %49 {offsets = [9, 0], sizes = [1, 128], strides = [1, 1]} : vector<16x128xf32> to vector<1x128xf32>
    %178 = vector.extract_strided_slice %123 {offsets = [0, 9], sizes = [32, 1], strides = [1, 1]} : vector<32x16xf32> to vector<32x1xf32>
    %179 = vector.broadcast %177 : vector<1x128xf32> to vector<32x128xf32>
    %180 = vector.broadcast %178 : vector<32x1xf32> to vector<32x128xf32>
    %181 = arith.mulf %179, %180 : vector<32x128xf32>
    %182 = arith.addf %176, %181 : vector<32x128xf32>
    %183 = vector.extract_strided_slice %49 {offsets = [10, 0], sizes = [1, 128], strides = [1, 1]} : vector<16x128xf32> to vector<1x128xf32>
    %184 = vector.extract_strided_slice %123 {offsets = [0, 10], sizes = [32, 1], strides = [1, 1]} : vector<32x16xf32> to vector<32x1xf32>
    %185 = vector.broadcast %183 : vector<1x128xf32> to vector<32x128xf32>
    %186 = vector.broadcast %184 : vector<32x1xf32> to vector<32x128xf32>
    %187 = arith.mulf %185, %186 : vector<32x128xf32>
    %188 = arith.addf %182, %187 : vector<32x128xf32>
    %189 = vector.extract_strided_slice %49 {offsets = [11, 0], sizes = [1, 128], strides = [1, 1]} : vector<16x128xf32> to vector<1x128xf32>
    %190 = vector.extract_strided_slice %123 {offsets = [0, 11], sizes = [32, 1], strides = [1, 1]} : vector<32x16xf32> to vector<32x1xf32>
    %191 = vector.broadcast %189 : vector<1x128xf32> to vector<32x128xf32>
    %192 = vector.broadcast %190 : vector<32x1xf32> to vector<32x128xf32>
    %193 = arith.mulf %191, %192 : vector<32x128xf32>
    %194 = arith.addf %188, %193 : vector<32x128xf32>
    %195 = vector.extract_strided_slice %49 {offsets = [12, 0], sizes = [1, 128], strides = [1, 1]} : vector<16x128xf32> to vector<1x128xf32>
    %196 = vector.extract_strided_slice %123 {offsets = [0, 12], sizes = [32, 1], strides = [1, 1]} : vector<32x16xf32> to vector<32x1xf32>
    %197 = vector.broadcast %195 : vector<1x128xf32> to vector<32x128xf32>
    %198 = vector.broadcast %196 : vector<32x1xf32> to vector<32x128xf32>
    %199 = arith.mulf %197, %198 : vector<32x128xf32>
    %200 = arith.addf %194, %199 : vector<32x128xf32>
    %201 = vector.extract_strided_slice %49 {offsets = [13, 0], sizes = [1, 128], strides = [1, 1]} : vector<16x128xf32> to vector<1x128xf32>
    %202 = vector.extract_strided_slice %123 {offsets = [0, 13], sizes = [32, 1], strides = [1, 1]} : vector<32x16xf32> to vector<32x1xf32>
    %203 = vector.broadcast %201 : vector<1x128xf32> to vector<32x128xf32>
    %204 = vector.broadcast %202 : vector<32x1xf32> to vector<32x128xf32>
    %205 = arith.mulf %203, %204 : vector<32x128xf32>
    %206 = arith.addf %200, %205 : vector<32x128xf32>
    %207 = vector.extract_strided_slice %49 {offsets = [14, 0], sizes = [1, 128], strides = [1, 1]} : vector<16x128xf32> to vector<1x128xf32>
    %208 = vector.extract_strided_slice %123 {offsets = [0, 14], sizes = [32, 1], strides = [1, 1]} : vector<32x16xf32> to vector<32x1xf32>
    %209 = vector.broadcast %207 : vector<1x128xf32> to vector<32x128xf32>
    %210 = vector.broadcast %208 : vector<32x1xf32> to vector<32x128xf32>
    %211 = arith.mulf %209, %210 : vector<32x128xf32>
    %212 = arith.addf %206, %211 : vector<32x128xf32>
    %213 = vector.extract_strided_slice %49 {offsets = [15, 0], sizes = [1, 128], strides = [1, 1]} : vector<16x128xf32> to vector<1x128xf32>
    %214 = vector.extract_strided_slice %123 {offsets = [0, 15], sizes = [32, 1], strides = [1, 1]} : vector<32x16xf32> to vector<32x1xf32>
    %215 = vector.broadcast %213 : vector<1x128xf32> to vector<32x128xf32>
    %216 = vector.broadcast %214 : vector<32x1xf32> to vector<32x128xf32>
    %217 = arith.mulf %215, %216 : vector<32x128xf32>
    %218 = arith.addf %212, %217 : vector<32x128xf32>
    %cst_101 = arith.constant 0.000000e+00 : f32
    %219 = vector.broadcast %cst_101 : f32 to vector<32x128xf32>
    %220 = arith.cmpf ogt, %218, %219 : vector<32x128xf32>
    %cst_102 = arith.constant 0.000000e+00 : f32
    %221 = vector.broadcast %cst_102 : f32 to vector<32x128xf32>
    %222 = arith.minimumf %218, %221 : vector<32x128xf32>
    %223 = math.exp %222 : vector<32x128xf32>
    %cst_103 = arith.constant 1.000000e+00 : f32
    %224 = vector.broadcast %cst_103 : f32 to vector<32x128xf32>
    %225 = arith.subf %223, %224 : vector<32x128xf32>
    %226 = arith.select %220, %218, %225 : vector<32x128xi1>, vector<32x128xf32>
    %227 = vector.extract_strided_slice %51 {offsets = [0, 0], sizes = [1, 128], strides = [1, 1]} : vector<16x128xf32> to vector<1x128xf32>
    %228 = vector.extract_strided_slice %123 {offsets = [0, 0], sizes = [32, 1], strides = [1, 1]} : vector<32x16xf32> to vector<32x1xf32>
    %229 = vector.broadcast %227 : vector<1x128xf32> to vector<32x128xf32>
    %230 = vector.broadcast %228 : vector<32x1xf32> to vector<32x128xf32>
    %231 = arith.mulf %229, %230 : vector<32x128xf32>
    %232 = vector.extract_strided_slice %51 {offsets = [1, 0], sizes = [1, 128], strides = [1, 1]} : vector<16x128xf32> to vector<1x128xf32>
    %233 = vector.extract_strided_slice %123 {offsets = [0, 1], sizes = [32, 1], strides = [1, 1]} : vector<32x16xf32> to vector<32x1xf32>
    %234 = vector.broadcast %232 : vector<1x128xf32> to vector<32x128xf32>
    %235 = vector.broadcast %233 : vector<32x1xf32> to vector<32x128xf32>
    %236 = arith.mulf %234, %235 : vector<32x128xf32>
    %237 = arith.addf %231, %236 : vector<32x128xf32>
    %238 = vector.extract_strided_slice %51 {offsets = [2, 0], sizes = [1, 128], strides = [1, 1]} : vector<16x128xf32> to vector<1x128xf32>
    %239 = vector.extract_strided_slice %123 {offsets = [0, 2], sizes = [32, 1], strides = [1, 1]} : vector<32x16xf32> to vector<32x1xf32>
    %240 = vector.broadcast %238 : vector<1x128xf32> to vector<32x128xf32>
    %241 = vector.broadcast %239 : vector<32x1xf32> to vector<32x128xf32>
    %242 = arith.mulf %240, %241 : vector<32x128xf32>
    %243 = arith.addf %237, %242 : vector<32x128xf32>
    %244 = vector.extract_strided_slice %51 {offsets = [3, 0], sizes = [1, 128], strides = [1, 1]} : vector<16x128xf32> to vector<1x128xf32>
    %245 = vector.extract_strided_slice %123 {offsets = [0, 3], sizes = [32, 1], strides = [1, 1]} : vector<32x16xf32> to vector<32x1xf32>
    %246 = vector.broadcast %244 : vector<1x128xf32> to vector<32x128xf32>
    %247 = vector.broadcast %245 : vector<32x1xf32> to vector<32x128xf32>
    %248 = arith.mulf %246, %247 : vector<32x128xf32>
    %249 = arith.addf %243, %248 : vector<32x128xf32>
    %250 = vector.extract_strided_slice %51 {offsets = [4, 0], sizes = [1, 128], strides = [1, 1]} : vector<16x128xf32> to vector<1x128xf32>
    %251 = vector.extract_strided_slice %123 {offsets = [0, 4], sizes = [32, 1], strides = [1, 1]} : vector<32x16xf32> to vector<32x1xf32>
    %252 = vector.broadcast %250 : vector<1x128xf32> to vector<32x128xf32>
    %253 = vector.broadcast %251 : vector<32x1xf32> to vector<32x128xf32>
    %254 = arith.mulf %252, %253 : vector<32x128xf32>
    %255 = arith.addf %249, %254 : vector<32x128xf32>
    %256 = vector.extract_strided_slice %51 {offsets = [5, 0], sizes = [1, 128], strides = [1, 1]} : vector<16x128xf32> to vector<1x128xf32>
    %257 = vector.extract_strided_slice %123 {offsets = [0, 5], sizes = [32, 1], strides = [1, 1]} : vector<32x16xf32> to vector<32x1xf32>
    %258 = vector.broadcast %256 : vector<1x128xf32> to vector<32x128xf32>
    %259 = vector.broadcast %257 : vector<32x1xf32> to vector<32x128xf32>
    %260 = arith.mulf %258, %259 : vector<32x128xf32>
    %261 = arith.addf %255, %260 : vector<32x128xf32>
    %262 = vector.extract_strided_slice %51 {offsets = [6, 0], sizes = [1, 128], strides = [1, 1]} : vector<16x128xf32> to vector<1x128xf32>
    %263 = vector.extract_strided_slice %123 {offsets = [0, 6], sizes = [32, 1], strides = [1, 1]} : vector<32x16xf32> to vector<32x1xf32>
    %264 = vector.broadcast %262 : vector<1x128xf32> to vector<32x128xf32>
    %265 = vector.broadcast %263 : vector<32x1xf32> to vector<32x128xf32>
    %266 = arith.mulf %264, %265 : vector<32x128xf32>
    %267 = arith.addf %261, %266 : vector<32x128xf32>
    %268 = vector.extract_strided_slice %51 {offsets = [7, 0], sizes = [1, 128], strides = [1, 1]} : vector<16x128xf32> to vector<1x128xf32>
    %269 = vector.extract_strided_slice %123 {offsets = [0, 7], sizes = [32, 1], strides = [1, 1]} : vector<32x16xf32> to vector<32x1xf32>
    %270 = vector.broadcast %268 : vector<1x128xf32> to vector<32x128xf32>
    %271 = vector.broadcast %269 : vector<32x1xf32> to vector<32x128xf32>
    %272 = arith.mulf %270, %271 : vector<32x128xf32>
    %273 = arith.addf %267, %272 : vector<32x128xf32>
    %274 = vector.extract_strided_slice %51 {offsets = [8, 0], sizes = [1, 128], strides = [1, 1]} : vector<16x128xf32> to vector<1x128xf32>
    %275 = vector.extract_strided_slice %123 {offsets = [0, 8], sizes = [32, 1], strides = [1, 1]} : vector<32x16xf32> to vector<32x1xf32>
    %276 = vector.broadcast %274 : vector<1x128xf32> to vector<32x128xf32>
    %277 = vector.broadcast %275 : vector<32x1xf32> to vector<32x128xf32>
    %278 = arith.mulf %276, %277 : vector<32x128xf32>
    %279 = arith.addf %273, %278 : vector<32x128xf32>
    %280 = vector.extract_strided_slice %51 {offsets = [9, 0], sizes = [1, 128], strides = [1, 1]} : vector<16x128xf32> to vector<1x128xf32>
    %281 = vector.extract_strided_slice %123 {offsets = [0, 9], sizes = [32, 1], strides = [1, 1]} : vector<32x16xf32> to vector<32x1xf32>
    %282 = vector.broadcast %280 : vector<1x128xf32> to vector<32x128xf32>
    %283 = vector.broadcast %281 : vector<32x1xf32> to vector<32x128xf32>
    %284 = arith.mulf %282, %283 : vector<32x128xf32>
    %285 = arith.addf %279, %284 : vector<32x128xf32>
    %286 = vector.extract_strided_slice %51 {offsets = [10, 0], sizes = [1, 128], strides = [1, 1]} : vector<16x128xf32> to vector<1x128xf32>
    %287 = vector.extract_strided_slice %123 {offsets = [0, 10], sizes = [32, 1], strides = [1, 1]} : vector<32x16xf32> to vector<32x1xf32>
    %288 = vector.broadcast %286 : vector<1x128xf32> to vector<32x128xf32>
    %289 = vector.broadcast %287 : vector<32x1xf32> to vector<32x128xf32>
    %290 = arith.mulf %288, %289 : vector<32x128xf32>
    %291 = arith.addf %285, %290 : vector<32x128xf32>
    %292 = vector.extract_strided_slice %51 {offsets = [11, 0], sizes = [1, 128], strides = [1, 1]} : vector<16x128xf32> to vector<1x128xf32>
    %293 = vector.extract_strided_slice %123 {offsets = [0, 11], sizes = [32, 1], strides = [1, 1]} : vector<32x16xf32> to vector<32x1xf32>
    %294 = vector.broadcast %292 : vector<1x128xf32> to vector<32x128xf32>
    %295 = vector.broadcast %293 : vector<32x1xf32> to vector<32x128xf32>
    %296 = arith.mulf %294, %295 : vector<32x128xf32>
    %297 = arith.addf %291, %296 : vector<32x128xf32>
    %298 = vector.extract_strided_slice %51 {offsets = [12, 0], sizes = [1, 128], strides = [1, 1]} : vector<16x128xf32> to vector<1x128xf32>
    %299 = vector.extract_strided_slice %123 {offsets = [0, 12], sizes = [32, 1], strides = [1, 1]} : vector<32x16xf32> to vector<32x1xf32>
    %300 = vector.broadcast %298 : vector<1x128xf32> to vector<32x128xf32>
    %301 = vector.broadcast %299 : vector<32x1xf32> to vector<32x128xf32>
    %302 = arith.mulf %300, %301 : vector<32x128xf32>
    %303 = arith.addf %297, %302 : vector<32x128xf32>
    %304 = vector.extract_strided_slice %51 {offsets = [13, 0], sizes = [1, 128], strides = [1, 1]} : vector<16x128xf32> to vector<1x128xf32>
    %305 = vector.extract_strided_slice %123 {offsets = [0, 13], sizes = [32, 1], strides = [1, 1]} : vector<32x16xf32> to vector<32x1xf32>
    %306 = vector.broadcast %304 : vector<1x128xf32> to vector<32x128xf32>
    %307 = vector.broadcast %305 : vector<32x1xf32> to vector<32x128xf32>
    %308 = arith.mulf %306, %307 : vector<32x128xf32>
    %309 = arith.addf %303, %308 : vector<32x128xf32>
    %310 = vector.extract_strided_slice %51 {offsets = [14, 0], sizes = [1, 128], strides = [1, 1]} : vector<16x128xf32> to vector<1x128xf32>
    %311 = vector.extract_strided_slice %123 {offsets = [0, 14], sizes = [32, 1], strides = [1, 1]} : vector<32x16xf32> to vector<32x1xf32>
    %312 = vector.broadcast %310 : vector<1x128xf32> to vector<32x128xf32>
    %313 = vector.broadcast %311 : vector<32x1xf32> to vector<32x128xf32>
    %314 = arith.mulf %312, %313 : vector<32x128xf32>
    %315 = arith.addf %309, %314 : vector<32x128xf32>
    %316 = vector.extract_strided_slice %51 {offsets = [15, 0], sizes = [1, 128], strides = [1, 1]} : vector<16x128xf32> to vector<1x128xf32>
    %317 = vector.extract_strided_slice %123 {offsets = [0, 15], sizes = [32, 1], strides = [1, 1]} : vector<32x16xf32> to vector<32x1xf32>
    %318 = vector.broadcast %316 : vector<1x128xf32> to vector<32x128xf32>
    %319 = vector.broadcast %317 : vector<32x1xf32> to vector<32x128xf32>
    %320 = arith.mulf %318, %319 : vector<32x128xf32>
    %321 = arith.addf %315, %320 : vector<32x128xf32>
    %cst_104 = arith.constant 0.000000e+00 : f32
    %322 = vector.broadcast %cst_104 : f32 to vector<32x128xf32>
    %323 = arith.cmpf ogt, %321, %322 : vector<32x128xf32>
    %cst_105 = arith.constant 0.000000e+00 : f32
    %324 = vector.broadcast %cst_105 : f32 to vector<32x128xf32>
    %325 = arith.minimumf %321, %324 : vector<32x128xf32>
    %326 = math.exp %325 : vector<32x128xf32>
    %cst_106 = arith.constant 1.000000e+00 : f32
    %327 = vector.broadcast %cst_106 : f32 to vector<32x128xf32>
    %328 = arith.subf %326, %327 : vector<32x128xf32>
    %329 = arith.select %323, %321, %328 : vector<32x128xi1>, vector<32x128xf32>
    %330 = arith.mulf %226, %329 : vector<32x128xf32>
    %cst_107 = arith.constant dense<0.000000e+00> : vector<128xf32>
    %331 = vector.multi_reduction <add>, %330, %cst_107 [0] : vector<32x128xf32> to vector<128xf32>
    %332 = vector.shape_cast %331 : vector<128xf32> to vector<1x128xf32>
    %333 = arith.addf %121, %332 : vector<1x128xf32>
    %c0_i32 = arith.constant 0 : i32
    %334 = vector.broadcast %c0_i32 : i32 to vector<16x128xi32>
    %335 = arith.cmpi eq, %120, %334 : vector<16x128xi32>
    %336 = arith.extui %335 : vector<16x128xi1> to vector<16x128xi32>
    %337 = arith.sitofp %336 : vector<16x128xi32> to vector<16x128xf32>
    %338 = arith.addf %2, %337 : vector<16x128xf32>
    %339 = arith.mulf %338, %119 : vector<16x128xf32>
    %340 = vector.extract_strided_slice %339 {offsets = [0, 0], sizes = [1, 128], strides = [1, 1]} : vector<16x128xf32> to vector<1x128xf32>
    %341 = vector.broadcast %340 : vector<1x128xf32> to vector<16x128xf32>
    %342 = arith.mulf %341, %49 : vector<16x128xf32>
    %343 = vector.extract_strided_slice %339 {offsets = [1, 0], sizes = [1, 128], strides = [1, 1]} : vector<16x128xf32> to vector<1x128xf32>
    %344 = vector.broadcast %343 : vector<1x128xf32> to vector<16x128xf32>
    %345 = arith.mulf %344, %51 : vector<16x128xf32>
    %346 = arith.addf %342, %345 : vector<16x128xf32>
    %347 = vector.extract_strided_slice %339 {offsets = [2, 0], sizes = [1, 128], strides = [1, 1]} : vector<16x128xf32> to vector<1x128xf32>
    %348 = vector.broadcast %347 : vector<1x128xf32> to vector<16x128xf32>
    %349 = arith.mulf %348, %53 : vector<16x128xf32>
    %350 = arith.addf %346, %349 : vector<16x128xf32>
    %351 = vector.extract_strided_slice %339 {offsets = [3, 0], sizes = [1, 128], strides = [1, 1]} : vector<16x128xf32> to vector<1x128xf32>
    %352 = vector.broadcast %351 : vector<1x128xf32> to vector<16x128xf32>
    %353 = arith.mulf %352, %55 : vector<16x128xf32>
    %354 = arith.addf %350, %353 : vector<16x128xf32>
    %355 = vector.extract_strided_slice %339 {offsets = [4, 0], sizes = [1, 128], strides = [1, 1]} : vector<16x128xf32> to vector<1x128xf32>
    %356 = vector.broadcast %355 : vector<1x128xf32> to vector<16x128xf32>
    %357 = arith.mulf %356, %57 : vector<16x128xf32>
    %358 = arith.addf %354, %357 : vector<16x128xf32>
    %359 = vector.extract_strided_slice %339 {offsets = [5, 0], sizes = [1, 128], strides = [1, 1]} : vector<16x128xf32> to vector<1x128xf32>
    %360 = vector.broadcast %359 : vector<1x128xf32> to vector<16x128xf32>
    %361 = arith.mulf %360, %59 : vector<16x128xf32>
    %362 = arith.addf %358, %361 : vector<16x128xf32>
    %363 = vector.extract_strided_slice %339 {offsets = [6, 0], sizes = [1, 128], strides = [1, 1]} : vector<16x128xf32> to vector<1x128xf32>
    %364 = vector.broadcast %363 : vector<1x128xf32> to vector<16x128xf32>
    %365 = arith.mulf %364, %61 : vector<16x128xf32>
    %366 = arith.addf %362, %365 : vector<16x128xf32>
    %367 = vector.extract_strided_slice %339 {offsets = [7, 0], sizes = [1, 128], strides = [1, 1]} : vector<16x128xf32> to vector<1x128xf32>
    %368 = vector.broadcast %367 : vector<1x128xf32> to vector<16x128xf32>
    %369 = arith.mulf %368, %63 : vector<16x128xf32>
    %370 = arith.addf %366, %369 : vector<16x128xf32>
    %371 = vector.extract_strided_slice %339 {offsets = [8, 0], sizes = [1, 128], strides = [1, 1]} : vector<16x128xf32> to vector<1x128xf32>
    %372 = vector.broadcast %371 : vector<1x128xf32> to vector<16x128xf32>
    %373 = arith.mulf %372, %65 : vector<16x128xf32>
    %374 = arith.addf %370, %373 : vector<16x128xf32>
    %375 = vector.extract_strided_slice %339 {offsets = [9, 0], sizes = [1, 128], strides = [1, 1]} : vector<16x128xf32> to vector<1x128xf32>
    %376 = vector.broadcast %375 : vector<1x128xf32> to vector<16x128xf32>
    %377 = arith.mulf %376, %67 : vector<16x128xf32>
    %378 = arith.addf %374, %377 : vector<16x128xf32>
    %379 = vector.extract_strided_slice %339 {offsets = [10, 0], sizes = [1, 128], strides = [1, 1]} : vector<16x128xf32> to vector<1x128xf32>
    %380 = vector.broadcast %379 : vector<1x128xf32> to vector<16x128xf32>
    %381 = arith.mulf %380, %69 : vector<16x128xf32>
    %382 = arith.addf %378, %381 : vector<16x128xf32>
    %383 = vector.extract_strided_slice %339 {offsets = [11, 0], sizes = [1, 128], strides = [1, 1]} : vector<16x128xf32> to vector<1x128xf32>
    %384 = vector.broadcast %383 : vector<1x128xf32> to vector<16x128xf32>
    %385 = arith.mulf %384, %71 : vector<16x128xf32>
    %386 = arith.addf %382, %385 : vector<16x128xf32>
    %387 = vector.extract_strided_slice %339 {offsets = [12, 0], sizes = [1, 128], strides = [1, 1]} : vector<16x128xf32> to vector<1x128xf32>
    %388 = vector.broadcast %387 : vector<1x128xf32> to vector<16x128xf32>
    %389 = arith.mulf %388, %73 : vector<16x128xf32>
    %390 = arith.addf %386, %389 : vector<16x128xf32>
    %391 = vector.extract_strided_slice %339 {offsets = [13, 0], sizes = [1, 128], strides = [1, 1]} : vector<16x128xf32> to vector<1x128xf32>
    %392 = vector.broadcast %391 : vector<1x128xf32> to vector<16x128xf32>
    %393 = arith.mulf %392, %75 : vector<16x128xf32>
    %394 = arith.addf %390, %393 : vector<16x128xf32>
    %395 = vector.extract_strided_slice %339 {offsets = [14, 0], sizes = [1, 128], strides = [1, 1]} : vector<16x128xf32> to vector<1x128xf32>
    %396 = vector.broadcast %395 : vector<1x128xf32> to vector<16x128xf32>
    %397 = arith.mulf %396, %77 : vector<16x128xf32>
    %398 = arith.addf %394, %397 : vector<16x128xf32>
    %399 = vector.extract_strided_slice %339 {offsets = [15, 0], sizes = [1, 128], strides = [1, 1]} : vector<16x128xf32> to vector<1x128xf32>
    %400 = vector.broadcast %399 : vector<1x128xf32> to vector<16x128xf32>
    %401 = arith.mulf %400, %79 : vector<16x128xf32>
    %402 = arith.addf %398, %401 : vector<16x128xf32>
    %c1_i32 = arith.constant 1 : i32
    %403 = vector.broadcast %c1_i32 : i32 to vector<16x128xi32>
    %404 = arith.cmpi eq, %120, %403 : vector<16x128xi32>
    %405 = arith.extui %404 : vector<16x128xi1> to vector<16x128xi32>
    %406 = arith.sitofp %405 : vector<16x128xi32> to vector<16x128xf32>
    %407 = arith.addf %5, %406 : vector<16x128xf32>
    %408 = arith.mulf %407, %119 : vector<16x128xf32>
    %409 = vector.extract_strided_slice %408 {offsets = [0, 0], sizes = [1, 128], strides = [1, 1]} : vector<16x128xf32> to vector<1x128xf32>
    %410 = vector.broadcast %409 : vector<1x128xf32> to vector<16x128xf32>
    %411 = arith.mulf %410, %49 : vector<16x128xf32>
    %412 = vector.extract_strided_slice %408 {offsets = [1, 0], sizes = [1, 128], strides = [1, 1]} : vector<16x128xf32> to vector<1x128xf32>
    %413 = vector.broadcast %412 : vector<1x128xf32> to vector<16x128xf32>
    %414 = arith.mulf %413, %51 : vector<16x128xf32>
    %415 = arith.addf %411, %414 : vector<16x128xf32>
    %416 = vector.extract_strided_slice %408 {offsets = [2, 0], sizes = [1, 128], strides = [1, 1]} : vector<16x128xf32> to vector<1x128xf32>
    %417 = vector.broadcast %416 : vector<1x128xf32> to vector<16x128xf32>
    %418 = arith.mulf %417, %53 : vector<16x128xf32>
    %419 = arith.addf %415, %418 : vector<16x128xf32>
    %420 = vector.extract_strided_slice %408 {offsets = [3, 0], sizes = [1, 128], strides = [1, 1]} : vector<16x128xf32> to vector<1x128xf32>
    %421 = vector.broadcast %420 : vector<1x128xf32> to vector<16x128xf32>
    %422 = arith.mulf %421, %55 : vector<16x128xf32>
    %423 = arith.addf %419, %422 : vector<16x128xf32>
    %424 = vector.extract_strided_slice %408 {offsets = [4, 0], sizes = [1, 128], strides = [1, 1]} : vector<16x128xf32> to vector<1x128xf32>
    %425 = vector.broadcast %424 : vector<1x128xf32> to vector<16x128xf32>
    %426 = arith.mulf %425, %57 : vector<16x128xf32>
    %427 = arith.addf %423, %426 : vector<16x128xf32>
    %428 = vector.extract_strided_slice %408 {offsets = [5, 0], sizes = [1, 128], strides = [1, 1]} : vector<16x128xf32> to vector<1x128xf32>
    %429 = vector.broadcast %428 : vector<1x128xf32> to vector<16x128xf32>
    %430 = arith.mulf %429, %59 : vector<16x128xf32>
    %431 = arith.addf %427, %430 : vector<16x128xf32>
    %432 = vector.extract_strided_slice %408 {offsets = [6, 0], sizes = [1, 128], strides = [1, 1]} : vector<16x128xf32> to vector<1x128xf32>
    %433 = vector.broadcast %432 : vector<1x128xf32> to vector<16x128xf32>
    %434 = arith.mulf %433, %61 : vector<16x128xf32>
    %435 = arith.addf %431, %434 : vector<16x128xf32>
    %436 = vector.extract_strided_slice %408 {offsets = [7, 0], sizes = [1, 128], strides = [1, 1]} : vector<16x128xf32> to vector<1x128xf32>
    %437 = vector.broadcast %436 : vector<1x128xf32> to vector<16x128xf32>
    %438 = arith.mulf %437, %63 : vector<16x128xf32>
    %439 = arith.addf %435, %438 : vector<16x128xf32>
    %440 = vector.extract_strided_slice %408 {offsets = [8, 0], sizes = [1, 128], strides = [1, 1]} : vector<16x128xf32> to vector<1x128xf32>
    %441 = vector.broadcast %440 : vector<1x128xf32> to vector<16x128xf32>
    %442 = arith.mulf %441, %65 : vector<16x128xf32>
    %443 = arith.addf %439, %442 : vector<16x128xf32>
    %444 = vector.extract_strided_slice %408 {offsets = [9, 0], sizes = [1, 128], strides = [1, 1]} : vector<16x128xf32> to vector<1x128xf32>
    %445 = vector.broadcast %444 : vector<1x128xf32> to vector<16x128xf32>
    %446 = arith.mulf %445, %67 : vector<16x128xf32>
    %447 = arith.addf %443, %446 : vector<16x128xf32>
    %448 = vector.extract_strided_slice %408 {offsets = [10, 0], sizes = [1, 128], strides = [1, 1]} : vector<16x128xf32> to vector<1x128xf32>
    %449 = vector.broadcast %448 : vector<1x128xf32> to vector<16x128xf32>
    %450 = arith.mulf %449, %69 : vector<16x128xf32>
    %451 = arith.addf %447, %450 : vector<16x128xf32>
    %452 = vector.extract_strided_slice %408 {offsets = [11, 0], sizes = [1, 128], strides = [1, 1]} : vector<16x128xf32> to vector<1x128xf32>
    %453 = vector.broadcast %452 : vector<1x128xf32> to vector<16x128xf32>
    %454 = arith.mulf %453, %71 : vector<16x128xf32>
    %455 = arith.addf %451, %454 : vector<16x128xf32>
    %456 = vector.extract_strided_slice %408 {offsets = [12, 0], sizes = [1, 128], strides = [1, 1]} : vector<16x128xf32> to vector<1x128xf32>
    %457 = vector.broadcast %456 : vector<1x128xf32> to vector<16x128xf32>
    %458 = arith.mulf %457, %73 : vector<16x128xf32>
    %459 = arith.addf %455, %458 : vector<16x128xf32>
    %460 = vector.extract_strided_slice %408 {offsets = [13, 0], sizes = [1, 128], strides = [1, 1]} : vector<16x128xf32> to vector<1x128xf32>
    %461 = vector.broadcast %460 : vector<1x128xf32> to vector<16x128xf32>
    %462 = arith.mulf %461, %75 : vector<16x128xf32>
    %463 = arith.addf %459, %462 : vector<16x128xf32>
    %464 = vector.extract_strided_slice %408 {offsets = [14, 0], sizes = [1, 128], strides = [1, 1]} : vector<16x128xf32> to vector<1x128xf32>
    %465 = vector.broadcast %464 : vector<1x128xf32> to vector<16x128xf32>
    %466 = arith.mulf %465, %77 : vector<16x128xf32>
    %467 = arith.addf %463, %466 : vector<16x128xf32>
    %468 = vector.extract_strided_slice %408 {offsets = [15, 0], sizes = [1, 128], strides = [1, 1]} : vector<16x128xf32> to vector<1x128xf32>
    %469 = vector.broadcast %468 : vector<1x128xf32> to vector<16x128xf32>
    %470 = arith.mulf %469, %79 : vector<16x128xf32>
    %471 = arith.addf %467, %470 : vector<16x128xf32>
    %c1_108 = arith.constant 1 : index
    %c0_109 = arith.constant 0 : index
    %c0_110 = arith.constant 0 : index
    %472 = vector.load %arg3[%c1_108, %c0_109, %c0_110] : memref<3x32x16xf32, #tpu.memory_space<vmem>>, vector<1x32x16xf32>
    %473 = vector.shape_cast %472 : vector<1x32x16xf32> to vector<32x16xf32>
    %474 = vector.extract_strided_slice %402 {offsets = [0, 0], sizes = [1, 128], strides = [1, 1]} : vector<16x128xf32> to vector<1x128xf32>
    %475 = vector.extract_strided_slice %473 {offsets = [0, 0], sizes = [32, 1], strides = [1, 1]} : vector<32x16xf32> to vector<32x1xf32>
    %476 = vector.broadcast %474 : vector<1x128xf32> to vector<32x128xf32>
    %477 = vector.broadcast %475 : vector<32x1xf32> to vector<32x128xf32>
    %478 = arith.mulf %476, %477 : vector<32x128xf32>
    %479 = vector.extract_strided_slice %402 {offsets = [1, 0], sizes = [1, 128], strides = [1, 1]} : vector<16x128xf32> to vector<1x128xf32>
    %480 = vector.extract_strided_slice %473 {offsets = [0, 1], sizes = [32, 1], strides = [1, 1]} : vector<32x16xf32> to vector<32x1xf32>
    %481 = vector.broadcast %479 : vector<1x128xf32> to vector<32x128xf32>
    %482 = vector.broadcast %480 : vector<32x1xf32> to vector<32x128xf32>
    %483 = arith.mulf %481, %482 : vector<32x128xf32>
    %484 = arith.addf %478, %483 : vector<32x128xf32>
    %485 = vector.extract_strided_slice %402 {offsets = [2, 0], sizes = [1, 128], strides = [1, 1]} : vector<16x128xf32> to vector<1x128xf32>
    %486 = vector.extract_strided_slice %473 {offsets = [0, 2], sizes = [32, 1], strides = [1, 1]} : vector<32x16xf32> to vector<32x1xf32>
    %487 = vector.broadcast %485 : vector<1x128xf32> to vector<32x128xf32>
    %488 = vector.broadcast %486 : vector<32x1xf32> to vector<32x128xf32>
    %489 = arith.mulf %487, %488 : vector<32x128xf32>
    %490 = arith.addf %484, %489 : vector<32x128xf32>
    %491 = vector.extract_strided_slice %402 {offsets = [3, 0], sizes = [1, 128], strides = [1, 1]} : vector<16x128xf32> to vector<1x128xf32>
    %492 = vector.extract_strided_slice %473 {offsets = [0, 3], sizes = [32, 1], strides = [1, 1]} : vector<32x16xf32> to vector<32x1xf32>
    %493 = vector.broadcast %491 : vector<1x128xf32> to vector<32x128xf32>
    %494 = vector.broadcast %492 : vector<32x1xf32> to vector<32x128xf32>
    %495 = arith.mulf %493, %494 : vector<32x128xf32>
    %496 = arith.addf %490, %495 : vector<32x128xf32>
    %497 = vector.extract_strided_slice %402 {offsets = [4, 0], sizes = [1, 128], strides = [1, 1]} : vector<16x128xf32> to vector<1x128xf32>
    %498 = vector.extract_strided_slice %473 {offsets = [0, 4], sizes = [32, 1], strides = [1, 1]} : vector<32x16xf32> to vector<32x1xf32>
    %499 = vector.broadcast %497 : vector<1x128xf32> to vector<32x128xf32>
    %500 = vector.broadcast %498 : vector<32x1xf32> to vector<32x128xf32>
    %501 = arith.mulf %499, %500 : vector<32x128xf32>
    %502 = arith.addf %496, %501 : vector<32x128xf32>
    %503 = vector.extract_strided_slice %402 {offsets = [5, 0], sizes = [1, 128], strides = [1, 1]} : vector<16x128xf32> to vector<1x128xf32>
    %504 = vector.extract_strided_slice %473 {offsets = [0, 5], sizes = [32, 1], strides = [1, 1]} : vector<32x16xf32> to vector<32x1xf32>
    %505 = vector.broadcast %503 : vector<1x128xf32> to vector<32x128xf32>
    %506 = vector.broadcast %504 : vector<32x1xf32> to vector<32x128xf32>
    %507 = arith.mulf %505, %506 : vector<32x128xf32>
    %508 = arith.addf %502, %507 : vector<32x128xf32>
    %509 = vector.extract_strided_slice %402 {offsets = [6, 0], sizes = [1, 128], strides = [1, 1]} : vector<16x128xf32> to vector<1x128xf32>
    %510 = vector.extract_strided_slice %473 {offsets = [0, 6], sizes = [32, 1], strides = [1, 1]} : vector<32x16xf32> to vector<32x1xf32>
    %511 = vector.broadcast %509 : vector<1x128xf32> to vector<32x128xf32>
    %512 = vector.broadcast %510 : vector<32x1xf32> to vector<32x128xf32>
    %513 = arith.mulf %511, %512 : vector<32x128xf32>
    %514 = arith.addf %508, %513 : vector<32x128xf32>
    %515 = vector.extract_strided_slice %402 {offsets = [7, 0], sizes = [1, 128], strides = [1, 1]} : vector<16x128xf32> to vector<1x128xf32>
    %516 = vector.extract_strided_slice %473 {offsets = [0, 7], sizes = [32, 1], strides = [1, 1]} : vector<32x16xf32> to vector<32x1xf32>
    %517 = vector.broadcast %515 : vector<1x128xf32> to vector<32x128xf32>
    %518 = vector.broadcast %516 : vector<32x1xf32> to vector<32x128xf32>
    %519 = arith.mulf %517, %518 : vector<32x128xf32>
    %520 = arith.addf %514, %519 : vector<32x128xf32>
    %521 = vector.extract_strided_slice %402 {offsets = [8, 0], sizes = [1, 128], strides = [1, 1]} : vector<16x128xf32> to vector<1x128xf32>
    %522 = vector.extract_strided_slice %473 {offsets = [0, 8], sizes = [32, 1], strides = [1, 1]} : vector<32x16xf32> to vector<32x1xf32>
    %523 = vector.broadcast %521 : vector<1x128xf32> to vector<32x128xf32>
    %524 = vector.broadcast %522 : vector<32x1xf32> to vector<32x128xf32>
    %525 = arith.mulf %523, %524 : vector<32x128xf32>
    %526 = arith.addf %520, %525 : vector<32x128xf32>
    %527 = vector.extract_strided_slice %402 {offsets = [9, 0], sizes = [1, 128], strides = [1, 1]} : vector<16x128xf32> to vector<1x128xf32>
    %528 = vector.extract_strided_slice %473 {offsets = [0, 9], sizes = [32, 1], strides = [1, 1]} : vector<32x16xf32> to vector<32x1xf32>
    %529 = vector.broadcast %527 : vector<1x128xf32> to vector<32x128xf32>
    %530 = vector.broadcast %528 : vector<32x1xf32> to vector<32x128xf32>
    %531 = arith.mulf %529, %530 : vector<32x128xf32>
    %532 = arith.addf %526, %531 : vector<32x128xf32>
    %533 = vector.extract_strided_slice %402 {offsets = [10, 0], sizes = [1, 128], strides = [1, 1]} : vector<16x128xf32> to vector<1x128xf32>
    %534 = vector.extract_strided_slice %473 {offsets = [0, 10], sizes = [32, 1], strides = [1, 1]} : vector<32x16xf32> to vector<32x1xf32>
    %535 = vector.broadcast %533 : vector<1x128xf32> to vector<32x128xf32>
    %536 = vector.broadcast %534 : vector<32x1xf32> to vector<32x128xf32>
    %537 = arith.mulf %535, %536 : vector<32x128xf32>
    %538 = arith.addf %532, %537 : vector<32x128xf32>
    %539 = vector.extract_strided_slice %402 {offsets = [11, 0], sizes = [1, 128], strides = [1, 1]} : vector<16x128xf32> to vector<1x128xf32>
    %540 = vector.extract_strided_slice %473 {offsets = [0, 11], sizes = [32, 1], strides = [1, 1]} : vector<32x16xf32> to vector<32x1xf32>
    %541 = vector.broadcast %539 : vector<1x128xf32> to vector<32x128xf32>
    %542 = vector.broadcast %540 : vector<32x1xf32> to vector<32x128xf32>
    %543 = arith.mulf %541, %542 : vector<32x128xf32>
    %544 = arith.addf %538, %543 : vector<32x128xf32>
    %545 = vector.extract_strided_slice %402 {offsets = [12, 0], sizes = [1, 128], strides = [1, 1]} : vector<16x128xf32> to vector<1x128xf32>
    %546 = vector.extract_strided_slice %473 {offsets = [0, 12], sizes = [32, 1], strides = [1, 1]} : vector<32x16xf32> to vector<32x1xf32>
    %547 = vector.broadcast %545 : vector<1x128xf32> to vector<32x128xf32>
    %548 = vector.broadcast %546 : vector<32x1xf32> to vector<32x128xf32>
    %549 = arith.mulf %547, %548 : vector<32x128xf32>
    %550 = arith.addf %544, %549 : vector<32x128xf32>
    %551 = vector.extract_strided_slice %402 {offsets = [13, 0], sizes = [1, 128], strides = [1, 1]} : vector<16x128xf32> to vector<1x128xf32>
    %552 = vector.extract_strided_slice %473 {offsets = [0, 13], sizes = [32, 1], strides = [1, 1]} : vector<32x16xf32> to vector<32x1xf32>
    %553 = vector.broadcast %551 : vector<1x128xf32> to vector<32x128xf32>
    %554 = vector.broadcast %552 : vector<32x1xf32> to vector<32x128xf32>
    %555 = arith.mulf %553, %554 : vector<32x128xf32>
    %556 = arith.addf %550, %555 : vector<32x128xf32>
    %557 = vector.extract_strided_slice %402 {offsets = [14, 0], sizes = [1, 128], strides = [1, 1]} : vector<16x128xf32> to vector<1x128xf32>
    %558 = vector.extract_strided_slice %473 {offsets = [0, 14], sizes = [32, 1], strides = [1, 1]} : vector<32x16xf32> to vector<32x1xf32>
    %559 = vector.broadcast %557 : vector<1x128xf32> to vector<32x128xf32>
    %560 = vector.broadcast %558 : vector<32x1xf32> to vector<32x128xf32>
    %561 = arith.mulf %559, %560 : vector<32x128xf32>
    %562 = arith.addf %556, %561 : vector<32x128xf32>
    %563 = vector.extract_strided_slice %402 {offsets = [15, 0], sizes = [1, 128], strides = [1, 1]} : vector<16x128xf32> to vector<1x128xf32>
    %564 = vector.extract_strided_slice %473 {offsets = [0, 15], sizes = [32, 1], strides = [1, 1]} : vector<32x16xf32> to vector<32x1xf32>
    %565 = vector.broadcast %563 : vector<1x128xf32> to vector<32x128xf32>
    %566 = vector.broadcast %564 : vector<32x1xf32> to vector<32x128xf32>
    %567 = arith.mulf %565, %566 : vector<32x128xf32>
    %568 = arith.addf %562, %567 : vector<32x128xf32>
    %cst_111 = arith.constant 0.000000e+00 : f32
    %569 = vector.broadcast %cst_111 : f32 to vector<32x128xf32>
    %570 = arith.cmpf ogt, %568, %569 : vector<32x128xf32>
    %cst_112 = arith.constant 0.000000e+00 : f32
    %571 = vector.broadcast %cst_112 : f32 to vector<32x128xf32>
    %572 = arith.minimumf %568, %571 : vector<32x128xf32>
    %573 = math.exp %572 : vector<32x128xf32>
    %cst_113 = arith.constant 1.000000e+00 : f32
    %574 = vector.broadcast %cst_113 : f32 to vector<32x128xf32>
    %575 = arith.subf %573, %574 : vector<32x128xf32>
    %576 = arith.select %570, %568, %575 : vector<32x128xi1>, vector<32x128xf32>
    %577 = vector.extract_strided_slice %471 {offsets = [0, 0], sizes = [1, 128], strides = [1, 1]} : vector<16x128xf32> to vector<1x128xf32>
    %578 = vector.extract_strided_slice %473 {offsets = [0, 0], sizes = [32, 1], strides = [1, 1]} : vector<32x16xf32> to vector<32x1xf32>
    %579 = vector.broadcast %577 : vector<1x128xf32> to vector<32x128xf32>
    %580 = vector.broadcast %578 : vector<32x1xf32> to vector<32x128xf32>
    %581 = arith.mulf %579, %580 : vector<32x128xf32>
    %582 = vector.extract_strided_slice %471 {offsets = [1, 0], sizes = [1, 128], strides = [1, 1]} : vector<16x128xf32> to vector<1x128xf32>
    %583 = vector.extract_strided_slice %473 {offsets = [0, 1], sizes = [32, 1], strides = [1, 1]} : vector<32x16xf32> to vector<32x1xf32>
    %584 = vector.broadcast %582 : vector<1x128xf32> to vector<32x128xf32>
    %585 = vector.broadcast %583 : vector<32x1xf32> to vector<32x128xf32>
    %586 = arith.mulf %584, %585 : vector<32x128xf32>
    %587 = arith.addf %581, %586 : vector<32x128xf32>
    %588 = vector.extract_strided_slice %471 {offsets = [2, 0], sizes = [1, 128], strides = [1, 1]} : vector<16x128xf32> to vector<1x128xf32>
    %589 = vector.extract_strided_slice %473 {offsets = [0, 2], sizes = [32, 1], strides = [1, 1]} : vector<32x16xf32> to vector<32x1xf32>
    %590 = vector.broadcast %588 : vector<1x128xf32> to vector<32x128xf32>
    %591 = vector.broadcast %589 : vector<32x1xf32> to vector<32x128xf32>
    %592 = arith.mulf %590, %591 : vector<32x128xf32>
    %593 = arith.addf %587, %592 : vector<32x128xf32>
    %594 = vector.extract_strided_slice %471 {offsets = [3, 0], sizes = [1, 128], strides = [1, 1]} : vector<16x128xf32> to vector<1x128xf32>
    %595 = vector.extract_strided_slice %473 {offsets = [0, 3], sizes = [32, 1], strides = [1, 1]} : vector<32x16xf32> to vector<32x1xf32>
    %596 = vector.broadcast %594 : vector<1x128xf32> to vector<32x128xf32>
    %597 = vector.broadcast %595 : vector<32x1xf32> to vector<32x128xf32>
    %598 = arith.mulf %596, %597 : vector<32x128xf32>
    %599 = arith.addf %593, %598 : vector<32x128xf32>
    %600 = vector.extract_strided_slice %471 {offsets = [4, 0], sizes = [1, 128], strides = [1, 1]} : vector<16x128xf32> to vector<1x128xf32>
    %601 = vector.extract_strided_slice %473 {offsets = [0, 4], sizes = [32, 1], strides = [1, 1]} : vector<32x16xf32> to vector<32x1xf32>
    %602 = vector.broadcast %600 : vector<1x128xf32> to vector<32x128xf32>
    %603 = vector.broadcast %601 : vector<32x1xf32> to vector<32x128xf32>
    %604 = arith.mulf %602, %603 : vector<32x128xf32>
    %605 = arith.addf %599, %604 : vector<32x128xf32>
    %606 = vector.extract_strided_slice %471 {offsets = [5, 0], sizes = [1, 128], strides = [1, 1]} : vector<16x128xf32> to vector<1x128xf32>
    %607 = vector.extract_strided_slice %473 {offsets = [0, 5], sizes = [32, 1], strides = [1, 1]} : vector<32x16xf32> to vector<32x1xf32>
    %608 = vector.broadcast %606 : vector<1x128xf32> to vector<32x128xf32>
    %609 = vector.broadcast %607 : vector<32x1xf32> to vector<32x128xf32>
    %610 = arith.mulf %608, %609 : vector<32x128xf32>
    %611 = arith.addf %605, %610 : vector<32x128xf32>
    %612 = vector.extract_strided_slice %471 {offsets = [6, 0], sizes = [1, 128], strides = [1, 1]} : vector<16x128xf32> to vector<1x128xf32>
    %613 = vector.extract_strided_slice %473 {offsets = [0, 6], sizes = [32, 1], strides = [1, 1]} : vector<32x16xf32> to vector<32x1xf32>
    %614 = vector.broadcast %612 : vector<1x128xf32> to vector<32x128xf32>
    %615 = vector.broadcast %613 : vector<32x1xf32> to vector<32x128xf32>
    %616 = arith.mulf %614, %615 : vector<32x128xf32>
    %617 = arith.addf %611, %616 : vector<32x128xf32>
    %618 = vector.extract_strided_slice %471 {offsets = [7, 0], sizes = [1, 128], strides = [1, 1]} : vector<16x128xf32> to vector<1x128xf32>
    %619 = vector.extract_strided_slice %473 {offsets = [0, 7], sizes = [32, 1], strides = [1, 1]} : vector<32x16xf32> to vector<32x1xf32>
    %620 = vector.broadcast %618 : vector<1x128xf32> to vector<32x128xf32>
    %621 = vector.broadcast %619 : vector<32x1xf32> to vector<32x128xf32>
    %622 = arith.mulf %620, %621 : vector<32x128xf32>
    %623 = arith.addf %617, %622 : vector<32x128xf32>
    %624 = vector.extract_strided_slice %471 {offsets = [8, 0], sizes = [1, 128], strides = [1, 1]} : vector<16x128xf32> to vector<1x128xf32>
    %625 = vector.extract_strided_slice %473 {offsets = [0, 8], sizes = [32, 1], strides = [1, 1]} : vector<32x16xf32> to vector<32x1xf32>
    %626 = vector.broadcast %624 : vector<1x128xf32> to vector<32x128xf32>
    %627 = vector.broadcast %625 : vector<32x1xf32> to vector<32x128xf32>
    %628 = arith.mulf %626, %627 : vector<32x128xf32>
    %629 = arith.addf %623, %628 : vector<32x128xf32>
    %630 = vector.extract_strided_slice %471 {offsets = [9, 0], sizes = [1, 128], strides = [1, 1]} : vector<16x128xf32> to vector<1x128xf32>
    %631 = vector.extract_strided_slice %473 {offsets = [0, 9], sizes = [32, 1], strides = [1, 1]} : vector<32x16xf32> to vector<32x1xf32>
    %632 = vector.broadcast %630 : vector<1x128xf32> to vector<32x128xf32>
    %633 = vector.broadcast %631 : vector<32x1xf32> to vector<32x128xf32>
    %634 = arith.mulf %632, %633 : vector<32x128xf32>
    %635 = arith.addf %629, %634 : vector<32x128xf32>
    %636 = vector.extract_strided_slice %471 {offsets = [10, 0], sizes = [1, 128], strides = [1, 1]} : vector<16x128xf32> to vector<1x128xf32>
    %637 = vector.extract_strided_slice %473 {offsets = [0, 10], sizes = [32, 1], strides = [1, 1]} : vector<32x16xf32> to vector<32x1xf32>
    %638 = vector.broadcast %636 : vector<1x128xf32> to vector<32x128xf32>
    %639 = vector.broadcast %637 : vector<32x1xf32> to vector<32x128xf32>
    %640 = arith.mulf %638, %639 : vector<32x128xf32>
    %641 = arith.addf %635, %640 : vector<32x128xf32>
    %642 = vector.extract_strided_slice %471 {offsets = [11, 0], sizes = [1, 128], strides = [1, 1]} : vector<16x128xf32> to vector<1x128xf32>
    %643 = vector.extract_strided_slice %473 {offsets = [0, 11], sizes = [32, 1], strides = [1, 1]} : vector<32x16xf32> to vector<32x1xf32>
    %644 = vector.broadcast %642 : vector<1x128xf32> to vector<32x128xf32>
    %645 = vector.broadcast %643 : vector<32x1xf32> to vector<32x128xf32>
    %646 = arith.mulf %644, %645 : vector<32x128xf32>
    %647 = arith.addf %641, %646 : vector<32x128xf32>
    %648 = vector.extract_strided_slice %471 {offsets = [12, 0], sizes = [1, 128], strides = [1, 1]} : vector<16x128xf32> to vector<1x128xf32>
    %649 = vector.extract_strided_slice %473 {offsets = [0, 12], sizes = [32, 1], strides = [1, 1]} : vector<32x16xf32> to vector<32x1xf32>
    %650 = vector.broadcast %648 : vector<1x128xf32> to vector<32x128xf32>
    %651 = vector.broadcast %649 : vector<32x1xf32> to vector<32x128xf32>
    %652 = arith.mulf %650, %651 : vector<32x128xf32>
    %653 = arith.addf %647, %652 : vector<32x128xf32>
    %654 = vector.extract_strided_slice %471 {offsets = [13, 0], sizes = [1, 128], strides = [1, 1]} : vector<16x128xf32> to vector<1x128xf32>
    %655 = vector.extract_strided_slice %473 {offsets = [0, 13], sizes = [32, 1], strides = [1, 1]} : vector<32x16xf32> to vector<32x1xf32>
    %656 = vector.broadcast %654 : vector<1x128xf32> to vector<32x128xf32>
    %657 = vector.broadcast %655 : vector<32x1xf32> to vector<32x128xf32>
    %658 = arith.mulf %656, %657 : vector<32x128xf32>
    %659 = arith.addf %653, %658 : vector<32x128xf32>
    %660 = vector.extract_strided_slice %471 {offsets = [14, 0], sizes = [1, 128], strides = [1, 1]} : vector<16x128xf32> to vector<1x128xf32>
    %661 = vector.extract_strided_slice %473 {offsets = [0, 14], sizes = [32, 1], strides = [1, 1]} : vector<32x16xf32> to vector<32x1xf32>
    %662 = vector.broadcast %660 : vector<1x128xf32> to vector<32x128xf32>
    %663 = vector.broadcast %661 : vector<32x1xf32> to vector<32x128xf32>
    %664 = arith.mulf %662, %663 : vector<32x128xf32>
    %665 = arith.addf %659, %664 : vector<32x128xf32>
    %666 = vector.extract_strided_slice %471 {offsets = [15, 0], sizes = [1, 128], strides = [1, 1]} : vector<16x128xf32> to vector<1x128xf32>
    %667 = vector.extract_strided_slice %473 {offsets = [0, 15], sizes = [32, 1], strides = [1, 1]} : vector<32x16xf32> to vector<32x1xf32>
    %668 = vector.broadcast %666 : vector<1x128xf32> to vector<32x128xf32>
    %669 = vector.broadcast %667 : vector<32x1xf32> to vector<32x128xf32>
    %670 = arith.mulf %668, %669 : vector<32x128xf32>
    %671 = arith.addf %665, %670 : vector<32x128xf32>
    %cst_114 = arith.constant 0.000000e+00 : f32
    %672 = vector.broadcast %cst_114 : f32 to vector<32x128xf32>
    %673 = arith.cmpf ogt, %671, %672 : vector<32x128xf32>
    %cst_115 = arith.constant 0.000000e+00 : f32
    %674 = vector.broadcast %cst_115 : f32 to vector<32x128xf32>
    %675 = arith.minimumf %671, %674 : vector<32x128xf32>
    %676 = math.exp %675 : vector<32x128xf32>
    %cst_116 = arith.constant 1.000000e+00 : f32
    %677 = vector.broadcast %cst_116 : f32 to vector<32x128xf32>
    %678 = arith.subf %676, %677 : vector<32x128xf32>
    %679 = arith.select %673, %671, %678 : vector<32x128xi1>, vector<32x128xf32>
    %680 = arith.mulf %576, %679 : vector<32x128xf32>
    %cst_117 = arith.constant dense<0.000000e+00> : vector<128xf32>
    %681 = vector.multi_reduction <add>, %680, %cst_117 [0] : vector<32x128xf32> to vector<128xf32>
    %682 = vector.shape_cast %681 : vector<128xf32> to vector<1x128xf32>
    %683 = arith.addf %333, %682 : vector<1x128xf32>
    %684 = vector.extract_strided_slice %339 {offsets = [0, 0], sizes = [1, 128], strides = [1, 1]} : vector<16x128xf32> to vector<1x128xf32>
    %685 = vector.broadcast %684 : vector<1x128xf32> to vector<16x128xf32>
    %686 = arith.mulf %685, %2 : vector<16x128xf32>
    %687 = arith.addf %339, %686 : vector<16x128xf32>
    %688 = vector.extract_strided_slice %339 {offsets = [1, 0], sizes = [1, 128], strides = [1, 1]} : vector<16x128xf32> to vector<1x128xf32>
    %689 = vector.broadcast %688 : vector<1x128xf32> to vector<16x128xf32>
    %690 = arith.mulf %689, %5 : vector<16x128xf32>
    %691 = arith.addf %687, %690 : vector<16x128xf32>
    %692 = vector.extract_strided_slice %339 {offsets = [2, 0], sizes = [1, 128], strides = [1, 1]} : vector<16x128xf32> to vector<1x128xf32>
    %693 = vector.broadcast %692 : vector<1x128xf32> to vector<16x128xf32>
    %694 = arith.mulf %693, %8 : vector<16x128xf32>
    %695 = arith.addf %691, %694 : vector<16x128xf32>
    %696 = vector.extract_strided_slice %339 {offsets = [3, 0], sizes = [1, 128], strides = [1, 1]} : vector<16x128xf32> to vector<1x128xf32>
    %697 = vector.broadcast %696 : vector<1x128xf32> to vector<16x128xf32>
    %698 = arith.mulf %697, %11 : vector<16x128xf32>
    %699 = arith.addf %695, %698 : vector<16x128xf32>
    %700 = vector.extract_strided_slice %339 {offsets = [4, 0], sizes = [1, 128], strides = [1, 1]} : vector<16x128xf32> to vector<1x128xf32>
    %701 = vector.broadcast %700 : vector<1x128xf32> to vector<16x128xf32>
    %702 = arith.mulf %701, %14 : vector<16x128xf32>
    %703 = arith.addf %699, %702 : vector<16x128xf32>
    %704 = vector.extract_strided_slice %339 {offsets = [5, 0], sizes = [1, 128], strides = [1, 1]} : vector<16x128xf32> to vector<1x128xf32>
    %705 = vector.broadcast %704 : vector<1x128xf32> to vector<16x128xf32>
    %706 = arith.mulf %705, %17 : vector<16x128xf32>
    %707 = arith.addf %703, %706 : vector<16x128xf32>
    %708 = vector.extract_strided_slice %339 {offsets = [6, 0], sizes = [1, 128], strides = [1, 1]} : vector<16x128xf32> to vector<1x128xf32>
    %709 = vector.broadcast %708 : vector<1x128xf32> to vector<16x128xf32>
    %710 = arith.mulf %709, %20 : vector<16x128xf32>
    %711 = arith.addf %707, %710 : vector<16x128xf32>
    %712 = vector.extract_strided_slice %339 {offsets = [7, 0], sizes = [1, 128], strides = [1, 1]} : vector<16x128xf32> to vector<1x128xf32>
    %713 = vector.broadcast %712 : vector<1x128xf32> to vector<16x128xf32>
    %714 = arith.mulf %713, %23 : vector<16x128xf32>
    %715 = arith.addf %711, %714 : vector<16x128xf32>
    %716 = vector.extract_strided_slice %339 {offsets = [8, 0], sizes = [1, 128], strides = [1, 1]} : vector<16x128xf32> to vector<1x128xf32>
    %717 = vector.broadcast %716 : vector<1x128xf32> to vector<16x128xf32>
    %718 = arith.mulf %717, %26 : vector<16x128xf32>
    %719 = arith.addf %715, %718 : vector<16x128xf32>
    %720 = vector.extract_strided_slice %339 {offsets = [9, 0], sizes = [1, 128], strides = [1, 1]} : vector<16x128xf32> to vector<1x128xf32>
    %721 = vector.broadcast %720 : vector<1x128xf32> to vector<16x128xf32>
    %722 = arith.mulf %721, %29 : vector<16x128xf32>
    %723 = arith.addf %719, %722 : vector<16x128xf32>
    %724 = vector.extract_strided_slice %339 {offsets = [10, 0], sizes = [1, 128], strides = [1, 1]} : vector<16x128xf32> to vector<1x128xf32>
    %725 = vector.broadcast %724 : vector<1x128xf32> to vector<16x128xf32>
    %726 = arith.mulf %725, %32 : vector<16x128xf32>
    %727 = arith.addf %723, %726 : vector<16x128xf32>
    %728 = vector.extract_strided_slice %339 {offsets = [11, 0], sizes = [1, 128], strides = [1, 1]} : vector<16x128xf32> to vector<1x128xf32>
    %729 = vector.broadcast %728 : vector<1x128xf32> to vector<16x128xf32>
    %730 = arith.mulf %729, %35 : vector<16x128xf32>
    %731 = arith.addf %727, %730 : vector<16x128xf32>
    %732 = vector.extract_strided_slice %339 {offsets = [12, 0], sizes = [1, 128], strides = [1, 1]} : vector<16x128xf32> to vector<1x128xf32>
    %733 = vector.broadcast %732 : vector<1x128xf32> to vector<16x128xf32>
    %734 = arith.mulf %733, %38 : vector<16x128xf32>
    %735 = arith.addf %731, %734 : vector<16x128xf32>
    %736 = vector.extract_strided_slice %339 {offsets = [13, 0], sizes = [1, 128], strides = [1, 1]} : vector<16x128xf32> to vector<1x128xf32>
    %737 = vector.broadcast %736 : vector<1x128xf32> to vector<16x128xf32>
    %738 = arith.mulf %737, %41 : vector<16x128xf32>
    %739 = arith.addf %735, %738 : vector<16x128xf32>
    %740 = vector.extract_strided_slice %339 {offsets = [14, 0], sizes = [1, 128], strides = [1, 1]} : vector<16x128xf32> to vector<1x128xf32>
    %741 = vector.broadcast %740 : vector<1x128xf32> to vector<16x128xf32>
    %742 = arith.mulf %741, %44 : vector<16x128xf32>
    %743 = arith.addf %739, %742 : vector<16x128xf32>
    %744 = vector.extract_strided_slice %339 {offsets = [15, 0], sizes = [1, 128], strides = [1, 1]} : vector<16x128xf32> to vector<1x128xf32>
    %745 = vector.broadcast %744 : vector<1x128xf32> to vector<16x128xf32>
    %746 = arith.mulf %745, %47 : vector<16x128xf32>
    %747 = arith.addf %743, %746 : vector<16x128xf32>
    %748 = arith.mulf %747, %119 : vector<16x128xf32>
    %749 = vector.extract_strided_slice %748 {offsets = [0, 0], sizes = [1, 128], strides = [1, 1]} : vector<16x128xf32> to vector<1x128xf32>
    %750 = vector.broadcast %749 : vector<1x128xf32> to vector<16x128xf32>
    %751 = arith.mulf %750, %49 : vector<16x128xf32>
    %752 = vector.extract_strided_slice %748 {offsets = [1, 0], sizes = [1, 128], strides = [1, 1]} : vector<16x128xf32> to vector<1x128xf32>
    %753 = vector.broadcast %752 : vector<1x128xf32> to vector<16x128xf32>
    %754 = arith.mulf %753, %51 : vector<16x128xf32>
    %755 = arith.addf %751, %754 : vector<16x128xf32>
    %756 = vector.extract_strided_slice %748 {offsets = [2, 0], sizes = [1, 128], strides = [1, 1]} : vector<16x128xf32> to vector<1x128xf32>
    %757 = vector.broadcast %756 : vector<1x128xf32> to vector<16x128xf32>
    %758 = arith.mulf %757, %53 : vector<16x128xf32>
    %759 = arith.addf %755, %758 : vector<16x128xf32>
    %760 = vector.extract_strided_slice %748 {offsets = [3, 0], sizes = [1, 128], strides = [1, 1]} : vector<16x128xf32> to vector<1x128xf32>
    %761 = vector.broadcast %760 : vector<1x128xf32> to vector<16x128xf32>
    %762 = arith.mulf %761, %55 : vector<16x128xf32>
    %763 = arith.addf %759, %762 : vector<16x128xf32>
    %764 = vector.extract_strided_slice %748 {offsets = [4, 0], sizes = [1, 128], strides = [1, 1]} : vector<16x128xf32> to vector<1x128xf32>
    %765 = vector.broadcast %764 : vector<1x128xf32> to vector<16x128xf32>
    %766 = arith.mulf %765, %57 : vector<16x128xf32>
    %767 = arith.addf %763, %766 : vector<16x128xf32>
    %768 = vector.extract_strided_slice %748 {offsets = [5, 0], sizes = [1, 128], strides = [1, 1]} : vector<16x128xf32> to vector<1x128xf32>
    %769 = vector.broadcast %768 : vector<1x128xf32> to vector<16x128xf32>
    %770 = arith.mulf %769, %59 : vector<16x128xf32>
    %771 = arith.addf %767, %770 : vector<16x128xf32>
    %772 = vector.extract_strided_slice %748 {offsets = [6, 0], sizes = [1, 128], strides = [1, 1]} : vector<16x128xf32> to vector<1x128xf32>
    %773 = vector.broadcast %772 : vector<1x128xf32> to vector<16x128xf32>
    %774 = arith.mulf %773, %61 : vector<16x128xf32>
    %775 = arith.addf %771, %774 : vector<16x128xf32>
    %776 = vector.extract_strided_slice %748 {offsets = [7, 0], sizes = [1, 128], strides = [1, 1]} : vector<16x128xf32> to vector<1x128xf32>
    %777 = vector.broadcast %776 : vector<1x128xf32> to vector<16x128xf32>
    %778 = arith.mulf %777, %63 : vector<16x128xf32>
    %779 = arith.addf %775, %778 : vector<16x128xf32>
    %780 = vector.extract_strided_slice %748 {offsets = [8, 0], sizes = [1, 128], strides = [1, 1]} : vector<16x128xf32> to vector<1x128xf32>
    %781 = vector.broadcast %780 : vector<1x128xf32> to vector<16x128xf32>
    %782 = arith.mulf %781, %65 : vector<16x128xf32>
    %783 = arith.addf %779, %782 : vector<16x128xf32>
    %784 = vector.extract_strided_slice %748 {offsets = [9, 0], sizes = [1, 128], strides = [1, 1]} : vector<16x128xf32> to vector<1x128xf32>
    %785 = vector.broadcast %784 : vector<1x128xf32> to vector<16x128xf32>
    %786 = arith.mulf %785, %67 : vector<16x128xf32>
    %787 = arith.addf %783, %786 : vector<16x128xf32>
    %788 = vector.extract_strided_slice %748 {offsets = [10, 0], sizes = [1, 128], strides = [1, 1]} : vector<16x128xf32> to vector<1x128xf32>
    %789 = vector.broadcast %788 : vector<1x128xf32> to vector<16x128xf32>
    %790 = arith.mulf %789, %69 : vector<16x128xf32>
    %791 = arith.addf %787, %790 : vector<16x128xf32>
    %792 = vector.extract_strided_slice %748 {offsets = [11, 0], sizes = [1, 128], strides = [1, 1]} : vector<16x128xf32> to vector<1x128xf32>
    %793 = vector.broadcast %792 : vector<1x128xf32> to vector<16x128xf32>
    %794 = arith.mulf %793, %71 : vector<16x128xf32>
    %795 = arith.addf %791, %794 : vector<16x128xf32>
    %796 = vector.extract_strided_slice %748 {offsets = [12, 0], sizes = [1, 128], strides = [1, 1]} : vector<16x128xf32> to vector<1x128xf32>
    %797 = vector.broadcast %796 : vector<1x128xf32> to vector<16x128xf32>
    %798 = arith.mulf %797, %73 : vector<16x128xf32>
    %799 = arith.addf %795, %798 : vector<16x128xf32>
    %800 = vector.extract_strided_slice %748 {offsets = [13, 0], sizes = [1, 128], strides = [1, 1]} : vector<16x128xf32> to vector<1x128xf32>
    %801 = vector.broadcast %800 : vector<1x128xf32> to vector<16x128xf32>
    %802 = arith.mulf %801, %75 : vector<16x128xf32>
    %803 = arith.addf %799, %802 : vector<16x128xf32>
    %804 = vector.extract_strided_slice %748 {offsets = [14, 0], sizes = [1, 128], strides = [1, 1]} : vector<16x128xf32> to vector<1x128xf32>
    %805 = vector.broadcast %804 : vector<1x128xf32> to vector<16x128xf32>
    %806 = arith.mulf %805, %77 : vector<16x128xf32>
    %807 = arith.addf %803, %806 : vector<16x128xf32>
    %808 = vector.extract_strided_slice %748 {offsets = [15, 0], sizes = [1, 128], strides = [1, 1]} : vector<16x128xf32> to vector<1x128xf32>
    %809 = vector.broadcast %808 : vector<1x128xf32> to vector<16x128xf32>
    %810 = arith.mulf %809, %79 : vector<16x128xf32>
    %811 = arith.addf %807, %810 : vector<16x128xf32>
    %812 = vector.extract_strided_slice %408 {offsets = [0, 0], sizes = [1, 128], strides = [1, 1]} : vector<16x128xf32> to vector<1x128xf32>
    %813 = vector.broadcast %812 : vector<1x128xf32> to vector<16x128xf32>
    %814 = arith.mulf %813, %2 : vector<16x128xf32>
    %815 = arith.addf %408, %814 : vector<16x128xf32>
    %816 = vector.extract_strided_slice %408 {offsets = [1, 0], sizes = [1, 128], strides = [1, 1]} : vector<16x128xf32> to vector<1x128xf32>
    %817 = vector.broadcast %816 : vector<1x128xf32> to vector<16x128xf32>
    %818 = arith.mulf %817, %5 : vector<16x128xf32>
    %819 = arith.addf %815, %818 : vector<16x128xf32>
    %820 = vector.extract_strided_slice %408 {offsets = [2, 0], sizes = [1, 128], strides = [1, 1]} : vector<16x128xf32> to vector<1x128xf32>
    %821 = vector.broadcast %820 : vector<1x128xf32> to vector<16x128xf32>
    %822 = arith.mulf %821, %8 : vector<16x128xf32>
    %823 = arith.addf %819, %822 : vector<16x128xf32>
    %824 = vector.extract_strided_slice %408 {offsets = [3, 0], sizes = [1, 128], strides = [1, 1]} : vector<16x128xf32> to vector<1x128xf32>
    %825 = vector.broadcast %824 : vector<1x128xf32> to vector<16x128xf32>
    %826 = arith.mulf %825, %11 : vector<16x128xf32>
    %827 = arith.addf %823, %826 : vector<16x128xf32>
    %828 = vector.extract_strided_slice %408 {offsets = [4, 0], sizes = [1, 128], strides = [1, 1]} : vector<16x128xf32> to vector<1x128xf32>
    %829 = vector.broadcast %828 : vector<1x128xf32> to vector<16x128xf32>
    %830 = arith.mulf %829, %14 : vector<16x128xf32>
    %831 = arith.addf %827, %830 : vector<16x128xf32>
    %832 = vector.extract_strided_slice %408 {offsets = [5, 0], sizes = [1, 128], strides = [1, 1]} : vector<16x128xf32> to vector<1x128xf32>
    %833 = vector.broadcast %832 : vector<1x128xf32> to vector<16x128xf32>
    %834 = arith.mulf %833, %17 : vector<16x128xf32>
    %835 = arith.addf %831, %834 : vector<16x128xf32>
    %836 = vector.extract_strided_slice %408 {offsets = [6, 0], sizes = [1, 128], strides = [1, 1]} : vector<16x128xf32> to vector<1x128xf32>
    %837 = vector.broadcast %836 : vector<1x128xf32> to vector<16x128xf32>
    %838 = arith.mulf %837, %20 : vector<16x128xf32>
    %839 = arith.addf %835, %838 : vector<16x128xf32>
    %840 = vector.extract_strided_slice %408 {offsets = [7, 0], sizes = [1, 128], strides = [1, 1]} : vector<16x128xf32> to vector<1x128xf32>
    %841 = vector.broadcast %840 : vector<1x128xf32> to vector<16x128xf32>
    %842 = arith.mulf %841, %23 : vector<16x128xf32>
    %843 = arith.addf %839, %842 : vector<16x128xf32>
    %844 = vector.extract_strided_slice %408 {offsets = [8, 0], sizes = [1, 128], strides = [1, 1]} : vector<16x128xf32> to vector<1x128xf32>
    %845 = vector.broadcast %844 : vector<1x128xf32> to vector<16x128xf32>
    %846 = arith.mulf %845, %26 : vector<16x128xf32>
    %847 = arith.addf %843, %846 : vector<16x128xf32>
    %848 = vector.extract_strided_slice %408 {offsets = [9, 0], sizes = [1, 128], strides = [1, 1]} : vector<16x128xf32> to vector<1x128xf32>
    %849 = vector.broadcast %848 : vector<1x128xf32> to vector<16x128xf32>
    %850 = arith.mulf %849, %29 : vector<16x128xf32>
    %851 = arith.addf %847, %850 : vector<16x128xf32>
    %852 = vector.extract_strided_slice %408 {offsets = [10, 0], sizes = [1, 128], strides = [1, 1]} : vector<16x128xf32> to vector<1x128xf32>
    %853 = vector.broadcast %852 : vector<1x128xf32> to vector<16x128xf32>
    %854 = arith.mulf %853, %32 : vector<16x128xf32>
    %855 = arith.addf %851, %854 : vector<16x128xf32>
    %856 = vector.extract_strided_slice %408 {offsets = [11, 0], sizes = [1, 128], strides = [1, 1]} : vector<16x128xf32> to vector<1x128xf32>
    %857 = vector.broadcast %856 : vector<1x128xf32> to vector<16x128xf32>
    %858 = arith.mulf %857, %35 : vector<16x128xf32>
    %859 = arith.addf %855, %858 : vector<16x128xf32>
    %860 = vector.extract_strided_slice %408 {offsets = [12, 0], sizes = [1, 128], strides = [1, 1]} : vector<16x128xf32> to vector<1x128xf32>
    %861 = vector.broadcast %860 : vector<1x128xf32> to vector<16x128xf32>
    %862 = arith.mulf %861, %38 : vector<16x128xf32>
    %863 = arith.addf %859, %862 : vector<16x128xf32>
    %864 = vector.extract_strided_slice %408 {offsets = [13, 0], sizes = [1, 128], strides = [1, 1]} : vector<16x128xf32> to vector<1x128xf32>
    %865 = vector.broadcast %864 : vector<1x128xf32> to vector<16x128xf32>
    %866 = arith.mulf %865, %41 : vector<16x128xf32>
    %867 = arith.addf %863, %866 : vector<16x128xf32>
    %868 = vector.extract_strided_slice %408 {offsets = [14, 0], sizes = [1, 128], strides = [1, 1]} : vector<16x128xf32> to vector<1x128xf32>
    %869 = vector.broadcast %868 : vector<1x128xf32> to vector<16x128xf32>
    %870 = arith.mulf %869, %44 : vector<16x128xf32>
    %871 = arith.addf %867, %870 : vector<16x128xf32>
    %872 = vector.extract_strided_slice %408 {offsets = [15, 0], sizes = [1, 128], strides = [1, 1]} : vector<16x128xf32> to vector<1x128xf32>
    %873 = vector.broadcast %872 : vector<1x128xf32> to vector<16x128xf32>
    %874 = arith.mulf %873, %47 : vector<16x128xf32>
    %875 = arith.addf %871, %874 : vector<16x128xf32>
    %876 = arith.mulf %875, %119 : vector<16x128xf32>
    %877 = vector.extract_strided_slice %876 {offsets = [0, 0], sizes = [1, 128], strides = [1, 1]} : vector<16x128xf32> to vector<1x128xf32>
    %878 = vector.broadcast %877 : vector<1x128xf32> to vector<16x128xf32>
    %879 = arith.mulf %878, %49 : vector<16x128xf32>
    %880 = vector.extract_strided_slice %876 {offsets = [1, 0], sizes = [1, 128], strides = [1, 1]} : vector<16x128xf32> to vector<1x128xf32>
    %881 = vector.broadcast %880 : vector<1x128xf32> to vector<16x128xf32>
    %882 = arith.mulf %881, %51 : vector<16x128xf32>
    %883 = arith.addf %879, %882 : vector<16x128xf32>
    %884 = vector.extract_strided_slice %876 {offsets = [2, 0], sizes = [1, 128], strides = [1, 1]} : vector<16x128xf32> to vector<1x128xf32>
    %885 = vector.broadcast %884 : vector<1x128xf32> to vector<16x128xf32>
    %886 = arith.mulf %885, %53 : vector<16x128xf32>
    %887 = arith.addf %883, %886 : vector<16x128xf32>
    %888 = vector.extract_strided_slice %876 {offsets = [3, 0], sizes = [1, 128], strides = [1, 1]} : vector<16x128xf32> to vector<1x128xf32>
    %889 = vector.broadcast %888 : vector<1x128xf32> to vector<16x128xf32>
    %890 = arith.mulf %889, %55 : vector<16x128xf32>
    %891 = arith.addf %887, %890 : vector<16x128xf32>
    %892 = vector.extract_strided_slice %876 {offsets = [4, 0], sizes = [1, 128], strides = [1, 1]} : vector<16x128xf32> to vector<1x128xf32>
    %893 = vector.broadcast %892 : vector<1x128xf32> to vector<16x128xf32>
    %894 = arith.mulf %893, %57 : vector<16x128xf32>
    %895 = arith.addf %891, %894 : vector<16x128xf32>
    %896 = vector.extract_strided_slice %876 {offsets = [5, 0], sizes = [1, 128], strides = [1, 1]} : vector<16x128xf32> to vector<1x128xf32>
    %897 = vector.broadcast %896 : vector<1x128xf32> to vector<16x128xf32>
    %898 = arith.mulf %897, %59 : vector<16x128xf32>
    %899 = arith.addf %895, %898 : vector<16x128xf32>
    %900 = vector.extract_strided_slice %876 {offsets = [6, 0], sizes = [1, 128], strides = [1, 1]} : vector<16x128xf32> to vector<1x128xf32>
    %901 = vector.broadcast %900 : vector<1x128xf32> to vector<16x128xf32>
    %902 = arith.mulf %901, %61 : vector<16x128xf32>
    %903 = arith.addf %899, %902 : vector<16x128xf32>
    %904 = vector.extract_strided_slice %876 {offsets = [7, 0], sizes = [1, 128], strides = [1, 1]} : vector<16x128xf32> to vector<1x128xf32>
    %905 = vector.broadcast %904 : vector<1x128xf32> to vector<16x128xf32>
    %906 = arith.mulf %905, %63 : vector<16x128xf32>
    %907 = arith.addf %903, %906 : vector<16x128xf32>
    %908 = vector.extract_strided_slice %876 {offsets = [8, 0], sizes = [1, 128], strides = [1, 1]} : vector<16x128xf32> to vector<1x128xf32>
    %909 = vector.broadcast %908 : vector<1x128xf32> to vector<16x128xf32>
    %910 = arith.mulf %909, %65 : vector<16x128xf32>
    %911 = arith.addf %907, %910 : vector<16x128xf32>
    %912 = vector.extract_strided_slice %876 {offsets = [9, 0], sizes = [1, 128], strides = [1, 1]} : vector<16x128xf32> to vector<1x128xf32>
    %913 = vector.broadcast %912 : vector<1x128xf32> to vector<16x128xf32>
    %914 = arith.mulf %913, %67 : vector<16x128xf32>
    %915 = arith.addf %911, %914 : vector<16x128xf32>
    %916 = vector.extract_strided_slice %876 {offsets = [10, 0], sizes = [1, 128], strides = [1, 1]} : vector<16x128xf32> to vector<1x128xf32>
    %917 = vector.broadcast %916 : vector<1x128xf32> to vector<16x128xf32>
    %918 = arith.mulf %917, %69 : vector<16x128xf32>
    %919 = arith.addf %915, %918 : vector<16x128xf32>
    %920 = vector.extract_strided_slice %876 {offsets = [11, 0], sizes = [1, 128], strides = [1, 1]} : vector<16x128xf32> to vector<1x128xf32>
    %921 = vector.broadcast %920 : vector<1x128xf32> to vector<16x128xf32>
    %922 = arith.mulf %921, %71 : vector<16x128xf32>
    %923 = arith.addf %919, %922 : vector<16x128xf32>
    %924 = vector.extract_strided_slice %876 {offsets = [12, 0], sizes = [1, 128], strides = [1, 1]} : vector<16x128xf32> to vector<1x128xf32>
    %925 = vector.broadcast %924 : vector<1x128xf32> to vector<16x128xf32>
    %926 = arith.mulf %925, %73 : vector<16x128xf32>
    %927 = arith.addf %923, %926 : vector<16x128xf32>
    %928 = vector.extract_strided_slice %876 {offsets = [13, 0], sizes = [1, 128], strides = [1, 1]} : vector<16x128xf32> to vector<1x128xf32>
    %929 = vector.broadcast %928 : vector<1x128xf32> to vector<16x128xf32>
    %930 = arith.mulf %929, %75 : vector<16x128xf32>
    %931 = arith.addf %927, %930 : vector<16x128xf32>
    %932 = vector.extract_strided_slice %876 {offsets = [14, 0], sizes = [1, 128], strides = [1, 1]} : vector<16x128xf32> to vector<1x128xf32>
    %933 = vector.broadcast %932 : vector<1x128xf32> to vector<16x128xf32>
    %934 = arith.mulf %933, %77 : vector<16x128xf32>
    %935 = arith.addf %931, %934 : vector<16x128xf32>
    %936 = vector.extract_strided_slice %876 {offsets = [15, 0], sizes = [1, 128], strides = [1, 1]} : vector<16x128xf32> to vector<1x128xf32>
    %937 = vector.broadcast %936 : vector<1x128xf32> to vector<16x128xf32>
    %938 = arith.mulf %937, %79 : vector<16x128xf32>
    %939 = arith.addf %935, %938 : vector<16x128xf32>
    %c2_118 = arith.constant 2 : index
    %c0_119 = arith.constant 0 : index
    %c0_120 = arith.constant 0 : index
    %940 = vector.load %arg3[%c2_118, %c0_119, %c0_120] : memref<3x32x16xf32, #tpu.memory_space<vmem>>, vector<1x32x16xf32>
    %941 = vector.shape_cast %940 : vector<1x32x16xf32> to vector<32x16xf32>
    %942 = vector.extract_strided_slice %811 {offsets = [0, 0], sizes = [1, 128], strides = [1, 1]} : vector<16x128xf32> to vector<1x128xf32>
    %943 = vector.extract_strided_slice %941 {offsets = [0, 0], sizes = [32, 1], strides = [1, 1]} : vector<32x16xf32> to vector<32x1xf32>
    %944 = vector.broadcast %942 : vector<1x128xf32> to vector<32x128xf32>
    %945 = vector.broadcast %943 : vector<32x1xf32> to vector<32x128xf32>
    %946 = arith.mulf %944, %945 : vector<32x128xf32>
    %947 = vector.extract_strided_slice %811 {offsets = [1, 0], sizes = [1, 128], strides = [1, 1]} : vector<16x128xf32> to vector<1x128xf32>
    %948 = vector.extract_strided_slice %941 {offsets = [0, 1], sizes = [32, 1], strides = [1, 1]} : vector<32x16xf32> to vector<32x1xf32>
    %949 = vector.broadcast %947 : vector<1x128xf32> to vector<32x128xf32>
    %950 = vector.broadcast %948 : vector<32x1xf32> to vector<32x128xf32>
    %951 = arith.mulf %949, %950 : vector<32x128xf32>
    %952 = arith.addf %946, %951 : vector<32x128xf32>
    %953 = vector.extract_strided_slice %811 {offsets = [2, 0], sizes = [1, 128], strides = [1, 1]} : vector<16x128xf32> to vector<1x128xf32>
    %954 = vector.extract_strided_slice %941 {offsets = [0, 2], sizes = [32, 1], strides = [1, 1]} : vector<32x16xf32> to vector<32x1xf32>
    %955 = vector.broadcast %953 : vector<1x128xf32> to vector<32x128xf32>
    %956 = vector.broadcast %954 : vector<32x1xf32> to vector<32x128xf32>
    %957 = arith.mulf %955, %956 : vector<32x128xf32>
    %958 = arith.addf %952, %957 : vector<32x128xf32>
    %959 = vector.extract_strided_slice %811 {offsets = [3, 0], sizes = [1, 128], strides = [1, 1]} : vector<16x128xf32> to vector<1x128xf32>
    %960 = vector.extract_strided_slice %941 {offsets = [0, 3], sizes = [32, 1], strides = [1, 1]} : vector<32x16xf32> to vector<32x1xf32>
    %961 = vector.broadcast %959 : vector<1x128xf32> to vector<32x128xf32>
    %962 = vector.broadcast %960 : vector<32x1xf32> to vector<32x128xf32>
    %963 = arith.mulf %961, %962 : vector<32x128xf32>
    %964 = arith.addf %958, %963 : vector<32x128xf32>
    %965 = vector.extract_strided_slice %811 {offsets = [4, 0], sizes = [1, 128], strides = [1, 1]} : vector<16x128xf32> to vector<1x128xf32>
    %966 = vector.extract_strided_slice %941 {offsets = [0, 4], sizes = [32, 1], strides = [1, 1]} : vector<32x16xf32> to vector<32x1xf32>
    %967 = vector.broadcast %965 : vector<1x128xf32> to vector<32x128xf32>
    %968 = vector.broadcast %966 : vector<32x1xf32> to vector<32x128xf32>
    %969 = arith.mulf %967, %968 : vector<32x128xf32>
    %970 = arith.addf %964, %969 : vector<32x128xf32>
    %971 = vector.extract_strided_slice %811 {offsets = [5, 0], sizes = [1, 128], strides = [1, 1]} : vector<16x128xf32> to vector<1x128xf32>
    %972 = vector.extract_strided_slice %941 {offsets = [0, 5], sizes = [32, 1], strides = [1, 1]} : vector<32x16xf32> to vector<32x1xf32>
    %973 = vector.broadcast %971 : vector<1x128xf32> to vector<32x128xf32>
    %974 = vector.broadcast %972 : vector<32x1xf32> to vector<32x128xf32>
    %975 = arith.mulf %973, %974 : vector<32x128xf32>
    %976 = arith.addf %970, %975 : vector<32x128xf32>
    %977 = vector.extract_strided_slice %811 {offsets = [6, 0], sizes = [1, 128], strides = [1, 1]} : vector<16x128xf32> to vector<1x128xf32>
    %978 = vector.extract_strided_slice %941 {offsets = [0, 6], sizes = [32, 1], strides = [1, 1]} : vector<32x16xf32> to vector<32x1xf32>
    %979 = vector.broadcast %977 : vector<1x128xf32> to vector<32x128xf32>
    %980 = vector.broadcast %978 : vector<32x1xf32> to vector<32x128xf32>
    %981 = arith.mulf %979, %980 : vector<32x128xf32>
    %982 = arith.addf %976, %981 : vector<32x128xf32>
    %983 = vector.extract_strided_slice %811 {offsets = [7, 0], sizes = [1, 128], strides = [1, 1]} : vector<16x128xf32> to vector<1x128xf32>
    %984 = vector.extract_strided_slice %941 {offsets = [0, 7], sizes = [32, 1], strides = [1, 1]} : vector<32x16xf32> to vector<32x1xf32>
    %985 = vector.broadcast %983 : vector<1x128xf32> to vector<32x128xf32>
    %986 = vector.broadcast %984 : vector<32x1xf32> to vector<32x128xf32>
    %987 = arith.mulf %985, %986 : vector<32x128xf32>
    %988 = arith.addf %982, %987 : vector<32x128xf32>
    %989 = vector.extract_strided_slice %811 {offsets = [8, 0], sizes = [1, 128], strides = [1, 1]} : vector<16x128xf32> to vector<1x128xf32>
    %990 = vector.extract_strided_slice %941 {offsets = [0, 8], sizes = [32, 1], strides = [1, 1]} : vector<32x16xf32> to vector<32x1xf32>
    %991 = vector.broadcast %989 : vector<1x128xf32> to vector<32x128xf32>
    %992 = vector.broadcast %990 : vector<32x1xf32> to vector<32x128xf32>
    %993 = arith.mulf %991, %992 : vector<32x128xf32>
    %994 = arith.addf %988, %993 : vector<32x128xf32>
    %995 = vector.extract_strided_slice %811 {offsets = [9, 0], sizes = [1, 128], strides = [1, 1]} : vector<16x128xf32> to vector<1x128xf32>
    %996 = vector.extract_strided_slice %941 {offsets = [0, 9], sizes = [32, 1], strides = [1, 1]} : vector<32x16xf32> to vector<32x1xf32>
    %997 = vector.broadcast %995 : vector<1x128xf32> to vector<32x128xf32>
    %998 = vector.broadcast %996 : vector<32x1xf32> to vector<32x128xf32>
    %999 = arith.mulf %997, %998 : vector<32x128xf32>
    %1000 = arith.addf %994, %999 : vector<32x128xf32>
    %1001 = vector.extract_strided_slice %811 {offsets = [10, 0], sizes = [1, 128], strides = [1, 1]} : vector<16x128xf32> to vector<1x128xf32>
    %1002 = vector.extract_strided_slice %941 {offsets = [0, 10], sizes = [32, 1], strides = [1, 1]} : vector<32x16xf32> to vector<32x1xf32>
    %1003 = vector.broadcast %1001 : vector<1x128xf32> to vector<32x128xf32>
    %1004 = vector.broadcast %1002 : vector<32x1xf32> to vector<32x128xf32>
    %1005 = arith.mulf %1003, %1004 : vector<32x128xf32>
    %1006 = arith.addf %1000, %1005 : vector<32x128xf32>
    %1007 = vector.extract_strided_slice %811 {offsets = [11, 0], sizes = [1, 128], strides = [1, 1]} : vector<16x128xf32> to vector<1x128xf32>
    %1008 = vector.extract_strided_slice %941 {offsets = [0, 11], sizes = [32, 1], strides = [1, 1]} : vector<32x16xf32> to vector<32x1xf32>
    %1009 = vector.broadcast %1007 : vector<1x128xf32> to vector<32x128xf32>
    %1010 = vector.broadcast %1008 : vector<32x1xf32> to vector<32x128xf32>
    %1011 = arith.mulf %1009, %1010 : vector<32x128xf32>
    %1012 = arith.addf %1006, %1011 : vector<32x128xf32>
    %1013 = vector.extract_strided_slice %811 {offsets = [12, 0], sizes = [1, 128], strides = [1, 1]} : vector<16x128xf32> to vector<1x128xf32>
    %1014 = vector.extract_strided_slice %941 {offsets = [0, 12], sizes = [32, 1], strides = [1, 1]} : vector<32x16xf32> to vector<32x1xf32>
    %1015 = vector.broadcast %1013 : vector<1x128xf32> to vector<32x128xf32>
    %1016 = vector.broadcast %1014 : vector<32x1xf32> to vector<32x128xf32>
    %1017 = arith.mulf %1015, %1016 : vector<32x128xf32>
    %1018 = arith.addf %1012, %1017 : vector<32x128xf32>
    %1019 = vector.extract_strided_slice %811 {offsets = [13, 0], sizes = [1, 128], strides = [1, 1]} : vector<16x128xf32> to vector<1x128xf32>
    %1020 = vector.extract_strided_slice %941 {offsets = [0, 13], sizes = [32, 1], strides = [1, 1]} : vector<32x16xf32> to vector<32x1xf32>
    %1021 = vector.broadcast %1019 : vector<1x128xf32> to vector<32x128xf32>
    %1022 = vector.broadcast %1020 : vector<32x1xf32> to vector<32x128xf32>
    %1023 = arith.mulf %1021, %1022 : vector<32x128xf32>
    %1024 = arith.addf %1018, %1023 : vector<32x128xf32>
    %1025 = vector.extract_strided_slice %811 {offsets = [14, 0], sizes = [1, 128], strides = [1, 1]} : vector<16x128xf32> to vector<1x128xf32>
    %1026 = vector.extract_strided_slice %941 {offsets = [0, 14], sizes = [32, 1], strides = [1, 1]} : vector<32x16xf32> to vector<32x1xf32>
    %1027 = vector.broadcast %1025 : vector<1x128xf32> to vector<32x128xf32>
    %1028 = vector.broadcast %1026 : vector<32x1xf32> to vector<32x128xf32>
    %1029 = arith.mulf %1027, %1028 : vector<32x128xf32>
    %1030 = arith.addf %1024, %1029 : vector<32x128xf32>
    %1031 = vector.extract_strided_slice %811 {offsets = [15, 0], sizes = [1, 128], strides = [1, 1]} : vector<16x128xf32> to vector<1x128xf32>
    %1032 = vector.extract_strided_slice %941 {offsets = [0, 15], sizes = [32, 1], strides = [1, 1]} : vector<32x16xf32> to vector<32x1xf32>
    %1033 = vector.broadcast %1031 : vector<1x128xf32> to vector<32x128xf32>
    %1034 = vector.broadcast %1032 : vector<32x1xf32> to vector<32x128xf32>
    %1035 = arith.mulf %1033, %1034 : vector<32x128xf32>
    %1036 = arith.addf %1030, %1035 : vector<32x128xf32>
    %cst_121 = arith.constant 0.000000e+00 : f32
    %1037 = vector.broadcast %cst_121 : f32 to vector<32x128xf32>
    %1038 = arith.cmpf ogt, %1036, %1037 : vector<32x128xf32>
    %cst_122 = arith.constant 0.000000e+00 : f32
    %1039 = vector.broadcast %cst_122 : f32 to vector<32x128xf32>
    %1040 = arith.minimumf %1036, %1039 : vector<32x128xf32>
    %1041 = math.exp %1040 : vector<32x128xf32>
    %cst_123 = arith.constant 1.000000e+00 : f32
    %1042 = vector.broadcast %cst_123 : f32 to vector<32x128xf32>
    %1043 = arith.subf %1041, %1042 : vector<32x128xf32>
    %1044 = arith.select %1038, %1036, %1043 : vector<32x128xi1>, vector<32x128xf32>
    %1045 = vector.extract_strided_slice %939 {offsets = [0, 0], sizes = [1, 128], strides = [1, 1]} : vector<16x128xf32> to vector<1x128xf32>
    %1046 = vector.extract_strided_slice %941 {offsets = [0, 0], sizes = [32, 1], strides = [1, 1]} : vector<32x16xf32> to vector<32x1xf32>
    %1047 = vector.broadcast %1045 : vector<1x128xf32> to vector<32x128xf32>
    %1048 = vector.broadcast %1046 : vector<32x1xf32> to vector<32x128xf32>
    %1049 = arith.mulf %1047, %1048 : vector<32x128xf32>
    %1050 = vector.extract_strided_slice %939 {offsets = [1, 0], sizes = [1, 128], strides = [1, 1]} : vector<16x128xf32> to vector<1x128xf32>
    %1051 = vector.extract_strided_slice %941 {offsets = [0, 1], sizes = [32, 1], strides = [1, 1]} : vector<32x16xf32> to vector<32x1xf32>
    %1052 = vector.broadcast %1050 : vector<1x128xf32> to vector<32x128xf32>
    %1053 = vector.broadcast %1051 : vector<32x1xf32> to vector<32x128xf32>
    %1054 = arith.mulf %1052, %1053 : vector<32x128xf32>
    %1055 = arith.addf %1049, %1054 : vector<32x128xf32>
    %1056 = vector.extract_strided_slice %939 {offsets = [2, 0], sizes = [1, 128], strides = [1, 1]} : vector<16x128xf32> to vector<1x128xf32>
    %1057 = vector.extract_strided_slice %941 {offsets = [0, 2], sizes = [32, 1], strides = [1, 1]} : vector<32x16xf32> to vector<32x1xf32>
    %1058 = vector.broadcast %1056 : vector<1x128xf32> to vector<32x128xf32>
    %1059 = vector.broadcast %1057 : vector<32x1xf32> to vector<32x128xf32>
    %1060 = arith.mulf %1058, %1059 : vector<32x128xf32>
    %1061 = arith.addf %1055, %1060 : vector<32x128xf32>
    %1062 = vector.extract_strided_slice %939 {offsets = [3, 0], sizes = [1, 128], strides = [1, 1]} : vector<16x128xf32> to vector<1x128xf32>
    %1063 = vector.extract_strided_slice %941 {offsets = [0, 3], sizes = [32, 1], strides = [1, 1]} : vector<32x16xf32> to vector<32x1xf32>
    %1064 = vector.broadcast %1062 : vector<1x128xf32> to vector<32x128xf32>
    %1065 = vector.broadcast %1063 : vector<32x1xf32> to vector<32x128xf32>
    %1066 = arith.mulf %1064, %1065 : vector<32x128xf32>
    %1067 = arith.addf %1061, %1066 : vector<32x128xf32>
    %1068 = vector.extract_strided_slice %939 {offsets = [4, 0], sizes = [1, 128], strides = [1, 1]} : vector<16x128xf32> to vector<1x128xf32>
    %1069 = vector.extract_strided_slice %941 {offsets = [0, 4], sizes = [32, 1], strides = [1, 1]} : vector<32x16xf32> to vector<32x1xf32>
    %1070 = vector.broadcast %1068 : vector<1x128xf32> to vector<32x128xf32>
    %1071 = vector.broadcast %1069 : vector<32x1xf32> to vector<32x128xf32>
    %1072 = arith.mulf %1070, %1071 : vector<32x128xf32>
    %1073 = arith.addf %1067, %1072 : vector<32x128xf32>
    %1074 = vector.extract_strided_slice %939 {offsets = [5, 0], sizes = [1, 128], strides = [1, 1]} : vector<16x128xf32> to vector<1x128xf32>
    %1075 = vector.extract_strided_slice %941 {offsets = [0, 5], sizes = [32, 1], strides = [1, 1]} : vector<32x16xf32> to vector<32x1xf32>
    %1076 = vector.broadcast %1074 : vector<1x128xf32> to vector<32x128xf32>
    %1077 = vector.broadcast %1075 : vector<32x1xf32> to vector<32x128xf32>
    %1078 = arith.mulf %1076, %1077 : vector<32x128xf32>
    %1079 = arith.addf %1073, %1078 : vector<32x128xf32>
    %1080 = vector.extract_strided_slice %939 {offsets = [6, 0], sizes = [1, 128], strides = [1, 1]} : vector<16x128xf32> to vector<1x128xf32>
    %1081 = vector.extract_strided_slice %941 {offsets = [0, 6], sizes = [32, 1], strides = [1, 1]} : vector<32x16xf32> to vector<32x1xf32>
    %1082 = vector.broadcast %1080 : vector<1x128xf32> to vector<32x128xf32>
    %1083 = vector.broadcast %1081 : vector<32x1xf32> to vector<32x128xf32>
    %1084 = arith.mulf %1082, %1083 : vector<32x128xf32>
    %1085 = arith.addf %1079, %1084 : vector<32x128xf32>
    %1086 = vector.extract_strided_slice %939 {offsets = [7, 0], sizes = [1, 128], strides = [1, 1]} : vector<16x128xf32> to vector<1x128xf32>
    %1087 = vector.extract_strided_slice %941 {offsets = [0, 7], sizes = [32, 1], strides = [1, 1]} : vector<32x16xf32> to vector<32x1xf32>
    %1088 = vector.broadcast %1086 : vector<1x128xf32> to vector<32x128xf32>
    %1089 = vector.broadcast %1087 : vector<32x1xf32> to vector<32x128xf32>
    %1090 = arith.mulf %1088, %1089 : vector<32x128xf32>
    %1091 = arith.addf %1085, %1090 : vector<32x128xf32>
    %1092 = vector.extract_strided_slice %939 {offsets = [8, 0], sizes = [1, 128], strides = [1, 1]} : vector<16x128xf32> to vector<1x128xf32>
    %1093 = vector.extract_strided_slice %941 {offsets = [0, 8], sizes = [32, 1], strides = [1, 1]} : vector<32x16xf32> to vector<32x1xf32>
    %1094 = vector.broadcast %1092 : vector<1x128xf32> to vector<32x128xf32>
    %1095 = vector.broadcast %1093 : vector<32x1xf32> to vector<32x128xf32>
    %1096 = arith.mulf %1094, %1095 : vector<32x128xf32>
    %1097 = arith.addf %1091, %1096 : vector<32x128xf32>
    %1098 = vector.extract_strided_slice %939 {offsets = [9, 0], sizes = [1, 128], strides = [1, 1]} : vector<16x128xf32> to vector<1x128xf32>
    %1099 = vector.extract_strided_slice %941 {offsets = [0, 9], sizes = [32, 1], strides = [1, 1]} : vector<32x16xf32> to vector<32x1xf32>
    %1100 = vector.broadcast %1098 : vector<1x128xf32> to vector<32x128xf32>
    %1101 = vector.broadcast %1099 : vector<32x1xf32> to vector<32x128xf32>
    %1102 = arith.mulf %1100, %1101 : vector<32x128xf32>
    %1103 = arith.addf %1097, %1102 : vector<32x128xf32>
    %1104 = vector.extract_strided_slice %939 {offsets = [10, 0], sizes = [1, 128], strides = [1, 1]} : vector<16x128xf32> to vector<1x128xf32>
    %1105 = vector.extract_strided_slice %941 {offsets = [0, 10], sizes = [32, 1], strides = [1, 1]} : vector<32x16xf32> to vector<32x1xf32>
    %1106 = vector.broadcast %1104 : vector<1x128xf32> to vector<32x128xf32>
    %1107 = vector.broadcast %1105 : vector<32x1xf32> to vector<32x128xf32>
    %1108 = arith.mulf %1106, %1107 : vector<32x128xf32>
    %1109 = arith.addf %1103, %1108 : vector<32x128xf32>
    %1110 = vector.extract_strided_slice %939 {offsets = [11, 0], sizes = [1, 128], strides = [1, 1]} : vector<16x128xf32> to vector<1x128xf32>
    %1111 = vector.extract_strided_slice %941 {offsets = [0, 11], sizes = [32, 1], strides = [1, 1]} : vector<32x16xf32> to vector<32x1xf32>
    %1112 = vector.broadcast %1110 : vector<1x128xf32> to vector<32x128xf32>
    %1113 = vector.broadcast %1111 : vector<32x1xf32> to vector<32x128xf32>
    %1114 = arith.mulf %1112, %1113 : vector<32x128xf32>
    %1115 = arith.addf %1109, %1114 : vector<32x128xf32>
    %1116 = vector.extract_strided_slice %939 {offsets = [12, 0], sizes = [1, 128], strides = [1, 1]} : vector<16x128xf32> to vector<1x128xf32>
    %1117 = vector.extract_strided_slice %941 {offsets = [0, 12], sizes = [32, 1], strides = [1, 1]} : vector<32x16xf32> to vector<32x1xf32>
    %1118 = vector.broadcast %1116 : vector<1x128xf32> to vector<32x128xf32>
    %1119 = vector.broadcast %1117 : vector<32x1xf32> to vector<32x128xf32>
    %1120 = arith.mulf %1118, %1119 : vector<32x128xf32>
    %1121 = arith.addf %1115, %1120 : vector<32x128xf32>
    %1122 = vector.extract_strided_slice %939 {offsets = [13, 0], sizes = [1, 128], strides = [1, 1]} : vector<16x128xf32> to vector<1x128xf32>
    %1123 = vector.extract_strided_slice %941 {offsets = [0, 13], sizes = [32, 1], strides = [1, 1]} : vector<32x16xf32> to vector<32x1xf32>
    %1124 = vector.broadcast %1122 : vector<1x128xf32> to vector<32x128xf32>
    %1125 = vector.broadcast %1123 : vector<32x1xf32> to vector<32x128xf32>
    %1126 = arith.mulf %1124, %1125 : vector<32x128xf32>
    %1127 = arith.addf %1121, %1126 : vector<32x128xf32>
    %1128 = vector.extract_strided_slice %939 {offsets = [14, 0], sizes = [1, 128], strides = [1, 1]} : vector<16x128xf32> to vector<1x128xf32>
    %1129 = vector.extract_strided_slice %941 {offsets = [0, 14], sizes = [32, 1], strides = [1, 1]} : vector<32x16xf32> to vector<32x1xf32>
    %1130 = vector.broadcast %1128 : vector<1x128xf32> to vector<32x128xf32>
    %1131 = vector.broadcast %1129 : vector<32x1xf32> to vector<32x128xf32>
    %1132 = arith.mulf %1130, %1131 : vector<32x128xf32>
    %1133 = arith.addf %1127, %1132 : vector<32x128xf32>
    %1134 = vector.extract_strided_slice %939 {offsets = [15, 0], sizes = [1, 128], strides = [1, 1]} : vector<16x128xf32> to vector<1x128xf32>
    %1135 = vector.extract_strided_slice %941 {offsets = [0, 15], sizes = [32, 1], strides = [1, 1]} : vector<32x16xf32> to vector<32x1xf32>
    %1136 = vector.broadcast %1134 : vector<1x128xf32> to vector<32x128xf32>
    %1137 = vector.broadcast %1135 : vector<32x1xf32> to vector<32x128xf32>
    %1138 = arith.mulf %1136, %1137 : vector<32x128xf32>
    %1139 = arith.addf %1133, %1138 : vector<32x128xf32>
    %cst_124 = arith.constant 0.000000e+00 : f32
    %1140 = vector.broadcast %cst_124 : f32 to vector<32x128xf32>
    %1141 = arith.cmpf ogt, %1139, %1140 : vector<32x128xf32>
    %cst_125 = arith.constant 0.000000e+00 : f32
    %1142 = vector.broadcast %cst_125 : f32 to vector<32x128xf32>
    %1143 = arith.minimumf %1139, %1142 : vector<32x128xf32>
    %1144 = math.exp %1143 : vector<32x128xf32>
    %cst_126 = arith.constant 1.000000e+00 : f32
    %1145 = vector.broadcast %cst_126 : f32 to vector<32x128xf32>
    %1146 = arith.subf %1144, %1145 : vector<32x128xf32>
    %1147 = arith.select %1141, %1139, %1146 : vector<32x128xi1>, vector<32x128xf32>
    %1148 = arith.mulf %1044, %1147 : vector<32x128xf32>
    %cst_127 = arith.constant dense<0.000000e+00> : vector<128xf32>
    %1149 = vector.multi_reduction <add>, %1148, %cst_127 [0] : vector<32x128xf32> to vector<128xf32>
    %1150 = vector.shape_cast %1149 : vector<128xf32> to vector<1x128xf32>
    %1151 = arith.addf %683, %1150 : vector<1x128xf32>
    %c0_128 = arith.constant 0 : index
    %c0_129 = arith.constant 0 : index
    %1152 = vector.load %arg4[%c0_128, %c0_129] : memref<1x128xf32, #tpu.memory_space<vmem>>, vector<1x128xf32>
    %c0_130 = arith.constant 0 : index
    %c0_131 = arith.constant 0 : index
    %1153 = vector.load %arg5[%c0_130, %c0_131] : memref<1x128xf32, #tpu.memory_space<vmem>>, vector<1x128xf32>
    %cst_132 = arith.constant 0.000000e+00 : f32
    %1154 = vector.broadcast %cst_132 : f32 to vector<1x128xf32>
    %1155 = arith.maximumf %1151, %1154 : vector<1x128xf32>
    %1156 = arith.mulf %1151, %1152 : vector<1x128xf32>
    %1157 = arith.subf %1155, %1156 : vector<1x128xf32>
    %1158 = math.absf %1151 : vector<1x128xf32>
    %cst_133 = arith.constant 0.000000e+00 : f32
    %1159 = vector.broadcast %cst_133 : f32 to vector<1x128xf32>
    %1160 = arith.subf %1159, %1158 : vector<1x128xf32>
    %1161 = math.exp %1160 : vector<1x128xf32>
    %cst_134 = arith.constant 1.000000e+00 : f32
    %1162 = vector.broadcast %cst_134 : f32 to vector<1x128xf32>
    %1163 = arith.addf %1162, %1161 : vector<1x128xf32>
    %1164 = math.log %1163 : vector<1x128xf32>
    %1165 = arith.addf %1157, %1164 : vector<1x128xf32>
    %c0_135 = arith.constant 0 : index
    %c0_136 = arith.constant 0 : index
    %1166 = vector.load %arg6[%c0_135, %c0_136] : memref<1x128xf32, #tpu.memory_space<vmem>>, vector<1x128xf32>
    tpu.vector_store %arg6[%c0_135, %c0_136], %1151 {strides = array<i32>} : memref<1x128xf32, #tpu.memory_space<vmem>>, vector<1x128xf32>,
    %1167 = arith.mulf %1165, %1153 : vector<1x128xf32>
    %c0_137 = arith.constant 0 : index
    %c0_138 = arith.constant 0 : index
    %1168 = vector.load %arg7[%c0_137, %c0_138] : memref<1x128xf32, #tpu.memory_space<vmem>>, vector<1x128xf32>
    tpu.vector_store %arg7[%c0_137, %c0_138], %1167 {strides = array<i32>} : memref<1x128xf32, #tpu.memory_space<vmem>>, vector<1x128xf32>,
    return
  }
  func.func @transform_0(%arg0: i32) -> (i32, i32, i32) {
    %c0_i32 = arith.constant 0 : i32
    %c0_i32_0 = arith.constant 0 : i32
    %c0_i32_1 = arith.constant 0 : i32
    return %c0_i32, %c0_i32_0, %arg0 : i32, i32, i32
  }
  func.func @transform_1(%arg0: i32) -> (i32, i32, i32) {
    %c0_i32 = arith.constant 0 : i32
    %c0_i32_0 = arith.constant 0 : i32
    %c0_i32_1 = arith.constant 0 : i32
    return %c0_i32, %c0_i32_0, %arg0 : i32, i32, i32
  }
  func.func @transform_2(%arg0: i32) -> (i32, i32, i32) {
    %c0_i32 = arith.constant 0 : i32
    %c0_i32_0 = arith.constant 0 : i32
    %c0_i32_1 = arith.constant 0 : i32
    %c0_i32_2 = arith.constant 0 : i32
    return %c0_i32, %c0_i32_0, %c0_i32_1 : i32, i32, i32
  }
  func.func @transform_3(%arg0: i32) -> (i32, i32) {
    %c0_i32 = arith.constant 0 : i32
    %c0_i32_0 = arith.constant 0 : i32
    return %c0_i32, %arg0 : i32, i32
  }
  func.func @transform_4(%arg0: i32) -> (i32, i32) {
    %c0_i32 = arith.constant 0 : i32
    %c0_i32_0 = arith.constant 0 : i32
    return %c0_i32, %arg0 : i32, i32
  }
  func.func @transform_5(%arg0: i32) -> (i32, i32) {
    %c0_i32 = arith.constant 0 : i32
    %c0_i32_0 = arith.constant 0 : i32
    return %c0_i32, %arg0 : i32, i32
  }
  func.func @transform_6(%arg0: i32) -> (i32, i32) {
    %c0_i32 = arith.constant 0 : i32
    %c0_i32_0 = arith.constant 0 : i32
    return %c0_i32, %arg0 : i32, i32
  }
}

</mosaic_0001>

<bundles_post_ra>
// kernel: tpu_custom_call.1
= control target key start
LH: loop header
LB: loop body
LE: loop exit
PB: predicated region body
PF: predicated region fallthrough
CT: control target
= control target key end

     0   :  { %12 = vsyncpa [#allocation3], 0  ;;  %s6400_s0 = inlined_call_operand.vmem [shape: bf16[16,16,128], index: 0, kind: input, shape index: {}]   ;;  %s6401_s1 = inlined_call_operand.hbm [shape: f32[16,16,128], index: 1, kind: input, shape index: {}]   ;;  %s6402_s2 = inlined_call_operand.vmem [shape: f32[3,32,16], index: 2, kind: input, shape index: {}]   ;;  %s6403_s3 = inlined_call_operand.vmem [shape: f32[1,128], index: 3, kind: input, shape index: {}]   ;;  %s6404_s4 = inlined_call_operand.vmem [shape: f32[1,128], index: 4, kind: input, shape index: {}]   ;;  %s6405_s5 = inlined_call_operand.hbm [shape: f32[1,128], index: 5, kind: output, shape index: {0}]   ;;  %s6406_s6 = inlined_call_operand.hbm [shape: f32[1,128], index: 6, kind: output, shape index: {1}]  }
   0x1   :  { %13 = vsyncpa [#allocation4], 0 }
   0x2   :  { %14 = vsyncpa [#allocation7], 0  ;;  %s3508_s21 = smov [#allocation2]  }
   0x3   :  { %s22_s22 = sshll.u32 %s3508_s21, 4  ;;  %s23_s22 = int_to_ptr.vmem [resolvable:$true] %s22_s22 }
   0x4   :  { %s3450_s23 = scalar_lea.vmem %s23_s22, 4096  ;;  %p3455_p1 = scmp.lt.s32.totalorder %s23_s22, %s23_s22 }
   0x5   :  { %p3451_p0 = scmp.ne.s32.totalorder %s23_s22, %s3450_s23  ;;  %p3456_p2 = scmp.lt.s32.totalorder %s3450_s23, %s3450_s23 }
   0x7   :  { %p3457_p3 = por %p3456_p2, %p3455_p1 }
   0x9   :  { %p3458_p4 = pnand %p3457_p3, %p3451_p0 }
   0xb   :  { %3461 = shalt.err (!%p3458_p4)
}
   0xc   :  { %s3509_s24 = smov 128   ;;  %s3510_s25 = smov 8  }
   0xd   :  { %28 = dma.hbm_to_vmem [thread:$0]  %s6401_s1, 4096, %s23_s22, [#allocation3], %s3509_s24, %s3509_s24, %s3510_s25  }
   0xe   :  { %3502 = dma.done.wait [#allocation3], 4096  }
   0xf   :  { %3503 = vsyncadd [#allocation3], 4294963200  ;;  %v6409_v0 = vmov 0   ;;  %v3573_v1 = vld [vmem:[%s6402_s2 + $0x10] sm:$0xff]  ;;  %v3578_v2 = vld [vmem:[%s6402_s2] sm:$0xff]  ;;  %v6407_v6 = vmov 1  }
  0x10   :  { %3285 = vset.pattern.permute.xlu1 %v6409_v0  ;;  %3284 = vset.pattern.permute.xlu0 %v6409_v0  ;;  %v3585_v3 = vld [vmem:[%s6402_s2 + $0x18] sm:$0xff]  ;;  %v3590_v4 = vld [vmem:[%s6402_s2 + $0x8] sm:$0xff]  ;;  %v3184_v8 = vld [vmem:[%s6400_s0] sm:$0xff]   ;;  %v6413_v30 = vmov 2   ;;  %vm276_vm0 = vcmask 1040384   ;;  %vm278_vm1 = vcmask 1041408  }
  0x11   :  { %330 = vperm.xlu1 %3285, %v3573_v1   ;;  %320 = vperm.xlu0 %3284, %v3578_v2   ;;  %v3597_v5 = vld [vmem:[%s6402_s2 + $0x28] sm:$0xff]  ;;  %v3248_v10 = vld [vmem:[%s6400_s0 + $0x10] sm:$0xff]   ;;  %v3249_v11 = vld [vmem:[%s6400_s0 + $0x18] sm:$0xff]   ;;  %v3627_v14 = vunpack.c.l.bf16 %v3184_v8  ;;  %v3629_v15 = vunpack.c.h.bf16 %v3184_v8  ;;  %vm280_vm2 = vcmask 1042432   ;;  %vm282_vm3 = vcmask 1043456  }
  0x12   :  { %v3605_v7 = vld [vmem:[%s6402_s2 + $0x48] sm:$0xff]  ;;  %v3250_v12 = vld [vmem:[%s6400_s0 + $0x20] sm:$0xff]   ;;  %v3252_v18 = vld [vmem:[%s6400_s0 + $0x30] sm:$0xff]   ;;  %v3641_v20 = vunpack.c.l.bf16 %v3248_v10  ;;  %v3643_v21 = vunpack.c.h.bf16 %v3248_v10  ;;  %v3645_v22 = vunpack.c.l.bf16 %v3249_v11  ;;  %v3647_v23 = vunpack.c.h.bf16 %v3249_v11 }
  0x13   :  { %v3247_v9 = vld [vmem:[%s6400_s0 + $0x8] sm:$0xff]   ;;  %v3253_v19 = vld [vmem:[%s6400_s0 + $0x38] sm:$0xff]   ;;  %v3254_v24 = vld [vmem:[%s6400_s0 + $0x40] sm:$0xff]   ;;  %v3653_v25 = vunpack.c.l.bf16 %v3250_v12  ;;  %v3655_v26 = vunpack.c.h.bf16 %v3250_v12  ;;  %v3666_v31 = vunpack.c.l.bf16 %v3252_v18  ;;  %v3668_v32 = vunpack.c.h.bf16 %v3252_v18 }
  0x14   :  { %v3251_v13 = vld [vmem:[%s6400_s0 + $0x28] sm:$0xff]   ;;  %v3631_v16 = vunpack.c.l.bf16 %v3247_v9  ;;  %v3633_v17 = vunpack.c.h.bf16 %v3247_v9  ;;  %v3670_v33 = vunpack.c.l.bf16 %v3253_v19  ;;  %v3672_v34 = vunpack.c.h.bf16 %v3253_v19  ;;  %v3704_v49 = vld [vmem:[%s6402_s2 + $0x20] sm:$0xff]  ;;  %v3256_v54 = vld [vmem:[%s6400_s0 + $0x50] sm:$0xff]  }
  0x15   :  { %335 = vperm.xlu1 %3285, %v3585_v3   ;;  %325 = vperm.xlu0 %3284, %v3590_v4   ;;  %v3657_v27 = vunpack.c.l.bf16 %v3251_v13  ;;  %v3659_v28 = vunpack.c.h.bf16 %v3251_v13  ;;  %v3255_v29 = vld [vmem:[%s6400_s0 + $0x48] sm:$0xff]   ;;  %6806 = vst [vmem:[#allocation12_spill] sm:$0xff] %v3666_v31  ;;  %6807 = vst [vmem:[#allocation13_spill] sm:$0xff] %v3668_v32  ;;  %v3675_v35 = vunpack.c.l.bf16 %v3254_v24  ;;  %v3677_v36 = vunpack.c.h.bf16 %v3254_v24  ;;  %v3257_v59 = vld [vmem:[%s6400_s0 + $0x58] sm:$0xff]  }
  0x16   :  { %6808 = vst [vmem:[#allocation14_spill] sm:$0xff] %v3670_v33  ;;  %6809 = vst [vmem:[#allocation15_spill] sm:$0xff] %v3672_v34  ;;  %v3679_v37 = vunpack.c.l.bf16 %v3255_v29  ;;  %v3681_v38 = vunpack.c.h.bf16 %v3255_v29  ;;  %v164_v39 = vadd.f32 %v3629_v15, %v3627_v14  ;;  %v171_v40 = vadd.f32 %v3633_v17, %v3631_v16  ;;  %v3717_v12 = vld [vmem:[%s6402_s2 + $0x38] sm:$0xff]  ;;  %v3258_v19 = vld [vmem:[%s6400_s0 + $0x60] sm:$0xff]  }
  0x17   :  { %6805 = vst [vmem:[#allocation11_spill] sm:$0xff] %v3657_v27  ;;  %6810 = vst [vmem:[#allocation16_spill] sm:$0xff] %v3675_v35  ;;  %v178_v41 = vadd.f32 %v3643_v21, %v3641_v20  ;;  %v185_v42 = vadd.f32 %v3647_v23, %v3645_v22  ;;  %v192_v43 = vadd.f32 %v3655_v26, %v3653_v25  ;;  %v3719_v13 = vunpack.c.l.bf16 %v3256_v54 }
  0x18   :  { %6811 = vst [vmem:[#allocation17_spill] sm:$0xff] %v3677_v36  ;;  %6812 = vst [vmem:[#allocation18_spill] sm:$0xff] %v3679_v37  ;;  %v199_v44 = vadd.f32 %v3659_v28, %v3657_v27  ;;  %v165_v45 = vrot.slane %v164_v39, 4  ;;  %v172_v46 = vrot.slane %v171_v40, 4  ;;  %v206_v47 = vadd.f32 %v3668_v32, %v3666_v31 }
  0x19   :  { %3286 = vset.pattern.permute.xlu1 %v6407_v6  ;;  %1300 = vperm.xlu0 %3284, %v3597_v5   ;;  %6813 = vst [vmem:[#allocation19_spill] sm:$0xff] %v3681_v38  ;;  %v213_v48 = vadd.f32 %v3672_v34, %v3670_v33  ;;  %v179_v50 = vrot.slane %v178_v41, 4  ;;  %v186_v51 = vrot.slane %v185_v42, 4  ;;  %v193_v52 = vrot.slane %v192_v43, 4  ;;  %6814 = vst [vmem:[#allocation20_spill] sm:$0xff] %v3719_v13 }
  0x1a   :  { %351 = vperm.xlu1 %3286, %v3590_v4   ;;  %v200_v53 = vrot.slane %v199_v44, 4  ;;  %v166_v55 = vadd.f32 %v165_v45, %v164_v39  ;;  %v173_v56 = vadd.f32 %v172_v46, %v171_v40  ;;  %v207_v57 = vrot.slane %v206_v47, 4  ;;  %v3261_v45 = vld [vmem:[%s6400_s0 + $0x78] sm:$0xff]  }
  0x1b   :  { %v214_v58 = vrot.slane %v213_v48, 4  ;;  %v180_v60 = vadd.f32 %v179_v50, %v178_v41  ;;  %v187_v61 = vadd.f32 %v186_v51, %v185_v42  ;;  %v194_v62 = vadd.f32 %v193_v52, %v192_v43  ;;  %v3259_v41 = vld [vmem:[%s6400_s0 + $0x68] sm:$0xff]   ;;  %v3260_v42 = vld [vmem:[%s6400_s0 + $0x70] sm:$0xff]  }
  0x1c   :  { %v201_v63 = vadd.f32 %v200_v53, %v199_v44  ;;  %v167_v8 = vrot.slane %v166_v55, 2  ;;  %v174_v9 = vrot.slane %v173_v56, 2  ;;  %v208_v10 = vadd.f32 %v207_v57, %v206_v47 }
  0x1d   :  { %2387 = vperm.xlu0 %3284, %v3605_v7   ;;  %v215_v11 = vadd.f32 %v214_v58, %v213_v48  ;;  %v3721_v18 = vunpack.c.h.bf16 %v3256_v54  ;;  %v181_v24 = vrot.slane %v180_v60, 2  ;;  %v188_v29 = vrot.slane %v187_v61, 2 }
  0x1e   :  { %355 = vperm.xlu1 %3286, %v3573_v1   ;;  %v3726_v39 = vunpack.c.l.bf16 %v3257_v59  ;;  %v3728_v40 = vunpack.c.h.bf16 %v3257_v59  ;;  %v195_v43 = vrot.slane %v194_v62, 2  ;;  %v202_v44 = vrot.slane %v201_v63, 2 }
  0x1f   :  { %6815 = vst [vmem:[#allocation21_spill] sm:$0xff] %v3721_v18  ;;  %v3739_v46 = vadd.f32 %v167_v8, %v166_v55  ;;  %v3741_v47 = vadd.f32 %v174_v9, %v173_v56  ;;  %v209_v48 = vrot.slane %v208_v10, 2  ;;  %v216_v50 = vrot.slane %v215_v11, 2  ;;  %v3756_v55 = vld [vmem:[%s6402_s2 + $0x40] sm:$0xff] }
  0x20   :  { %6816 = vst [vmem:[#allocation22_spill] sm:$0xff] %v3726_v39  ;;  %6817 = vst [vmem:[#allocation23_spill] sm:$0xff] %v3728_v40  ;;  %v3744_v51 = vunpack.c.l.bf16 %v3258_v19  ;;  %v3746_v52 = vunpack.c.h.bf16 %v3258_v19  ;;  %v3748_v53 = vadd.f32 %v181_v24, %v180_v60  ;;  %v3750_v54 = vadd.f32 %v188_v29, %v187_v61 }
  0x21   :  { %3318 = vset.pattern.permute.xlu0 %v6407_v6  ;;  %v6411_v57 = vmov 3   ;;  %v3758_v56 = vunpack.c.l.bf16 %v3259_v41  ;;  %v3760_v58 = vunpack.c.h.bf16 %v3259_v41  ;;  %v3762_v59 = vunpack.c.l.bf16 %v3260_v42 }
  0x22   :  { %3287 = vset.pattern.permute.xlu1 %v6413_v30  ;;  %347 = vperm.xlu0 %3318, %v3578_v2   ;;  %6818 = vst [vmem:[#allocation24_spill] sm:$0xff] %v3744_v51  ;;  %6819 = vst [vmem:[#allocation25_spill] sm:$0xff] %v3746_v52  ;;  %v3764_v8 = vunpack.c.h.bf16 %v3260_v42  ;;  %v3767_v60 = vunpack.c.l.bf16 %v3261_v45  ;;  %v3769_v61 = vunpack.c.h.bf16 %v3261_v45  ;;  %v3771_v9 = vadd.f32 %v195_v43, %v194_v62  ;;  %v3791_v43 = vld [vmem:[%s6402_s2 + $0x58] sm:$0xff] }
  0x23   :  { %375 = vperm.xlu1 %3287, %v3578_v2   ;;  %6820 = vst [vmem:[#allocation26_spill] sm:$0xff] %v3758_v56  ;;  %6821 = vst [vmem:[#allocation27_spill] sm:$0xff] %v3760_v58  ;;  %v3773_v19 = vadd.f32 %v202_v44, %v201_v63  ;;  %v169_v24 = vrot.slane %v3739_v46, 1  ;;  %v176_v29 = vrot.slane %v3741_v47, 1  ;;  %v3777_v41 = vadd.f32 %v209_v48, %v208_v10 }
  0x24   :  { %6822 = vst [vmem:[#allocation28_spill] sm:$0xff] %v3762_v59  ;;  %6823 = vst [vmem:[#allocation29_spill] sm:$0xff] %v3764_v8  ;;  %v3779_v6 = vadd.f32 %v216_v50, %v215_v11  ;;  %v183_v42 = vrot.slane %v3748_v53, 1  ;;  %v190_v0 = vrot.slane %v3750_v54, 1  ;;  %v220_v62 = vadd.f32 %v3677_v36, %v3675_v35 }
  0x25   :  { %6824 = vst [vmem:[#allocation30_spill] sm:$0xff] %v3767_v60  ;;  %6825 = vst [vmem:[#allocation31_spill] sm:$0xff] %v3769_v61  ;;  %v227_v63 = vadd.f32 %v3681_v38, %v3679_v37  ;;  %v234_v10 = vadd.f32 %v3721_v18, %v3719_v13  ;;  %v241_v11 = vadd.f32 %v3728_v40, %v3726_v39  ;;  %v6451_v18 = vmov 4  }
  0x26   :  { %359 = vperm.xlu0 %3318, %v3585_v3   ;;  %v248_v44 = vadd.f32 %v3746_v52, %v3744_v51  ;;  %v255_v45 = vadd.f32 %v3760_v58, %v3758_v56  ;;  %v221_v48 = vrot.slane %v220_v62, 4  ;;  %v269_v30 = vadd.f32 %v3769_v61, %v3767_v60 }
  0x27   :  { %383 = vperm.xlu1 %3287, %v3573_v1   ;;  %v228_v50 = vrot.slane %v227_v63, 4  ;;  %v235_v13 = vrot.slane %v234_v10, 4  ;;  %v242_v37 = vrot.slane %v241_v11, 4  ;;  %v197_v58 = vrot.slane %v3771_v9, 1 }
  0x28   :  { %v249_v40 = vrot.slane %v248_v44, 4  ;;  %v256_v39 = vrot.slane %v255_v45, 4  ;;  %v222_v52 = vadd.f32 %v221_v48, %v220_v62  ;;  %v204_v61 = vrot.slane %v3773_v19, 1 }
  0x29   :  { %v229_v56 = vadd.f32 %v228_v50, %v227_v63  ;;  %v236_v35 = vadd.f32 %v235_v13, %v234_v10  ;;  %v243_v33 = vadd.f32 %v242_v37, %v241_v11  ;;  %v270_v31 = vrot.slane %v269_v30, 4 }
  0x2a   :  { %1322 = vperm.xlu0 %3318, %v3704_v49   ;;  %v223_v60 = vrot.slane %v222_v52, 2  ;;  %v6826_v50 = vmov 2   ;;  %v170_v37 = vadd.f32 %v169_v24, %v3739_v46  ;;  %v177_v10 = vadd.f32 %v176_v29, %v3741_v47 }
  0x2b   :  { %387 = vperm.xlu1 %3287, %v3585_v3   ;;  %v230_v38 = vrot.slane %v229_v56, 2  ;;  %v237_v36 = vrot.slane %v236_v35, 2  ;;  %v244_v62 = vrot.slane %v243_v33, 2  ;;  %v271_v32 = vadd.f32 %v270_v31, %v269_v30 }
  0x2c   :  { %v224_v13 = vadd.f32 %v223_v60, %v222_v52  ;;  %vm284_vm4 = vcmask 1044480   ;;  %vm286_vm5 = vcmask 1045504   ;;  %vm288_vm6 = vcmask 1046528  }
  0x2d   :  { %v238_v11 = vadd.f32 %v237_v36, %v236_v35  ;;  %v205_v35 = vadd.f32 %v204_v61, %v3773_v19 }
  0x2e   :  { %1334 = vperm.xlu0 %3318, %v3717_v12   ;;  %v225_v34 = vrot.slane %v224_v13, 1 }
  0x2f   :  { %3288 = vset.pattern.permute.xlu1 %v6411_v57  ;;  %v262_v57 = vadd.f32 %v3764_v8, %v3762_v59  ;;  %v250_v8 = vadd.f32 %v249_v40, %v248_v44  ;;  %v257_v59 = vadd.f32 %v256_v39, %v255_v45  ;;  %v231_v39 = vadd.f32 %v230_v38, %v229_v56 }
  0x30   :  { %407 = vperm.xlu1 %3288, %v3590_v4   ;;  %v245_v44 = vadd.f32 %v244_v62, %v243_v33  ;;  %v239_v46 = vrot.slane %v238_v11, 1  ;;  %v226_v56 = vadd.f32 %v225_v34, %v224_v13  ;;  %v198_v33 = vadd.f32 %v197_v58, %v3771_v9 }
  0x31   :  { %v263_v51 = vrot.slane %v262_v57, 4  ;;  %v251_v63 = vrot.slane %v250_v8, 2  ;;  %v258_v40 = vrot.slane %v257_v59, 2  ;;  %v232_v27 = vrot.slane %v231_v39, 1 }
  0x32   :  { %2409 = vperm.xlu0 %3318, %v3756_v55   ;;  %v246_v52 = vrot.slane %v245_v44, 1  ;;  %v240_v36 = vadd.f32 %v239_v46, %v238_v11 }
  0x33   :  { %v264_v48 = vadd.f32 %v263_v51, %v262_v57  ;;  %v252_v45 = vadd.f32 %v251_v63, %v250_v8  ;;  %v184_v51 = vadd.f32 %v183_v42, %v3748_v53  ;;  %v191_v57 = vadd.f32 %v190_v0, %v3750_v54 }
  0x34   :  { %411 = vperm.xlu1 %3288, %v3573_v1   ;;  %v233_v60 = vadd.f32 %v232_v27, %v231_v39  ;;  %v259_v47 = vadd.f32 %v258_v40, %v257_v59  ;;  %v247_v31 = vadd.f32 %v246_v52, %v245_v44  ;;  %v272_v8 = vrot.slane %v271_v32, 2 }
  0x35   :  { %v265_v38 = vrot.slane %v264_v48, 2  ;;  %v253_v30 = vrot.slane %v252_v45, 1  ;;  %v277_v53 = vsel %vm276_vm0, %v170_v37, %v177_v10  ;;  %v218_v54 = vrot.slane %v3779_v6, 1 }
  0x36   :  { %2421 = vperm.xlu0 %3318, %v3791_v43   ;;  %v290_v24 = vsel %vm276_vm0, %v226_v56, %v233_v60  ;;  %v279_v27 = vsel %vm278_vm1, %v277_v53, %v184_v51  ;;  %v260_v58 = vrot.slane %v259_v47, 1  ;;  %v273_v29 = vadd.f32 %v272_v8, %v271_v32 }
  0x37   :  { %v266_v0 = vadd.f32 %v265_v38, %v264_v48  ;;  %v291_v34 = vsel %vm278_vm1, %v290_v24, %v240_v36  ;;  %v281_v59 = vsel %vm280_vm2, %v279_v27, %v191_v57  ;;  %v254_v9 = vadd.f32 %v253_v30, %v252_v45 }
  0x38   :  { %3289 = vset.pattern.permute.xlu1 %v6451_v18  ;;  %v211_v18 = vrot.slane %v3777_v41, 1  ;;  %v283_v19 = vsel %vm282_vm3, %v281_v59, %v198_v33  ;;  %v292_v62 = vsel %vm280_vm2, %v291_v34, %v247_v31  ;;  %v6459_v63 = vmov 5  }
  0x39   :  { %431 = vperm.xlu1 %3289, %v3578_v2   ;;  %v285_v42 = vsel %vm284_vm4, %v283_v19, %v205_v35  ;;  %v267_v48 = vrot.slane %v266_v0, 1  ;;  %v219_v37 = vadd.f32 %v218_v54, %v3779_v6  ;;  %v261_v13 = vadd.f32 %v260_v58, %v259_v47 }
  0x3a   :  { %3320 = vset.pattern.permute.xlu0 %v6826_v50  ;;  %v212_v61 = vadd.f32 %v211_v18, %v3777_v41  ;;  %v6827_v39 = vmov 3   ;;  %v293_v32 = vsel %vm282_vm3, %v292_v62, %v254_v9  ;;  %v274_v41 = vrot.slane %v273_v29, 1 }
  0x3b   :  { %379 = vperm.xlu0 %3320, %v3590_v4   ;;  %v268_v40 = vadd.f32 %v267_v48, %v266_v0  ;;  %v294_v11 = vsel %vm284_vm4, %v293_v32, %v261_v13  ;;  %v6467_v51 = vmov 6   ;;  %v6469_v38 = vmov 7  }
  0x3c   :  { %v287_v18 = vsel %vm286_vm5, %v285_v42, %v212_v61  ;;  %v275_v6 = vadd.f32 %v274_v41, %v273_v29  ;;  %v307_v57 = vlaneseq  ;;  %v6828_v60 = vmov 4  }
  0x3d   :  { %439 = vperm.xlu1 %3289, %v3573_v1   ;;  %v289_v10 = vsel %vm288_vm6, %v287_v18, %v219_v37  ;;  %v295_v44 = vsel %vm286_vm5, %v294_v11, %v268_v40  ;;  %v6465_v36 = vmov 8   ;;  %v3520_v30 = vmov 0.0  }
  0x3e   :  { %v297_v45 = vadd.f32 1.0, %v289_v10  ;;  %v296_v46 = vsel %vm288_vm6, %v295_v44, %v275_v6  ;;  %v308_v47 = vshrl.u32 %v307_v57, 7  ;;  %v6463_v59 = vmov 9  }
  0x3f   :  { %1354 = vperm.xlu0 %3320, %v3597_v5   ;;  %v298_v52 = vadd.f32 1.0, %v296_v46 }
  0x40   :  { %3363 = vrcp.f32 %v297_v45  ;;  %vm1012_vm7 = vcmp.eq.s32.totalorder %v308_v47, 0  ;;  %v3872_v34 = vsub.s32 0, %v308_v47  ;;  %v3876_v58 = vsub.s32 1, %v308_v47 }
  0x41   :  { %443 = vperm.xlu1 %3289, %v3585_v3   ;;  %3365 = vrcp.f32 %v298_v52  ;;  %v3157_v31 = vsel %vm1012_vm7, 1.0, %v3520_v30  ;;  %v3879_v61 = vsub.s32 2, %v308_v47  ;;  %v3886_v19 = vsub.s32 3, %v308_v47 }
  0x42   :  { %v1018_v24 = vadd.f32 %v3627_v14, %v3157_v31  ;;  %6829 = vst [vmem:[#allocation32_spill] sm:$0xff] %v3872_v34  ;;  %6830 = vst [vmem:[#allocation33_spill] sm:$0xff] %v3876_v58  ;;  %vm1148_vm8 = vcmp.eq.s32.totalorder %v308_v47, 1  ;;  %v3902_v13 = vsub.s32 4, %v308_v47  ;;  %v3918_v44 = vsub.s32 5, %v308_v47 }
  0x43   :  { %2441 = vperm.xlu0 %3320, %v3605_v7   ;;  %6831 = vst [vmem:[#allocation34_spill] sm:$0xff] %v3879_v61  ;;  %6833 = vst [vmem:[#allocation36_spill] sm:$0xff] %v3886_v19 }
  0x44   :  { %6836 = vst [vmem:[#allocation39_spill] sm:$0xff] %v3902_v13  ;;  %6838 = vst [vmem:[#allocation41_spill] sm:$0xff] %v3918_v44 }
  0x45   :  { %3290 = vset.pattern.permute.xlu1 %v6459_v63 }
  0x46   :  { %463 = vperm.xlu1 %3290, %v3590_v4  }
  0x47   :  { %3322 = vset.pattern.permute.xlu0 %v6827_v39 }
  0x48   :  { %403 = vperm.xlu0 %3322, %v3578_v2  }
  0x4a   :  { %467 = vperm.xlu1 %3290, %v3573_v1  }
  0x4c   :  { %415 = vperm.xlu0 %3322, %v3585_v3  }
  0x4d   :  { %v3364_v56 = vpop.eup %3363 }
  0x4e   :  { %3291 = vset.pattern.permute.xlu1 %v6467_v51  ;;  %v301_v33 = vmul.f32 %v3364_v56, %v297_v45  ;;  %v3366_v35 = vpop.eup %3365  ;;  %v3158_v45 = vsel %vm1148_vm8, 1.0, %v3520_v30 }
  0x4f   :  { %487 = vperm.xlu1 %3291, %v3578_v2   ;;  %v302_v8 = vmul.f32 %v3366_v35, %v298_v52 }
  0x50   :  { %1378 = vperm.xlu0 %3322, %v3704_v49  }
  0x51   :  { %v304_v0 = vsub.f32 2.0, %v302_v8 }
  0x53   :  { %495 = vperm.xlu1 %3291, %v3573_v1   ;;  %v3874_v54 = vmul.f32 %v3366_v35, %v304_v0  ;;  %v3928_v35 = vsub.s32 6, %v308_v47  ;;  %v3937_v0 = vsub.s32 7, %v308_v47 }
  0x54   :  { %1390 = vperm.xlu0 %3322, %v3717_v12  }
  0x55   :  { %v3893_v42 = vmul.f32 %v3629_v15, %v3874_v54  ;;  %6840 = vst [vmem:[#allocation43_spill] sm:$0xff] %v3928_v35  ;;  %6842 = vst [vmem:[#allocation45_spill] sm:$0xff] %v3937_v0 }
  0x57   :  { %499 = vperm.xlu1 %3291, %v3585_v3  }
  0x58   :  { %2465 = vperm.xlu0 %3322, %v3756_v55  }
  0x5b   :  { %3292 = vset.pattern.permute.xlu1 %v6469_v38  ;;  %v6856_v38 = vld [vmem:[#allocation19_spill] sm:$0xff] }
  0x5c   :  { %519 = vperm.xlu1 %3292, %v3590_v4   ;;  %2477 = vperm.xlu0 %3322, %v3791_v43   ;;  %v303_v43 = vsub.f32 2.0, %v301_v33 }
  0x5e   :  { %v3865_v53 = vmul.f32 %v3364_v56, %v303_v43 }
  0x60   :  { %523 = vperm.xlu1 %3292, %v3573_v1   ;;  %3324 = vset.pattern.permute.xlu0 %v6828_v60  ;;  %v1020_v27 = vmul.f32 %v1018_v24, %v3865_v53  ;;  %v6461_v24 = vmov 10  }
  0x61   :  { %435 = vperm.xlu0 %3324, %v3590_v4  }
  0x62   :  { %v3882_v9 = vrot.slane %v1020_v27, %v3872_v34  ;;  %v3889_v29 = vrot.slane %v1020_v27, %v3876_v58  ;;  %v3896_v62 = vrot.slane %v1020_v27, %v3879_v61  ;;  %v3905_v18 = vrot.slane %v1020_v27, %v3886_v19 }
  0x63   :  { %v3922_v46 = vrot.slane %v1020_v27, %v3902_v13  ;;  %v3931_v43 = vrot.slane %v1020_v27, %v3918_v44 }
  0x64   :  { %3293 = vset.pattern.permute.xlu1 %v6465_v36  ;;  %6832 = vst [vmem:[#allocation35_spill] sm:$0xff] %v3882_v9  ;;  %6834 = vst [vmem:[#allocation37_spill] sm:$0xff] %v3889_v29  ;;  %v1987_v48 = vmul.f32 %v3627_v14, %v3882_v9  ;;  %v1988_v37 = vmul.f32 %v3629_v15, %v3882_v9  ;;  %v1991_v32 = vmul.f32 %v3631_v16, %v3889_v29  ;;  %v6855_v36 = vld [vmem:[#allocation12_spill] sm:$0xff] }
  0x65   :  { %543 = vperm.xlu1 %3293, %v3578_v2   ;;  %1410 = vperm.xlu0 %3324, %v3597_v5   ;;  %6835 = vst [vmem:[#allocation38_spill] sm:$0xff] %v3896_v62  ;;  %6837 = vst [vmem:[#allocation40_spill] sm:$0xff] %v3905_v18  ;;  %v1992_v41 = vmul.f32 %v3633_v17, %v3889_v29  ;;  %v1995_v11 = vmul.f32 %v3641_v20, %v3896_v62 }
  0x66   :  { %v1989_v40 = vadd.f32 %v1987_v48, %v1020_v27  ;;  %v1990_v10 = vadd.f32 %v1988_v37, %v3893_v42  ;;  %v1996_v6 = vmul.f32 %v3643_v21, %v3896_v62  ;;  %6839 = vst [vmem:[#allocation42_spill] sm:$0xff] %v3922_v46  ;;  %v1999_v56 = vmul.f32 %v3645_v22, %v3905_v18 }
  0x67   :  { %v2000_v33 = vmul.f32 %v3647_v23, %v3905_v18  ;;  %6841 = vst [vmem:[#allocation44_spill] sm:$0xff] %v3931_v43  ;;  %v2004_v30 = vmul.f32 %v3655_v26, %v3922_v46  ;;  %v3940_v48 = vrot.slane %v1020_v27, %v3928_v35  ;;  %v1154_v37 = vadd.f32 %v3631_v16, %v3158_v45 }
  0x68   :  { %v1993_v52 = vadd.f32 %v1991_v32, %v1989_v40  ;;  %v1994_v57 = vadd.f32 %v1992_v41, %v1990_v10  ;;  %v2003_v40 = vmul.f32 %v3653_v25, %v3922_v46  ;;  %v2008_v10 = vmul.f32 %v3659_v28, %v3931_v43 }
  0x69   :  { %551 = vperm.xlu1 %3293, %v3573_v1   ;;  %2497 = vperm.xlu0 %3324, %v3605_v7   ;;  %6843 = vst [vmem:[#allocation46_spill] sm:$0xff] %v3940_v48  ;;  %v3956_v45 = vrot.slane %v3893_v42, %v3872_v34 }
  0x6a   :  { %v1997_v31 = vadd.f32 %v1995_v11, %v1993_v52  ;;  %v1998_v8 = vadd.f32 %v1996_v6, %v1994_v57  ;;  %v3949_v11 = vrot.slane %v1020_v27, %v3937_v0  ;;  %v6845_v6 = vld [vmem:[#allocation13_spill] sm:$0xff]  ;;  %v3959_v57 = vmul.f32 %v1154_v37, %v3865_v53 }
  0x6b   :  { %v2012_v52 = vmul.f32 %v6845_v6, %v3940_v48  ;;  %6846 = vst [vmem:[#allocation13_spill] sm:$0xff] %v3956_v45  ;;  %v3976_v37 = vrot.slane %v3893_v42, %v3879_v61 }
  0x6c   :  { %v2001_v32 = vadd.f32 %v1999_v56, %v1997_v31  ;;  %v2002_v41 = vadd.f32 %v2000_v33, %v1998_v8  ;;  %6844 = vst [vmem:[#allocation47_spill] sm:$0xff] %v3949_v11  ;;  %v6847_v33 = vld [vmem:[#allocation11_spill] sm:$0xff]  ;;  %v4001_v46 = vrot.slane %v3959_v57, %v3886_v19 }
  0x6d   :  { %555 = vperm.xlu1 %3293, %v3585_v3   ;;  %3326 = vset.pattern.permute.xlu0 %v6459_v63  ;;  %v2007_v27 = vmul.f32 %v6847_v33, %v3931_v43  ;;  %v6848_v8 = vld [vmem:[#allocation15_spill] sm:$0xff]  ;;  %v3972_v63 = vrot.slane %v3893_v42, %v3876_v58 }
  0x6e   :  { %459 = vperm.xlu0 %3326, %v3578_v2   ;;  %v2006_v47 = vadd.f32 %v2004_v30, %v2002_v41  ;;  %v2005_v56 = vadd.f32 %v2003_v40, %v2001_v32  ;;  %v2016_v30 = vmul.f32 %v6848_v8, %v3949_v11  ;;  %v3968_v41 = vmul.f32 %v3633_v17, %v3874_v54  ;;  %v6851_v40 = vld [vmem:[#allocation17_spill] sm:$0xff] }
  0x6f   :  { %6849 = vst [vmem:[#allocation11_spill] sm:$0xff] %v3972_v63  ;;  %6850 = vst [vmem:[#allocation15_spill] sm:$0xff] %v3976_v37  ;;  %v2024_v43 = vmul.f32 %v6856_v38, %v3972_v63 }
  0x70   :  { %v2010_v31 = vadd.f32 %v2008_v10, %v2006_v47  ;;  %v3983_v10 = vrot.slane %v3959_v57, %v3872_v34  ;;  %v3987_v47 = vrot.slane %v3959_v57, %v3876_v58  ;;  %6857 = vst [vmem:[#allocation12_spill] sm:$0xff] %v4001_v46 }
  0x71   :  { %3294 = vset.pattern.permute.xlu1 %v6463_v59  ;;  %v3991_v59 = vrot.slane %v3959_v57, %v3879_v61 }
  0x72   :  { %575 = vperm.xlu1 %3294, %v3590_v4   ;;  %471 = vperm.xlu0 %3326, %v3585_v3   ;;  %v2014_v32 = vadd.f32 %v2012_v52, %v2010_v31  ;;  %6852 = vst [vmem:[#allocation17_spill] sm:$0xff] %v3983_v10  ;;  %6853 = vst [vmem:[#allocation48_spill] sm:$0xff] %v3987_v47  ;;  %v2011_v52 = vmul.f32 %v6855_v36, %v3940_v48 }
  0x73   :  { %6854 = vst [vmem:[#allocation49_spill] sm:$0xff] %v3991_v59  ;;  %v2009_v31 = vadd.f32 %v2007_v27, %v2005_v56  ;;  %v2179_v18 = vmul.f32 %v3627_v14, %v3983_v10  ;;  %v2180_v62 = vmul.f32 %v3629_v15, %v3983_v10  ;;  %v2183_v48 = vmul.f32 %v3631_v16, %v3987_v47 }
  0x74   :  { %v4011_v56 = vrot.slane %v3959_v57, %v3902_v13  ;;  %v2184_v29 = vmul.f32 %v3633_v17, %v3987_v47  ;;  %v2187_v15 = vmul.f32 %v3641_v20, %v3991_v59  ;;  %v2188_v16 = vmul.f32 %v3643_v21, %v3991_v59 }
  0x75   :  { %v2181_v9 = vadd.f32 %v2179_v18, %v3959_v57  ;;  %v2182_v14 = vadd.f32 %v2180_v62, %v3968_v41  ;;  %v6489_v10 = vmov 11   ;;  %v2191_v20 = vmul.f32 %v3645_v22, %v4001_v46 }
  0x76   :  { %579 = vperm.xlu1 %3294, %v3573_v1   ;;  %1434 = vperm.xlu0 %3326, %v3704_v49   ;;  %6858 = vst [vmem:[#allocation19_spill] sm:$0xff] %v4011_v56  ;;  %v2192_v21 = vmul.f32 %v3647_v23, %v4001_v46 }
  0x77   :  { %v2185_v18 = vadd.f32 %v2183_v48, %v2181_v9  ;;  %v2186_v62 = vadd.f32 %v2184_v29, %v2182_v14  ;;  %v4041_v9 = vrot.slane %v3959_v57, %v3918_v44  ;;  %v6862_v29 = vld [vmem:[#allocation16_spill] sm:$0xff] }
  0x78   :  { %v2019_v23 = vmul.f32 %v6862_v29, %v3956_v45 }
  0x79   :  { %v2190_v47 = vadd.f32 %v2188_v16, %v2186_v62  ;;  %v4062_v16 = vrot.slane %v3959_v57, %v3928_v35 }
  0x7a   :  { %3295 = vset.pattern.permute.xlu1 %v6461_v24  ;;  %1446 = vperm.xlu0 %3326, %v3717_v12   ;;  %v2020_v24 = vmul.f32 %v6851_v40, %v3956_v45 }
  0x7b   :  { %599 = vperm.xlu1 %3295, %v3578_v2   ;;  %6865 = vst [vmem:[#allocation50_spill] sm:$0xff] %v4062_v16 }
  0x7e   :  { %2521 = vperm.xlu0 %3326, %v3756_v55  }
  0x7f   :  { %607 = vperm.xlu1 %3295, %v3573_v1  }
  0x82   :  { %3327 = vset.pattern.permute.xlu0 %v6467_v51  ;;  %v2018_v51 = vadd.f32 %v2016_v30, %v2014_v32  ;;  %v6859_v30 = vld [vmem:[#allocation21_spill] sm:$0xff] }
  0x83   :  { %611 = vperm.xlu1 %3295, %v3585_v3   ;;  %491 = vperm.xlu0 %3327, %v3590_v4   ;;  %v2028_v32 = vmul.f32 %v6859_v30, %v3976_v37  ;;  %6861 = vst [vmem:[#allocation21_spill] sm:$0xff] %v4041_v9 }
  0x84   :  { %v2022_v27 = vadd.f32 %v2020_v24, %v2018_v51  ;;  %v2013_v51 = vadd.f32 %v2011_v52, %v2009_v31  ;;  %v6860_v24 = vld [vmem:[#allocation14_spill] sm:$0xff]  ;;  %v2195_v52 = vmul.f32 %v3653_v25, %v4011_v56  ;;  %v4053_v25 = vld [vmem:[%s6402_s2 + $0x50] sm:$0xff] }
  0x85   :  { %v2015_v60 = vmul.f32 %v6860_v24, %v3949_v11 }
  0x86   :  { %v2026_v17 = vadd.f32 %v2024_v43, %v2022_v27  ;;  %v2196_v43 = vmul.f32 %v3655_v26, %v4011_v56  ;;  %v2194_v27 = vadd.f32 %v2192_v21, %v2190_v47  ;;  %v6493_v47 = vmov 12  }
  0x87   :  { %3296 = vset.pattern.permute.xlu1 %v6489_v10  ;;  %1466 = vperm.xlu0 %3327, %v3597_v5   ;;  %v2189_v10 = vadd.f32 %v2187_v15, %v2185_v18  ;;  %v2017_v22 = vadd.f32 %v2015_v60, %v2013_v51  ;;  %v2200_v60 = vmul.f32 %v3659_v28, %v4041_v9 }
  0x88   :  { %631 = vperm.xlu1 %3296, %v3590_v4   ;;  %v4032_v59 = vadd.f32 %v2028_v32, %v2026_v17  ;;  %v2199_v32 = vmul.f32 %v6847_v33, %v4041_v9  ;;  %v2198_v15 = vadd.f32 %v2196_v43, %v2194_v27  ;;  %v6866_v17 = vld [vmem:[#allocation18_spill] sm:$0xff]  ;;  %v2204_v21 = vmul.f32 %v6845_v6, %v4062_v16 }
  0x89   :  { %v2193_v26 = vadd.f32 %v2191_v20, %v2189_v10  ;;  %v2021_v51 = vadd.f32 %v2019_v23, %v2017_v22  ;;  %v2023_v18 = vmul.f32 %v6866_v17, %v3972_v63  ;;  %v2203_v20 = vmul.f32 %v6855_v36, %v4062_v16  ;;  %v6871_v23 = vld [vmem:[#allocation20_spill] sm:$0xff] }
  0x8a   :  { %v2202_v62 = vadd.f32 %v2200_v60, %v2198_v15  ;;  %v4079_v43 = vrot.slane %v3959_v57, %v3937_v0  ;;  %v4088_v36 = vrot.slane %v3893_v42, %v3886_v19  ;;  %v4099_v15 = vrot.slane %v3968_v41, %v3872_v34 }
  0x8b   :  { %2549 = vperm.xlu0 %3327, %v3756_v55   ;;  %v2197_v14 = vadd.f32 %v2195_v52, %v2193_v26  ;;  %v6869_v52 = vmov 7   ;;  %v2025_v22 = vadd.f32 %v2023_v18, %v2021_v51  ;;  %v2027_v26 = vmul.f32 %v6871_v23, %v3976_v37  ;;  %v6876_v18 = vld [vmem:[#allocation22_spill] sm:$0xff] }
  0x8c   :  { %v4045_v48 = vpop.permute.xlu1 %330  ;;  %635 = vperm.xlu1 %3296, %v3573_v1   ;;  %v4048_v31 = vpop.permute.xlu0 %320  ;;  %6870 = vst [vmem:[#allocation52_spill] sm:$0xff] %v4079_v43  ;;  %6873 = vst [vmem:[#allocation53_spill] sm:$0xff] %v4088_v36  ;;  %v2206_v60 = vadd.f32 %v2204_v21, %v2202_v62  ;;  %v2207_v57 = vmul.f32 %v6860_v24, %v4079_v43  ;;  %v2212_v21 = vmul.f32 %v6851_v40, %v4099_v15 }
  0x8d   :  { %6863 = vst [vmem:[#allocation14_spill] sm:$0xff] %v4045_v48  ;;  %6864 = vst [vmem:[#allocation16_spill] sm:$0xff] %v4048_v31  ;;  %v2201_v28 = vadd.f32 %v2199_v32, %v2197_v14  ;;  %v2208_v14 = vmul.f32 %v6848_v8, %v4079_v43  ;;  %v2029_v51 = vadd.f32 %v2027_v26, %v2025_v22  ;;  %v6881_v48 = vld [vmem:[#allocation24_spill] sm:$0xff]  ;;  %v6920_v31 = vld [vmem:[#allocation31_spill] sm:$0xff] }
  0x8e   :  { %6875 = vst [vmem:[#allocation55_spill] sm:$0xff] %v4099_v15  ;;  %v4119_v22 = vrot.slane %v3968_v41, %v3876_v58 }
  0x8f   :  { %2557 = vperm.xlu0 %3327, %v4053_v25   ;;  %v2205_v6 = vadd.f32 %v2203_v20, %v2201_v28  ;;  %v2210_v62 = vadd.f32 %v2208_v14, %v2206_v60  ;;  %v2211_v20 = vmul.f32 %v6862_v29, %v4099_v15 }
  0x90   :  { %v4066_v10 = vpop.permute.xlu1 %335  ;;  %3297 = vset.pattern.permute.xlu1 %v6493_v47  ;;  %v4069_v33 = vpop.permute.xlu0 %325  ;;  %v2031_v47 = vmul.f32 %v6876_v18, %v4088_v36  ;;  %6880 = vst [vmem:[#allocation58_spill] sm:$0xff] %v4119_v22  ;;  %v2215_v60 = vmul.f32 %v6866_v17, %v4119_v22 }
  0x91   :  { %6867 = vst [vmem:[#allocation18_spill] sm:$0xff] %v4066_v10  ;;  %6868 = vst [vmem:[#allocation51_spill] sm:$0xff] %v4069_v33  ;;  %655 = vperm.xlu1 %3297, %v3578_v2   ;;  %v2209_v8 = vadd.f32 %v2207_v57, %v2205_v6  ;;  %v4129_v6 = vrot.slane %v3968_v41, %v3879_v61  ;;  %v2214_v40 = vadd.f32 %v2212_v21, %v2210_v62  ;;  %v6501_v57 = vmov 13   ;;  %v6887_v62 = vld [vmem:[#allocation26_spill] sm:$0xff]  ;;  %v4612_v33 = vld [vmem:[#allocation2 + $0x28] sm:$0xff] }
  0x92   :  { %v2033_v26 = vadd.f32 %v2031_v47, %v2029_v51  ;;  %v2216_v47 = vmul.f32 %v6856_v38, %v4119_v22  ;;  %v4141_v51 = vrot.slane %v3968_v41, %v3886_v19  ;;  %v4154_v21 = vrot.slane %v3893_v42, %v3928_v35  ;;  %6967 = vst [vmem:[#allocation120_spill] sm:$0xff] %v4612_v33 }
  0x93   :  { %3331 = vset.pattern.permute.xlu0 %v6869_v52  ;;  %6883 = vst [vmem:[#allocation59_spill] sm:$0xff] %v4129_v6  ;;  %v2213_v29 = vadd.f32 %v2211_v20, %v2209_v8  ;;  %v2219_v38 = vmul.f32 %v6871_v23, %v4129_v6  ;;  %v2220_v20 = vmul.f32 %v6859_v30, %v4129_v6  ;;  %v6892_v23 = vld [vmem:[#allocation28_spill] sm:$0xff] }
  0x94   :  { %515 = vperm.xlu0 %3331, %v3578_v2   ;;  %v4084_v27 = vpop.permute.xlu0 %1300  ;;  %6885 = vst [vmem:[#allocation61_spill] sm:$0xff] %v4141_v51  ;;  %6888 = vst [vmem:[#allocation26_spill] sm:$0xff] %v4154_v21  ;;  %v2223_v22 = vmul.f32 %v6876_v18, %v4141_v51  ;;  %v4167_v30 = vrot.slane %v3968_v41, %v3918_v44  ;;  %v2043_v6 = vmul.f32 %v6892_v23, %v4154_v21 }
  0x95   :  { %6872 = vst [vmem:[#allocation20_spill] sm:$0xff] %v4084_v27  ;;  %v4090_v32 = vpop.permute.xlu1 %351  ;;  %663 = vperm.xlu1 %3297, %v3573_v1   ;;  %v4105_v27 = vrot.slane %v3893_v42, %v3902_v13  ;;  %v4179_v18 = vrot.slane %v3893_v42, %v3937_v0 }
  0x96   :  { %6874 = vst [vmem:[#allocation54_spill] sm:$0xff] %v4090_v32  ;;  %6891 = vst [vmem:[#allocation65_spill] sm:$0xff] %v4167_v30 }
  0x97   :  { %6877 = vst [vmem:[#allocation22_spill] sm:$0xff] %v4105_v27  ;;  %6894 = vst [vmem:[#allocation66_spill] sm:$0xff] %v4179_v18  ;;  %v2048_v16 = vmul.f32 %v6920_v31, %v4179_v18 }
  0x98   :  { %527 = vperm.xlu0 %3331, %v3585_v3   ;;  %v4108_v28 = vpop.permute.xlu0 %2387 }
  0x99   :  { %6878 = vst [vmem:[#allocation56_spill] sm:$0xff] %v4108_v28  ;;  %v4110_v24 = vpop.permute.xlu1 %355  ;;  %667 = vperm.xlu1 %3297, %v3585_v3   ;;  %v2035_v28 = vmul.f32 %v6881_v48, %v4105_v27 }
  0x9a   :  { %6879 = vst [vmem:[#allocation57_spill] sm:$0xff] %v4110_v24  ;;  %v4125_v24 = vrot.slane %v3893_v42, %v3918_v44 }
  0x9b   :  { %v2037_v8 = vadd.f32 %v2035_v28, %v2033_v26  ;;  %v2217_v28 = vadd.f32 %v2215_v60, %v2213_v29  ;;  %v2218_v26 = vadd.f32 %v2216_v47, %v2214_v40  ;;  %v4183_v60 = vrot.slane %v3968_v41, %v3928_v35 }
  0x9c   :  { %6882 = vst [vmem:[#allocation24_spill] sm:$0xff] %v4125_v24  ;;  %1490 = vperm.xlu0 %3331, %v3704_v49   ;;  %v2039_v17 = vmul.f32 %v6887_v62, %v4125_v24 }
  0x9d   :  { %3298 = vset.pattern.permute.xlu1 %v6501_v57  ;;  %v4137_v14 = vpop.permute.xlu0 %347  ;;  %v4159_v57 = vrot.slane %v3968_v41, %v3902_v13  ;;  %v2221_v43 = vadd.f32 %v2219_v38, %v2217_v28  ;;  %v2222_v29 = vadd.f32 %v2220_v20, %v2218_v26  ;;  %6895 = vst [vmem:[#allocation67_spill] sm:$0xff] %v4183_v60  ;;  %v6899_v38 = vld [vmem:[#allocation30_spill] sm:$0xff] }
  0x9e   :  { %6884 = vst [vmem:[#allocation60_spill] sm:$0xff] %v4137_v14  ;;  %687 = vperm.xlu1 %3298, %v3590_v4   ;;  %v4144_v37 = vpop.permute.xlu1 %375  ;;  %v2041_v45 = vadd.f32 %v2039_v17, %v2037_v8  ;;  %v4191_v17 = vrot.slane %v3968_v41, %v3937_v0  ;;  %v2047_v20 = vmul.f32 %v6899_v38, %v4179_v18 }
  0x9f   :  { %6886 = vst [vmem:[#allocation62_spill] sm:$0xff] %v4144_v37  ;;  %6889 = vst [vmem:[#allocation63_spill] sm:$0xff] %v4159_v57  ;;  %v2227_v40 = vmul.f32 %v6881_v48, %v4159_v57  ;;  %v2225_v47 = vadd.f32 %v2223_v22, %v2221_v43  ;;  %v6518_v48 = vmov 14   ;;  %v2235_v43 = vmul.f32 %v6892_v23, %v4183_v60 }
  0xa0   :  { %1502 = vperm.xlu0 %3331, %v3717_v12   ;;  %6897 = vst [vmem:[#allocation69_spill] sm:$0xff] %v4191_v17  ;;  %v2045_v42 = vadd.f32 %v2043_v6, %v2041_v45  ;;  %v6900_v22 = vmov 8   ;;  %v2239_v41 = vmul.f32 %v6899_v38, %v4191_v17 }
  0xa1   :  { %v4163_v63 = vpop.permute.xlu0 %359  ;;  %v2229_v28 = vadd.f32 %v2227_v40, %v2225_v47 }
  0xa2   :  { %6890 = vst [vmem:[#allocation64_spill] sm:$0xff] %v4163_v63  ;;  %691 = vperm.xlu1 %3298, %v3573_v1   ;;  %v4172_v15 = vpop.permute.xlu1 %383  ;;  %v2049_v45 = vadd.f32 %v2047_v20, %v2045_v42  ;;  %v6906_v42 = vld [vmem:[#allocation23_spill] sm:$0xff] }
  0xa3   :  { %6893 = vst [vmem:[#allocation28_spill] sm:$0xff] %v4172_v15  ;;  %v2231_v15 = vmul.f32 %v6887_v62, %v4167_v30  ;;  %v2032_v20 = vmul.f32 %v6906_v42, %v4088_v36  ;;  %v4290_v36 = vld [vmem:[%s6402_s2] sm:$0xff] }
  0xa4   :  { %2581 = vperm.xlu0 %3331, %v3605_v7  }
  0xa5   :  { %v4187_v8 = vpop.permute.xlu0 %1322  ;;  %v2233_v62 = vadd.f32 %v2231_v15, %v2229_v28  ;;  %v4214_v15 = vmul.f32 %v2049_v45, %v3865_v53  ;;  %v4252_v45 = vld [vmem:[#allocation2 + $0x10] sm:$0xff] }
  0xa6   :  { %6896 = vst [vmem:[#allocation68_spill] sm:$0xff] %v4187_v8  ;;  %3299 = vset.pattern.permute.xlu1 %v6518_v48  ;;  %v4194_v7 = vpop.permute.xlu1 %387  ;;  %v3419_v8 = vld [vmem:[%s6402_s2 + $0x10] sm:$0xff] }
  0xa7   :  { %6898 = vst [vmem:[#allocation70_spill] sm:$0xff] %v4194_v7  ;;  %711 = vperm.xlu1 %3299, %v3578_v2   ;;  %v2237_v6 = vadd.f32 %v2235_v43, %v2233_v62  ;;  %v4233_v28 = vrot.slane %v4214_v15, %v3876_v58  ;;  %v4299_v7 = vrot.slane %v4214_v15, %v3886_v19 }
  0xa8   :  { %3333 = vset.pattern.permute.xlu0 %v6900_v22 }
  0xa9   :  { %547 = vperm.xlu0 %3333, %v3590_v4   ;;  %v4205_v26 = vpop.permute.xlu0 %1334  ;;  %v2241_v47 = vadd.f32 %v2239_v41, %v2237_v6  ;;  %v4250_v41 = vld [vmem:[#allocation2] sm:$0xff]  ;;  %v2034_v6 = vadd.f32 %v2032_v20, %v4032_v59 }
  0xaa   :  { %6901 = vst [vmem:[#allocation30_spill] sm:$0xff] %v4205_v26 }
  0xab   :  { %719 = vperm.xlu1 %3299, %v3573_v1   ;;  %v4208_v40 = vpop.permute.xlu1 %407  ;;  %v4220_v38 = vmul.f32 %v2241_v47, %v3865_v53  ;;  %v2224_v53 = vmul.f32 %v6906_v42, %v4141_v51  ;;  %v6908_v47 = vld [vmem:[#allocation25_spill] sm:$0xff]  ;;  %v6911_v51 = vmov 9  }
  0xac   :  { %6902 = vst [vmem:[#allocation71_spill] sm:$0xff] %v4208_v40  ;;  %v2036_v42 = vmul.f32 %v6908_v47, %v4105_v27 }
  0xad   :  { %1522 = vperm.xlu0 %3333, %v3597_v5   ;;  %v4211_v2 = vpop.permute.xlu0 %2409  ;;  %v4229_v5 = vrot.slane %v4214_v15, %v3872_v34  ;;  %v4244_v43 = vrot.slane %v4220_v38, %v3876_v58  ;;  %v2226_v26 = vadd.f32 %v2224_v53, %v2222_v29  ;;  %v4283_v29 = vld [vmem:[#allocation2 + $0x20] sm:$0xff]  ;;  %v4307_v63 = vrot.slane %v4220_v38, %v3886_v19 }
  0xae   :  { %6903 = vst [vmem:[#allocation72_spill] sm:$0xff] %v4211_v2  ;;  %v2228_v2 = vmul.f32 %v6908_v47, %v4159_v57  ;;  %v2038_v53 = vadd.f32 %v2036_v42, %v2034_v6  ;;  %v6912_v47 = vld [vmem:[#allocation27_spill] sm:$0xff]  ;;  %v4342_v37 = vrot.slane %v4220_v38, %v3902_v13 }
  0xaf   :  { %723 = vperm.xlu1 %3299, %v3585_v3   ;;  %v4217_v23 = vpop.permute.xlu1 %411  ;;  %v6516_v3 = vmov 15   ;;  %v2057_v48 = vmul.f32 %v4229_v5, %v4250_v41  ;;  %v2255_v20 = vmul.f32 %v4244_v43, %v4252_v45  ;;  %v2040_v57 = vmul.f32 %v6912_v47, %v4125_v24 }
  0xb0   :  { %6904 = vst [vmem:[#allocation73_spill] sm:$0xff] %v4217_v23  ;;  %v4275_v23 = vrot.slane %v4220_v38, %v3879_v61  ;;  %v2232_v6 = vmul.f32 %v6912_v47, %v4167_v30  ;;  %v2230_v42 = vadd.f32 %v2228_v2, %v2226_v26  ;;  %v6916_v47 = vld [vmem:[#allocation29_spill] sm:$0xff] }
  0xb1   :  { %2605 = vperm.xlu0 %3333, %v3756_v55   ;;  %v4223_v1 = vpop.permute.xlu0 %2421  ;;  %v4240_v55 = vrot.slane %v4220_v38, %v3872_v34  ;;  %v2042_v10 = vadd.f32 %v2040_v57, %v2038_v53  ;;  %v2044_v26 = vmul.f32 %v6916_v47, %v4154_v21  ;;  %v4320_v2 = vld [vmem:[%s6402_s2 + $0x18] sm:$0xff]  ;;  %v4334_v53 = vrot.slane %v4214_v15, %v3902_v13 }
  0xb2   :  { %6905 = vst [vmem:[#allocation74_spill] sm:$0xff] %v4223_v1  ;;  %v4265_v1 = vrot.slane %v4214_v15, %v3879_v61  ;;  %6917 = vst [vmem:[#allocation29_spill] sm:$0xff] %v4320_v2  ;;  %v2236_v21 = vmul.f32 %v6916_v47, %v4183_v60  ;;  %v2234_v30 = vadd.f32 %v2232_v6, %v2230_v42 }
  0xb3   :  { %3300 = vset.pattern.permute.xlu1 %v6516_v3  ;;  %v2249_v59 = vmul.f32 %v4240_v55, %v4250_v41  ;;  %v2046_v14 = vadd.f32 %v2044_v26, %v2042_v10  ;;  %v4356_v6 = vrot.slane %v4214_v15, %v3918_v44  ;;  %v2240_v42 = vmul.f32 %v6920_v31, %v4191_v17 }
  0xb4   :  { %743 = vperm.xlu1 %3300, %v3590_v4   ;;  %v4247_v62 = vpop.permute.xlu1 %431  ;;  %v2063_v4 = vmul.f32 %v4233_v28, %v4252_v45  ;;  %v2238_v60 = vadd.f32 %v2236_v21, %v2234_v30  ;;  %v4378_v30 = vrot.slane %v4214_v15, %v3928_v35 }
  0xb5   :  { %6907 = vst [vmem:[#allocation23_spill] sm:$0xff] %v4247_v62  ;;  %2613 = vperm.xlu0 %3333, %v4053_v25   ;;  %v2257_v24 = vadd.f32 %v2255_v20, %v2249_v59  ;;  %v4328_v20 = vld [vmem:[%s6402_s2 + $0x30] sm:$0xff]  ;;  %v2050_v31 = vadd.f32 %v2048_v16, %v2046_v14  ;;  %v4389_v16 = vld [vmem:[#allocation2 + $0x60] sm:$0xff]  ;;  %v4394_v14 = vld [vmem:[%s6402_s2 + $0x28] sm:$0xff] }
  0xb6   :  { %v4257_v3 = vpop.permute.xlu0 %379  ;;  %6926 = vst [vmem:[#allocation82_spill] sm:$0xff] %v4389_v16 }
  0xb7   :  { %6909 = vst [vmem:[#allocation25_spill] sm:$0xff] %v4257_v3 }
  0xb8   :  { %747 = vperm.xlu1 %3300, %v3419_v8   ;;  %v4280_v27 = vpop.permute.xlu1 %439  ;;  %v2065_v8 = vadd.f32 %v2063_v4, %v2057_v48  ;;  %v6914_v48 = vmov 0  }
  0xb9   :  { %6910 = vst [vmem:[#allocation75_spill] sm:$0xff] %v4280_v27  ;;  %3338 = vset.pattern.permute.xlu0 %v6911_v51  ;;  %v2071_v27 = vmul.f32 %v4265_v1, %v4283_v29  ;;  %v2263_v51 = vmul.f32 %v4275_v23, %v4283_v29 }
  0xba   :  { %571 = vperm.xlu0 %3338, %v4290_v36   ;;  %v4293_v62 = vpop.permute.xlu0 %1354 }
  0xbb   :  { %6913 = vst [vmem:[#allocation27_spill] sm:$0xff] %v4293_v62  ;;  %v4313_v62 = vld [vmem:[#allocation2 + $0x30] sm:$0xff] }
  0xbc   :  { %3301 = vset.pattern.permute.xlu1 %v6914_v48  ;;  %v4310_v4 = vpop.permute.xlu1 %443  ;;  %v2073_v48 = vadd.f32 %v2071_v27, %v2065_v8  ;;  %v2079_v57 = vmul.f32 %v4299_v7, %v4313_v62  ;;  %v4347_v8 = vld [vmem:[#allocation2 + $0x40] sm:$0xff] }
  0xbd   :  { %6915 = vst [vmem:[#allocation76_spill] sm:$0xff] %v4310_v4  ;;  %1295 = vperm.xlu1 %3301, %v3704_v49   ;;  %v2265_v4 = vadd.f32 %v2263_v51, %v2257_v24  ;;  %v2087_v51 = vmul.f32 %v4334_v53, %v4347_v8  ;;  %v2279_v26 = vmul.f32 %v4342_v37, %v4347_v8 }
  0xbe   :  { %583 = vperm.xlu0 %3338, %v4320_v2   ;;  %v4323_v59 = vpop.permute.xlu0 %2441  ;;  %v2081_v24 = vadd.f32 %v2079_v57, %v2073_v48  ;;  %v4371_v57 = vld [vmem:[#allocation2 + $0x50] sm:$0xff] }
  0xbf   :  { %6918 = vst [vmem:[#allocation77_spill] sm:$0xff] %v4323_v59  ;;  %v2271_v59 = vmul.f32 %v4307_v63, %v4313_v62  ;;  %6923 = vst [vmem:[#allocation80_spill] sm:$0xff] %v4371_v57  ;;  %v2095_v21 = vmul.f32 %v4356_v6, %v4371_v57 }
  0xc0   :  { %v2089_v17 = vadd.f32 %v2087_v51, %v2081_v24  ;;  %v4402_v24 = vld [vmem:[%s6402_s2 + $0x48] sm:$0xff]  ;;  %v4406_v51 = vmul.f32 %v2050_v31, %v3874_v54  ;;  %v4423_v31 = vrot.slane %v4220_v38, %v3937_v0 }
  0xc1   :  { %1305 = vperm.xlu1 %3301, %v4328_v20   ;;  %v4345_v27 = vpop.permute.xlu1 %463  ;;  %v2273_v10 = vadd.f32 %v2271_v59, %v2265_v4  ;;  %v2242_v59 = vadd.f32 %v2240_v42, %v2238_v60  ;;  %6928 = vst [vmem:[#allocation84_spill] sm:$0xff] %v4402_v24 }
  0xc2   :  { %6919 = vst [vmem:[#allocation78_spill] sm:$0xff] %v4345_v27  ;;  %1546 = vperm.xlu0 %3338, %v3704_v49   ;;  %v4366_v49 = vrot.slane %v4220_v38, %v3918_v44  ;;  %v2097_v42 = vadd.f32 %v2095_v21, %v2089_v17  ;;  %v4425_v17 = vld [vmem:[#allocation2 + $0x70] sm:$0xff]  ;;  %v4483_v9 = vrot.slane %v4406_v51, %v3879_v61 }
  0xc3   :  { %v4360_v47 = vpop.permute.xlu0 %403  ;;  %v2281_v18 = vadd.f32 %v2279_v26, %v2273_v10  ;;  %v2103_v10 = vmul.f32 %v4378_v30, %v4389_v16  ;;  %v4412_v26 = vrot.slane %v4214_v15, %v3937_v0  ;;  %6930 = vst [vmem:[#allocation86_spill] sm:$0xff] %v4425_v17  ;;  %v6932_v15 = vmov 10  }
  0xc4   :  { %6921 = vst [vmem:[#allocation31_spill] sm:$0xff] %v4360_v47  ;;  %v4386_v47 = vrot.slane %v4220_v38, %v3928_v35  ;;  %v4440_v38 = vld [vmem:[%s6402_s2 + $0x8] sm:$0xff]  ;;  %6938 = vst [vmem:[#allocation93_spill] sm:$0xff] %v4483_v9 }
  0xc5   :  { %1310 = vperm.xlu1 %3301, %v3717_v12   ;;  %v4369_v48 = vpop.permute.xlu1 %467 }
  0xc6   :  { %6922 = vst [vmem:[#allocation79_spill] sm:$0xff] %v4369_v48  ;;  %1558 = vperm.xlu0 %3338, %v3717_v12   ;;  %v2287_v48 = vmul.f32 %v4366_v49, %v4371_v57  ;;  %v6925_v12 = vmov 1   ;;  %v2295_v27 = vmul.f32 %v4386_v47, %v4389_v16  ;;  %v4502_v16 = vld [vmem:[#allocation2 + $0xa0] sm:$0xff]  ;;  %v4527_v57 = vld [vmem:[#allocation2 + $0xb0] sm:$0xff] }
  0xc7   :  { %v4380_v4 = vpop.permute.xlu0 %415  ;;  %6942 = vst [vmem:[#allocation97_spill] sm:$0xff] %v4502_v16  ;;  %6948 = vst [vmem:[#allocation103_spill] sm:$0xff] %v4527_v57 }
  0xc8   :  { %6924 = vst [vmem:[#allocation81_spill] sm:$0xff] %v4380_v4  ;;  %v2289_v4 = vadd.f32 %v2287_v48, %v2281_v18  ;;  %v4435_v18 = vrot.slane %v4406_v51, %v3872_v34 }
  0xc9   :  { %3302 = vset.pattern.permute.xlu1 %v6925_v12 }
  0xca   :  { %1326 = vperm.xlu1 %3302, %v4394_v14   ;;  %v4397_v60 = vpop.permute.xlu1 %487  ;;  %2637 = vperm.xlu0 %3338, %v4402_v24  }
  0xcb   :  { %6927 = vst [vmem:[#allocation83_spill] sm:$0xff] %v4397_v60  ;;  %v4414_v12 = vpop.permute.xlu0 %1378  ;;  %v4417_v60 = vmul.f32 %v2242_v59, %v3874_v54  ;;  %v2111_v54 = vmul.f32 %v4412_v26, %v4425_v17  ;;  %v2297_v59 = vadd.f32 %v2295_v27, %v2289_v4  ;;  %v4460_v27 = vrot.slane %v4406_v51, %v3876_v58  ;;  %v4465_v4 = vld [vmem:[%s6402_s2 + $0x20] sm:$0xff] }
  0xcc   :  { %6929 = vst [vmem:[#allocation85_spill] sm:$0xff] %v4414_v12  ;;  %v2105_v12 = vadd.f32 %v2103_v10, %v2097_v42  ;;  %v2303_v42 = vmul.f32 %v4423_v31, %v4425_v17 }
  0xcd   :  { %v4449_v10 = vrot.slane %v4417_v60, %v3872_v34 }
  0xce   :  { %1330 = vperm.xlu1 %3302, %v4328_v20   ;;  %v4428_v21 = vpop.permute.xlu1 %495  ;;  %3340 = vset.pattern.permute.xlu0 %v6932_v15  ;;  %v2113_v11 = vadd.f32 %v2111_v54, %v2105_v12  ;;  %v4474_v54 = vrot.slane %v4417_v60, %v3876_v58 }
  0xcf   :  { %6931 = vst [vmem:[#allocation87_spill] sm:$0xff] %v4428_v21  ;;  %603 = vperm.xlu0 %3340, %v4440_v38   ;;  %v4443_v48 = vpop.permute.xlu0 %1390  ;;  %v4451_v21 = vld [vmem:[#allocation2 + $0x80] sm:$0xff] }
  0xd0   :  { %6933 = vst [vmem:[#allocation88_spill] sm:$0xff] %v4443_v48  ;;  %6934 = vst [vmem:[#allocation89_spill] sm:$0xff] %v4451_v21  ;;  %v2119_v40 = vmul.f32 %v4435_v18, %v4451_v21  ;;  %v2311_v12 = vmul.f32 %v4449_v10, %v4451_v21 }
  0xd2   :  { %3303 = vset.pattern.permute.xlu1 %v6826_v50  ;;  %v4454_v15 = vpop.permute.xlu1 %499  ;;  %v2305_v50 = vadd.f32 %v2303_v42, %v2297_v59  ;;  %v2121_v17 = vadd.f32 %v2119_v40, %v2113_v11  ;;  %v4494_v11 = vrot.slane %v4417_v60, %v3879_v61  ;;  %v4499_v40 = vld [vmem:[%s6402_s2 + $0x40] sm:$0xff] }
  0xd3   :  { %6935 = vst [vmem:[#allocation90_spill] sm:$0xff] %v4454_v15  ;;  %1350 = vperm.xlu1 %3303, %v4465_v4   ;;  %v4468_v48 = vpop.permute.xlu0 %2465  ;;  %1578 = vperm.xlu0 %3340, %v4394_v14   ;;  %v4477_v15 = vld [vmem:[#allocation2 + $0x90] sm:$0xff] }
  0xd4   :  { %6936 = vst [vmem:[#allocation91_spill] sm:$0xff] %v4468_v48  ;;  %6937 = vst [vmem:[#allocation92_spill] sm:$0xff] %v4477_v15  ;;  %v2127_v22 = vmul.f32 %v4460_v27, %v4477_v15  ;;  %v2313_v48 = vadd.f32 %v2311_v12, %v2305_v50  ;;  %v2319_v21 = vmul.f32 %v4474_v54, %v4477_v15 }
  0xd5   :  { %6941 = vst [vmem:[#allocation96_spill] sm:$0xff] %v4494_v11  ;;  %v2135_v50 = vmul.f32 %v4483_v9, %v4502_v16  ;;  %v4508_v12 = vrot.slane %v4406_v51, %v3886_v19 }
  0xd6   :  { %v2321_v3 = vadd.f32 %v2319_v21, %v2313_v48  ;;  %v4533_v21 = vrot.slane %v4406_v51, %v3902_v13 }
  0xd7   :  { %1358 = vperm.xlu1 %3303, %v4328_v20   ;;  %v4486_v59 = vpop.permute.xlu1 %519  ;;  %v4488_v42 = vpop.permute.xlu0 %2477  ;;  %2661 = vperm.xlu0 %3340, %v4499_v40   ;;  %6943 = vst [vmem:[#allocation98_spill] sm:$0xff] %v4508_v12  ;;  %v2143_v9 = vmul.f32 %v4508_v12, %v4527_v57  ;;  %v4549_v12 = vld [vmem:[#allocation2 + $0xc0] sm:$0xff] }
  0xd8   :  { %6939 = vst [vmem:[#allocation94_spill] sm:$0xff] %v4486_v59  ;;  %6940 = vst [vmem:[#allocation95_spill] sm:$0xff] %v4488_v42  ;;  %v2129_v59 = vadd.f32 %v2127_v22, %v2121_v17  ;;  %v4513_v42 = vld [vmem:[%s6402_s2 + $0x38] sm:$0xff]  ;;  %v2327_v22 = vmul.f32 %v4494_v11, %v4502_v16  ;;  %v4522_v17 = vrot.slane %v4417_v60, %v3886_v19  ;;  %v6962_v11 = vmov 4  }
  0xd9   :  { %6944 = vst [vmem:[#allocation99_spill] sm:$0xff] %v4513_v42  ;;  %6949 = vst [vmem:[#allocation104_spill] sm:$0xff] %v4533_v21  ;;  %v4540_v16 = vrot.slane %v4417_v60, %v3902_v13 }
  0xda   :  { %6946 = vst [vmem:[#allocation101_spill] sm:$0xff] %v4522_v17  ;;  %v2137_v32 = vadd.f32 %v2135_v50, %v2129_v59  ;;  %v2329_v48 = vadd.f32 %v2327_v22, %v2321_v3  ;;  %6954 = vst [vmem:[#allocation108_spill] sm:$0xff] %v4549_v12  ;;  %v2151_v3 = vmul.f32 %v4533_v21, %v4549_v12  ;;  %v4569_v21 = vld [vmem:[#allocation2 + $0xd0] sm:$0xff] }
  0xdb   :  { %1362 = vperm.xlu1 %3303, %v4513_v42   ;;  %v4516_v15 = vpop.permute.xlu1 %523  ;;  %2669 = vperm.xlu0 %3340, %v4053_v25   ;;  %6950 = vst [vmem:[#allocation105_spill] sm:$0xff] %v4540_v16  ;;  %v4555_v22 = vrot.slane %v4406_v51, %v3918_v44  ;;  %6959 = vst [vmem:[#allocation113_spill] sm:$0xff] %v4569_v21 }
  0xdc   :  { %6945 = vst [vmem:[#allocation100_spill] sm:$0xff] %v4516_v15  ;;  %v4525_v56 = vpop.permute.xlu0 %435  ;;  %v2335_v15 = vmul.f32 %v4522_v17, %v4527_v57 }
  0xdd   :  { %6947 = vst [vmem:[#allocation102_spill] sm:$0xff] %v4525_v56  ;;  %v6951_v56 = vmov 11   ;;  %6955 = vst [vmem:[#allocation109_spill] sm:$0xff] %v4555_v22 }
  0xde   :  { %v2337_v57 = vadd.f32 %v2335_v15, %v2329_v48 }
  0xdf   :  { %3304 = vset.pattern.permute.xlu1 %v6827_v39  ;;  %3345 = vset.pattern.permute.xlu0 %v6951_v56  ;;  %v2145_v39 = vadd.f32 %v2143_v9, %v2137_v32  ;;  %v2343_v56 = vmul.f32 %v4540_v16, %v4549_v12  ;;  %v2159_v9 = vmul.f32 %v4555_v22, %v4569_v21  ;;  %v4585_v16 = vld [vmem:[#allocation2 + $0x18] sm:$0xff] }
  0xe0   :  { %1382 = vperm.xlu1 %3304, %v4394_v14   ;;  %v4544_v59 = vpop.permute.xlu1 %543  ;;  %v4546_v50 = vpop.permute.xlu0 %1410  ;;  %627 = vperm.xlu0 %3345, %v4290_v36   ;;  %v4575_v32 = vrot.slane %v4406_v51, %v3928_v35 }
  0xe1   :  { %6952 = vst [vmem:[#allocation106_spill] sm:$0xff] %v4544_v59  ;;  %6953 = vst [vmem:[#allocation107_spill] sm:$0xff] %v4546_v50  ;;  %v4561_v59 = vrot.slane %v4417_v60, %v3918_v44  ;;  %v2153_v15 = vadd.f32 %v2151_v3, %v2145_v39  ;;  %v2345_v48 = vadd.f32 %v2343_v56, %v2337_v57  ;;  %v4598_v3 = vld [vmem:[#allocation2 + $0xe0] sm:$0xff] }
  0xe2   :  { %6960 = vst [vmem:[#allocation114_spill] sm:$0xff] %v4575_v32  ;;  %v2064_v57 = vmul.f32 %v4233_v28, %v4585_v16  ;;  %6965 = vst [vmem:[#allocation118_spill] sm:$0xff] %v4598_v3 }
  0xe3   :  { %6956 = vst [vmem:[#allocation110_spill] sm:$0xff] %v4561_v59  ;;  %v2351_v12 = vmul.f32 %v4561_v59, %v4569_v21  ;;  %v2167_v21 = vmul.f32 %v4575_v32, %v4598_v3 }
  0xe4   :  { %1386 = vperm.xlu1 %3304, %v4328_v20   ;;  %v4564_v50 = vpop.permute.xlu1 %551  ;;  %v4566_v17 = vpop.permute.xlu0 %2497  ;;  %639 = vperm.xlu0 %3345, %v4320_v2  }
  0xe5   :  { %6957 = vst [vmem:[#allocation111_spill] sm:$0xff] %v4564_v50  ;;  %6958 = vst [vmem:[#allocation112_spill] sm:$0xff] %v4566_v17  ;;  %v4581_v50 = vrot.slane %v4417_v60, %v3928_v35  ;;  %v4583_v17 = vld [vmem:[#allocation2 + $0x8] sm:$0xff]  ;;  %v2353_v59 = vadd.f32 %v2351_v12, %v2345_v48  ;;  %v2072_v12 = vmul.f32 %v4265_v1, %v4612_v33 }
  0xe6   :  { %v2058_v56 = vmul.f32 %v4229_v5, %v4583_v17  ;;  %v4610_v5 = vrot.slane %v4417_v60, %v3937_v0 }
  0xe7   :  { %6961 = vst [vmem:[#allocation115_spill] sm:$0xff] %v4581_v50 }
  0xe8   :  { %3305 = vset.pattern.permute.xlu1 %v6962_v11  ;;  %v4588_v22 = vpop.permute.xlu1 %555  ;;  %1602 = vperm.xlu0 %3345, %v4465_v4   ;;  %v4604_v11 = vrot.slane %v4406_v51, %v3937_v0  ;;  %6966 = vst [vmem:[#allocation119_spill] sm:$0xff] %v4610_v5  ;;  %v2066_v51 = vadd.f32 %v2064_v57, %v2058_v56 }
  0xe9   :  { %6963 = vst [vmem:[#allocation116_spill] sm:$0xff] %v4588_v22  ;;  %1406 = vperm.xlu1 %3305, %v4465_v4   ;;  %v4592_v39 = vpop.permute.xlu0 %459  ;;  %v2161_v22 = vadd.f32 %v2159_v9, %v2153_v15  ;;  %v4622_v9 = vld [vmem:[#allocation2 + $0xf0] sm:$0xff] }
  0xea   :  { %6964 = vst [vmem:[#allocation117_spill] sm:$0xff] %v4592_v39  ;;  %v2359_v39 = vmul.f32 %v4581_v50, %v4598_v3  ;;  %6970 = vst [vmem:[#allocation123_spill] sm:$0xff] %v4622_v9  ;;  %v2175_v60 = vmul.f32 %v4604_v11, %v4622_v9  ;;  %v2367_v3 = vmul.f32 %v4610_v5, %v4622_v9  ;;  %v4628_v50 = vld [vmem:[#allocation2 + $0x38] sm:$0xff]  ;;  %v6977_v9 = vmov 12  }
  0xeb   :  { %v2169_v15 = vadd.f32 %v2167_v21, %v2161_v22  ;;  %6971 = vst [vmem:[#allocation124_spill] sm:$0xff] %v4628_v50  ;;  %v2074_v1 = vadd.f32 %v2072_v12, %v2066_v51  ;;  %v2080_v21 = vmul.f32 %v4299_v7, %v4628_v50  ;;  %v4662_v12 = vld [vmem:[#allocation2 + $0x58] sm:$0xff] }
  0xec   :  { %1614 = vperm.xlu0 %3345, %v4513_v42   ;;  %v2361_v48 = vadd.f32 %v2359_v39, %v2353_v59  ;;  %v4642_v39 = vld [vmem:[#allocation2 + $0x48] sm:$0xff]  ;;  %6983 = vst [vmem:[#allocation134_spill] sm:$0xff] %v4662_v12 }
  0xed   :  { %1414 = vperm.xlu1 %3305, %v4328_v20   ;;  %v4616_v28 = vpop.permute.xlu1 %575  ;;  %v4618_v32 = vpop.permute.xlu0 %471  ;;  %v4638_v22 = vadd.f32 %v2175_v60, %v2169_v15  ;;  %6976 = vst [vmem:[#allocation129_spill] sm:$0xff] %v4642_v39  ;;  %v2082_v5 = vadd.f32 %v2080_v21, %v2074_v1 }
  0xee   :  { %6968 = vst [vmem:[#allocation121_spill] sm:$0xff] %v4616_v28  ;;  %6969 = vst [vmem:[#allocation122_spill] sm:$0xff] %v4618_v32  ;;  %v4640_v59 = vadd.f32 %v2367_v3, %v2361_v48  ;;  %v6978_v28 = vmov 5  }
  0xef   :  { %6974 = vst [vmem:[#allocation127_spill] sm:$0xff] %v4638_v22  ;;  %v4656_v3 = vrot.slane %v4638_v22, %v3918_v44 }
  0xf0   :  { %2693 = vperm.xlu0 %3345, %v4402_v24   ;;  %6975 = vst [vmem:[#allocation128_spill] sm:$0xff] %v4640_v59  ;;  %v4660_v51 = vrot.slane %v4640_v59, %v3918_v44 }
  0xf1   :  { %1418 = vperm.xlu1 %3305, %v4513_v42   ;;  %v4632_v56 = vpop.permute.xlu1 %579  ;;  %v4634_v57 = vpop.permute.xlu0 %1434  ;;  %6981 = vst [vmem:[#allocation132_spill] sm:$0xff] %v4656_v3 }
  0xf2   :  { %6972 = vst [vmem:[#allocation125_spill] sm:$0xff] %v4632_v56  ;;  %6973 = vst [vmem:[#allocation126_spill] sm:$0xff] %v4634_v57  ;;  %v2088_v56 = vmul.f32 %v4334_v53, %v4642_v39  ;;  %v2096_v53 = vmul.f32 %v4356_v6, %v4662_v12  ;;  %v2256_v6 = vmul.f32 %v4244_v43, %v4585_v16 }
  0xf3   :  { %6982 = vst [vmem:[#allocation133_spill] sm:$0xff] %v4660_v51 }
  0xf4   :  { %3347 = vset.pattern.permute.xlu0 %v6977_v9  ;;  %v2090_v60 = vadd.f32 %v2088_v56, %v2082_v5  ;;  %v2264_v5 = vmul.f32 %v4275_v23, %v4612_v33  ;;  %v6988_v56 = vld [vmem:[#allocation35_spill] sm:$0xff]  ;;  %v2272_v23 = vmul.f32 %v4307_v63, %v4628_v50 }
  0xf5   :  { %3306 = vset.pattern.permute.xlu1 %v6978_v28  ;;  %v4646_v32 = vpop.permute.xlu0 %1446  ;;  %659 = vperm.xlu0 %3347, %v4440_v38   ;;  %v2250_v28 = vmul.f32 %v4240_v55, %v4583_v17  ;;  %v6990_v55 = vmov 6  }
  0xf6   :  { %6979 = vst [vmem:[#allocation130_spill] sm:$0xff] %v4646_v32  ;;  %1438 = vperm.xlu1 %3306, %v4394_v14   ;;  %v4652_v7 = vpop.permute.xlu1 %599  ;;  %v4678_v32 = vld [vmem:[#allocation2 + $0x68] sm:$0xff]  ;;  %v2098_v57 = vadd.f32 %v2096_v53, %v2090_v60  ;;  %v4699_v60 = vld [vmem:[#allocation2 + $0x78] sm:$0xff]  ;;  %v2280_v53 = vmul.f32 %v4342_v37, %v4642_v39  ;;  %v2288_v37 = vmul.f32 %v4366_v49, %v4662_v12 }
  0xf7   :  { %6980 = vst [vmem:[#allocation131_spill] sm:$0xff] %v4652_v7  ;;  %6987 = vst [vmem:[#allocation138_spill] sm:$0xff] %v4678_v32  ;;  %v4705_v7 = vrot.slane %v4250_v41, %v3872_v34  ;;  %v4733_v49 = vrot.slane %v4252_v45, %v3872_v34  ;;  %v7001_v12 = vld [vmem:[#allocation40_spill] sm:$0xff] }
  0xf8   :  { %6992 = vst [vmem:[#allocation140_spill] sm:$0xff] %v4699_v60 }
  0xf9   :  { %v2522_v15 = vpop.permute.xlu0 %2521  ;;  %1634 = vperm.xlu0 %3347, %v4394_v14  }
  0xfa   :  { %1442 = vperm.xlu1 %3306, %v4328_v20   ;;  %v4668_v48 = vpop.permute.xlu1 %607  ;;  %v4671_v1 = vmul.f32 %v2522_v15, %v4656_v3  ;;  %v4674_v21 = vmul.f32 %v4660_v51, %v2522_v15  ;;  %v2104_v3 = vmul.f32 %v4378_v30, %v4678_v32  ;;  %v6989_v15 = vld [vmem:[#allocation37_spill] sm:$0xff] }
  0xfb   :  { %6984 = vst [vmem:[#allocation135_spill] sm:$0xff] %v4668_v48  ;;  %v1026_v48 = vmul.f32 %v6988_v56, %v4250_v41  ;;  %v1032_v51 = vmul.f32 %v6989_v15, %v4252_v45  ;;  %v7003_v56 = vmov 13  }
  0xfc   :  { %6985 = vst [vmem:[#allocation136_spill] sm:$0xff] %v4671_v1  ;;  %6986 = vst [vmem:[#allocation137_spill] sm:$0xff] %v4674_v21  ;;  %v2258_v1 = vadd.f32 %v2256_v6, %v2250_v28  ;;  %v6993_v6 = vld [vmem:[#allocation38_spill] sm:$0xff] }
  0xfd   :  { %2717 = vperm.xlu0 %3347, %v4499_v40   ;;  %v1034_v28 = vadd.f32 %v1032_v51, %v1026_v48  ;;  %v1040_v63 = vmul.f32 %v6993_v6, %v4283_v29  ;;  %v4725_v51 = vrot.slane %v4638_v22, %v3928_v35  ;;  %v4737_v48 = vrot.slane %v4250_v41, %v3876_v58 }
  0xfe   :  { %3307 = vset.pattern.permute.xlu1 %v6990_v55  ;;  %v4692_v21 = vpop.permute.xlu1 %611  ;;  %v4694_v43 = vpop.permute.xlu0 %491  ;;  %v2266_v30 = vadd.f32 %v2264_v5, %v2258_v1  ;;  %v2106_v55 = vadd.f32 %v2104_v3, %v2098_v57  ;;  %v6995_v5 = vld [vmem:[#allocation17_spill] sm:$0xff]  ;;  %v6996_v57 = vld [vmem:[#allocation48_spill] sm:$0xff]  ;;  %v1048_v6 = vmul.f32 %v7001_v12, %v4313_v62 }
  0xff   :  { %6991 = vst [vmem:[#allocation139_spill] sm:$0xff] %v4692_v21  ;;  %1462 = vperm.xlu1 %3307, %v4465_v4   ;;  %v2112_v21 = vmul.f32 %v4412_v26, %v4699_v60  ;;  %v1162_v39 = vmul.f32 %v6995_v5, %v4250_v41  ;;  %v1168_v3 = vmul.f32 %v6996_v57, %v4252_v45  ;;  %6998 = vst [vmem:[#allocation143_spill] sm:$0xff] %v4725_v51  ;;  %v7002_v5 = vld [vmem:[#allocation49_spill] sm:$0xff] }
 0x100   :  { %v2274_v1 = vadd.f32 %v2272_v23, %v2266_v30  ;;  %v4739_v23 = vld [vmem:[#allocation2 + $0x88] sm:$0xff]  ;;  %v1042_v57 = vadd.f32 %v1040_v63, %v1034_v28  ;;  %v1176_v15 = vmul.f32 %v7002_v5, %v4283_v29  ;;  %v4768_v29 = vrot.slane %v4250_v41, %v3879_v61 }
 0x101   :  { %2725 = vperm.xlu0 %3347, %v4053_v25   ;;  %v4729_v25 = vrot.slane %v4640_v59, %v3928_v35  ;;  %7000 = vst [vmem:[#allocation145_spill] sm:$0xff] %v4739_v23  ;;  %v2114_v33 = vadd.f32 %v2112_v21, %v2106_v55  ;;  %v2120_v9 = vmul.f32 %v4435_v18, %v4739_v23 }
 0x102   :  { %v4712_v50 = vpop.permute.xlu0 %1466  ;;  %v2282_v30 = vadd.f32 %v2280_v53, %v2274_v1  ;;  %v2312_v63 = vmul.f32 %v4449_v10, %v4739_v23 }
 0x103   :  { %6994 = vst [vmem:[#allocation141_spill] sm:$0xff] %v4712_v50  ;;  %1470 = vperm.xlu1 %3307, %v4328_v20   ;;  %v4721_v26 = vpop.permute.xlu1 %631  ;;  %6999 = vst [vmem:[#allocation144_spill] sm:$0xff] %v4729_v25  ;;  %v4745_v50 = vrot.slane %v4252_v45, %v3876_v58 }
 0x104   :  { %6997 = vst [vmem:[#allocation142_spill] sm:$0xff] %v4721_v26  ;;  %v2296_v26 = vmul.f32 %v4386_v47, %v4678_v32  ;;  %v2290_v1 = vadd.f32 %v2288_v37, %v2282_v30  ;;  %v2304_v47 = vmul.f32 %v4423_v31, %v4699_v60  ;;  %v1170_v32 = vadd.f32 %v1168_v3, %v1162_v39  ;;  %v4774_v39 = vld [vmem:[#allocation2 + $0x98] sm:$0xff] }
 0x105   :  { %3352 = vset.pattern.permute.xlu0 %v7003_v56  ;;  %v4772_v31 = vrot.slane %v4252_v45, %v3879_v61  ;;  %7007 = vst [vmem:[#allocation149_spill] sm:$0xff] %v4774_v39  ;;  %v7008_v37 = vld [vmem:[#allocation42_spill] sm:$0xff]  ;;  %v4782_v30 = vrot.slane %v4250_v41, %v3886_v19  ;;  %v2320_v10 = vmul.f32 %v4474_v54, %v4774_v39 }
 0x106   :  { %v2550_v53 = vpop.permute.xlu0 %2549  ;;  %683 = vperm.xlu0 %3352, %v4290_v36   ;;  %v2298_v28 = vadd.f32 %v2296_v26, %v2290_v1  ;;  %v1056_v3 = vmul.f32 %v7008_v37, %v4347_v8  ;;  %v1178_v1 = vadd.f32 %v1176_v15, %v1170_v32  ;;  %v4808_v54 = vrot.slane %v4252_v45, %v3902_v13 }
 0x107   :  { %1474 = vperm.xlu1 %3307, %v4513_v42   ;;  %v4758_v21 = vpop.permute.xlu1 %635  ;;  %v4761_v18 = vmul.f32 %v2550_v53, %v4725_v51  ;;  %v4764_v55 = vmul.f32 %v4729_v25, %v2550_v53  ;;  %v2122_v53 = vadd.f32 %v2120_v9, %v2114_v33  ;;  %v4813_v9 = vld [vmem:[#allocation2 + $0xa8] sm:$0xff]  ;;  %v4861_v61 = vrot.slane %v4252_v45, %v3928_v35 }
 0x108   :  { %7004 = vst [vmem:[#allocation146_spill] sm:$0xff] %v4758_v21  ;;  %v1184_v21 = vmul.f32 %v4001_v46, %v4313_v62  ;;  %v2306_v26 = vadd.f32 %v2304_v47, %v2298_v28  ;;  %v4804_v62 = vrot.slane %v4250_v41, %v3902_v13  ;;  %7012 = vst [vmem:[#allocation153_spill] sm:$0xff] %v4813_v9  ;;  %v7014_v47 = vld [vmem:[#allocation93_spill] sm:$0xff]  ;;  %v7017_v13 = vld [vmem:[#allocation80_spill] sm:$0xff] }
 0x109   :  { %7005 = vst [vmem:[#allocation147_spill] sm:$0xff] %v4761_v18  ;;  %7006 = vst [vmem:[#allocation148_spill] sm:$0xff] %v4764_v55  ;;  %v2128_v55 = vmul.f32 %v4460_v27, %v4774_v39  ;;  %v1050_v18 = vadd.f32 %v1048_v6, %v1042_v57  ;;  %v4800_v27 = vrot.slane %v4252_v45, %v3886_v19  ;;  %v7018_v39 = vld [vmem:[#allocation44_spill] sm:$0xff]  ;;  %v7027_v46 = vld [vmem:[#allocation82_spill] sm:$0xff] }
 0x10a   :  { %v2558_v60 = vpop.permute.xlu0 %2557  ;;  %695 = vperm.xlu0 %3352, %v4320_v2   ;;  %v2314_v15 = vadd.f32 %v2312_v63, %v2306_v26  ;;  %v2136_v28 = vmul.f32 %v7014_v47, %v4813_v9  ;;  %v7019_v47 = vld [vmem:[#allocation19_spill] sm:$0xff] }
 0x10b   :  { %3308 = vset.pattern.permute.xlu1 %v6869_v52  ;;  %v4793_v23 = vmul.f32 %v2558_v60, %v4725_v51  ;;  %v4796_v33 = vmul.f32 %v4729_v25, %v2558_v60  ;;  %v7013_v60 = vld [vmem:[#allocation51_spill] sm:$0xff]  ;;  %v2130_v57 = vadd.f32 %v2128_v55, %v2122_v53  ;;  %v7015_v25 = vld [vmem:[#allocation96_spill] sm:$0xff]  ;;  %v1058_v26 = vadd.f32 %v1056_v3, %v1050_v18  ;;  %v4849_v18 = vld [vmem:[#allocation2 + $0xb8] sm:$0xff] }
 0x10c   :  { %1494 = vperm.xlu1 %3308, %v4394_v14   ;;  %v4811_v32 = vpop.permute.xlu1 %655  ;;  %v339_v6 = vmul.f32 %v7013_v60, %v4705_v7  ;;  %v2328_v51 = vmul.f32 %v7015_v25, %v4813_v9  ;;  %v2322_v63 = vadd.f32 %v2320_v10, %v2314_v15  ;;  %v1064_v55 = vmul.f32 %v7018_v39, %v7017_v13  ;;  %v7023_v10 = vld [vmem:[#allocation98_spill] sm:$0xff] }
 0x10d   :  { %7009 = vst [vmem:[#allocation150_spill] sm:$0xff] %v4793_v23  ;;  %7010 = vst [vmem:[#allocation151_spill] sm:$0xff] %v4796_v33  ;;  %v791_v33 = vmul.f32 %v4733_v49, %v7013_v60  ;;  %v7016_v23 = vld [vmem:[#allocation54_spill] sm:$0xff]  ;;  %v1186_v53 = vadd.f32 %v1184_v21, %v1178_v1  ;;  %v1192_v19 = vmul.f32 %v7019_v47, %v4347_v8  ;;  %v7020_v60 = vld [vmem:[#allocation25_spill] sm:$0xff] }
 0x10e   :  { %7011 = vst [vmem:[#allocation152_spill] sm:$0xff] %v4811_v32  ;;  %v363_v52 = vmul.f32 %v7016_v23, %v4737_v48  ;;  %v799_v32 = vmul.f32 %v4745_v50, %v7016_v23  ;;  %1658 = vperm.xlu0 %3352, %v4465_v4   ;;  %v391_v9 = vmul.f32 %v7020_v60, %v4768_v29  ;;  %7022 = vst [vmem:[#allocation93_spill] sm:$0xff] %v4849_v18 }
 0x10f   :  { %v4832_v25 = vpop.permute.xlu0 %515  ;;  %v811_v56 = vmul.f32 %v4772_v31, %v7020_v60  ;;  %v4840_v23 = vrot.slane %v4250_v41, %v3918_v44  ;;  %v4844_v21 = vrot.slane %v4252_v45, %v3918_v44  ;;  %v2138_v3 = vadd.f32 %v2136_v28, %v2130_v57  ;;  %v7024_v60 = vld [vmem:[#allocation101_spill] sm:$0xff]  ;;  %7026 = vst [vmem:[#allocation54_spill] sm:$0xff] %v4861_v61  ;;  %v7028_v57 = vld [vmem:[#allocation46_spill] sm:$0xff] }
 0x110   :  { %1498 = vperm.xlu1 %3308, %v4328_v20   ;;  %v4847_v8 = vpop.permute.xlu1 %663  ;;  %v2144_v1 = vmul.f32 %v7023_v10, %v4849_v18  ;;  %v2330_v15 = vadd.f32 %v2328_v51, %v2322_v63  ;;  %v2336_v39 = vmul.f32 %v7024_v60, %v4849_v18  ;;  %v367_v47 = vadd.f32 %v363_v52, %v339_v6  ;;  %v7029_v51 = vld [vmem:[#allocation21_spill] sm:$0xff]  ;;  %v7038_v10 = vld [vmem:[#allocation71_spill] sm:$0xff]  ;;  %v7044_v18 = vld [vmem:[#allocation16_spill] sm:$0xff] }
 0x111   :  { %7021 = vst [vmem:[#allocation51_spill] sm:$0xff] %v4847_v8  ;;  %v803_v37 = vadd.f32 %v799_v32, %v791_v33  ;;  %v4857_v44 = vrot.slane %v4250_v41, %v3928_v35  ;;  %v1066_v8 = vadd.f32 %v1064_v55, %v1058_v26  ;;  %v1072_v28 = vmul.f32 %v7028_v57, %v7027_v46 }
 0x112   :  { %v1194_v12 = vadd.f32 %v1192_v19, %v1186_v53  ;;  %v1200_v63 = vmul.f32 %v7029_v51, %v7017_v13  ;;  %1670 = vperm.xlu0 %3352, %v4513_v42   ;;  %v395_v33 = vadd.f32 %v391_v9, %v367_v47  ;;  %v4872_v6 = vrot.slane %v4250_v41, %v3937_v0  ;;  %v4881_v53 = vld [vmem:[#allocation2 + $0xc8] sm:$0xff]  ;;  %v7037_v41 = vld [vmem:[#allocation105_spill] sm:$0xff] }
 0x113   :  { %7025 = vst [vmem:[#allocation96_spill] sm:$0xff] %v4857_v44  ;;  %v4868_v52 = vpop.permute.xlu0 %527  ;;  %v815_v32 = vadd.f32 %v811_v56, %v803_v37  ;;  %v4876_v26 = vrot.slane %v4252_v45, %v3937_v0  ;;  %v7033_v55 = vmov 8   ;;  %7035 = vst [vmem:[#allocation82_spill] sm:$0xff] %v4881_v53  ;;  %v2146_v13 = vadd.f32 %v2144_v1, %v2138_v3  ;;  %v7036_v9 = vld [vmem:[#allocation104_spill] sm:$0xff]  ;;  %v7040_v1 = vld [vmem:[#allocation86_spill] sm:$0xff] }
 0x114   :  { %7030 = vst [vmem:[#allocation80_spill] sm:$0xff] %v4868_v52  ;;  %7031 = vst [vmem:[#allocation25_spill] sm:$0xff] %v4872_v6  ;;  %3309 = vset.pattern.permute.xlu1 %v7033_v55  ;;  %v4879_v19 = vpop.permute.xlu1 %667  ;;  %v2152_v56 = vmul.f32 %v7036_v9, %v4881_v53  ;;  %v2338_v37 = vadd.f32 %v2336_v39, %v2330_v15  ;;  %v2344_v47 = vmul.f32 %v7037_v41, %v4881_v53  ;;  %v7039_v55 = vld [vmem:[#allocation102_spill] sm:$0xff]  ;;  %v7041_v9 = vld [vmem:[#allocation47_spill] sm:$0xff] }
 0x115   :  { %7032 = vst [vmem:[#allocation98_spill] sm:$0xff] %v4876_v26  ;;  %7034 = vst [vmem:[#allocation101_spill] sm:$0xff] %v4879_v19  ;;  %1518 = vperm.xlu1 %3309, %v4465_v4   ;;  %v419_v45 = vmul.f32 %v7038_v10, %v4782_v30  ;;  %v823_v60 = vmul.f32 %v4800_v27, %v7038_v10  ;;  %v447_v19 = vmul.f32 %v7039_v55, %v4804_v62  ;;  %v7042_v41 = vld [vmem:[#allocation50_spill] sm:$0xff] }
 0x116   :  { %v835_v35 = vmul.f32 %v4808_v54, %v7039_v55  ;;  %v4896_v3 = vadd.f32 %v1072_v28, %v1066_v8  ;;  %v4900_v39 = vmul.f32 %v7041_v9, %v7040_v1  ;;  %v4902_v15 = vadd.f32 %v1200_v63, %v1194_v12  ;;  %2749 = vperm.xlu0 %3352, %v4402_v24   ;;  %v4915_v9 = vld [vmem:[#allocation2 + $0xd8] sm:$0xff]  ;;  %v7049_v24 = vld [vmem:[#allocation60_spill] sm:$0xff] }
 0x117   :  { %v4906_v53 = vmul.f32 %v7042_v41, %v7027_v46  ;;  %v4909_v10 = vpop.permute.xlu0 %1490  ;;  %v338_v57 = vmul.f32 %v7044_v18, %v4705_v7  ;;  %v790_v8 = vmul.f32 %v4733_v49, %v7044_v18  ;;  %v423_v28 = vadd.f32 %v419_v45, %v395_v33  ;;  %7045 = vst [vmem:[#allocation105_spill] sm:$0xff] %v4915_v9  ;;  %v7047_v63 = vld [vmem:[#allocation109_spill] sm:$0xff]  ;;  %v7050_v45 = vld [vmem:[#allocation62_spill] sm:$0xff] }
 0x118   :  { %7043 = vst [vmem:[#allocation104_spill] sm:$0xff] %v4909_v10  ;;  %v827_v55 = vadd.f32 %v823_v60, %v815_v32  ;;  %v2154_v46 = vadd.f32 %v2152_v56, %v2146_v13  ;;  %v2160_v41 = vmul.f32 %v7047_v63, %v4915_v9  ;;  %v2346_v51 = vadd.f32 %v2344_v47, %v2338_v37  ;;  %v7048_v10 = vld [vmem:[#allocation110_spill] sm:$0xff] }
 0x119   :  { %1526 = vperm.xlu1 %3309, %v4328_v20   ;;  %v4918_v12 = vpop.permute.xlu1 %687  ;;  %v2352_v5 = vmul.f32 %v7048_v10, %v4915_v9  ;;  %v362_v58 = vmul.f32 %v7049_v24, %v4737_v48  ;;  %v798_v18 = vmul.f32 %v4745_v50, %v7049_v24  ;;  %v451_v33 = vadd.f32 %v447_v19, %v423_v28  ;;  %v7051_v56 = vld [vmem:[#allocation78_spill] sm:$0xff] }
 0x11a   :  { %7046 = vst [vmem:[#allocation71_spill] sm:$0xff] %v4918_v12  ;;  %v839_v32 = vadd.f32 %v835_v35, %v827_v55  ;;  %v390_v60 = vmul.f32 %v7050_v45, %v4768_v29  ;;  %v810_v13 = vmul.f32 %v4772_v31, %v7050_v45  ;;  %v475_v37 = vmul.f32 %v7051_v56, %v4840_v23  ;;  %v4952_v55 = vld [vmem:[#allocation2 + $0xe8] sm:$0xff]  ;;  %v7058_v12 = vld [vmem:[#allocation114_spill] sm:$0xff] }
 0x11b   :  { %v847_v47 = vmul.f32 %v4844_v21, %v7051_v56  ;;  %v7052_v10 = vmov 14   ;;  %v4937_v63 = vpop.permute.xlu0 %1502  ;;  %v503_v24 = vmul.f32 %v4694_v43, %v4857_v44  ;;  %v859_v35 = vmul.f32 %v4861_v61, %v4694_v43  ;;  %7056 = vst [vmem:[#allocation109_spill] sm:$0xff] %v4952_v55 }
 0x11c   :  { %3354 = vset.pattern.permute.xlu0 %v7052_v10  ;;  %7053 = vst [vmem:[#allocation102_spill] sm:$0xff] %v4937_v63  ;;  %v4946_v19 = vrot.slane %v4638_v22, %v3937_v0  ;;  %v4950_v28 = vrot.slane %v4640_v59, %v3937_v0  ;;  %v2162_v56 = vadd.f32 %v2160_v41, %v2154_v46  ;;  %v7060_v59 = vld [vmem:[#allocation18_spill] sm:$0xff] }
 0x11d   :  { %715 = vperm.xlu0 %3354, %v4440_v38   ;;  %1530 = vperm.xlu1 %3309, %v4513_v42   ;;  %v4955_v45 = vpop.permute.xlu1 %691  ;;  %v2168_v43 = vmul.f32 %v7058_v12, %v4952_v55  ;;  %v2354_v63 = vadd.f32 %v2352_v5, %v2346_v51  ;;  %v7059_v38 = vld [vmem:[#allocation115_spill] sm:$0xff]  ;;  %v366_v22 = vadd.f32 %v362_v58, %v338_v57 }
 0x11e   :  { %7054 = vst [vmem:[#allocation86_spill] sm:$0xff] %v4946_v19  ;;  %7055 = vst [vmem:[#allocation16_spill] sm:$0xff] %v4950_v28  ;;  %v2360_v9 = vmul.f32 %v7059_v38, %v4952_v55  ;;  %v802_v10 = vadd.f32 %v798_v18, %v790_v8  ;;  %v479_v52 = vadd.f32 %v475_v37, %v451_v33  ;;  %v4976_v8 = vld [vmem:[#allocation2 + $0xf8] sm:$0xff] }
 0x11f   :  { %7057 = vst [vmem:[#allocation110_spill] sm:$0xff] %v4955_v45  ;;  %v851_v2 = vadd.f32 %v847_v47, %v839_v32  ;;  %v341_v0 = vmul.f32 %v7060_v59, %v4705_v7  ;;  %v793_v42 = vmul.f32 %v4733_v49, %v7060_v59  ;;  %v7061_v45 = vld [vmem:[#allocation64_spill] sm:$0xff]  ;;  %v2582_v5 = vpop.permute.xlu0 %2581  ;;  %7064 = vst [vmem:[#allocation78_spill] sm:$0xff] %v4976_v8  ;;  %v7065_v59 = vmov 9  }
 0x120   :  { %v365_v41 = vmul.f32 %v7061_v45, %v4737_v48  ;;  %v801_v12 = vmul.f32 %v4745_v50, %v7061_v45  ;;  %v507_v51 = vadd.f32 %v503_v24, %v479_v52  ;;  %v4971_v58 = vmul.f32 %v2582_v5, %v4946_v19  ;;  %v7066_v52 = vld [vmem:[#allocation119_spill] sm:$0xff]  ;;  %v7067_v24 = vld [vmem:[#allocation94_spill] sm:$0xff] }
 0x121   :  { %v863_v46 = vadd.f32 %v859_v35, %v851_v2  ;;  %1690 = vperm.xlu0 %3354, %v4394_v14   ;;  %v4974_v57 = vmul.f32 %v4950_v28, %v2582_v5  ;;  %3310 = vset.pattern.permute.xlu1 %v7065_v59  ;;  %v2170_v18 = vadd.f32 %v2168_v43, %v2162_v56  ;;  %v7069_v56 = vld [vmem:[#allocation31_spill] sm:$0xff]  ;;  %v7075_v59 = vld [vmem:[#allocation81_spill] sm:$0xff] }
 0x122   :  { %7062 = vst [vmem:[#allocation60_spill] sm:$0xff] %v4971_v58  ;;  %v2176_v33 = vmul.f32 %v4604_v11, %v4976_v8  ;;  %v2362_v32 = vadd.f32 %v2360_v9, %v2354_v63  ;;  %v2368_v2 = vmul.f32 %v7066_v52, %v4976_v8  ;;  %v394_v37 = vadd.f32 %v390_v60, %v366_v22  ;;  %v4988_v38 = vpop.permute.xlu1 %711  ;;  %v7072_v60 = vld [vmem:[#allocation70_spill] sm:$0xff] }
 0x123   :  { %7063 = vst [vmem:[#allocation62_spill] sm:$0xff] %v4974_v57  ;;  %v814_v47 = vadd.f32 %v810_v13, %v802_v10  ;;  %v531_v35 = vmul.f32 %v7067_v24, %v4872_v6  ;;  %v871_v45 = vmul.f32 %v4876_v26, %v7067_v24  ;;  %1550 = vperm.xlu1 %3310, %v4394_v14   ;;  %7068 = vst [vmem:[#allocation114_spill] sm:$0xff] %v4988_v38 }
 0x124   :  { %v418_v43 = vmul.f32 %v7069_v56, %v4782_v30  ;;  %v822_v11 = vmul.f32 %v4800_v27, %v7069_v56  ;;  %v4996_v22 = vrot.slane %v4583_v17, %v3872_v34  ;;  %v5000_v9 = vrot.slane %v4585_v16, %v3872_v34  ;;  %v548_v63 = vpop.permute.xlu0 %547 }
 0x125   :  { %v393_v13 = vmul.f32 %v7072_v60, %v4768_v29  ;;  %v813_v10 = vmul.f32 %v4772_v31, %v7072_v60  ;;  %2773 = vperm.xlu0 %3354, %v4499_v40   ;;  %v535_v5 = vadd.f32 %v531_v35, %v507_v51  ;;  %v875_v52 = vadd.f32 %v871_v45, %v863_v46 }
 0x126   :  { %7070 = vst [vmem:[#allocation115_spill] sm:$0xff] %v4996_v22  ;;  %7071 = vst [vmem:[#allocation18_spill] sm:$0xff] %v5000_v9  ;;  %v559_v24 = vmul.f32 %v548_v63, %v4996_v22  ;;  %v883_v56 = vmul.f32 %v5000_v9, %v548_v63  ;;  %v5009_v28 = vadd.f32 %v2176_v33, %v2170_v18  ;;  %v5018_v40 = vpop.permute.xlu1 %719  ;;  %v7084_v63 = vmov 10  }
 0x127   :  { %v5011_v19 = vadd.f32 %v2368_v2, %v2362_v32  ;;  %v369_v57 = vadd.f32 %v365_v41, %v341_v0  ;;  %v805_v58 = vadd.f32 %v801_v12, %v793_v42  ;;  %v421_v38 = vmul.f32 %v7075_v59, %v4782_v30  ;;  %1554 = vperm.xlu1 %3310, %v4328_v20   ;;  %v7077_v0 = vld [vmem:[#allocation23_spill] sm:$0xff]  ;;  %v5031_v12 = vld [vmem:[%s6402_s2 + $0x50] sm:$0xff] }
 0x128   :  { %7073 = vst [vmem:[#allocation64_spill] sm:$0xff] %v5009_v28  ;;  %v825_v60 = vmul.f32 %v4800_v27, %v7075_v59  ;;  %7076 = vst [vmem:[#allocation94_spill] sm:$0xff] %v5018_v40  ;;  %v422_v51 = vadd.f32 %v418_v43, %v394_v37  ;;  %v826_v46 = vadd.f32 %v822_v11, %v814_v47  ;;  %v5034_v59 = vpop.permute.xlu0 %1522  ;;  %v7080_v2 = vld [vmem:[#allocation117_spill] sm:$0xff]  ;;  %v7083_v43 = vld [vmem:[#allocation52_spill] sm:$0xff] }
 0x129   :  { %7074 = vst [vmem:[#allocation119_spill] sm:$0xff] %v5011_v19  ;;  %v5020_v35 = vadd.f32 %v559_v24, %v535_v5  ;;  %v5022_v18 = vadd.f32 %v883_v56, %v875_v52  ;;  %v397_v33 = vadd.f32 %v393_v13, %v369_v57  ;;  %v817_v32 = vadd.f32 %v813_v10, %v805_v58  ;;  %v7086_v52 = vld [vmem:[#allocation89_spill] sm:$0xff] }
 0x12a   :  { %v446_v42 = vmul.f32 %v7077_v0, %v4804_v62  ;;  %v834_v41 = vmul.f32 %v4808_v54, %v7077_v0  ;;  %7078 = vst [vmem:[#allocation31_spill] sm:$0xff] %v5031_v12  ;;  %2781 = vperm.xlu0 %3354, %v5031_v12   ;;  %7079 = vst [vmem:[#allocation70_spill] sm:$0xff] %v5034_v59  ;;  %v474_v37 = vmul.f32 %v7080_v2, %v4840_v23  ;;  %v5053_v5 = vpop.permute.xlu1 %723  ;;  %v7087_v24 = vld [vmem:[#allocation13_spill] sm:$0xff]  ;;  %v7088_v0 = vld [vmem:[#allocation55_spill] sm:$0xff] }
 0x12b   :  { %v846_v58 = vmul.f32 %v4844_v21, %v7080_v2  ;;  %v5042_v57 = vrot.slane %v5009_v28, %v3872_v34  ;;  %v5046_v47 = vrot.slane %v5011_v19, %v3872_v34  ;;  %v1210_v45 = vadd.f32 %v4906_v53, %v4902_v15  ;;  %3311 = vset.pattern.permute.xlu1 %v7084_v63  ;;  %v7089_v53 = vld [vmem:[#allocation76_spill] sm:$0xff] }
 0x12c   :  { %v1216_v11 = vmul.f32 %v7083_v43, %v7040_v1  ;;  %v425_v13 = vadd.f32 %v421_v38, %v397_v33  ;;  %v829_v10 = vadd.f32 %v825_v60, %v817_v32  ;;  %7085 = vst [vmem:[#allocation117_spill] sm:$0xff] %v5053_v5  ;;  %v1088_v56 = vmul.f32 %v7087_v24, %v7086_v52  ;;  %v7090_v38 = vld [vmem:[#allocation122_spill] sm:$0xff]  ;;  %v2606_v63 = vpop.permute.xlu0 %2605 }
 0x12d   :  { %7081 = vst [vmem:[#allocation81_spill] sm:$0xff] %v5042_v57  ;;  %7082 = vst [vmem:[#allocation23_spill] sm:$0xff] %v5046_v47  ;;  %v1224_v2 = vmul.f32 %v7088_v0, %v7086_v52  ;;  %v450_v40 = vadd.f32 %v446_v42, %v422_v51  ;;  %v838_v59 = vadd.f32 %v834_v41, %v826_v46  ;;  %1574 = vperm.xlu1 %3311, %v4465_v4   ;;  %v7091_v32 = vmov 15  }
 0x12e   :  { %v449_v15 = vmul.f32 %v7089_v53, %v4804_v62  ;;  %v837_v1 = vmul.f32 %v4808_v54, %v7089_v53  ;;  %v477_v60 = vmul.f32 %v7090_v38, %v4840_v23  ;;  %v849_v33 = vmul.f32 %v4844_v21, %v7090_v38  ;;  %3359 = vset.pattern.permute.xlu0 %v7091_v32  ;;  %v7094_v38 = vld [vmem:[#allocation83_spill] sm:$0xff] }
 0x12f   :  { %v478_v52 = vadd.f32 %v474_v37, %v450_v40  ;;  %v850_v51 = vadd.f32 %v846_v58, %v838_v59  ;;  %739 = vperm.xlu0 %3359, %v4290_v36   ;;  %v5071_v46 = vmul.f32 %v2606_v63, %v5042_v57  ;;  %v5074_v42 = vmul.f32 %v5046_v47, %v2606_v63  ;;  %v5087_v37 = vpop.permute.xlu1 %743 }
 0x130   :  { %v1082_v41 = vadd.f32 %v4900_v39, %v4896_v3  ;;  %v1218_v53 = vadd.f32 %v1216_v11, %v1210_v45  ;;  %v453_v5 = vadd.f32 %v449_v15, %v425_v13  ;;  %v841_v8 = vadd.f32 %v837_v1, %v829_v10  ;;  %7095 = vst [vmem:[#allocation13_spill] sm:$0xff] %v5087_v37  ;;  %v7096_v3 = vld [vmem:[#allocation92_spill] sm:$0xff]  ;;  %v7097_v39 = vld [vmem:[#allocation11_spill] sm:$0xff]  ;;  %v7098_v45 = vld [vmem:[#allocation58_spill] sm:$0xff]  ;;  %v2614_v63 = vpop.permute.xlu0 %2613 }
 0x131   :  { %7092 = vst [vmem:[#allocation52_spill] sm:$0xff] %v5071_v46  ;;  %7093 = vst [vmem:[#allocation89_spill] sm:$0xff] %v5074_v42  ;;  %v502_v55 = vmul.f32 %v7094_v38, %v4857_v44  ;;  %v858_v40 = vmul.f32 %v4861_v61, %v7094_v38  ;;  %v530_v36 = vmul.f32 %v4832_v25, %v4872_v6  ;;  %1582 = vperm.xlu1 %3311, %v4328_v20   ;;  %v7099_v38 = vld [vmem:[#allocation29_spill] sm:$0xff]  ;;  %v7102_v46 = vld [vmem:[#allocation90_spill] sm:$0xff] }
 0x132   :  { %v870_v59 = vmul.f32 %v4876_v26, %v4832_v25  ;;  %v1096_v58 = vmul.f32 %v7097_v39, %v7096_v3  ;;  %v1232_v11 = vmul.f32 %v7098_v45, %v7096_v3  ;;  %v481_v13 = vadd.f32 %v477_v60, %v453_v5  ;;  %v7103_v5 = vld [vmem:[#allocation80_spill] sm:$0xff] }
 0x133   :  { %v853_v10 = vadd.f32 %v849_v33, %v841_v8  ;;  %v506_v15 = vadd.f32 %v502_v55, %v478_v52  ;;  %v862_v1 = vadd.f32 %v858_v40, %v850_v51  ;;  %751 = vperm.xlu0 %3359, %v7099_v38   ;;  %v5095_v42 = vmul.f32 %v2614_v63, %v5042_v57  ;;  %v7104_v40 = vld [vmem:[#allocation99_spill] sm:$0xff]  ;;  %v5109_v3 = vpop.permute.xlu1 %747 }
 0x134   :  { %v5098_v25 = vmul.f32 %v5046_v47, %v2614_v63  ;;  %v505_v37 = vmul.f32 %v7102_v46, %v4857_v44  ;;  %v861_v12 = vmul.f32 %v4861_v61, %v7102_v46  ;;  %v533_v8 = vmul.f32 %v7103_v5, %v4872_v6  ;;  %7105 = vst [vmem:[#allocation122_spill] sm:$0xff] %v5109_v3  ;;  %v7106_v63 = vld [vmem:[#allocation33_spill] sm:$0xff]  ;;  %v7114_v6 = vld [vmem:[#allocation116_spill] sm:$0xff] }
 0x135   :  { %7100 = vst [vmem:[#allocation55_spill] sm:$0xff] %v5095_v42  ;;  %v873_v55 = vmul.f32 %v4876_v26, %v7103_v5  ;;  %v1090_v60 = vadd.f32 %v1088_v56, %v1082_v41  ;;  %v1226_v33 = vadd.f32 %v1224_v2, %v1218_v53  ;;  %v534_v52 = vadd.f32 %v530_v36, %v506_v15  ;;  %v7109_v5 = vld [vmem:[#allocation106_spill] sm:$0xff]  ;;  %v572_v41 = vpop.permute.xlu0 %571 }
 0x136   :  { %7101 = vst [vmem:[#allocation76_spill] sm:$0xff] %v5098_v25  ;;  %v874_v51 = vadd.f32 %v870_v59, %v862_v1  ;;  %1586 = vperm.xlu1 %3311, %v7104_v40   ;;  %v5113_v38 = vrot.slane %v4583_v17, %v7106_v63  ;;  %v5117_v46 = vrot.slane %v4585_v16, %v7106_v63  ;;  %v7110_v1 = vld [vmem:[#allocation97_spill] sm:$0xff]  ;;  %v7111_v25 = vld [vmem:[#allocation15_spill] sm:$0xff]  ;;  %v7113_v3 = vmov 11  }
 0x137   :  { %v509_v47 = vadd.f32 %v505_v37, %v481_v13  ;;  %v865_v57 = vadd.f32 %v861_v12, %v853_v10  ;;  %v558_v56 = vmul.f32 %v7109_v5, %v4996_v22  ;;  %v882_v2 = vmul.f32 %v5000_v9, %v7109_v5  ;;  %1714 = vperm.xlu0 %3359, %v4465_v4   ;;  %v7112_v12 = vld [vmem:[#allocation59_spill] sm:$0xff] }
 0x138   :  { %7107 = vst [vmem:[#allocation83_spill] sm:$0xff] %v5113_v38  ;;  %7108 = vst [vmem:[#allocation92_spill] sm:$0xff] %v5117_v46  ;;  %v586_v59 = vmul.f32 %v572_v41, %v5113_v38  ;;  %v894_v15 = vmul.f32 %v5117_v46, %v572_v41  ;;  %v1104_v42 = vmul.f32 %v7111_v25, %v7110_v1 }
 0x139   :  { %v537_v53 = vadd.f32 %v533_v8, %v509_v47  ;;  %v877_v36 = vadd.f32 %v873_v55, %v865_v57  ;;  %v1240_v37 = vmul.f32 %v7112_v12, %v7110_v1  ;;  %v562_v13 = vadd.f32 %v558_v56, %v534_v52  ;;  %v5136_v8 = vpop.permute.xlu1 %1295  ;;  %v584_v52 = vpop.permute.xlu0 %583  ;;  %v7116_v56 = vld [vmem:[#allocation53_spill] sm:$0xff] }
 0x13a   :  { %v886_v10 = vadd.f32 %v882_v2, %v874_v51  ;;  %3312 = vset.pattern.permute.xlu1 %v7113_v3  ;;  %v1098_v5 = vadd.f32 %v1096_v58, %v1090_v60  ;;  %v1234_v26 = vadd.f32 %v1232_v11, %v1226_v33  ;;  %v561_v47 = vmul.f32 %v7114_v6, %v4996_v22  ;;  %v7115_v33 = vld [vmem:[#allocation103_spill] sm:$0xff]  ;;  %v7122_v3 = vld [vmem:[#allocation84_spill] sm:$0xff] }
 0x13b   :  { %v885_v57 = vmul.f32 %v5000_v9, %v7114_v6  ;;  %1606 = vperm.xlu1 %3312, %v4394_v14   ;;  %v5138_v55 = vadd.f32 %v586_v59, %v562_v13  ;;  %1726 = vperm.xlu0 %3359, %v7104_v40   ;;  %v589_v58 = vmul.f32 %v584_v52, %v5113_v38  ;;  %v7117_v14 = vld [vmem:[#allocation61_spill] sm:$0xff]  ;;  %v7131_v9 = vld [vmem:[#allocation38_spill] sm:$0xff] }
 0x13c   :  { %v5140_v41 = vadd.f32 %v894_v15, %v886_v10  ;;  %v565_v51 = vadd.f32 %v561_v47, %v537_v53  ;;  %v897_v60 = vmul.f32 %v5117_v46, %v584_v52  ;;  %v1112_v6 = vmul.f32 %v7116_v56, %v7115_v33  ;;  %v7120_v47 = vld [vmem:[#allocation37_spill] sm:$0xff] }
 0x13d   :  { %v889_v11 = vadd.f32 %v885_v57, %v877_v36  ;;  %v1248_v2 = vmul.f32 %v7117_v14, %v7115_v33  ;;  %v1106_v1 = vadd.f32 %v1104_v42, %v1098_v5  ;;  %v1242_v59 = vadd.f32 %v1240_v37, %v1234_v26  ;;  %v5154_v53 = vpop.permute.xlu1 %1305  ;;  %v7119_v36 = vld [vmem:[#allocation35_spill] sm:$0xff]  ;;  %v5160_v52 = vpop.permute.xlu0 %1546  ;;  %v7123_v26 = vld [vmem:[#allocation17_spill] sm:$0xff]  ;;  %v7124_v37 = vld [vmem:[#allocation48_spill] sm:$0xff] }
 0x13e   :  { %v5149_v13 = vadd.f32 %v589_v58, %v565_v51  ;;  %7118 = vst [vmem:[#allocation11_spill] sm:$0xff] %v5154_v53  ;;  %v1027_v10 = vmul.f32 %v7119_v36, %v4583_v17  ;;  %v1033_v57 = vmul.f32 %v7120_v47, %v4585_v16  ;;  %7121 = vst [vmem:[#allocation58_spill] sm:$0xff] %v5160_v52  ;;  %v7126_v58 = vld [vmem:[#allocation22_spill] sm:$0xff]  ;;  %v7127_v33 = vld [vmem:[#allocation63_spill] sm:$0xff]  ;;  %v7128_v53 = vmov 12  }
 0x13f   :  { %v5151_v15 = vadd.f32 %v897_v60, %v889_v11  ;;  %1610 = vperm.xlu1 %3312, %v4328_v20   ;;  %2805 = vperm.xlu0 %3359, %v7122_v3   ;;  %v1163_v42 = vmul.f32 %v7123_v26, %v4583_v17  ;;  %v1169_v5 = vmul.f32 %v7124_v37, %v4585_v16  ;;  %v7125_v20 = vld [vmem:[#allocation108_spill] sm:$0xff] }
 0x140   :  { %v1114_v51 = vadd.f32 %v1112_v6, %v1106_v1  ;;  %v1120_v11 = vmul.f32 %v7126_v58, %v7125_v20  ;;  %v1250_v60 = vadd.f32 %v1248_v2, %v1242_v59  ;;  %v1256_v36 = vmul.f32 %v7127_v33, %v7125_v20  ;;  %v7130_v3 = vld [vmem:[#allocation120_spill] sm:$0xff]  ;;  %v5182_v6 = vld [vmem:[%s6402_s2 + $0x58] sm:$0xff]  ;;  %v7148_v33 = vld [vmem:[#allocation67_spill] sm:$0xff] }
 0x141   :  { %v5172_v47 = vpop.permute.xlu1 %1310  ;;  %v1035_v52 = vadd.f32 %v1033_v57, %v1027_v10  ;;  %v1041_v22 = vmul.f32 %v7131_v9, %v7130_v3  ;;  %v5177_v26 = vpop.permute.xlu0 %1558  ;;  %7133 = vst [vmem:[#allocation80_spill] sm:$0xff] %v5182_v6  ;;  %v1171_v2 = vadd.f32 %v1169_v5, %v1163_v42  ;;  %v7134_v1 = vld [vmem:[#allocation49_spill] sm:$0xff]  ;;  %v5189_v10 = vrot.slane %v5009_v28, %v7106_v63  ;;  %v7138_v37 = vld [vmem:[#allocation24_spill] sm:$0xff] }
 0x142   :  { %7129 = vst [vmem:[#allocation29_spill] sm:$0xff] %v5172_v47  ;;  %7132 = vst [vmem:[#allocation90_spill] sm:$0xff] %v5177_v26  ;;  %v1177_v59 = vmul.f32 %v7134_v1, %v7130_v3  ;;  %v1122_v9 = vadd.f32 %v1120_v11, %v1114_v51  ;;  %v7137_v57 = vld [vmem:[#allocation113_spill] sm:$0xff]  ;;  %v7140_v5 = vld [vmem:[#allocation124_spill] sm:$0xff] }
 0x143   :  { %3313 = vset.pattern.permute.xlu1 %v7128_v53  ;;  %2813 = vperm.xlu0 %3359, %v5182_v6   ;;  %7135 = vst [vmem:[#allocation99_spill] sm:$0xff] %v5189_v10  ;;  %v1128_v20 = vmul.f32 %v7138_v37, %v7137_v57  ;;  %v1258_v53 = vadd.f32 %v1256_v36, %v1250_v60  ;;  %v7139_v26 = vld [vmem:[#allocation65_spill] sm:$0xff]  ;;  %v7141_v47 = vld [vmem:[#allocation40_spill] sm:$0xff] }
 0x144   :  { %1630 = vperm.xlu1 %3313, %v4465_v4   ;;  %v5193_v4 = vrot.slane %v5011_v19, %v7106_v63  ;;  %v1264_v6 = vmul.f32 %v7139_v26, %v7137_v57  ;;  %v1043_v42 = vadd.f32 %v1041_v22, %v1035_v52  ;;  %v1049_v3 = vmul.f32 %v7141_v47, %v7140_v5  ;;  %v5204_v1 = vld [vmem:[%s6402_s2 + $0x30] sm:$0xff]  ;;  %v7146_v47 = vld [vmem:[#allocation118_spill] sm:$0xff] }
 0x145   :  { %v5207_v61 = vpop.permute.xlu1 %1326  ;;  %v2638_v51 = vpop.permute.xlu0 %2637  ;;  %v1179_v11 = vadd.f32 %v1177_v59, %v1171_v2  ;;  %v7143_v60 = vld [vmem:[#allocation12_spill] sm:$0xff]  ;;  %v1130_v52 = vadd.f32 %v1128_v20, %v1122_v9  ;;  %v7147_v26 = vld [vmem:[#allocation26_spill] sm:$0xff]  ;;  %v1272_v58 = vmul.f32 %v7148_v33, %v7146_v47  ;;  %v7152_v20 = vld [vmem:[#allocation129_spill] sm:$0xff] }
 0x146   :  { %7136 = vst [vmem:[#allocation106_spill] sm:$0xff] %v5193_v4  ;;  %7142 = vst [vmem:[#allocation97_spill] sm:$0xff] %v5207_v61  ;;  %v1185_v36 = vmul.f32 %v7143_v60, %v7140_v5  ;;  %v5212_v57 = vmul.f32 %v2638_v51, %v5189_v10  ;;  %v5215_v22 = vmul.f32 %v5193_v4, %v2638_v51  ;;  %v7149_v61 = vld [vmem:[#allocation121_spill] sm:$0xff]  ;;  %v7150_v5 = vld [vmem:[#allocation34_spill] sm:$0xff] }
 0x147   :  { %v1136_v37 = vmul.f32 %v7147_v26, %v7146_v47  ;;  %v1266_v44 = vadd.f32 %v1264_v6, %v1258_v53  ;;  %v587_v2 = vmul.f32 %v7149_v61, %v5113_v38  ;;  %v895_v59 = vmul.f32 %v5117_v46, %v7149_v61  ;;  %v7153_v51 = vld [vmem:[#allocation42_spill] sm:$0xff]  ;;  %v7154_v10 = vld [vmem:[#allocation19_spill] sm:$0xff] }
 0x148   :  { %1638 = vperm.xlu1 %3313, %v5204_v1   ;;  %7144 = vst [vmem:[#allocation15_spill] sm:$0xff] %v5212_v57  ;;  %7145 = vst [vmem:[#allocation59_spill] sm:$0xff] %v5215_v22  ;;  %v5227_v60 = vrot.slane %v4583_v17, %v7150_v5  ;;  %v5231_v9 = vrot.slane %v4585_v16, %v7150_v5  ;;  %v1051_v6 = vadd.f32 %v1049_v3, %v1043_v42  ;;  %v7157_v42 = vmov 13  }
 0x149   :  { %v5234_v53 = vpop.permute.xlu1 %1330  ;;  %v1057_v47 = vmul.f32 %v7153_v51, %v7152_v20  ;;  %v1187_v4 = vadd.f32 %v1185_v36, %v1179_v11  ;;  %v1193_v61 = vmul.f32 %v7154_v10, %v7152_v20  ;;  %v591_v57 = vadd.f32 %v587_v2, %v5020_v35  ;;  %v7158_v11 = vld [vmem:[#allocation134_spill] sm:$0xff]  ;;  %v7159_v36 = vld [vmem:[#allocation44_spill] sm:$0xff]  ;;  %v7160_v20 = vld [vmem:[#allocation21_spill] sm:$0xff] }
 0x14a   :  { %7151 = vst [vmem:[#allocation116_spill] sm:$0xff] %v5234_v53  ;;  %v604_v22 = vpop.permute.xlu0 %603  ;;  %v899_v38 = vadd.f32 %v895_v59, %v5022_v18  ;;  %v1065_v51 = vmul.f32 %v7159_v36, %v7158_v11  ;;  %v1201_v35 = vmul.f32 %v7160_v20, %v7158_v11  ;;  %v5256_v18 = vld [vmem:[%s6402_s2 + $0x28] sm:$0xff]  ;;  %v1274_v2 = vadd.f32 %v1272_v58, %v1266_v44  ;;  %v7163_v59 = vld [vmem:[#allocation69_spill] sm:$0xff]  ;;  %v7167_v36 = vld [vmem:[#allocation138_spill] sm:$0xff] }
 0x14b   :  { %v615_v46 = vmul.f32 %v604_v22, %v5227_v60  ;;  %v907_v33 = vmul.f32 %v5231_v9, %v604_v22  ;;  %v1059_v3 = vadd.f32 %v1057_v47, %v1051_v6  ;;  %v1195_v10 = vadd.f32 %v1193_v61, %v1187_v4  ;;  %v7169_v44 = vld [vmem:[#allocation50_spill] sm:$0xff] }
 0x14c   :  { %1642 = vperm.xlu1 %3313, %v7104_v40   ;;  %v5269_v47 = vrot.slane %v5009_v28, %v7150_v5  ;;  %v5273_v61 = vrot.slane %v5011_v19, %v7150_v5  ;;  %v1209_v58 = vmul.f32 %v7169_v44, %v7167_v36 }
 0x14d   :  { %v5244_v40 = vadd.f32 %v615_v46, %v591_v57  ;;  %v5246_v53 = vadd.f32 %v907_v33, %v899_v38  ;;  %v1138_v38 = vadd.f32 %v1136_v37, %v1130_v52  ;;  %v7161_v33 = vld [vmem:[#allocation123_spill] sm:$0xff]  ;;  %v7162_v57 = vld [vmem:[#allocation66_spill] sm:$0xff]  ;;  %v1067_v11 = vadd.f32 %v1065_v51, %v1059_v3 }
 0x14e   :  { %v5259_v46 = vpop.permute.xlu1 %1350  ;;  %v1144_v22 = vmul.f32 %v7162_v57, %v7161_v33  ;;  %v1280_v4 = vmul.f32 %v7163_v59, %v7161_v33  ;;  %v5265_v6 = vpop.permute.xlu0 %1578  ;;  %7165 = vst [vmem:[#allocation35_spill] sm:$0xff] %v5269_v47  ;;  %7166 = vst [vmem:[#allocation37_spill] sm:$0xff] %v5273_v61  ;;  %v7168_v37 = vld [vmem:[#allocation46_spill] sm:$0xff]  ;;  %v1203_v20 = vadd.f32 %v1201_v35, %v1195_v10 }
 0x14f   :  { %7155 = vst [vmem:[#allocation103_spill] sm:$0xff] %v5244_v40  ;;  %7156 = vst [vmem:[#allocation53_spill] sm:$0xff] %v5246_v53  ;;  %v1073_v52 = vmul.f32 %v7168_v37, %v7167_v36  ;;  %v7171_v53 = vld [vmem:[#allocation57_spill] sm:$0xff]  ;;  %v7174_v36 = vld [vmem:[#allocation14_spill] sm:$0xff] }
 0x150   :  { %3314 = vset.pattern.permute.xlu1 %v7157_v42  ;;  %7164 = vst [vmem:[#allocation61_spill] sm:$0xff] %v5265_v6  ;;  %v5282_v42 = vadd.f32 %v1144_v22, %v1138_v38  ;;  %v5284_v6 = vadd.f32 %v1280_v4, %v1274_v2  ;;  %v364_v40 = vmul.f32 %v7171_v53, %v4737_v48  ;;  %v7175_v22 = vld [vmem:[#allocation28_spill] sm:$0xff]  ;;  %v7177_v4 = vld [vmem:[#allocation47_spill] sm:$0xff] }
 0x151   :  { %1662 = vperm.xlu1 %3314, %v5256_v18   ;;  %v800_v3 = vmul.f32 %v4745_v50, %v7171_v53  ;;  %v340_v37 = vmul.f32 %v7174_v36, %v4705_v7  ;;  %v792_v38 = vmul.f32 %v4733_v49, %v7174_v36  ;;  %v392_v2 = vmul.f32 %v7175_v22, %v4768_v29  ;;  %v7176_v53 = vld [vmem:[#allocation140_spill] sm:$0xff] }
 0x152   :  { %v5280_v33 = vpop.permute.xlu1 %1358  ;;  %v2662_v51 = vpop.permute.xlu0 %2661  ;;  %v812_v48 = vmul.f32 %v4772_v31, %v7175_v22  ;;  %v1075_v50 = vadd.f32 %v1073_v52, %v1067_v11  ;;  %v1081_v44 = vmul.f32 %v7177_v4, %v7176_v53  ;;  %v5313_v49 = vrot.slane %v5282_v42, %v3872_v34  ;;  %v3432_v52 = vld [vmem:[%s6402_s2 + $0x20] sm:$0xff] }
 0x153   :  { %7170 = vst [vmem:[#allocation84_spill] sm:$0xff] %v5280_v33  ;;  %v5291_v10 = vmul.f32 %v2662_v51, %v5269_v47  ;;  %v5294_v35 = vmul.f32 %v5273_v61, %v2662_v51  ;;  %v1217_v51 = vmul.f32 %v7083_v43, %v7176_v53  ;;  %v5317_v29 = vrot.slane %v5284_v6, %v3872_v34 }
 0x154   :  { %v368_v31 = vadd.f32 %v364_v40, %v340_v37  ;;  %v804_v11 = vadd.f32 %v800_v3, %v792_v38  ;;  %v7184_v3 = vld [vmem:[#allocation20_spill] sm:$0xff]  ;;  %v1083_v4 = vadd.f32 %v1081_v44, %v1075_v50  ;;  %v7192_v50 = vld [vmem:[#allocation73_spill] sm:$0xff] }
 0x155   :  { %1666 = vperm.xlu1 %3314, %v5204_v1   ;;  %7172 = vst [vmem:[#allocation17_spill] sm:$0xff] %v5291_v10  ;;  %7173 = vst [vmem:[#allocation48_spill] sm:$0xff] %v5294_v35  ;;  %v1211_v10 = vadd.f32 %v1209_v58, %v1203_v20  ;;  %v7178_v35 = vmov 14   ;;  %v5324_v20 = vrot.slane %v5282_v42, %v7106_v63  ;;  %v5328_v58 = vrot.slane %v5284_v6, %v7106_v63  ;;  %v7193_v63 = vld [vmem:[#allocation149_spill] sm:$0xff] }
 0x156   :  { %v5309_v7 = vpop.permute.xlu1 %1362  ;;  %7179 = vst [vmem:[#allocation108_spill] sm:$0xff] %v5317_v29  ;;  %v2670_v43 = vpop.permute.xlu0 %2669  ;;  %v5338_v37 = vmul.f32 %v7184_v3, %v5313_v49  ;;  %v5342_v38 = vmul.f32 %v5317_v29, %v7184_v3  ;;  %v396_v22 = vadd.f32 %v392_v2, %v368_v31  ;;  %v816_v53 = vadd.f32 %v812_v48, %v804_v11 }
 0x157   :  { %7180 = vst [vmem:[#allocation120_spill] sm:$0xff] %v5324_v20  ;;  %7181 = vst [vmem:[#allocation38_spill] sm:$0xff] %v5328_v58  ;;  %v5331_v36 = vmul.f32 %v2670_v43, %v5269_v47  ;;  %v5334_v40 = vmul.f32 %v5273_v61, %v2670_v43  ;;  %v1219_v33 = vadd.f32 %v1217_v51, %v1211_v10  ;;  %v7186_v43 = vld [vmem:[#allocation131_spill] sm:$0xff] }
 0x158   :  { %v614_v61 = vmul.f32 %v7186_v43, %v5227_v60  ;;  %v824_v44 = vmul.f32 %v4800_v27, %v7192_v50 }
 0x159   :  { %3315 = vset.pattern.permute.xlu1 %v7178_v35  ;;  %7182 = vst [vmem:[#allocation49_spill] sm:$0xff] %v5331_v36  ;;  %7183 = vst [vmem:[#allocation113_spill] sm:$0xff] %v5334_v40  ;;  %v906_v40 = vmul.f32 %v5231_v9, %v7186_v43  ;;  %v7187_v36 = vld [vmem:[#allocation36_spill] sm:$0xff] }
 0x15a   :  { %1686 = vperm.xlu1 %3315, %v3432_v52   ;;  %v7185_v52 = vld [vmem:[#allocation145_spill] sm:$0xff]  ;;  %v5354_v3 = vrot.slane %v4583_v17, %v7187_v36  ;;  %v5358_v2 = vrot.slane %v4585_v16, %v7187_v36  ;;  %v420_v17 = vmul.f32 %v7192_v50, %v4782_v30  ;;  %v618_v51 = vadd.f32 %v614_v61, %v5138_v55 }
 0x15b   :  { %v1089_v35 = vmul.f32 %v7087_v24, %v7185_v52  ;;  %v1225_v47 = vmul.f32 %v7088_v0, %v7185_v52  ;;  %v5361_v24 = vpop.permute.xlu1 %1382  ;;  %v7191_v0 = vld [vmem:[#allocation68_spill] sm:$0xff]  ;;  %v628_v16 = vpop.permute.xlu0 %627  ;;  %v910_v11 = vadd.f32 %v906_v40, %v5140_v41  ;;  %v1233_v30 = vmul.f32 %v7098_v45, %v7193_v63  ;;  %v3433_v41 = vld [vmem:[%s6402_s2 + $0x38] sm:$0xff]  ;;  %v7198_v45 = vld [vmem:[#allocation75_spill] sm:$0xff] }
 0x15c   :  { %7188 = vst [vmem:[#allocation124_spill] sm:$0xff] %v5354_v3  ;;  %7189 = vst [vmem:[#allocation40_spill] sm:$0xff] %v5358_v2  ;;  %v5365_v10 = vmul.f32 %v7191_v0, %v5324_v20  ;;  %v5369_v48 = vmul.f32 %v5328_v58, %v7191_v0  ;;  %v642_v31 = vmul.f32 %v628_v16, %v5354_v3 }
 0x15d   :  { %7190 = vst [vmem:[#allocation12_spill] sm:$0xff] %v5361_v24  ;;  %v918_v52 = vmul.f32 %v5358_v2, %v628_v16  ;;  %v1091_v43 = vadd.f32 %v1089_v35, %v1083_v4  ;;  %v1097_v0 = vmul.f32 %v7097_v39, %v7193_v63  ;;  %v1227_v34 = vadd.f32 %v1225_v47, %v1219_v33  ;;  %v7194_v24 = vld [vmem:[#allocation139_spill] sm:$0xff] }
 0x15e   :  { %1694 = vperm.xlu1 %3315, %v5204_v1   ;;  %v617_v27 = vmul.f32 %v7194_v24, %v5227_v60  ;;  %v909_v55 = vmul.f32 %v5231_v9, %v7194_v24  ;;  %v5387_v61 = vadd.f32 %v642_v31, %v618_v51  ;;  %v424_v47 = vadd.f32 %v420_v17, %v396_v22 }
 0x15f   :  { %v5389_v50 = vadd.f32 %v918_v52, %v910_v11  ;;  %v5394_v39 = vpop.permute.xlu1 %1386  ;;  %v828_v33 = vadd.f32 %v824_v44, %v816_v53  ;;  %v448_v63 = vmul.f32 %v7198_v45, %v4804_v62  ;;  %v836_v35 = vmul.f32 %v4808_v54, %v7198_v45  ;;  %v640_v40 = vpop.permute.xlu0 %639  ;;  %v7201_v62 = vld [vmem:[#allocation153_spill] sm:$0xff]  ;;  %v7204_v11 = vld [vmem:[#allocation30_spill] sm:$0xff] }
 0x160   :  { %7195 = vst [vmem:[#allocation118_spill] sm:$0xff] %v5387_v61  ;;  %7197 = vst [vmem:[#allocation121_spill] sm:$0xff] %v5394_v39  ;;  %v621_v4 = vadd.f32 %v617_v27, %v5149_v13  ;;  %v645_v24 = vmul.f32 %v640_v40, %v5354_v3  ;;  %v913_v16 = vadd.f32 %v909_v55, %v5151_v15  ;;  %v7219_v39 = vld [vmem:[#allocation63_spill] sm:$0xff] }
 0x161   :  { %7196 = vst [vmem:[#allocation26_spill] sm:$0xff] %v5389_v50  ;;  %v921_v51 = vmul.f32 %v5358_v2, %v640_v40  ;;  %v5406_v31 = vrot.slane %v5282_v42, %v7150_v5  ;;  %v5410_v22 = vrot.slane %v5284_v6, %v7150_v5  ;;  %v1105_v54 = vmul.f32 %v7111_v25, %v7201_v62  ;;  %v7205_v25 = vld [vmem:[#allocation79_spill] sm:$0xff]  ;;  %v7222_v50 = vld [vmem:[#allocation54_spill] sm:$0xff]  ;;  %v7232_v5 = vld [vmem:[#allocation24_spill] sm:$0xff] }
 0x162   :  { %1698 = vperm.xlu1 %3315, %v3433_v41   ;;  %v1241_v13 = vmul.f32 %v7112_v12, %v7201_v62  ;;  %v1099_v53 = vadd.f32 %v1097_v0, %v1091_v43  ;;  %v1235_v17 = vadd.f32 %v1233_v30, %v1227_v34  ;;  %v5416_v44 = vadd.f32 %v645_v24, %v621_v4  ;;  %v7234_v2 = vld [vmem:[#allocation45_spill] sm:$0xff] }
 0x163   :  { %7199 = vst [vmem:[#allocation129_spill] sm:$0xff] %v5406_v31  ;;  %7200 = vst [vmem:[#allocation42_spill] sm:$0xff] %v5410_v22  ;;  %v5418_v15 = vadd.f32 %v921_v51, %v913_v16  ;;  %v5423_v52 = vmul.f32 %v7204_v11, %v5324_v20  ;;  %v5427_v27 = vmul.f32 %v5328_v58, %v7204_v11  ;;  %v5436_v43 = vpop.permute.xlu0 %1602  ;;  %v7210_v11 = vld [vmem:[#allocation41_spill] sm:$0xff] }
 0x164   :  { %7202 = vst [vmem:[#allocation19_spill] sm:$0xff] %v5416_v44  ;;  %v476_v55 = vmul.f32 %v7205_v25, %v4840_v23  ;;  %v848_v34 = vmul.f32 %v4844_v21, %v7205_v25  ;;  %v5434_v12 = vpop.permute.xlu1 %1406  ;;  %7206 = vst [vmem:[#allocation44_spill] sm:$0xff] %v5436_v43  ;;  %v452_v0 = vadd.f32 %v448_v63, %v424_v47  ;;  %v7207_v23 = vld [vmem:[#allocation27_spill] sm:$0xff] }
 0x165   :  { %7203 = vst [vmem:[#allocation134_spill] sm:$0xff] %v5418_v15  ;;  %v840_v30 = vadd.f32 %v836_v35, %v828_v33  ;;  %v5440_v41 = vrot.slane %v5282_v42, %v7187_v36  ;;  %v5444_v45 = vrot.slane %v5284_v6, %v7187_v36  ;;  %v5448_v40 = vmul.f32 %v7207_v23, %v5406_v31  ;;  %v7209_v35 = vld [vmem:[#allocation93_spill] sm:$0xff]  ;;  %v7220_v15 = vld [vmem:[#allocation96_spill] sm:$0xff]  ;;  %v7221_v44 = vld [vmem:[#allocation87_spill] sm:$0xff] }
 0x166   :  { %3316 = vset.pattern.permute.xlu1 %v7091_v32  ;;  %v5452_v21 = vmul.f32 %v5410_v22, %v7207_v23  ;;  %v1107_v63 = vadd.f32 %v1105_v54, %v1099_v53  ;;  %v1113_v4 = vmul.f32 %v7116_v56, %v7209_v35  ;;  %v1243_v24 = vadd.f32 %v1241_v13, %v1235_v17  ;;  %v7213_v56 = vld [vmem:[#allocation85_spill] sm:$0xff]  ;;  %v7218_v32 = vld [vmem:[#allocation22_spill] sm:$0xff] }
 0x167   :  { %1718 = vperm.xlu1 %3316, %v5256_v18   ;;  %v7208_v18 = vld [vmem:[#allocation39_spill] sm:$0xff]  ;;  %v1249_v16 = vmul.f32 %v7117_v14, %v7209_v35  ;;  %v480_v51 = vadd.f32 %v476_v55, %v452_v0  ;;  %v852_v62 = vadd.f32 %v848_v34, %v840_v30  ;;  %v5468_v25 = vrot.slane %v5282_v42, %v7210_v11  ;;  %v5477_v53 = vpop.permute.xlu0 %1614 }
 0x168   :  { %v5456_v47 = vrot.slane %v5282_v42, %v7208_v18  ;;  %v5460_v33 = vrot.slane %v5284_v6, %v7208_v18  ;;  %v5472_v23 = vrot.slane %v5284_v6, %v7210_v11  ;;  %v5475_v54 = vpop.permute.xlu1 %1414  ;;  %7212 = vst [vmem:[#allocation123_spill] sm:$0xff] %v5477_v53  ;;  %v1393_v13 = vmul.f32 %v7213_v56, %v5440_v41  ;;  %v7216_v34 = vld [vmem:[#allocation43_spill] sm:$0xff] }
 0x169   :  { %7211 = vst [vmem:[#allocation21_spill] sm:$0xff] %v5475_v54  ;;  %v1797_v14 = vmul.f32 %v5444_v45, %v7213_v56  ;;  %v5485_v17 = vrot.slane %v5009_v28, %v7187_v36  ;;  %v5489_v55 = vrot.slane %v5011_v19, %v7187_v36  ;;  %v5497_v0 = vrot.slane %v5284_v6, %v7216_v34  ;;  %v7217_v28 = vld [vmem:[#allocation82_spill] sm:$0xff] }
 0x16a   :  { %v1313_v30 = vmul.f32 %v5136_v8, %v5313_v49  ;;  %v1765_v35 = vmul.f32 %v5317_v29, %v5136_v8  ;;  %v1115_v56 = vadd.f32 %v1113_v4, %v1107_v63  ;;  %v1121_v54 = vmul.f32 %v7218_v32, %v7217_v28 }
 0x16b   :  { %1722 = vperm.xlu1 %3316, %v5204_v1   ;;  %7214 = vst [vmem:[#allocation66_spill] sm:$0xff] %v5485_v17  ;;  %7215 = vst [vmem:[#allocation69_spill] sm:$0xff] %v5489_v55  ;;  %v5493_v1 = vrot.slane %v5282_v42, %v7216_v34  ;;  %v1251_v19 = vadd.f32 %v1249_v16, %v1243_v24  ;;  %v1257_v53 = vmul.f32 %v7219_v39, %v7217_v28  ;;  %v7223_v63 = vmov 0   ;;  %v2694_v32 = vpop.permute.xlu0 %2693  ;;  %v7224_v24 = vld [vmem:[#allocation88_spill] sm:$0xff] }
 0x16c   :  { %v504_v43 = vmul.f32 %v7221_v44, %v7220_v15  ;;  %v860_v61 = vmul.f32 %v7222_v50, %v7221_v44  ;;  %v1365_v36 = vmul.f32 %v5259_v46, %v5406_v31  ;;  %v1785_v8 = vmul.f32 %v5410_v22, %v5259_v46  ;;  %v5516_v4 = vpop.permute.xlu1 %1418  ;;  %v5522_v39 = vld [vmem:[#allocation2 + $0x8] sm:$0xff]  ;;  %v5537_v15 = vld [vmem:[%s6402_s2 + $0x40] sm:$0xff] }
 0x16d   :  { %v5520_v28 = vmul.f32 %v7224_v24, %v5440_v41  ;;  %7225 = vst [vmem:[#allocation138_spill] sm:$0xff] %v5522_v39  ;;  %v5526_v50 = vrot.slane %v5522_v39, %v7208_v18  ;;  %v5529_v44 = vmul.f32 %v2694_v32, %v5485_v17  ;;  %v5532_v46 = vmul.f32 %v5489_v55, %v2694_v32  ;;  %v7233_v39 = vld [vmem:[#allocation65_spill] sm:$0xff] }
 0x16e   :  { %v5542_v16 = vmul.f32 %v5444_v45, %v7224_v24  ;;  %v1341_v32 = vadd.f32 %v5365_v10, %v1313_v30  ;;  %v1777_v55 = vadd.f32 %v5369_v48, %v1765_v35  ;;  %v5556_v24 = vadd.f32 %v504_v43, %v480_v51  ;;  %v7236_v10 = vld [vmem:[#allocation25_spill] sm:$0xff]  ;;  %v7237_v48 = vld [vmem:[#allocation100_spill] sm:$0xff] }
 0x16f   :  { %3317 = vset.pattern.permute.xlu1 %v7223_v63  ;;  %7226 = vst [vmem:[#allocation46_spill] sm:$0xff] %v5526_v50  ;;  %7227 = vst [vmem:[#allocation50_spill] sm:$0xff] %v5529_v44  ;;  %v5544_v63 = vld [vmem:[#allocation2 + $0x18] sm:$0xff]  ;;  %v1259_v50 = vadd.f32 %v1257_v53, %v1251_v19  ;;  %v5560_v3 = vrot.slane %v5282_v42, %v7234_v2  ;;  %v5574_v43 = vrot.slane %v5284_v6, %v7234_v2  ;;  %v7240_v42 = vld [vmem:[#allocation31_spill] sm:$0xff] }
 0x170   :  { %7228 = vst [vmem:[#allocation57_spill] sm:$0xff] %v5532_v46  ;;  %2382 = vperm.xlu1 %3317, %v5537_v15   ;;  %7229 = vst [vmem:[#allocation14_spill] sm:$0xff] %v5544_v63  ;;  %v5548_v17 = vrot.slane %v5544_v63, %v7208_v18  ;;  %v1123_v46 = vadd.f32 %v1121_v54, %v1115_v56  ;;  %v7231_v44 = vld [vmem:[#allocation105_spill] sm:$0xff]  ;;  %v1369_v18 = vadd.f32 %v1365_v36, %v1341_v32  ;;  %v5576_v51 = vpop.permute.xlu0 %659  ;;  %v7242_v53 = vld [vmem:[#allocation67_spill] sm:$0xff] }
 0x171   :  { %v1129_v34 = vmul.f32 %v7232_v5, %v7231_v44  ;;  %v1265_v11 = vmul.f32 %v7233_v39, %v7231_v44  ;;  %7235 = vst [vmem:[#allocation140_spill] sm:$0xff] %v5560_v3  ;;  %v5562_v63 = vadd.f32 %v860_v61, %v852_v62  ;;  %v5566_v54 = vmul.f32 %v7237_v48, %v7236_v10  ;;  %v7238_v5 = vld [vmem:[#allocation98_spill] sm:$0xff]  ;;  %v5579_v36 = vpop.permute.xlu1 %1438  ;;  %v7241_v61 = vld [vmem:[#allocation109_spill] sm:$0xff] }
 0x172   :  { %7230 = vst [vmem:[#allocation28_spill] sm:$0xff] %v5548_v17  ;;  %v1789_v17 = vadd.f32 %v1785_v8, %v1777_v55  ;;  %v5570_v19 = vmul.f32 %v7238_v5, %v7237_v48  ;;  %7239 = vst [vmem:[#allocation47_spill] sm:$0xff] %v5574_v43  ;;  %v1137_v62 = vmul.f32 %v7147_v26, %v7241_v61  ;;  %v7243_v8 = vld [vmem:[#allocation29_spill] sm:$0xff] }
 0x173   :  { %v1273_v55 = vmul.f32 %v7242_v53, %v7241_v61  ;;  %v1421_v30 = vmul.f32 %v5434_v12, %v5456_v47  ;;  %v1809_v35 = vmul.f32 %v5460_v33, %v5434_v12  ;;  %v1131_v6 = vadd.f32 %v1129_v34, %v1123_v46  ;;  %v7244_v32 = vld [vmem:[#allocation97_spill] sm:$0xff]  ;;  %v7245_v61 = vld [vmem:[#allocation107_spill] sm:$0xff]  ;;  %v7246_v12 = vld [vmem:[#allocation78_spill] sm:$0xff] }
 0x174   :  { %2392 = vperm.xlu1 %3317, %v7240_v42   ;;  %v1267_v56 = vadd.f32 %v1265_v11, %v1259_v50  ;;  %v1316_v39 = vmul.f32 %v7243_v8, %v5313_v49  ;;  %v1768_v44 = vmul.f32 %v5317_v29, %v7243_v8  ;;  %v1338_v26 = vmul.f32 %v7244_v32, %v5324_v20  ;;  %v7247_v46 = vld [vmem:[#allocation80_spill] sm:$0xff] }
 0x175   :  { %v1774_v10 = vmul.f32 %v5328_v58, %v7244_v32  ;;  %v1397_v48 = vadd.f32 %v1393_v13, %v1369_v18  ;;  %v1801_v5 = vadd.f32 %v1797_v14, %v1789_v17  ;;  %v5599_v53 = vmul.f32 %v7245_v61, %v5456_v47  ;;  %v5608_v8 = vpop.permute.xlu1 %1442  ;;  %v5610_v32 = vpop.permute.xlu0 %1634  ;;  %v7250_v18 = vld [vmem:[#allocation126_spill] sm:$0xff] }
 0x176   :  { %v1145_v11 = vmul.f32 %v7162_v57, %v7246_v12  ;;  %v1368_v34 = vmul.f32 %v5309_v7, %v5406_v31  ;;  %v1788_v50 = vmul.f32 %v5410_v22, %v5309_v7  ;;  %7248 = vst [vmem:[#allocation20_spill] sm:$0xff] %v5608_v8  ;;  %7249 = vst [vmem:[#allocation145_spill] sm:$0xff] %v5610_v32 }
 0x177   :  { %v1449_v13 = vmul.f32 %v7250_v18, %v5468_v25  ;;  %v1821_v14 = vmul.f32 %v5472_v23, %v7250_v18  ;;  %v1425_v17 = vadd.f32 %v1421_v30, %v1397_v48  ;;  %v1813_v57 = vadd.f32 %v1809_v35, %v1801_v5  ;;  %v7251_v18 = vld [vmem:[#allocation104_spill] sm:$0xff] }
 0x178   :  { %2397 = vperm.xlu1 %3317, %v7247_v46   ;;  %v1810_v31 = vmul.f32 %v5460_v33, %v7245_v61  ;;  %v1281_v7 = vmul.f32 %v7163_v59, %v7246_v12  ;;  %v1344_v22 = vadd.f32 %v5423_v52, %v1316_v39  ;;  %v1780_v8 = vadd.f32 %v5427_v27, %v1768_v44  ;;  %v7254_v52 = vld [vmem:[#allocation12_spill] sm:$0xff] }
 0x179   :  { %v1139_v58 = vadd.f32 %v1137_v62, %v1131_v6  ;;  %v1275_v32 = vadd.f32 %v1273_v55, %v1267_v56  ;;  %v1342_v29 = vadd.f32 %v1338_v26, %v5338_v37  ;;  %v1778_v20 = vadd.f32 %v1774_v10, %v5342_v38  ;;  %v5629_v59 = vpop.permute.xlu0 %2717  ;;  %v5638_v38 = vld [vmem:[%s6402_s2 + $0x48] sm:$0xff] }
 0x17a   :  { %v1505_v30 = vmul.f32 %v7251_v18, %v5560_v3  ;;  %v1845_v35 = vmul.f32 %v5574_v43, %v7251_v18  ;;  %v1372_v48 = vadd.f32 %v1368_v34, %v1344_v22  ;;  %v1792_v5 = vadd.f32 %v1788_v50, %v1780_v8  ;;  %7253 = vst [vmem:[#allocation131_spill] sm:$0xff] %v5629_v59  ;;  %v1463_v62 = vpop.permute.xlu1 %1462 }
 0x17b   :  { %v7252_v61 = vmov 1   ;;  %v1394_v27 = vmul.f32 %v7254_v52, %v5440_v41  ;;  %v1798_v37 = vmul.f32 %v5444_v45, %v7254_v52  ;;  %v1453_v22 = vadd.f32 %v1449_v13, %v1425_v17 }
 0x17c   :  { %3319 = vset.pattern.permute.xlu1 %v7252_v61  ;;  %v1825_v55 = vadd.f32 %v1821_v14, %v1813_v57  ;;  %v1424_v6 = vmul.f32 %v5516_v4, %v5456_v47  ;;  %v1812_v56 = vmul.f32 %v5460_v33, %v5516_v4  ;;  %v1477_v39 = vmul.f32 %v1463_v62, %v5493_v1  ;;  %v7256_v4 = vld [vmem:[#allocation130_spill] sm:$0xff]  ;;  %v7258_v61 = vld [vmem:[#allocation111_spill] sm:$0xff] }
 0x17d   :  { %2413 = vperm.xlu1 %3319, %v5638_v38   ;;  %v1833_v44 = vmul.f32 %v5497_v0, %v1463_v62  ;;  %v5647_v26 = vadd.f32 %v1145_v11, %v1139_v58  ;;  %v5649_v10 = vadd.f32 %v1281_v7, %v1275_v32  ;;  %v1370_v12 = vadd.f32 %v5448_v40, %v1342_v29  ;;  %v5655_v17 = vpop.permute.xlu0 %2725 }
 0x17e   :  { %v1790_v34 = vadd.f32 %v5452_v21, %v1778_v20  ;;  %v1400_v50 = vadd.f32 %v5520_v28, %v1372_v48  ;;  %v1804_v8 = vadd.f32 %v5542_v16, %v1792_v5  ;;  %v1481_v13 = vadd.f32 %v1477_v39, %v1453_v22  ;;  %7255 = vst [vmem:[#allocation68_spill] sm:$0xff] %v5655_v17  ;;  %v5662_v29 = vpop.permute.xlu1 %1470  ;;  %v7257_v5 = vld [vmem:[#allocation115_spill] sm:$0xff] }
 0x17f   :  { %v1837_v14 = vadd.f32 %v1833_v44, %v1825_v55  ;;  %v1452_v57 = vmul.f32 %v7256_v4, %v5468_v25  ;;  %v1824_v58 = vmul.f32 %v5472_v23, %v7256_v4  ;;  %v1398_v11 = vadd.f32 %v1394_v27, %v1370_v12 }
 0x180   :  { %v1802_v32 = vadd.f32 %v1798_v37, %v1790_v34  ;;  %v1428_v20 = vadd.f32 %v1424_v6, %v1400_v50  ;;  %v1816_v40 = vadd.f32 %v1812_v56, %v1804_v8  ;;  %v5664_v21 = vadd.f32 %v1505_v30, %v1481_v13  ;;  %v7259_v30 = vld [vmem:[#allocation18_spill] sm:$0xff]  ;;  %v7264_v34 = vld [vmem:[#allocation141_spill] sm:$0xff]  ;;  %v7265_v13 = vld [vmem:[#allocation83_spill] sm:$0xff] }
 0x181   :  { %2417 = vperm.xlu1 %3319, %v7240_v42   ;;  %v5666_v28 = vadd.f32 %v1845_v35, %v1837_v14  ;;  %v536_v16 = vadd.f32 %v5566_v54, %v5556_v24  ;;  %v876_v7 = vadd.f32 %v5570_v19, %v5562_v63  ;;  %v1450_v18 = vmul.f32 %v5579_v36, %v5468_v25  ;;  %v7260_v35 = vld [vmem:[#allocation32_spill] sm:$0xff]  ;;  %v7262_v63 = vld [vmem:[#allocation102_spill] sm:$0xff]  ;;  %v5693_v22 = vpop.permute.xlu0 %683  ;;  %v7266_v14 = vld [vmem:[#allocation125_spill] sm:$0xff] }
 0x182   :  { %v1822_v48 = vmul.f32 %v5472_v23, %v5579_v36  ;;  %v560_v52 = vmul.f32 %v7258_v61, %v7257_v5  ;;  %v884_v27 = vmul.f32 %v7259_v30, %v7258_v61  ;;  %v5682_v37 = vrot.slane %v5647_v26, %v7260_v35  ;;  %v1475_v6 = vpop.permute.xlu1 %1474  ;;  %v7268_v5 = vld [vmem:[#allocation135_spill] sm:$0xff] }
 0x183   :  { %v5686_v24 = vrot.slane %v5649_v10, %v7260_v35  ;;  %v1508_v54 = vmul.f32 %v7262_v63, %v5560_v3  ;;  %v1848_v19 = vmul.f32 %v5574_v43, %v7262_v63  ;;  %v1426_v36 = vadd.f32 %v5599_v53, %v1398_v11  ;;  %v7291_v35 = vld [vmem:[#allocation122_spill] sm:$0xff] }
 0x184   :  { %v1814_v62 = vadd.f32 %v1810_v31, %v1802_v32  ;;  %v7263_v55 = vmov 2   ;;  %v1456_v56 = vadd.f32 %v1452_v57, %v1428_v20  ;;  %v1480_v39 = vmul.f32 %v1475_v6, %v5493_v1  ;;  %v7267_v57 = vld [vmem:[#allocation92_spill] sm:$0xff] }
 0x185   :  { %7261 = vst [vmem:[#allocation73_spill] sm:$0xff] %v5686_v24  ;;  %3321 = vset.pattern.permute.xlu1 %v7263_v55  ;;  %v1828_v44 = vadd.f32 %v1824_v58, %v1816_v40  ;;  %v1836_v12 = vmul.f32 %v5497_v0, %v1475_v6  ;;  %v1478_v50 = vmul.f32 %v7264_v34, %v5493_v1  ;;  %v5711_v63 = vpop.permute.xlu0 %695 }
 0x186   :  { %2437 = vperm.xlu1 %3321, %v5537_v15   ;;  %v1834_v53 = vmul.f32 %v5497_v0, %v7264_v34  ;;  %v1454_v31 = vadd.f32 %v1450_v18, %v1426_v36  ;;  %v1826_v8 = vadd.f32 %v1822_v48, %v1814_v62  ;;  %v588_v4 = vmul.f32 %v7266_v14, %v7265_v13  ;;  %v7269_v18 = vld [vmem:[#allocation70_spill] sm:$0xff]  ;;  %v7273_v13 = vld [vmem:[#allocation41_spill] sm:$0xff] }
 0x187   :  { %v896_v11 = vmul.f32 %v7267_v57, %v7266_v14  ;;  %v1484_v32 = vadd.f32 %v1480_v39, %v1456_v56  ;;  %v1840_v58 = vadd.f32 %v1836_v12, %v1828_v44  ;;  %v564_v20 = vadd.f32 %v560_v52, %v536_v16  ;;  %v1495_v62 = vpop.permute.xlu1 %1494  ;;  %v7270_v56 = vld [vmem:[#allocation124_spill] sm:$0xff]  ;;  %v7271_v39 = vld [vmem:[#allocation146_spill] sm:$0xff] }
 0x188   :  { %v888_v40 = vadd.f32 %v884_v27, %v876_v7  ;;  %v616_v61 = vmul.f32 %v7268_v5, %v5227_v60  ;;  %v908_v30 = vmul.f32 %v5231_v9, %v7268_v5  ;;  %v1534_v48 = vmul.f32 %v7269_v18, %v5682_v37  ;;  %v7272_v12 = vld [vmem:[#allocation40_spill] sm:$0xff]  ;;  %v7274_v14 = vld [vmem:[#allocation138_spill] sm:$0xff] }
 0x189   :  { %v1858_v36 = vmul.f32 %v5686_v24, %v7269_v18  ;;  %v5718_v55 = vadd.f32 %v1508_v54, %v1484_v32  ;;  %v5720_v16 = vadd.f32 %v1848_v19, %v1840_v58  ;;  %v1482_v7 = vadd.f32 %v1478_v50, %v1454_v31  ;;  %v7275_v19 = vld [vmem:[#allocation14_spill] sm:$0xff]  ;;  %v7278_v32 = vld [vmem:[#allocation51_spill] sm:$0xff] }
 0x18a   :  { %2445 = vperm.xlu1 %3321, %v7240_v42   ;;  %v1506_v60 = vmul.f32 %v1495_v62, %v5560_v3  ;;  %v1838_v52 = vadd.f32 %v1834_v53, %v1826_v8  ;;  %v1846_v9 = vmul.f32 %v5574_v43, %v1495_v62  ;;  %v592_v27 = vadd.f32 %v588_v4, %v564_v20  ;;  %v5736_v8 = vpop.permute.xlu0 %1658  ;;  %v7279_v20 = vld [vmem:[#allocation28_spill] sm:$0xff]  ;;  %v7281_v18 = vld [vmem:[#allocation43_spill] sm:$0xff] }
 0x18b   :  { %v900_v6 = vadd.f32 %v896_v11, %v888_v40  ;;  %v644_v44 = vmul.f32 %v7271_v39, %v7270_v56  ;;  %v920_v34 = vmul.f32 %v7272_v12, %v7271_v39  ;;  %v5730_v54 = vrot.slane %v7274_v14, %v7273_v13  ;;  %7276 = vst [vmem:[#allocation149_spill] sm:$0xff] %v5736_v8  ;;  %v7277_v11 = vld [vmem:[#allocation46_spill] sm:$0xff]  ;;  %v5743_v5 = vpop.permute.xlu1 %1498 }
 0x18c   :  { %v5734_v50 = vrot.slane %v7275_v19, %v7273_v13  ;;  %v1510_v31 = vadd.f32 %v1506_v60, %v1482_v7  ;;  %v1850_v53 = vadd.f32 %v1846_v9, %v1838_v52  ;;  %v620_v4 = vadd.f32 %v616_v61, %v592_v27  ;;  %7280 = vst [vmem:[#allocation139_spill] sm:$0xff] %v5743_v5  ;;  %v7282_v9 = vld [vmem:[#allocation33_spill] sm:$0xff]  ;;  %v7285_v39 = vld [vmem:[#allocation142_spill] sm:$0xff] }
 0x18d   :  { %v912_v57 = vadd.f32 %v908_v30, %v900_v6  ;;  %v672_v58 = vmul.f32 %v7278_v32, %v7277_v11  ;;  %v932_v40 = vmul.f32 %v7279_v20, %v7278_v32  ;;  %v5747_v62 = vrot.slane %v7274_v14, %v7281_v18 }
 0x18e   :  { %2449 = vperm.xlu1 %3321, %v7247_v46   ;;  %v5751_v7 = vrot.slane %v7275_v19, %v7281_v18  ;;  %v5753_v61 = vadd.f32 %v1534_v48, %v1510_v31  ;;  %v5755_v30 = vadd.f32 %v1858_v36, %v1850_v53  ;;  %v648_v60 = vadd.f32 %v644_v44, %v620_v4  ;;  %v7286_v48 = vld [vmem:[#allocation110_spill] sm:$0xff] }
 0x18f   :  { %v924_v52 = vadd.f32 %v920_v34, %v912_v57  ;;  %v5759_v27 = vrot.slane %v5647_v26, %v7282_v9  ;;  %v5763_v6 = vrot.slane %v5649_v10, %v7282_v9  ;;  %v643_v32 = vmul.f32 %v7285_v39, %v7270_v56  ;;  %v5775_v34 = vpop.permute.xlu0 %1670 }
 0x190   :  { %v919_v17 = vmul.f32 %v7272_v12, %v7285_v39  ;;  %v700_v36 = vmul.f32 %v7286_v48, %v5730_v54  ;;  %v5773_v44 = vrot.slane %v7274_v14, %v7234_v2  ;;  %7287 = vst [vmem:[#allocation30_spill] sm:$0xff] %v5775_v34  ;;  %v676_v31 = vadd.f32 %v672_v58, %v648_v60  ;;  %v7289_v12 = vld [vmem:[#allocation94_spill] sm:$0xff]  ;;  %v7292_v34 = vld [vmem:[#allocation103_spill] sm:$0xff] }
 0x191   :  { %7283 = vst [vmem:[#allocation75_spill] sm:$0xff] %v5759_v27  ;;  %7284 = vst [vmem:[#allocation153_spill] sm:$0xff] %v5763_v6  ;;  %v936_v53 = vadd.f32 %v932_v40, %v924_v52  ;;  %v944_v4 = vmul.f32 %v5734_v50, %v7286_v48  ;;  %v5781_v56 = vrot.slane %v7275_v19, %v7234_v2  ;;  %v7288_v57 = vmov 3   ;;  %v1519_v40 = vpop.permute.xlu1 %1518  ;;  %v7290_v19 = vld [vmem:[#allocation58_spill] sm:$0xff] }
 0x192   :  { %3323 = vset.pattern.permute.xlu1 %v7288_v57  ;;  %v728_v39 = vmul.f32 %v7289_v12, %v5747_v62  ;;  %v956_v14 = vmul.f32 %v5751_v7, %v7289_v12  ;;  %v671_v59 = vmul.f32 %v5576_v51, %v7277_v11  ;;  %v931_v58 = vmul.f32 %v7279_v20, %v5576_v51  ;;  %v7293_v51 = vld [vmem:[#allocation53_spill] sm:$0xff] }
 0x193   :  { %2469 = vperm.xlu1 %3323, %v5638_v38   ;;  %v1561_v60 = vmul.f32 %v7290_v19, %v5759_v27  ;;  %v1869_v52 = vmul.f32 %v5763_v6, %v7290_v19  ;;  %v1533_v48 = vmul.f32 %v1519_v40, %v5682_v37  ;;  %v1857_v57 = vmul.f32 %v5686_v24, %v1519_v40  ;;  %v5803_v2 = vpop.permute.xlu0 %2749 }
 0x194   :  { %v704_v12 = vadd.f32 %v700_v36, %v676_v31  ;;  %v756_v9 = vmul.f32 %v7291_v35, %v5773_v44  ;;  %v647_v18 = vadd.f32 %v643_v32, %v7292_v34  ;;  %v923_v8 = vadd.f32 %v919_v17, %v7293_v51  ;;  %7294 = vst [vmem:[#allocation79_spill] sm:$0xff] %v5803_v2  ;;  %v7304_v2 = vld [vmem:[#allocation36_spill] sm:$0xff] }
 0x195   :  { %v948_v43 = vadd.f32 %v944_v4, %v936_v53  ;;  %v968_v13 = vmul.f32 %v5781_v56, %v7291_v35  ;;  %v1537_v19 = vadd.f32 %v1533_v48, %v5664_v21  ;;  %v1861_v5 = vadd.f32 %v1857_v57, %v5666_v28  ;;  %v5810_v31 = vpop.permute.xlu1 %1526  ;;  %v7295_v53 = vld [vmem:[#allocation71_spill] sm:$0xff] }
 0x196   :  { %v732_v3 = vadd.f32 %v728_v39, %v704_v12  ;;  %v675_v40 = vadd.f32 %v671_v59, %v647_v18  ;;  %v935_v36 = vadd.f32 %v931_v58, %v923_v8  ;;  %v699_v4 = vmul.f32 %v7295_v53, %v5730_v54  ;;  %v7296_v59 = vld [vmem:[#allocation13_spill] sm:$0xff] }
 0x197   :  { %2473 = vperm.xlu1 %3323, %v7240_v42   ;;  %v960_v32 = vadd.f32 %v956_v14, %v948_v43  ;;  %v5812_v34 = vadd.f32 %v1561_v60, %v1537_v19  ;;  %v5814_v17 = vadd.f32 %v1869_v52, %v1861_v5  ;;  %v943_v21 = vmul.f32 %v5734_v50, %v7295_v53  ;;  %v7298_v60 = vld [vmem:[#allocation90_spill] sm:$0xff] }
 0x198   :  { %v5820_v35 = vadd.f32 %v756_v9, %v732_v3  ;;  %v755_v28 = vmul.f32 %v7296_v59, %v5773_v44  ;;  %v716_v42 = vpop.permute.xlu0 %715  ;;  %v703_v18 = vadd.f32 %v699_v4, %v675_v40  ;;  %v7297_v14 = vmov 4   ;;  %v7299_v19 = vld [vmem:[#allocation34_spill] sm:$0xff] }
 0x199   :  { %v5824_v8 = vadd.f32 %v968_v13, %v960_v32  ;;  %v727_v43 = vmul.f32 %v716_v42, %v5747_v62  ;;  %v947_v39 = vadd.f32 %v943_v21, %v935_v36  ;;  %v955_v5 = vmul.f32 %v5751_v7, %v716_v42  ;;  %v1531_v58 = vpop.permute.xlu1 %1530  ;;  %v7301_v42 = vld [vmem:[#allocation152_spill] sm:$0xff] }
 0x19a   :  { %v1564_v52 = vmul.f32 %v7298_v60, %v5759_v27  ;;  %v1872_v3 = vmul.f32 %v5763_v6, %v7298_v60  ;;  %v1536_v9 = vmul.f32 %v1531_v58, %v5682_v37  ;;  %v1860_v13 = vmul.f32 %v5686_v24, %v1531_v58 }
 0x19b   :  { %3325 = vset.pattern.permute.xlu1 %v7297_v14  ;;  %v967_v48 = vmul.f32 %v5781_v56, %v7296_v59  ;;  %v768_v57 = vmin.f32 %v5820_v35, 0.0  ;;  %v731_v12 = vadd.f32 %v727_v43, %v703_v18  ;;  %v959_v51 = vadd.f32 %v955_v5, %v947_v39  ;;  %v5861_v39 = vld [vmem:[%s6402_s2 + $0x50] sm:$0xff] }
 0x19c   :  { %2493 = vperm.xlu1 %3325, %v5537_v15   ;;  %v5841_v40 = vrot.slane %v5647_v26, %v7299_v19  ;;  %v5845_v36 = vrot.slane %v5649_v10, %v7299_v19  ;;  %v1540_v32 = vadd.f32 %v1536_v9, %v5718_v55  ;;  %v1864_v53 = vadd.f32 %v1860_v13, %v5720_v16  ;;  %v5849_v4 = vpop.permute.xlu0 %1690  ;;  %v7302_v9 = vld [vmem:[#allocation61_spill] sm:$0xff] }
 0x19d   :  { %7300 = vst [vmem:[#allocation27_spill] sm:$0xff] %v5849_v4  ;;  %v5851_v21 = vadd.f32 %v755_v28, %v731_v12  ;;  %v5853_v59 = vadd.f32 %v967_v48, %v959_v51  ;;  %v670_v18 = vmul.f32 %v7301_v42, %v7277_v11  ;;  %v980_v43 = vmin.f32 %v5824_v8, 0.0 }
 0x19e   :  { %v1551_v55 = vpop.permute.xlu1 %1550  ;;  %v5864_v16 = vadd.f32 %v1564_v52, %v1540_v32  ;;  %v5866_v5 = vadd.f32 %v1872_v3, %v1864_v53  ;;  %v930_v28 = vmul.f32 %v7279_v20, %v7301_v42  ;;  %v774_v14 = vmul.f32 1.442695, %v768_v57 }
 0x19f   :  { %v767_v58 = vmin.f32 %v5851_v21, 0.0  ;;  %v979_v60 = vmin.f32 %v5853_v59, 0.0  ;;  %v1590_v13 = vmul.f32 %v7302_v9, %v5841_v40  ;;  %v1882_v48 = vmul.f32 %v5845_v36, %v7302_v9 }
 0x1a0   :  { %2501 = vperm.xlu1 %3325, %v5861_v39   ;;  %v1562_v12 = vmul.f32 %v1551_v55, %v5759_v27  ;;  %v1870_v52 = vmul.f32 %v5763_v6, %v1551_v55  ;;  %v5878_v3 = vpop.permute.xlu0 %2773  ;;  %v698_v51 = vmul.f32 %v5693_v22, %v5730_v54  ;;  %v942_v57 = vmul.f32 %v5734_v50, %v5693_v22  ;;  %v7306_v22 = vld [vmem:[#allocation118_spill] sm:$0xff]  ;;  %v7308_v6 = vld [vmem:[#allocation101_spill] sm:$0xff] }
 0x1a1   :  { %7303 = vst [vmem:[#allocation93_spill] sm:$0xff] %v5878_v3  ;;  %v772_v32 = vmul.f32 1.442695, %v767_v58  ;;  %v984_v53 = vmul.f32 1.442695, %v979_v60  ;;  %v5886_v19 = vrot.slane %v5647_v26, %v7304_v2  ;;  %v5895_v3 = vrot.slane %v5649_v10, %v7304_v2  ;;  %v7307_v60 = vld [vmem:[#allocation26_spill] sm:$0xff] }
 0x1a2   :  { %v986_v42 = vmul.f32 1.442695, %v980_v43  ;;  %v1566_v9 = vadd.f32 %v1562_v12, %v5753_v61  ;;  %v1874_v4 = vadd.f32 %v1870_v52, %v5755_v30  ;;  %v5891_v55 = vpop.permute.xlu1 %1554  ;;  %v674_v58 = vadd.f32 %v670_v18, %v7306_v22  ;;  %v7312_v18 = vld [vmem:[#allocation114_spill] sm:$0xff] }
 0x1a3   :  { %7305 = vst [vmem:[#allocation85_spill] sm:$0xff] %v5891_v55  ;;  %v934_v43 = vadd.f32 %v930_v28, %v7307_v60  ;;  %3367 = vpow2.f32 %v772_v32  ;;  %v673_v27 = vmul.f32 %v7308_v6, %v7277_v11  ;;  %v933_v12 = vmul.f32 %v7279_v20, %v7308_v6  ;;  %v7313_v11 = vld [vmem:[#allocation117_spill] sm:$0xff]  ;;  %v7317_v20 = vld [vmem:[#allocation116_spill] sm:$0xff]  ;;  %v7319_v60 = vld [vmem:[#allocation19_spill] sm:$0xff] }
 0x1a4   :  { %2505 = vperm.xlu1 %3325, %v7247_v46   ;;  %3369 = vpow2.f32 %v984_v53  ;;  %v5903_v30 = vadd.f32 %v1590_v13, %v1566_v9  ;;  %v5905_v46 = vadd.f32 %v1882_v48, %v1874_v4  ;;  %v702_v52 = vadd.f32 %v698_v51, %v674_v58  ;;  %v7315_v4 = vld [vmem:[#allocation11_spill] sm:$0xff]  ;;  %v7316_v9 = vld [vmem:[#allocation120_spill] sm:$0xff] }
 0x1a5   :  { %v5901_v61 = vpop.permute.xlu0 %2781  ;;  %3371 = vpow2.f32 %v774_v14  ;;  %v946_v2 = vadd.f32 %v942_v57, %v934_v43  ;;  %v726_v28 = vmul.f32 %v7312_v18, %v5747_v62  ;;  %v954_v32 = vmul.f32 %v5751_v7, %v7312_v18  ;;  %v7320_v18 = vld [vmem:[#allocation134_spill] sm:$0xff] }
 0x1a6   :  { %7309 = vst [vmem:[#allocation82_spill] sm:$0xff] %v5901_v61  ;;  %7310 = vst [vmem:[#allocation22_spill] sm:$0xff] %v5903_v30  ;;  %v729_v53 = vmul.f32 %v7313_v11, %v5747_v62  ;;  %3373 = vpow2.f32 %v986_v42  ;;  %v7314_v13 = vmov 5   ;;  %v1315_v48 = vmul.f32 %v7315_v4, %v5313_v49  ;;  %v7318_v62 = vld [vmem:[#allocation44_spill] sm:$0xff] }
 0x1a7   :  { %7311 = vst [vmem:[#allocation63_spill] sm:$0xff] %v5905_v46  ;;  %v1339_v6 = vmul.f32 %v7317_v20, %v7316_v9  ;;  %v701_v14 = vmul.f32 %v5711_v63, %v5730_v54  ;;  %v945_v51 = vmul.f32 %v5734_v50, %v5711_v63  ;;  %v1617_v42 = vmul.f32 %v7318_v62, %v5886_v19 }
 0x1a8   :  { %3328 = vset.pattern.permute.xlu1 %v7314_v13  ;;  %v1575_v57 = vpop.permute.xlu1 %1574  ;;  %v1893_v22 = vmul.f32 %v5895_v3, %v7318_v62  ;;  %v677_v43 = vadd.f32 %v673_v27, %v7319_v60  ;;  %v937_v54 = vadd.f32 %v933_v12, %v7320_v18  ;;  %v730_v61 = vadd.f32 %v726_v28, %v702_v52 }
 0x1a9   :  { %2525 = vperm.xlu1 %3328, %v5638_v38   ;;  %v1589_v49 = vmul.f32 %v1575_v57, %v5841_v40  ;;  %v1881_v58 = vmul.f32 %v5845_v36, %v1575_v57  ;;  %v958_v63 = vadd.f32 %v954_v32, %v946_v2  ;;  %v957_v62 = vmul.f32 %v5751_v7, %v7313_v11  ;;  %v7321_v57 = vld [vmem:[#allocation108_spill] sm:$0xff]  ;;  %v7323_v32 = vld [vmem:[#allocation129_spill] sm:$0xff]  ;;  %v7325_v11 = vld [vmem:[#allocation42_spill] sm:$0xff] }
 0x1aa   :  { %v740_v9 = vpop.permute.xlu0 %739  ;;  %v1767_v24 = vmul.f32 %v7321_v57, %v7315_v4  ;;  %v705_v27 = vadd.f32 %v701_v14, %v677_v43  ;;  %v949_v60 = vadd.f32 %v945_v51, %v937_v54  ;;  %v1343_v2 = vadd.f32 %v1339_v6, %v1315_v48  ;;  %v7326_v48 = vld [vmem:[#allocation123_spill] sm:$0xff] }
 0x1ab   :  { %v1593_v50 = vadd.f32 %v1589_v49, %v5812_v34  ;;  %v1885_v46 = vadd.f32 %v1881_v58, %v5814_v17  ;;  %v754_v30 = vmul.f32 %v740_v9, %v5773_v44  ;;  %v966_v55 = vmul.f32 %v5781_v56, %v740_v9  ;;  %v7322_v34 = vld [vmem:[#allocation38_spill] sm:$0xff]  ;;  %v7324_v49 = vld [vmem:[#allocation84_spill] sm:$0xff] }
 0x1ac   :  { %v5942_v12 = vpop.permute.xlu1 %1582  ;;  %v1775_v17 = vmul.f32 %v7322_v34, %v7317_v20  ;;  %v1367_v7 = vmul.f32 %v7324_v49, %v7323_v32  ;;  %v1787_v4 = vmul.f32 %v7325_v11, %v7324_v49  ;;  %v1620_v6 = vmul.f32 %v7326_v48, %v5886_v19 }
 0x1ad   :  { %2529 = vperm.xlu1 %3328, %v5861_v39   ;;  %v5946_v52 = vadd.f32 %v754_v30, %v730_v61  ;;  %v5948_v28 = vadd.f32 %v966_v55, %v958_v63  ;;  %v5954_v51 = vadd.f32 %v1617_v42, %v1593_v50  ;;  %v5956_v58 = vadd.f32 %v1893_v22, %v1885_v46 }
 0x1ae   :  { %v752_v14 = vpop.permute.xlu0 %751  ;;  %v1896_v61 = vmul.f32 %v5895_v3, %v7326_v48  ;;  %v733_v20 = vadd.f32 %v729_v53, %v705_v27  ;;  %v961_v18 = vadd.f32 %v957_v62, %v949_v60  ;;  %v7327_v42 = vmov 6   ;;  %v7328_v48 = vld [vmem:[#allocation121_spill] sm:$0xff] }
 0x1af   :  { %v766_v55 = vmin.f32 %v5946_v52, 0.0  ;;  %v978_v30 = vmin.f32 %v5948_v28, 0.0  ;;  %v757_v43 = vmul.f32 %v752_v14, %v5773_v44  ;;  %v969_v54 = vmul.f32 %v5781_v56, %v752_v14 }
 0x1b0   :  { %v3368_v22 = vpop.eup %3367  ;;  %vm763_vm9 = vcmp.gt.f32.partialorder %v5851_v21, 0.0  ;;  %vm975_vm10 = vcmp.gt.f32.partialorder %v5853_v59, 0.0  ;;  %vm764_vm11 = vcmp.gt.f32.partialorder %v5820_v35, 0.0  ;;  %vm976_vm12 = vcmp.gt.f32.partialorder %v5824_v8, 0.0 }
 0x1b1   :  { %3329 = vset.pattern.permute.xlu1 %v7327_v42  ;;  %v1587_v46 = vpop.permute.xlu1 %1586  ;;  %v770_v9 = vmul.f32 1.442695, %v766_v55  ;;  %v982_v63 = vmul.f32 1.442695, %v978_v30  ;;  %v3370_v34 = vpop.eup %3369  ;;  %v3150_v53 = vadd.f32 -1.0, %v3368_v22  ;;  %v5971_v44 = vadd.f32 %v757_v43, %v733_v20 }
 0x1b2   :  { %v1592_v50 = vmul.f32 %v1587_v46, %v5841_v40  ;;  %v1884_v57 = vmul.f32 %v5845_v36, %v1587_v46  ;;  %2553 = vperm.xlu1 %3329, %v5638_v38   ;;  %v5973_v62 = vadd.f32 %v969_v54, %v961_v18  ;;  %v3372_v56 = vpop.eup %3371  ;;  %v3154_v27 = vadd.f32 -1.0, %v3370_v34  ;;  %v5992_v46 = vld [vmem:[%s6402_s2 + $0x58] sm:$0xff] }
 0x1b3   :  { %3375 = vpow2.f32 %v770_v9  ;;  %v3374_v49 = vpop.eup %3373  ;;  %v783_v11 = vsel %vm763_vm9, %v5851_v21, %v3150_v53  ;;  %v769_v14 = vmin.f32 %v5971_v44, 0.0  ;;  %v1395_v55 = vmul.f32 %v7328_v48, %v5440_v41  ;;  %v7332_v53 = vld [vmem:[#allocation39_spill] sm:$0xff] }
 0x1b4   :  { %v1596_v60 = vadd.f32 %v1592_v50, %v5864_v16  ;;  %v1888_v32 = vadd.f32 %v1884_v57, %v5866_v5  ;;  %3377 = vpow2.f32 %v982_v63  ;;  %v995_v30 = vsel %vm975_vm10, %v5853_v59, %v3154_v27  ;;  %v7329_v59 = vld [vmem:[#allocation21_spill] sm:$0xff]  ;;  %v7330_v63 = vld [vmem:[#allocation20_spill] sm:$0xff] }
 0x1b5   :  { %v981_v20 = vmin.f32 %v5973_v62, 0.0  ;;  %v1779_v5 = vadd.f32 %v1775_v17, %v1767_v24  ;;  %v1371_v18 = vadd.f32 %v1367_v7, %v1343_v2  ;;  %v5987_v21 = vmul.f32 %v995_v30, %v783_v11  ;;  %v7336_v30 = vld [vmem:[#allocation47_spill] sm:$0xff] }
 0x1b6   :  { %3330 = vset.pattern.permute.xlu1 %v7314_v13  ;;  %v1607_v16 = vpop.permute.xlu1 %1606  ;;  %v5985_v43 = vadd.f32 %v1620_v6, %v1596_v60  ;;  %v776_v54 = vmul.f32 1.442695, %v769_v14  ;;  %v1799_v41 = vmul.f32 %v5444_v45, %v7328_v48  ;;  %v1423_v13 = vmul.f32 %v7329_v59, %v5456_v47  ;;  %v7335_v48 = vld [vmem:[#allocation41_spill] sm:$0xff] }
 0x1b7   :  { %2533 = vperm.xlu1 %3330, %v5992_v46   ;;  %v988_v6 = vmul.f32 1.442695, %v981_v20  ;;  %v5999_v22 = vadd.f32 %v1896_v61, %v1888_v32  ;;  %v3151_v24 = vadd.f32 -1.0, %v3372_v56  ;;  %v3155_v2 = vadd.f32 -1.0, %v3374_v49  ;;  %v7333_v49 = vld [vmem:[#allocation140_spill] sm:$0xff] }
 0x1b8   :  { %v1791_v17 = vadd.f32 %v1787_v4, %v1779_v5  ;;  %3379 = vpow2.f32 %v776_v54  ;;  %v1399_v7 = vadd.f32 %v1395_v55, %v1371_v18  ;;  %v1811_v9 = vmul.f32 %v5460_v33, %v7329_v59  ;;  %v7337_v5 = vld [vmem:[#allocation145_spill] sm:$0xff] }
 0x1b9   :  { %v1451_v50 = vmul.f32 %v7330_v63, %v5468_v25  ;;  %3381 = vpow2.f32 %v988_v6  ;;  %v7331_v45 = vmov 7   ;;  %v1823_v4 = vmul.f32 %v5472_v23, %v7330_v63  ;;  %v7334_v23 = vld [vmem:[#allocation139_spill] sm:$0xff] }
 0x1ba   :  { %v6005_v57 = vpop.permute.xlu1 %1610  ;;  %v1803_v47 = vadd.f32 %v1799_v41, %v1791_v17  ;;  %v1427_v61 = vadd.f32 %v1423_v13, %v1399_v7  ;;  %v1479_v33 = vmul.f32 %v5662_v29, %v5493_v1  ;;  %v784_v25 = vsel %vm764_vm11, %v5820_v35, %v3151_v24  ;;  %v7338_v24 = vld [vmem:[#allocation73_spill] sm:$0xff] }
 0x1bb   :  { %3332 = vset.pattern.permute.xlu1 %v7331_v45  ;;  %v996_v34 = vsel %vm976_vm12, %v5824_v8, %v3155_v2  ;;  %v6019_v56 = vrot.slane %v5647_v26, %v7332_v53  ;;  %v1835_v32 = vmul.f32 %v5497_v0, %v5662_v29  ;;  %v1507_v11 = vmul.f32 %v7334_v23, %v7333_v49 }
 0x1bc   :  { %2577 = vperm.xlu1 %3332, %v5537_v15   ;;  %v1815_v27 = vadd.f32 %v1811_v9, %v1803_v47  ;;  %v1455_v60 = vadd.f32 %v1451_v50, %v1427_v61  ;;  %v6027_v1 = vrot.slane %v5649_v10, %v7332_v53  ;;  %v6033_v55 = vrot.slane %v5647_v26, %v7335_v48 }
 0x1bd   :  { %v1847_v20 = vmul.f32 %v7336_v30, %v7334_v23  ;;  %v1000_v29 = vmul.f32 %v996_v34, %v784_v25  ;;  %v1646_v18 = vmul.f32 %v7337_v5, %v6019_v56  ;;  %v6042_v54 = vrot.slane %v5649_v10, %v7335_v48  ;;  %v7341_v25 = vld [vmem:[#allocation153_spill] sm:$0xff] }
 0x1be   :  { %v1827_v35 = vadd.f32 %v1823_v4, %v1815_v27  ;;  %v1483_v8 = vadd.f32 %v1479_v33, %v1455_v60  ;;  %v1535_v41 = vmul.f32 %v5810_v31, %v5682_v37  ;;  %vm762_vm13 = vcmp.gt.f32.partialorder %v5946_v52, 0.0  ;;  %v7339_v4 = vld [vmem:[#allocation75_spill] sm:$0xff] }
 0x1bf   :  { %v6029_v14 = vpop.permute.xlu1 %1630  ;;  %v1618_v7 = vmul.f32 %v1607_v16, %v5886_v19  ;;  %v1894_v9 = vmul.f32 %v5895_v3, %v1607_v16  ;;  %v1906_v37 = vmul.f32 %v6027_v1, %v7337_v5  ;;  %vm974_vm14 = vcmp.gt.f32.partialorder %v5948_v28, 0.0 }
 0x1c0   :  { %3334 = vset.pattern.permute.xlu1 %v7327_v42  ;;  %v3376_v0 = vpop.eup %3375  ;;  %v1839_v13 = vadd.f32 %v1835_v32, %v1827_v35  ;;  %v1511_v6 = vadd.f32 %v1507_v11, %v1483_v8  ;;  %v1859_v42 = vmul.f32 %v7338_v24, %v5810_v31  ;;  %v7340_v31 = vld [vmem:[#allocation85_spill] sm:$0xff]  ;;  %v1591_v49 = vmul.f32 %v5942_v12, %v5841_v40  ;;  %v7342_v35 = vld [vmem:[#allocation22_spill] sm:$0xff] }
 0x1c1   :  { %2561 = vperm.xlu1 %3334, %v5992_v46   ;;  %v3378_v59 = vpop.eup %3377  ;;  %v3149_v2 = vadd.f32 -1.0, %v3376_v0  ;;  %v1563_v33 = vmul.f32 %v7340_v31, %v7339_v4  ;;  %v1871_v34 = vmul.f32 %v7341_v25, %v7340_v31  ;;  %vm765_vm15 = vcmp.gt.f32.partialorder %v5971_v44, 0.0 }
 0x1c2   :  { %v3153_v17 = vadd.f32 -1.0, %v3378_v59  ;;  %v1851_v50 = vadd.f32 %v1847_v20, %v1839_v13  ;;  %v1539_v61 = vadd.f32 %v1535_v41, %v1511_v6  ;;  %v1622_v8 = vadd.f32 %v1618_v7, %v7342_v35  ;;  %v7347_v35 = vld [vmem:[#allocation43_spill] sm:$0xff] }
 0x1c3   :  { %v1639_v63 = vpop.permute.xlu1 %1638  ;;  %v782_v47 = vsel %vm762_vm13, %v5946_v52, %v3149_v2  ;;  %v1883_v52 = vmul.f32 %v5845_v36, %v5942_v12  ;;  %vm977_vm0 = vcmp.gt.f32.partialorder %v5973_v62, 0.0  ;;  %v1619_v7 = vmul.f32 %v6005_v57, %v5886_v19 }
 0x1c4   :  { %v994_v27 = vsel %vm974_vm14, %v5948_v28, %v3153_v17  ;;  %v1863_v60 = vadd.f32 %v1859_v42, %v1851_v50  ;;  %v7343_v28 = vld [vmem:[#allocation63_spill] sm:$0xff]  ;;  %v1567_v59 = vadd.f32 %v1563_v33, %v1539_v61  ;;  %v1645_v19 = vmul.f32 %v6029_v14, %v6019_v56 }
 0x1c5   :  { %3335 = vset.pattern.permute.xlu1 %v7331_v45  ;;  %v3380_v16 = vpop.eup %3379  ;;  %v998_v32 = vmul.f32 %v994_v27, %v782_v47  ;;  %v1898_v30 = vadd.f32 %v1894_v9, %v7343_v28  ;;  %v1650_v9 = vadd.f32 %v1646_v18, %v1622_v8  ;;  %v1907_v47 = vmul.f32 %v6027_v1, %v1639_v63 }
 0x1c6   :  { %2585 = vperm.xlu1 %3335, %v5861_v39   ;;  %v3382_v23 = vpop.eup %3381  ;;  %v3152_v11 = vadd.f32 -1.0, %v3380_v16  ;;  %v1875_v36 = vadd.f32 %v1871_v34, %v1863_v60  ;;  %v1595_v2 = vadd.f32 %v1591_v49, %v1567_v59  ;;  %v7346_v16 = vld [vmem:[#allocation149_spill] sm:$0xff]  ;;  %v1684_v8 = vrot.slane %v5647_v26, %v7347_v35 }
 0x1c7   :  { %v1643_v20 = vpop.permute.xlu1 %1642  ;;  %v1002_v0 = vadd.f32 %v5987_v21, %v998_v32  ;;  %v3156_v5 = vadd.f32 -1.0, %v3382_v23  ;;  %v7344_v21 = vmov 8   ;;  %v1910_v50 = vadd.f32 %v1906_v37, %v1898_v30  ;;  %v7345_v37 = vld [vmem:[#allocation45_spill] sm:$0xff] }
 0x1c8   :  { %v1648_v41 = vmul.f32 %v1643_v20, %v6019_v56  ;;  %v1908_v40 = vmul.f32 %v6027_v1, %v1643_v20  ;;  %v785_v12 = vsel %vm765_vm15, %v5971_v44, %v3152_v11  ;;  %v1895_v44 = vmul.f32 %v5895_v3, %v6005_v57 }
 0x1c9   :  { %v997_v13 = vsel %vm977_vm0, %v5973_v62, %v3156_v5  ;;  %v1003_v6 = vadd.f32 %v1002_v0, %v1000_v29  ;;  %v1887_v62 = vadd.f32 %v1883_v52, %v1875_v36  ;;  %v1647_v29 = vmul.f32 %v1639_v63, %v6019_v56  ;;  %v1715_v52 = vpop.permute.xlu0 %1714 }
 0x1ca   :  { %v6077_v24 = vadd.f32 %v1648_v41, %v5985_v43  ;;  %v6080_v42 = vadd.f32 %v1908_v40, %v5999_v22  ;;  %3336 = vset.pattern.permute.xlu1 %v7344_v21  ;;  %v1001_v17 = vmul.f32 %v997_v13, %v785_v12  ;;  %v1905_v3 = vmul.f32 %v6027_v1, %v6029_v14 }
 0x1cb   :  { %2609 = vperm.xlu1 %3336, %v5638_v38   ;;  %v1623_v57 = vadd.f32 %v1619_v7, %v1595_v2  ;;  %v1899_v31 = vadd.f32 %v1895_v44, %v1887_v62  ;;  %v6106_v25 = vrot.slane %v5647_v26, %v7345_v37  ;;  %v6110_v56 = vrot.slane %v5649_v10, %v7345_v37  ;;  %v7349_v26 = vld [vmem:[#allocation30_spill] sm:$0xff] }
 0x1cc   :  { %v1663_v43 = vpop.permute.xlu1 %1662  ;;  %v6089_v22 = vadd.f32 %v1003_v6, %v1001_v17  ;;  %v1917_v60 = vmul.f32 %v6042_v54, %v7346_v16  ;;  %v1649_v32 = vadd.f32 %v1645_v19, %v5954_v51  ;;  %v1909_v49 = vadd.f32 %v1905_v3, %v5956_v58  ;;  %v7350_v3 = vld [vmem:[#allocation27_spill] sm:$0xff] }
 0x1cd   :  { %v1674_v61 = vmul.f32 %v1663_v43, %v6033_v55  ;;  %v1918_v4 = vmul.f32 %v6042_v54, %v1663_v43  ;;  %v1651_v1 = vadd.f32 %v1647_v29, %v1623_v57  ;;  %v1911_v14 = vadd.f32 %v1907_v47, %v1899_v31  ;;  %v1727_v13 = vpop.permute.xlu0 %1726 }
 0x1ce   :  { %v1928_v28 = vrot.slane %v5649_v10, %v7347_v35  ;;  %v7348_v30 = vmov 9   ;;  %v1729_v0 = vmul.f32 %v1715_v52, %v6106_v25  ;;  %v1941_v51 = vmul.f32 %v6110_v56, %v1715_v52 }
 0x1cf   :  { %v6098_v33 = vadd.f32 %v1674_v61, %v1650_v9  ;;  %v6100_v18 = vadd.f32 %v1918_v4, %v1910_v50  ;;  %3337 = vset.pattern.permute.xlu1 %v7331_v45  ;;  %v1673_v45 = vmul.f32 %v7346_v16, %v6033_v55  ;;  %v1921_v41 = vadd.f32 %v1917_v60, %v1909_v49 }
 0x1d0   :  { %2589 = vperm.xlu1 %3337, %v5992_v46   ;;  %v1667_v63 = vpop.permute.xlu1 %1666  ;;  %v1676_v12 = vmul.f32 %v7349_v26, %v6033_v55  ;;  %v1920_v10 = vmul.f32 %v6042_v54, %v7349_v26  ;;  %v1702_v57 = vmul.f32 %v7350_v3, %v1684_v8  ;;  %v1930_v31 = vmul.f32 %v1928_v28, %v7350_v3 }
 0x1d1   :  { %v1675_v34 = vmul.f32 %v1667_v63, %v6033_v55  ;;  %v1919_v27 = vmul.f32 %v6042_v54, %v1667_v63  ;;  %v1677_v5 = vadd.f32 %v1673_v45, %v1649_v32  ;;  %v1732_v55 = vmul.f32 %v1727_v13, %v6106_v25 }
 0x1d2   :  { %v1944_v54 = vmul.f32 %v6110_v56, %v1727_v13  ;;  %v1680_v9 = vadd.f32 %v1676_v12, %v6077_v24  ;;  %v1924_v50 = vadd.f32 %v1920_v10, %v6080_v42  ;;  %v1934_v16 = vadd.f32 %v1930_v31, %v6100_v18  ;;  %v7355_v12 = vld [vmem:[#allocation32_spill] sm:$0xff] }
 0x1d3   :  { %v1679_v23 = vadd.f32 %v1675_v34, %v1651_v1  ;;  %v1923_v11 = vadd.f32 %v1919_v27, %v1911_v14  ;;  %v1706_v34 = vadd.f32 %v1702_v57, %v6098_v33  ;;  %v7351_v60 = vmov 10   ;;  %v7356_v10 = vld [vmem:[#allocation72_spill] sm:$0xff] }
 0x1d4   :  { %3339 = vset.pattern.permute.xlu1 %v7348_v30 }
 0x1d5   :  { %2633 = vperm.xlu1 %3339, %v5537_v15   ;;  %v1687_v20 = vpop.permute.xlu1 %1686 }
 0x1d6   :  { %v1701_v58 = vmul.f32 %v1687_v20, %v1684_v8  ;;  %v1929_v40 = vmul.f32 %v1928_v28, %v1687_v20  ;;  %v7352_v20 = vld [vmem:[#allocation33_spill] sm:$0xff] }
 0x1d8   :  { %v1705_v59 = vadd.f32 %v1701_v58, %v1677_v5  ;;  %v1933_v36 = vadd.f32 %v1929_v40, %v1921_v41  ;;  %v7354_v58 = vld [vmem:[#allocation128_spill] sm:$0xff] }
 0x1d9   :  { %3341 = vset.pattern.permute.xlu1 %v7344_v21  ;;  %v1695_v15 = vpop.permute.xlu1 %1694  ;;  %v6175_v41 = vrot.slane %v7354_v58, %v7352_v20 }
 0x1da   :  { %v6133_v6 = vadd.f32 %v1729_v0, %v1705_v59  ;;  %v6135_v2 = vadd.f32 %v1941_v51, %v1933_v36  ;;  %v1703_v17 = vmul.f32 %v1695_v15, %v1684_v8  ;;  %v1931_v7 = vmul.f32 %v1928_v28, %v1695_v15  ;;  %2617 = vperm.xlu1 %3341, %v5992_v46   ;;  %v7353_v0 = vld [vmem:[#allocation127_spill] sm:$0xff] }
 0x1db   :  { %v6168_v51 = vrot.slane %v7353_v0, %v7352_v20 }
 0x1dc   :  { %v1741_v44 = vmin.f32 %v6133_v6, 0.0  ;;  %v1953_v62 = vmin.f32 %v6135_v2, 0.0  ;;  %v1707_v29 = vadd.f32 %v1703_v17, %v1679_v23  ;;  %v1935_v21 = vadd.f32 %v1931_v7, %v1923_v11 }
 0x1dd   :  { %v1699_v43 = vpop.permute.xlu1 %1698  ;;  %v2424_v15 = vmul.f32 %v7356_v10, %v6168_v51  ;;  %v2860_v7 = vmul.f32 %v6175_v41, %v7356_v10  ;;  %vm1737_vm1 = vcmp.gt.f32.partialorder %v6133_v6, 0.0  ;;  %vm1949_vm2 = vcmp.gt.f32.partialorder %v6135_v2, 0.0 }
 0x1de   :  { %v1745_v47 = vmul.f32 1.442695, %v1741_v44  ;;  %v1957_v61 = vmul.f32 1.442695, %v1953_v62  ;;  %v1704_v4 = vmul.f32 %v1699_v43, %v1684_v8  ;;  %v1932_v19 = vmul.f32 %v1928_v28, %v1699_v43  ;;  %3342 = vset.pattern.permute.xlu1 %v7348_v30 }
 0x1df   :  { %2641 = vperm.xlu1 %3342, %v5861_v39  }
 0x1e0   :  { %3383 = vpow2.f32 %v1745_v47  ;;  %v1708_v63 = vadd.f32 %v1704_v4, %v1680_v9  ;;  %v1936_v1 = vadd.f32 %v1932_v19, %v1924_v50  ;;  %v6198_v9 = vld [vmem:[%s6402_s2 + $0x40] sm:$0xff] }
 0x1e1   :  { %3385 = vpow2.f32 %v1957_v61 }
 0x1e2   :  { %v6148_v14 = vadd.f32 %v1732_v55, %v1708_v63  ;;  %v6150_v24 = vadd.f32 %v1944_v54, %v1936_v1  ;;  %v1719_v42 = vpop.permute.xlu1 %1718  ;;  %v7357_v54 = vmov 11  }
 0x1e3   :  { %v1730_v27 = vmul.f32 %v1719_v42, %v6106_v25  ;;  %v1942_v45 = vmul.f32 %v6110_v56, %v1719_v42  ;;  %3343 = vset.pattern.permute.xlu1 %v7351_v60 }
 0x1e4   :  { %v1744_v32 = vmin.f32 %v6148_v14, 0.0  ;;  %v1956_v49 = vmin.f32 %v6150_v24, 0.0  ;;  %2665 = vperm.xlu1 %3343, %v5638_v38   ;;  %vm1740_vm3 = vcmp.gt.f32.partialorder %v6148_v14, 0.0  ;;  %vm1952_vm4 = vcmp.gt.f32.partialorder %v6150_v24, 0.0 }
 0x1e5   :  { %v6160_v52 = vadd.f32 %v1730_v27, %v1706_v34  ;;  %v6162_v23 = vadd.f32 %v1942_v45, %v1934_v16  ;;  %v7358_v34 = vld [vmem:[#allocation74_spill] sm:$0xff] }
 0x1e6   :  { %v1751_v11 = vmul.f32 1.442695, %v1744_v32  ;;  %v1963_v33 = vmul.f32 1.442695, %v1956_v49  ;;  %v1723_v8 = vpop.permute.xlu1 %1722  ;;  %v2427_v27 = vmul.f32 %v7358_v34, %v6168_v51  ;;  %v2863_v16 = vmul.f32 %v6175_v41, %v7358_v34 }
 0x1e7   :  { %v1742_v28 = vmin.f32 %v6160_v52, 0.0  ;;  %v1954_v18 = vmin.f32 %v6162_v23, 0.0  ;;  %v1731_v5 = vmul.f32 %v1723_v8, %v6106_v25  ;;  %v1943_v38 = vmul.f32 %v6110_v56, %v1723_v8 }
 0x1e8   :  { %3387 = vpow2.f32 %v1751_v11  ;;  %3344 = vset.pattern.permute.xlu1 %v7348_v30  ;;  %v2379_v25 = vrot.slane %v7353_v0, %v7355_v12  ;;  %v2851_v56 = vrot.slane %v7354_v58, %v7355_v12  ;;  %v7359_v11 = vld [vmem:[#allocation34_spill] sm:$0xff]  ;;  %vm1738_vm5 = vcmp.gt.f32.partialorder %v6160_v52, 0.0 }
 0x1e9   :  { %3389 = vpow2.f32 %v1963_v33  ;;  %v1747_v40 = vmul.f32 1.442695, %v1742_v28  ;;  %v1959_v59 = vmul.f32 1.442695, %v1954_v18  ;;  %2645 = vperm.xlu1 %3344, %v5992_v46   ;;  %v6178_v36 = vadd.f32 %v1731_v5, %v1707_v29  ;;  %v7360_v28 = vld [vmem:[#allocation56_spill] sm:$0xff] }
 0x1ea   :  { %v6180_v26 = vadd.f32 %v1943_v38, %v1935_v21  ;;  %v2401_v18 = vmul.f32 %v7360_v28, %v2379_v25  ;;  %v2853_v38 = vmul.f32 %v2851_v56, %v7360_v28  ;;  %vm1950_vm6 = vcmp.gt.f32.partialorder %v6162_v23, 0.0 }
 0x1eb   :  { %3391 = vpow2.f32 %v1747_v40  ;;  %v2383_v30 = vpop.permute.xlu1 %2382  ;;  %v1743_v13 = vmin.f32 %v6178_v36, 0.0  ;;  %v6227_v40 = vrot.slane %v7354_v58, %v7359_v11  ;;  %vm1739_vm7 = vcmp.gt.f32.partialorder %v6178_v36, 0.0 }
 0x1ec   :  { %3393 = vpow2.f32 %v1959_v59  ;;  %v1955_v44 = vmin.f32 %v6180_v26, 0.0  ;;  %v2400_v62 = vmul.f32 %v2383_v30, %v2379_v25  ;;  %v2852_v55 = vmul.f32 %v2851_v56, %v2383_v30 }
 0x1ed   :  { %v3384_v17 = vpop.eup %3383  ;;  %3346 = vset.pattern.permute.xlu1 %v7357_v54  ;;  %v1749_v43 = vmul.f32 1.442695, %v1743_v13  ;;  %vm1951_vm8 = vcmp.gt.f32.partialorder %v6180_v26, 0.0 }
 0x1ee   :  { %v3386_v29 = vpop.eup %3385  ;;  %v3163_v21 = vadd.f32 -1.0, %v3384_v17  ;;  %2689 = vperm.xlu1 %3346, %v6198_v9   ;;  %v1961_v47 = vmul.f32 1.442695, %v1955_v44  ;;  %v6201_v61 = vadd.f32 %v2424_v15, %v2400_v62  ;;  %v6203_v4 = vadd.f32 %v2860_v7, %v2852_v55 }
 0x1ef   :  { %v3167_v50 = vadd.f32 -1.0, %v3386_v29  ;;  %v2393_v19 = vpop.permute.xlu1 %2392  ;;  %3395 = vpow2.f32 %v1749_v43  ;;  %v1005_v29 = vrot.slane %v6089_v22, 4  ;;  %v7362_v43 = vmov 12  }
 0x1f0   :  { %v1757_v3 = vsel %vm1737_vm1, %v6133_v6, %v3163_v21  ;;  %v2402_v57 = vmul.f32 %v2393_v19, %v2379_v25  ;;  %v2854_v31 = vmul.f32 %v2851_v56, %v2393_v19  ;;  %3397 = vpow2.f32 %v1961_v47 }
 0x1f1   :  { %v1969_v63 = vsel %vm1949_vm2, %v6135_v2, %v3167_v50  ;;  %v6215_v2 = vrot.slane %v7353_v0, %v7359_v11 }
 0x1f2   :  { %v1973_v1 = vmul.f32 %v1969_v63, %v1757_v3  ;;  %3348 = vset.pattern.permute.xlu1 %v7351_v60  ;;  %v6250_v63 = vld [vmem:[%s6402_s2 + $0x48] sm:$0xff]  ;;  %s3528_s2 = smov [#allocation5]  }
 0x1f3   :  { %2673 = vperm.xlu1 %3348, %v5992_v46   ;;  %v2398_v42 = vpop.permute.xlu1 %2397  ;;  %s3096_s24 = sshll.u32 %s3528_s2, 4  ;;  %s3097_s24 = int_to_ptr.vmem [resolvable:$true] %s3096_s24 }
 0x1f4   :  { %v2403_v45 = vmul.f32 %v2398_v42, %v2379_v25  ;;  %v2855_v6 = vmul.f32 %v2851_v56, %v2398_v42  ;;  %v7361_v56 = vld [vmem:[#allocation77_spill] sm:$0xff]  ;;  %s3462_s25 = scalar_lea.vmem %s3097_s24, 16  ;;  %s3466_s0 = scalar_lea.vmem %s3097_s24, 32 }
 0x1f5   :  { %v3388_v32 = vpop.eup %3387  ;;  %v2453_v17 = vmul.f32 %v7361_v56, %v6215_v2  ;;  %p3463_p5 = scmp.ne.s32.totalorder %s3097_s24, %s3462_s25  ;;  %p3467_p6 = scmp.lt.s32.totalorder %s3097_s24, %s3097_s24 }
 0x1f6   :  { %v3390_v49 = vpop.eup %3389  ;;  %v3166_v33 = vadd.f32 -1.0, %v3388_v32  ;;  %v6217_v8 = vadd.f32 %v2427_v27, %v2403_v45  ;;  %v6219_v60 = vadd.f32 %v2863_v16, %v2855_v6  ;;  %v7363_v32 = vld [vmem:[#allocation36_spill] sm:$0xff]  ;;  %p3468_p7 = scmp.lt.s32.totalorder %s3466_s0, %s3462_s25 }
 0x1f7   :  { %v3170_v20 = vadd.f32 -1.0, %v3390_v49  ;;  %3349 = vset.pattern.permute.xlu1 %v7357_v54  ;;  %v2883_v11 = vrot.slane %v7354_v58, %v7363_v32 }
 0x1f8   :  { %v3392_v5 = vpop.eup %3391  ;;  %v1760_v59 = vsel %vm1740_vm3, %v6148_v14, %v3166_v33  ;;  %2697 = vperm.xlu1 %3349, %v5861_v39   ;;  %v2414_v12 = vpop.permute.xlu1 %2413  ;;  %v1006_v33 = vadd.f32 %v1005_v29, %v6089_v22  ;;  %p3469_p8 = por %p3468_p7, %p3467_p6 }
 0x1f9   :  { %v3394_v25 = vpop.eup %3393  ;;  %v1972_v30 = vsel %vm1952_vm4, %v6150_v24, %v3170_v20  ;;  %v3164_v10 = vadd.f32 -1.0, %v3392_v5  ;;  %v2425_v15 = vmul.f32 %v2414_v12, %v6168_v51  ;;  %v2861_v13 = vmul.f32 %v6175_v41, %v2414_v12 }
 0x1fa   :  { %v1976_v7 = vmul.f32 %v1972_v30, %v1760_v59  ;;  %v3168_v14 = vadd.f32 -1.0, %v3394_v25  ;;  %v2873_v24 = vmul.f32 %v6227_v40, %v7361_v56  ;;  %p3470_p9 = pnand %p3469_p8, %p3463_p5 }
 0x1fb   :  { %v1758_v44 = vsel %vm1738_vm5, %v6160_v52, %v3164_v10  ;;  %v2429_v62 = vadd.f32 %v2425_v15, %v2401_v18  ;;  %v2865_v55 = vadd.f32 %v2861_v13, %v2853_v38  ;;  %v7365_v10 = vmov 13  }
 0x1fc   :  { %v1970_v21 = vsel %vm1950_vm6, %v6162_v23, %v3168_v14  ;;  %3350 = vset.pattern.permute.xlu1 %v7362_v43  ;;  %v2418_v50 = vpop.permute.xlu1 %2417  ;;  %v3396_v47 = vpop.eup %3395 }
 0x1fd   :  { %v1974_v19 = vmul.f32 %v1970_v21, %v1758_v44  ;;  %v2426_v3 = vmul.f32 %v2418_v50, %v6168_v51  ;;  %v2862_v52 = vmul.f32 %v6175_v41, %v2418_v50  ;;  %2721 = vperm.xlu1 %3350, %v6250_v63   ;;  %v6253_v42 = vadd.f32 %v2453_v17, %v2429_v62  ;;  %v3398_v34 = vpop.eup %3397 }
 0x1fe   :  { %v3165_v23 = vadd.f32 -1.0, %v3396_v47  ;;  %v2877_v27 = vadd.f32 %v2873_v24, %v2865_v55  ;;  %v3169_v45 = vadd.f32 -1.0, %v3398_v34  ;;  %v2463_v41 = vrot.slane %v7353_v0, %v7363_v32  ;;  %v7366_v55 = vld [vmem:[#allocation95_spill] sm:$0xff] }
 0x1ff   :  { %v1977_v16 = vadd.f32 %v1974_v19, %v1973_v1  ;;  %v2430_v6 = vadd.f32 %v2426_v3, %v2402_v57  ;;  %v2866_v51 = vadd.f32 %v2862_v52, %v2854_v31  ;;  %v2887_v29 = vmul.f32 %v2883_v11, %v7366_v55 }
 0x200   :  { %v1759_v49 = vsel %vm1739_vm7, %v6178_v36, %v3165_v23  ;;  %v1971_v28 = vsel %vm1951_vm8, %v6180_v26, %v3169_v45  ;;  %v7364_v36 = vld [vmem:[#allocation91_spill] sm:$0xff]  ;;  %v1007_v26 = vrot.slane %v1006_v33, 2  ;;  %v2483_v24 = vmul.f32 %v7366_v55, %v2463_v41  ;;  %v7367_v45 = vld [vmem:[#allocation112_spill] sm:$0xff] }
 0x201   :  { %3351 = vset.pattern.permute.xlu1 %v7357_v54  ;;  %v2438_v1 = vpop.permute.xlu1 %2437  ;;  %v1975_v18 = vmul.f32 %v1971_v28, %v1759_v49  ;;  %v2480_v20 = vmul.f32 %v7364_v36, %v2463_v41  ;;  %v2884_v22 = vmul.f32 %v2883_v11, %v7364_v36  ;;  %v2491_v19 = vrot.slane %v7353_v0, %v7332_v53  ;;  %v7374_v55 = vld [vmem:[#allocation132_spill] sm:$0xff] }
 0x202   :  { %v2452_v57 = vmul.f32 %v2438_v1, %v6215_v2  ;;  %v2872_v31 = vmul.f32 %v6227_v40, %v2438_v1  ;;  %2701 = vperm.xlu1 %3351, %v5992_v46  }
 0x203   :  { %v1978_v5 = vadd.f32 %v1977_v16, %v1975_v18 }
 0x204   :  { %v2456_v38 = vadd.f32 %v2452_v57, %v6201_v61  ;;  %v2876_v59 = vadd.f32 %v2872_v31, %v6203_v4  ;;  %v1008_v4 = vadd.f32 %v1007_v26, %v1006_v33  ;;  %v7370_v26 = vld [vmem:[#allocation137_spill] sm:$0xff] }
 0x205   :  { %v2446_v12 = vpop.permute.xlu1 %2445  ;;  %v1979_v54 = vadd.f32 %v1978_v5, %v1976_v7 }
 0x206   :  { %v2454_v25 = vmul.f32 %v2446_v12, %v6215_v2  ;;  %v2874_v30 = vmul.f32 %v6227_v40, %v2446_v12  ;;  %3353 = vset.pattern.permute.xlu1 %v7365_v10  ;;  %v2484_v15 = vadd.f32 %v2480_v20, %v2456_v38  ;;  %v2888_v13 = vadd.f32 %v2884_v22, %v2876_v59 }
 0x207   :  { %2745 = vperm.xlu1 %3353, %v6198_v9   ;;  %v1980_v56 = vrot.slane %v1979_v54, 4  ;;  %v1009_v34 = vrot.slane %v1008_v4, 1  ;;  %v7368_v20 = vmov 14  }
 0x208   :  { %v2458_v17 = vadd.f32 %v2454_v25, %v2430_v6  ;;  %v2878_v61 = vadd.f32 %v2874_v30, %v2866_v51 }
 0x209   :  { %v2450_v14 = vpop.permute.xlu1 %2449  ;;  %v1981_v44 = vadd.f32 %v1980_v56, %v1979_v54  ;;  %v1010_v32 = vadd.f32 %v1009_v34, %v1008_v4  ;;  %v7373_v4 = vmov 15  }
 0x20a   :  { %v2455_v62 = vmul.f32 %v2450_v14, %v6215_v2  ;;  %v2875_v7 = vmul.f32 %v6227_v40, %v2450_v14  ;;  %v2895_v2 = vrot.slane %v7354_v58, %v7332_v53 }
 0x20b   :  { %3355 = vset.pattern.permute.xlu1 %v7362_v43  ;;  %v1982_v21 = vrot.slane %v1981_v44, 2 }
 0x20c   :  { %v2459_v50 = vadd.f32 %v2455_v62, %v6217_v8  ;;  %v2879_v47 = vadd.f32 %v2875_v7, %v6219_v60  ;;  %2729 = vperm.xlu1 %3355, %v5992_v46   ;;  %v2509_v60 = vmul.f32 %v7367_v45, %v2491_v19  ;;  %v2897_v6 = vmul.f32 %v2895_v2, %v7367_v45  ;;  %v7379_v45 = vld [vmem:[#allocation144_spill] sm:$0xff] }
 0x20d   :  { %v1983_v43 = vadd.f32 %v1982_v21, %v1981_v44 }
 0x20e   :  { %v2470_v40 = vpop.permute.xlu1 %2469  ;;  %v2487_v3 = vadd.f32 %v2483_v24, %v2459_v50  ;;  %v2891_v52 = vadd.f32 %v2887_v29, %v2879_v47  ;;  %v7375_v29 = vld [vmem:[#allocation133_spill] sm:$0xff] }
 0x20f   :  { %v2481_v23 = vmul.f32 %v2470_v40, %v2463_v41  ;;  %v2885_v16 = vmul.f32 %v2883_v11, %v2470_v40  ;;  %v1984_v8 = vrot.slane %v1983_v43, 1 }
 0x210   :  { %3356 = vset.pattern.permute.xlu1 %v7365_v10 }
 0x211   :  { %v2485_v51 = vadd.f32 %v2481_v23, %v6253_v42  ;;  %v2889_v0 = vadd.f32 %v2885_v16, %v2877_v27  ;;  %2753 = vperm.xlu1 %3356, %v5861_v39   ;;  %v1985_v49 = vadd.f32 %v1984_v8, %v1983_v43  ;;  %v7377_v23 = vld [vmem:[#allocation151_spill] sm:$0xff] }
 0x212   :  { %v2474_v58 = vpop.permute.xlu1 %2473  ;;  %v7378_v8 = vld [vmem:[#allocation143_spill] sm:$0xff] }
 0x213   :  { %v2482_v33 = vmul.f32 %v2474_v58, %v2463_v41  ;;  %v2886_v28 = vmul.f32 %v2883_v11, %v2474_v58  ;;  %v2513_v1 = vadd.f32 %v2509_v60, %v2485_v51  ;;  %v2901_v18 = vadd.f32 %v2897_v6, %v2889_v0  ;;  %v7369_v11 = vld [vmem:[#allocation136_spill] sm:$0xff] }
 0x214   :  { %v6293_v57 = vadd.f32 %v1985_v49, %v1010_v32  ;;  %v7380_v58 = vld [vmem:[#allocation60_spill] sm:$0xff]  ;;  %v7381_v49 = vld [vmem:[#allocation62_spill] sm:$0xff] }
 0x215   :  { %v2486_v31 = vadd.f32 %v2482_v33, %v2458_v17  ;;  %v2890_v36 = vadd.f32 %v2886_v28, %v2878_v61  ;;  %3357 = vset.pattern.permute.xlu1 %v7368_v20  ;;  %v7371_v17 = vld [vmem:[#allocation147_spill] sm:$0xff]  ;;  %v7372_v61 = vld [vmem:[#allocation148_spill] sm:$0xff] }
 0x216   :  { %2777 = vperm.xlu1 %3357, %v6250_v63  }
 0x217   :  { %v2494_v5 = vpop.permute.xlu1 %2493 }
 0x218   :  { %v2508_v42 = vmul.f32 %v2494_v5, %v2491_v19  ;;  %v2896_v27 = vmul.f32 %v2895_v2, %v2494_v5  ;;  %v7383_v5 = vld [vmem:[#allocation16_spill] sm:$0xff] }
 0x21a   :  { %v2512_v38 = vadd.f32 %v2508_v42, %v2484_v15  ;;  %v2900_v59 = vadd.f32 %v2896_v27, %v2888_v13  ;;  %3358 = vset.pattern.permute.xlu1 %v7365_v10 }
 0x21b   :  { %2757 = vperm.xlu1 %3358, %v5992_v46   ;;  %v2502_v41 = vpop.permute.xlu1 %2501 }
 0x21c   :  { %v2540_v22 = vadd.f32 %v7369_v11, %v2512_v38  ;;  %v2912_v12 = vadd.f32 %v7370_v26, %v2900_v59  ;;  %v2510_v54 = vmul.f32 %v2502_v41, %v2491_v19  ;;  %v2898_v25 = vmul.f32 %v2895_v2, %v2502_v41  ;;  %v7384_v41 = vld [vmem:[#allocation52_spill] sm:$0xff] }
 0x21e   :  { %v2514_v30 = vadd.f32 %v2510_v54, %v2486_v31  ;;  %v2902_v56 = vadd.f32 %v2898_v25, %v2890_v36  ;;  %v2568_v63 = vadd.f32 %v7371_v17, %v2540_v22  ;;  %v2924_v14 = vadd.f32 %v7372_v61, %v2912_v12  ;;  %v7382_v36 = vld [vmem:[#allocation86_spill] sm:$0xff]  ;;  %v7385_v22 = vld [vmem:[#allocation89_spill] sm:$0xff] }
 0x21f   :  { %3360 = vset.pattern.permute.xlu1 %v7373_v4  ;;  %v2506_v15 = vpop.permute.xlu1 %2505 }
 0x220   :  { %v2511_v13 = vmul.f32 %v2506_v15, %v2491_v19  ;;  %v2899_v10 = vmul.f32 %v2895_v2, %v2506_v15  ;;  %2801 = vperm.xlu1 %3360, %v6198_v9  }
 0x222   :  { %v2515_v44 = vadd.f32 %v2511_v13, %v2487_v3  ;;  %v2903_v62 = vadd.f32 %v2899_v10, %v2891_v52  ;;  %v7376_v52 = vld [vmem:[#allocation150_spill] sm:$0xff]  ;;  %v7387_v10 = vld [vmem:[#allocation76_spill] sm:$0xff] }
 0x224   :  { %3361 = vset.pattern.permute.xlu1 %v7368_v20  ;;  %v2526_v7 = vpop.permute.xlu1 %2525 }
 0x225   :  { %v2537_v24 = vmul.f32 %v2526_v7, %v7374_v55  ;;  %v2909_v21 = vmul.f32 %v7375_v29, %v2526_v7  ;;  %2785 = vperm.xlu1 %3361, %v5992_v46  }
 0x227   :  { %v2541_v50 = vadd.f32 %v2537_v24, %v2513_v1  ;;  %v2913_v47 = vadd.f32 %v2909_v21, %v2901_v18 }
 0x228   :  { %v2530_v40 = vpop.permute.xlu1 %2529 }
 0x229   :  { %v2538_v34 = vmul.f32 %v2530_v40, %v7374_v55  ;;  %v2910_v19 = vmul.f32 %v7375_v29, %v2530_v40  ;;  %3362 = vset.pattern.permute.xlu1 %v7373_v4 }
 0x22a   :  { %2809 = vperm.xlu1 %3362, %v5861_v39  }
 0x22b   :  { %v2542_v9 = vadd.f32 %v2538_v34, %v2514_v30  ;;  %v2914_v2 = vadd.f32 %v2910_v19, %v2902_v56  ;;  %v7391_v34 = vld [vmem:[#allocation59_spill] sm:$0xff] }
 0x22d   :  { %v2554_v3 = vpop.permute.xlu1 %2553  ;;  %v2570_v43 = vadd.f32 %v7376_v52, %v2542_v9  ;;  %v2926_v16 = vadd.f32 %v7377_v23, %v2914_v2  ;;  %v7392_v23 = vld [vmem:[#allocation99_spill] sm:$0xff] }
 0x22e   :  { %v2565_v46 = vmul.f32 %v2554_v3, %v7378_v8  ;;  %v2921_v60 = vmul.f32 %v7379_v45, %v2554_v3 }
 0x230   :  { %v2569_v6 = vadd.f32 %v2565_v46, %v2541_v50  ;;  %v2925_v51 = vadd.f32 %v2921_v60, %v2913_v47  ;;  %v7390_v47 = vld [vmem:[#allocation15_spill] sm:$0xff] }
 0x232   :  { %v2534_v0 = vpop.permute.xlu1 %2533  ;;  %v2597_v32 = vadd.f32 %v7380_v58, %v2569_v6  ;;  %v2937_v33 = vadd.f32 %v7381_v49, %v2925_v51  ;;  %v7394_v51 = vld [vmem:[#allocation17_spill] sm:$0xff]  ;;  %v7395_v58 = vld [vmem:[#allocation48_spill] sm:$0xff] }
 0x233   :  { %v2539_v39 = vmul.f32 %v2534_v0, %v7374_v55  ;;  %v2911_v28 = vmul.f32 %v7375_v29, %v2534_v0  ;;  %v7389_v55 = vld [vmem:[#allocation23_spill] sm:$0xff] }
 0x235   :  { %v2543_v1 = vadd.f32 %v2539_v39, %v2515_v44  ;;  %v2915_v18 = vadd.f32 %v2911_v28, %v2903_v62  ;;  %v7388_v62 = vld [vmem:[#allocation81_spill] sm:$0xff] }
 0x237   :  { %v2578_v31 = vpop.permute.xlu1 %2577 }
 0x238   :  { %v2592_v20 = vmul.f32 %v2578_v31, %v7382_v36  ;;  %v2932_v42 = vmul.f32 %v7383_v5, %v2578_v31 }
 0x23a   :  { %v2596_v27 = vadd.f32 %v2592_v20, %v2568_v63  ;;  %v2936_v38 = vadd.f32 %v2932_v42, %v2924_v14  ;;  %v7386_v14 = vld [vmem:[#allocation55_spill] sm:$0xff]  ;;  %v7396_v42 = vld [vmem:[#allocation49_spill] sm:$0xff] }
 0x23c   :  { %v2562_v59 = vpop.permute.xlu1 %2561  ;;  %v2624_v11 = vadd.f32 %v7384_v41, %v2596_v27  ;;  %v2948_v26 = vadd.f32 %v7385_v22, %v2936_v38  ;;  %v7397_v38 = vld [vmem:[#allocation113_spill] sm:$0xff]  ;;  %v7398_v41 = vld [vmem:[#allocation35_spill] sm:$0xff] }
 0x23d   :  { %v2567_v12 = vmul.f32 %v2562_v59, %v7378_v8  ;;  %v2923_v54 = vmul.f32 %v7379_v45, %v2562_v59  ;;  %v7393_v8 = vld [vmem:[#allocation106_spill] sm:$0xff]  ;;  %v7399_v22 = vld [vmem:[#allocation37_spill] sm:$0xff] }
 0x23f   :  { %v2571_v25 = vadd.f32 %v2567_v12, %v2543_v1  ;;  %v2927_v30 = vadd.f32 %v2923_v54, %v2915_v18 }
 0x241   :  { %v2586_v56 = vpop.permute.xlu1 %2585 }
 0x242   :  { %v2594_v17 = vmul.f32 %v2586_v56, %v7382_v36  ;;  %v2934_v61 = vmul.f32 %v7383_v5, %v2586_v56 }
 0x244   :  { %v2598_v4 = vadd.f32 %v2594_v17, %v2570_v43  ;;  %v2938_v15 = vadd.f32 %v2934_v61, %v2926_v16  ;;  %v7401_v17 = vld [vmem:[#allocation57_spill] sm:$0xff] }
 0x246   :  { %v2610_v63 = vpop.permute.xlu1 %2609  ;;  %v2626_v13 = vadd.f32 %v7386_v14, %v2598_v4  ;;  %v2950_v44 = vadd.f32 %v7387_v10, %v2938_v15 }
 0x247   :  { %v2621_v7 = vmul.f32 %v2610_v63, %v7388_v62  ;;  %v2945_v24 = vmul.f32 %v7389_v55, %v2610_v63 }
 0x249   :  { %v2625_v29 = vadd.f32 %v2621_v7, %v2597_v32  ;;  %v2949_v21 = vadd.f32 %v2945_v24, %v2937_v33 }
 0x24b   :  { %v2590_v50 = vpop.permute.xlu1 %2589  ;;  %v2653_v40 = vadd.f32 %v7390_v47, %v2625_v29  ;;  %v2961_v19 = vadd.f32 %v7391_v34, %v2949_v21  ;;  %v7405_v29 = vld [vmem:[#allocation69_spill] sm:$0xff] }
 0x24c   :  { %v2595_v9 = vmul.f32 %v2590_v50, %v7382_v36  ;;  %v2935_v2 = vmul.f32 %v7383_v5, %v2590_v50  ;;  %v7406_v50 = vld [vmem:[#allocation131_spill] sm:$0xff] }
 0x24e   :  { %v2599_v3 = vadd.f32 %v2595_v9, %v2571_v25  ;;  %v2939_v52 = vadd.f32 %v2935_v2, %v2927_v30  ;;  %v7400_v30 = vld [vmem:[#allocation50_spill] sm:$0xff] }
 0x250   :  { %v2634_v43 = vpop.permute.xlu1 %2633 }
 0x251   :  { %v2648_v16 = vmul.f32 %v2634_v43, %v7392_v23  ;;  %v2956_v46 = vmul.f32 %v7393_v8, %v2634_v43 }
 0x253   :  { %v2652_v45 = vadd.f32 %v2648_v16, %v2624_v11  ;;  %v2960_v60 = vadd.f32 %v2956_v46, %v2948_v26 }
 0x255   :  { %v2618_v6 = vpop.permute.xlu1 %2617  ;;  %v2680_v0 = vadd.f32 %v7394_v51, %v2652_v45  ;;  %v2972_v32 = vadd.f32 %v7395_v58, %v2960_v60  ;;  %v7407_v45 = vld [vmem:[#allocation68_spill] sm:$0xff] }
 0x256   :  { %v2623_v49 = vmul.f32 %v2618_v6, %v7388_v62  ;;  %v2947_v33 = vmul.f32 %v7389_v55, %v2618_v6  ;;  %v7404_v55 = vld [vmem:[#allocation66_spill] sm:$0xff] }
 0x258   :  { %v2627_v39 = vadd.f32 %v2623_v49, %v2599_v3  ;;  %v2951_v28 = vadd.f32 %v2947_v33, %v2939_v52 }
 0x25a   :  { %v2642_v1 = vpop.permute.xlu1 %2641 }
 0x25b   :  { %v2650_v18 = vmul.f32 %v2642_v1, %v7392_v23  ;;  %v2958_v31 = vmul.f32 %v7393_v8, %v2642_v1 }
 0x25d   :  { %v2654_v36 = vadd.f32 %v2650_v18, %v2626_v13  ;;  %v2962_v20 = vadd.f32 %v2958_v31, %v2950_v44  ;;  %v7402_v13 = vld [vmem:[#allocation64_spill] sm:$0xff]  ;;  %v7403_v44 = vld [vmem:[#allocation119_spill] sm:$0xff] }
 0x25e   :  { %v2715_v10 = vrot.slane %v7402_v13, %v7332_v53  ;;  %v2991_v62 = vrot.slane %v7403_v44, %v7332_v53  ;;  %v2743_v58 = vrot.slane %v7402_v13, %v7335_v48  ;;  %v7408_v18 = vld [vmem:[#allocation79_spill] sm:$0xff] }
 0x25f   :  { %v2666_v5 = vpop.permute.xlu1 %2665  ;;  %v2682_v27 = vadd.f32 %v7396_v42, %v2654_v36  ;;  %v2974_v59 = vadd.f32 %v7397_v38, %v2962_v20 }
 0x260   :  { %v2677_v11 = vmul.f32 %v2666_v5, %v7398_v41  ;;  %v2969_v26 = vmul.f32 %v7399_v22, %v2666_v5  ;;  %v2732_v47 = vmul.f32 %v7406_v50, %v2715_v10  ;;  %v2734_v60 = vmul.f32 %v7407_v45, %v2715_v10 }
 0x261   :  { %v2994_v6 = vmul.f32 %v2991_v62, %v7407_v45  ;;  %v2761_v31 = vmul.f32 %v7408_v18, %v2743_v58 }
 0x262   :  { %v2681_v12 = vadd.f32 %v2677_v11, %v2653_v40  ;;  %v2973_v54 = vadd.f32 %v2969_v26, %v2961_v19  ;;  %v2992_v40 = vmul.f32 %v2991_v62, %v7406_v50  ;;  %v3015_v26 = vrot.slane %v7403_v44, %v7347_v35 }
 0x264   :  { %v2646_v25 = vpop.permute.xlu1 %2645  ;;  %v2709_v56 = vadd.f32 %v7400_v30, %v2681_v12  ;;  %v2985_v61 = vadd.f32 %v7401_v17, %v2973_v54  ;;  %v7409_v30 = vld [vmem:[#allocation93_spill] sm:$0xff] }
 0x265   :  { %v2651_v4 = vmul.f32 %v2646_v25, %v7392_v23  ;;  %v2959_v15 = vmul.f32 %v7393_v8, %v2646_v25  ;;  %v3016_v17 = vmul.f32 %v3015_v26, %v7409_v30 }
 0x267   :  { %v2655_v63 = vadd.f32 %v2651_v4, %v2627_v39  ;;  %v2963_v14 = vadd.f32 %v2959_v15, %v2951_v28 }
 0x269   :  { %v2690_v7 = vpop.permute.xlu1 %2689 }
 0x26a   :  { %v2704_v24 = vmul.f32 %v2690_v7, %v7404_v55  ;;  %v2980_v21 = vmul.f32 %v7405_v29, %v2690_v7 }
 0x26c   :  { %v2708_v34 = vadd.f32 %v2704_v24, %v2680_v0  ;;  %v2984_v19 = vadd.f32 %v2980_v21, %v2972_v32  ;;  %v3003_v32 = vrot.slane %v7403_v44, %v7335_v48 }
 0x26e   :  { %v2674_v9 = vpop.permute.xlu1 %2673  ;;  %v2736_v2 = vadd.f32 %v2732_v47, %v2708_v34  ;;  %v2996_v3 = vadd.f32 %v2992_v40, %v2984_v19  ;;  %v3005_v36 = vmul.f32 %v3003_v32, %v7408_v18  ;;  %v3027_v40 = vrot.slane %v7403_v44, %v7345_v37  ;;  %v7410_v34 = vld [vmem:[#allocation82_spill] sm:$0xff] }
 0x26f   :  { %v2679_v52 = vmul.f32 %v2674_v9, %v7398_v41  ;;  %v2971_v43 = vmul.f32 %v7399_v22, %v2674_v9  ;;  %v2771_v22 = vrot.slane %v7402_v13, %v7347_v35  ;;  %v2799_v35 = vrot.slane %v7402_v13, %v7345_v37 }
 0x270   :  { %v3018_v9 = vmul.f32 %v3015_v26, %v7410_v34 }
 0x271   :  { %v2683_v23 = vadd.f32 %v2679_v52, %v2655_v63  ;;  %v2975_v53 = vadd.f32 %v2971_v43, %v2963_v14  ;;  %v2790_v19 = vmul.f32 %v7410_v34, %v2771_v22  ;;  %v2806_v52 = vpop.permute.xlu0 %2805 }
 0x273   :  { %v2698_v16 = vpop.permute.xlu1 %2697 }
 0x274   :  { %v2706_v8 = vmul.f32 %v2698_v16, %v7404_v55  ;;  %v2982_v46 = vmul.f32 %v7405_v29, %v2698_v16 }
 0x276   :  { %v2710_v51 = vadd.f32 %v2706_v8, %v2682_v27  ;;  %v2986_v0 = vadd.f32 %v2982_v46, %v2974_v59 }
 0x278   :  { %v2722_v49 = vpop.permute.xlu1 %2721  ;;  %v2738_v33 = vadd.f32 %v2734_v60, %v2710_v51  ;;  %v2998_v39 = vadd.f32 %v2994_v6, %v2986_v0 }
 0x279   :  { %v2733_v28 = vmul.f32 %v2722_v49, %v2715_v10  ;;  %v2993_v1 = vmul.f32 %v2991_v62, %v2722_v49 }
 0x27b   :  { %v2737_v20 = vadd.f32 %v2733_v28, %v2709_v56  ;;  %v2997_v5 = vadd.f32 %v2993_v1, %v2985_v61  ;;  %v2788_v56 = vmul.f32 %v7409_v30, %v2771_v22 }
 0x27d   :  { %v2702_v42 = vpop.permute.xlu1 %2701  ;;  %v2765_v27 = vadd.f32 %v2761_v31, %v2737_v20  ;;  %v3009_v38 = vadd.f32 %v3005_v36, %v2997_v5  ;;  %v2814_v5 = vpop.permute.xlu0 %2813 }
 0x27e   :  { %v2707_v59 = vmul.f32 %v2702_v42, %v7404_v55  ;;  %v2983_v41 = vmul.f32 %v7405_v29, %v2702_v42 }
 0x280   :  { %v2711_v11 = vadd.f32 %v2707_v59, %v2683_v23  ;;  %v2987_v48 = vadd.f32 %v2983_v41, %v2975_v53  ;;  %v2817_v23 = vmul.f32 %v2806_v52, %v2799_v35  ;;  %v3029_v53 = vmul.f32 %v3027_v40, %v2806_v52 }
 0x282   :  { %v2746_v12 = vpop.permute.xlu1 %2745 }
 0x283   :  { %v2760_v54 = vmul.f32 %v2746_v12, %v2743_v58  ;;  %v3004_v25 = vmul.f32 %v3003_v32, %v2746_v12 }
 0x285   :  { %v2764_v61 = vadd.f32 %v2760_v54, %v2736_v2  ;;  %v3008_v4 = vadd.f32 %v3004_v25, %v2996_v3 }
 0x287   :  { %v2730_v15 = vpop.permute.xlu1 %2729  ;;  %v2792_v63 = vadd.f32 %v2788_v56, %v2764_v61  ;;  %v3020_v14 = vadd.f32 %v3016_v17, %v3008_v4 }
 0x288   :  { %v2735_v7 = vmul.f32 %v2730_v15, %v2715_v10  ;;  %v2995_v55 = vmul.f32 %v2991_v62, %v2730_v15 }
 0x28a   :  { %v2739_v24 = vadd.f32 %v2735_v7, %v2711_v11  ;;  %v2999_v29 = vadd.f32 %v2995_v55, %v2987_v48  ;;  %v2819_v11 = vmul.f32 %v2814_v5, %v2799_v35  ;;  %v3031_v48 = vmul.f32 %v3027_v40, %v2814_v5 }
 0x28c   :  { %v2754_v21 = vpop.permute.xlu1 %2753 }
 0x28d   :  { %v2762_v50 = vmul.f32 %v2754_v21, %v2743_v58  ;;  %v3006_v47 = vmul.f32 %v3003_v32, %v2754_v21 }
 0x28f   :  { %v2766_v2 = vadd.f32 %v2762_v50, %v2738_v33  ;;  %v3010_v3 = vadd.f32 %v3006_v47, %v2998_v39 }
 0x291   :  { %v2778_v10 = vpop.permute.xlu1 %2777  ;;  %v2794_v62 = vadd.f32 %v2790_v19, %v2766_v2  ;;  %v3022_v43 = vadd.f32 %v3018_v9, %v3010_v3 }
 0x292   :  { %v2789_v16 = vmul.f32 %v2778_v10, %v2771_v22  ;;  %v3017_v8 = vmul.f32 %v3015_v26, %v2778_v10 }
 0x294   :  { %v2793_v46 = vadd.f32 %v2789_v16, %v2765_v27  ;;  %v3021_v45 = vadd.f32 %v3017_v8, %v3009_v38 }
 0x296   :  { %v2821_v13 = vadd.f32 %v2817_v23, %v2793_v46  ;;  %v3033_v60 = vadd.f32 %v3029_v53, %v3021_v45  ;;  %v2758_v6 = vpop.permute.xlu1 %2757 }
 0x297   :  { %v2763_v37 = vmul.f32 %v2758_v6, %v2743_v58  ;;  %v3007_v44 = vmul.f32 %v3003_v32, %v2758_v6 }
 0x298   :  { %v2829_v51 = vmin.f32 %v2821_v13, 0.0  ;;  %v3041_v0 = vmin.f32 %v3033_v60, 0.0  ;;  %vm2825_vm9 = vcmp.gt.f32.partialorder %v2821_v13, 0.0  ;;  %vm3037_vm10 = vcmp.gt.f32.partialorder %v3033_v60, 0.0 }
 0x299   :  { %v2767_v49 = vadd.f32 %v2763_v37, %v2739_v24  ;;  %v3011_v33 = vadd.f32 %v3007_v44, %v2999_v29 }
 0x29a   :  { %v2834_v39 = vmul.f32 1.442695, %v2829_v51  ;;  %v3046_v28 = vmul.f32 1.442695, %v3041_v0 }
 0x29b   :  { %v2802_v1 = vpop.permute.xlu1 %2801 }
 0x29c   :  { %3399 = vpow2.f32 %v2834_v39  ;;  %v2816_v18 = vmul.f32 %v2802_v1, %v2799_v35  ;;  %v3028_v31 = vmul.f32 %v3027_v40, %v2802_v1 }
 0x29d   :  { %3401 = vpow2.f32 %v3046_v28 }
 0x29e   :  { %v2820_v36 = vadd.f32 %v2816_v18, %v2792_v63  ;;  %v3032_v20 = vadd.f32 %v3028_v31, %v3020_v14 }
 0x2a0   :  { %v2828_v42 = vmin.f32 %v2820_v36, 0.0  ;;  %v3040_v27 = vmin.f32 %v3032_v20, 0.0  ;;  %v2786_v38 = vpop.permute.xlu1 %2785  ;;  %vm2824_vm11 = vcmp.gt.f32.partialorder %v2820_v36, 0.0  ;;  %vm3036_vm12 = vcmp.gt.f32.partialorder %v3032_v20, 0.0 }
 0x2a1   :  { %v2791_v59 = vmul.f32 %v2786_v38, %v2771_v22  ;;  %v3019_v58 = vmul.f32 %v3015_v26, %v2786_v38 }
 0x2a2   :  { %v2832_v32 = vmul.f32 1.442695, %v2828_v42  ;;  %v3044_v41 = vmul.f32 1.442695, %v3040_v27 }
 0x2a3   :  { %v2795_v12 = vadd.f32 %v2791_v59, %v2767_v49  ;;  %v3023_v54 = vadd.f32 %v3019_v58, %v3011_v33 }
 0x2a4   :  { %3403 = vpow2.f32 %v2832_v32 }
 0x2a5   :  { %3405 = vpow2.f32 %v3044_v41  ;;  %v2823_v25 = vadd.f32 %v2819_v11, %v2795_v12  ;;  %v3035_v30 = vadd.f32 %v3031_v48, %v3023_v54  ;;  %v2810_v56 = vpop.permute.xlu1 %2809 }
 0x2a6   :  { %v2818_v17 = vmul.f32 %v2810_v56, %v2799_v35  ;;  %v3030_v61 = vmul.f32 %v3027_v40, %v2810_v56 }
 0x2a7   :  { %v2831_v4 = vmin.f32 %v2823_v25, 0.0  ;;  %v3043_v15 = vmin.f32 %v3035_v30, 0.0  ;;  %vm2827_vm13 = vcmp.gt.f32.partialorder %v2823_v25, 0.0  ;;  %vm3039_vm14 = vcmp.gt.f32.partialorder %v3035_v30, 0.0 }
 0x2a8   :  { %v2822_v63 = vadd.f32 %v2818_v17, %v2794_v62  ;;  %v3034_v14 = vadd.f32 %v3030_v61, %v3022_v43 }
 0x2a9   :  { %v3400_v7 = vpop.eup %3399  ;;  %v2838_v22 = vmul.f32 1.442695, %v2831_v4  ;;  %v3050_v26 = vmul.f32 1.442695, %v3043_v15 }
 0x2aa   :  { %v3402_v55 = vpop.eup %3401  ;;  %v3176_v24 = vadd.f32 -1.0, %v3400_v7  ;;  %v2830_v29 = vmin.f32 %v2822_v63, 0.0  ;;  %v3042_v50 = vmin.f32 %v3034_v14, 0.0  ;;  %vm2826_vm15 = vcmp.gt.f32.partialorder %v2822_v63, 0.0 }
 0x2ab   :  { %v3180_v21 = vadd.f32 -1.0, %v3402_v55  ;;  %3407 = vpow2.f32 %v2838_v22  ;;  %vm3038_vm0 = vcmp.gt.f32.partialorder %v3034_v14, 0.0 }
 0x2ac   :  { %v2845_v47 = vsel %vm2825_vm9, %v2821_v13, %v3176_v24  ;;  %3409 = vpow2.f32 %v3050_v26  ;;  %v2836_v34 = vmul.f32 1.442695, %v2830_v29  ;;  %v3048_v40 = vmul.f32 1.442695, %v3042_v50 }
 0x2ad   :  { %v3057_v35 = vsel %vm3037_vm10, %v3033_v60, %v3180_v21 }
 0x2ae   :  { %v3061_v19 = vmul.f32 %v3057_v35, %v2845_v47  ;;  %3411 = vpow2.f32 %v2836_v34 }
 0x2af   :  { %3413 = vpow2.f32 %v3048_v40 }
 0x2b1   :  { %v3404_v9 = vpop.eup %3403 }
 0x2b2   :  { %v3406_v2 = vpop.eup %3405  ;;  %v3175_v3 = vadd.f32 -1.0, %v3404_v9 }
 0x2b3   :  { %v3179_v52 = vadd.f32 -1.0, %v3406_v2 }
 0x2b4   :  { %v2844_v10 = vsel %vm2824_vm11, %v2820_v36, %v3175_v3 }
 0x2b5   :  { %v3056_v62 = vsel %vm3036_vm12, %v3032_v20, %v3179_v52 }
 0x2b6   :  { %v3060_v43 = vmul.f32 %v3056_v62, %v2844_v10 }
 0x2b8   :  { %v3408_v23 = vpop.eup %3407  ;;  %v3064_v53 = vadd.f32 %v3061_v19, %v3060_v43 }
 0x2b9   :  { %v3410_v16 = vpop.eup %3409  ;;  %v3178_v8 = vadd.f32 -1.0, %v3408_v23 }
 0x2ba   :  { %v3182_v46 = vadd.f32 -1.0, %v3410_v16 }
 0x2bb   :  { %v3412_v45 = vpop.eup %3411  ;;  %v2847_v13 = vsel %vm2827_vm13, %v2823_v25, %v3178_v8 }
 0x2bc   :  { %v3414_v60 = vpop.eup %3413  ;;  %v3059_v6 = vsel %vm3039_vm14, %v3035_v30, %v3182_v46  ;;  %v3177_v37 = vadd.f32 -1.0, %v3412_v45 }
 0x2bd   :  { %v3063_v44 = vmul.f32 %v3059_v6, %v2847_v13  ;;  %v3181_v51 = vadd.f32 -1.0, %v3414_v60 }
 0x2be   :  { %v2846_v0 = vsel %vm2826_vm15, %v2822_v63, %v3177_v37 }
 0x2bf   :  { %v3058_v49 = vsel %vm3038_vm0, %v3034_v14, %v3181_v51 }
 0x2c0   :  { %v3062_v33 = vmul.f32 %v3058_v49, %v2846_v0 }
 0x2c2   :  { %v3065_v39 = vadd.f32 %v3064_v53, %v3062_v33 }
 0x2c4   :  { %v3066_v28 = vadd.f32 %v3065_v39, %v3063_v44 }
 0x2c6   :  { %v3067_v1 = vrot.slane %v3066_v28, 4 }
 0x2c8   :  { %v3068_v18 = vadd.f32 %v3067_v1, %v3066_v28 }
 0x2ca   :  { %v3069_v31 = vrot.slane %v3068_v18, 2 }
 0x2cc   :  { %v3070_v36 = vadd.f32 %v3069_v31, %v3068_v18 }
 0x2ce   :  { %v3071_v20 = vrot.slane %v3070_v36, 1 }
 0x2d0   :  { %v3072_v5 = vadd.f32 %v3071_v20, %v3070_v36 }
 0x2d2   :  { %v3073_v42 = vadd.f32 %v3072_v5, %v6293_v57 }
 0x2d4   :  { %3087 = vst [vmem:[#allocation5] sm:$0x1] %v3073_v42  ;;  %v3079_v27 = vand.u32 2147483647, %v3073_v42 }
 0x2d5   :  { %3473 = shalt.err (!%p3470_p9)
}
 0x2d6   :  { %3099 = dma.vmem_to_hbm [thread:$0]  %s3097_s24, 16, %s6405_s5, [#allocation4]   ;;  %v3080_v38 = vsub.f32 0.0, %v3079_v27  ;;  %v3074_v32 = vld [vmem:[%s6403_s3] sm:$0x1]  ;;  %v3076_v41 = vmax.f32 %v3073_v42, 0.0 }
 0x2d7   :  { %v3077_v11 = vmul.f32 %v3074_v32, %v3073_v42  ;;  %v3075_v25 = vld [vmem:[%s6404_s4] sm:$0x1]  ;;  %s3529_s5 = smov [#allocation6]  }
 0x2d8   :  { %v3081_v59 = vmul.f32 1.442695, %v3080_v38  ;;  %s3106_s1 = sshll.u32 %s3529_s5, 4  ;;  %s3107_s1 = int_to_ptr.vmem [resolvable:$true] %s3106_s1 }
 0x2d9   :  { %v3078_v12 = vsub.f32 %v3076_v41, %v3077_v11  ;;  %s3482_s8 = scalar_lea.vmem %s3107_s1, 16  ;;  %s3486_s9 = scalar_lea.vmem %s3107_s1, 32 }
 0x2da   :  { %3415 = vpow2.f32 %v3081_v59  ;;  %p3483_p10 = scmp.ne.s32.totalorder %s3107_s1, %s3482_s8  ;;  %p3487_p11 = scmp.lt.s32.totalorder %s3107_s1, %s3107_s1 }
 0x2db   :  { %p3488_p12 = scmp.lt.s32.totalorder %s3486_s9, %s3482_s8 }
 0x2dd   :  { %p3489_p13 = por %p3488_p12, %p3487_p11 }
 0x2df   :  { %p3490_p0 = pnand %p3489_p13, %p3483_p10 }
 0x2e7   :  { %v3416_v58 = vpop.eup %3415 }
 0x2e8   :  { %v3083_v57 = vadd.f32 1.0, %v3416_v58 }
 0x2ea   :  { %3417 = vlog2.f32 %v3083_v57 }
 0x2f7   :  { %v3418_v48 = vpop.eup %3417 }
 0x2f8   :  { %v3085_v54 = vmul.f32 0.6931472, %v3418_v48 }
 0x2fa   :  { %v3086_v30 = vadd.f32 %v3085_v54, %v3078_v12 }
 0x2fc   :  { %v3088_v56 = vmul.f32 %v3086_v30, %v3075_v25 }
 0x2fe   :  { %3089 = vst [vmem:[#allocation6] sm:$0x1] %v3088_v56 }
 0x2ff   :  { %3493 = shalt.err (!%p3490_p0)
}
 0x300   :  { %3109 = dma.vmem_to_hbm [thread:$0]  %s3107_s1, 16, %s6406_s6, [#allocation7]  }
 0x301   :  { %3504 = dma.done.wait [#allocation4], 16  }
 0x302   :  { %3505 = vsyncadd [#allocation4], 4294967280 }
 0x303   :  { %3506 = dma.done.wait [#allocation7], 16  }
 0x304   :  { %3507 = vsyncadd [#allocation7], 4294967280 }
 0x305   :  { %3116 = vsyncpa [#allocation3], 1 }
 0x306   :  { %3117 = vsyncpa [#allocation4], 1 }
 0x307   :  { %3118 = vsyncpa [#allocation7], 1 }

</bundles_post_ra>
